<compile_context>
chip_gen: v5e
topology: v5e:2x2
jax: 0.10.0
libtpu: 0.0.40
codegen_flags: <defaults>
</compile_context>

<pallas_src>
import functools

import jax
import jax.numpy as jnp
from jax.experimental import pallas as pl
from jax.experimental.pallas import tpu as pltpu


# ----------------------------------------------------------------------------
# Fused kernel: one grid step per image; all five convs, intermediates in VMEM.
# ----------------------------------------------------------------------------
def _fused_rcnn_kernel(x_ref, w1_ref, b1_ref, w2_ref, b2_ref,
                       wr_ref, br_ref, wh_ref, bh_ref,
                       feat_ref, rpn_ref,
                       padA, padB,
                       *, H, W, K, Cin, C):
    HW = H * W

    # Zero the padded scratch buffers; borders stay zero => "same" padding.
    padA[...] = jnp.zeros_like(padA)
    padB[...] = jnp.zeros_like(padB)

    def im2col(xp, cin):
        # xp: (H+K-1, W+K-1, cin) -> (H*W, K*K*cin); tap order (kh, kw, c)
        cols = [xp[kh:kh + H, kw:kw + W, :].reshape(HW, cin)
                for kh in range(K) for kw in range(K)]
        return jnp.concatenate(cols, axis=-1)

    def conv3x3(xp, w_ref, b_ref, cin):
        patch = im2col(xp, cin).astype(w_ref.dtype)        # bf16 for the MXU
        acc = jnp.dot(patch, w_ref[...],
                      preferred_element_type=jnp.float32)  # single deep matmul
        return jnp.maximum(acc + b_ref[...], 0.0)          # (H*W, cout) f32

    # ---- backbone conv1: padded image -> padA interior ----------------------
    f1 = conv3x3(x_ref[0], w1_ref, b1_ref, Cin)
    padA[1:H + 1, 1:W + 1, :] = f1.reshape(H, W, C).astype(padA.dtype)

    # ---- backbone conv2: padA -> features f (kept in padB for the RPN) ------
    f = conv3x3(padA[...], w2_ref, b2_ref, C)              # (H*W, C) f32
    padB[1:H + 1, 1:W + 1, :] = f.reshape(H, W, C).astype(padB.dtype)
    feat_ref[0] = jnp.transpose(f).astype(feat_ref.dtype)  # (C, H*W): lane-dense, NCHW

    # ---- RPN: 3x3 conv + fused (cls | bbox) 1x1 conv -------------------------
    t = conv3x3(padB[...], wr_ref, br_ref, C)              # (H*W, C) f32
    head = jnp.dot(t.astype(wh_ref.dtype), wh_ref[...],
                   preferred_element_type=jnp.float32) + bh_ref[...]
    rpn_ref[0] = jnp.transpose(head).astype(rpn_ref.dtype)  # (Chead, H*W)


def _fused_forward(xp, w1, b1, w2, b2, wr, br, wh, bh,
                   *, H, W, K, Cin, C, Chead):
    N = xp.shape[0]
    Hp, Wp = H + K - 1, W + K - 1
    kernel = functools.partial(_fused_rcnn_kernel, H=H, W=W, K=K, Cin=Cin, C=C)

    return pl.pallas_call(
        kernel,
        out_shape=(jax.ShapeDtypeStruct((N, C, H * W), jnp.float32),
                   jax.ShapeDtypeStruct((N, Chead, H * W), jnp.float32)),
        grid_spec=pltpu.PrefetchScalarGridSpec(
            num_scalar_prefetch=0,
            grid=(N,),
            in_specs=[
                pl.BlockSpec((1, Hp, Wp, Cin), lambda n: (n, 0, 0, 0)),
                # weights/biases: constant index_map -> stay VMEM-resident
                pl.BlockSpec((K * K * Cin, C), lambda n: (0, 0)),
                pl.BlockSpec((1, C), lambda n: (0, 0)),
                pl.BlockSpec((K * K * C, C), lambda n: (0, 0)),
                pl.BlockSpec((1, C), lambda n: (0, 0)),
                pl.BlockSpec((K * K * C, C), lambda n: (0, 0)),
                pl.BlockSpec((1, C), lambda n: (0, 0)),
                pl.BlockSpec((C, Chead), lambda n: (0, 0)),
                pl.BlockSpec((1, Chead), lambda n: (0, 0)),
            ],
            out_specs=[
                pl.BlockSpec((1, C, H * W), lambda n: (n, 0, 0)),
                pl.BlockSpec((1, Chead, H * W), lambda n: (n, 0, 0)),
            ],
            scratch_shapes=[
                pltpu.VMEM((Hp, Wp, C), jnp.float32),   # padded f1
                pltpu.VMEM((Hp, Wp, C), jnp.float32),   # padded f (backbone out)
            ],
        ),
        compiler_params=pltpu.CompilerParams(
            dimension_semantics=("parallel",),
            vmem_limit_bytes=32 * 1024 * 1024,
        ),
    )(xp, w1, b1, w2, b2, wr, br, wh, bh)


# ----------------------------------------------------------------------------
# Parameter construction (deterministic, synthetic — no checkpoint loading).
# ----------------------------------------------------------------------------
def init_params(key, cin, out_channels=32, num_anchors=3):
    ks = jax.random.split(key, 10)

    def conv_p(k, kh, ci, co):
        kw_, kb_ = jax.random.split(k)
        scale = 1.0 / jnp.sqrt(jnp.float32(kh * kh * ci))
        return (jax.random.normal(kw_, (kh, kh, ci, co), jnp.float32) * scale,
                jax.random.normal(kb_, (co,), jnp.float32) * 0.01)

    return {
        "backbone_conv1": conv_p(ks[0], 3, cin, out_channels),
        "backbone_conv2": conv_p(ks[1], 3, out_channels, out_channels),
        "rpn_conv":       conv_p(ks[2], 3, out_channels, out_channels),
        "rpn_cls":        conv_p(ks[3], 1, out_channels, num_anchors),
        "rpn_bbox":       conv_p(ks[4], 1, out_channels, 4 * num_anchors),
    }


# ----------------------------------------------------------------------------
# GeneralizedRCNN.forward_test equivalent (inference path, RCNN_ON=False).
# Accepts NCHW input (PyTorch convention), returns NCHW outputs.
# ----------------------------------------------------------------------------
def generalized_rcnn_forward_test(params, images_nchw, *, num_anchors=3):
    N, Cin, H, W = images_nchw.shape
    K = 3
    C = params["backbone_conv1"][0].shape[-1]

    # NCHW -> NHWC once; pad ONCE per image (not per layer).
    x = jnp.transpose(images_nchw, (0, 2, 3, 1))
    xp = jnp.pad(x, ((0, 0), (1, 1), (1, 1), (0, 0))).astype(jnp.float32)

    def w3(w):      # (K, K, ci, co) -> (K*K*ci, co) bf16, matching im2col order
        k, _, ci, co = w.shape
        return w.reshape(k * k * ci, co).astype(jnp.bfloat16)

    def b2(b):
        return b.reshape(1, -1).astype(jnp.float32)

    w1, bb1 = params["backbone_conv1"]
    w2_, bb2 = params["backbone_conv2"]
    wr, bbr = params["rpn_conv"]
    wc, bc = params["rpn_cls"]
    wb, bbx = params["rpn_bbox"]

    # Fuse cls + bbox 1x1 heads into one matmul; pad Cout 15 -> 16 (sublane mult).
    A = num_anchors
    n_head = A + 4 * A
    Chead = ((n_head + 7) // 8) * 8
    wh = jnp.concatenate([wc.reshape(C, A), wb.reshape(C, 4 * A)], axis=-1)
    wh = jnp.pad(wh, ((0, 0), (0, Chead - n_head))).astype(jnp.bfloat16)
    bh = jnp.pad(jnp.concatenate([bc, bbx]), (0, Chead - n_head))

    feat, rpn = _fused_forward(xp, w3(w1), b2(bb1), w3(w2_), b2(bb2),
                               w3(wr), b2(bbr), wh, b2(bh),
                               H=H, W=W, K=K, Cin=Cin, C=C, Chead=Chead)

    # Kernel already emits channel-major (NCHW) layouts: only reshape/slice here.
    return {
        "features":   feat.reshape(N, C, H, W),
        "objectness": rpn[:, :A, :].reshape(N, A, H, W),
        "bbox_pred":  rpn[:, A:n_head, :].reshape(N, 4 * A, H, W),
    }


if __name__ == "__main__":
    key = jax.random.PRNGKey(0)
    k_img, k_par = jax.random.split(key)

    # small shapes: batch=2, channels=4, spatial=16
    images = jax.random.normal(k_img, (2, 4, 16, 16), jnp.float32)   # NCHW
    params = init_params(k_par, cin=4, out_channels=32, num_anchors=3)

    out = generalized_rcnn_forward_test(params, images)
    jax.block_until_ready(out)

    assert out["features"].shape == (2, 32, 16, 16)
    assert out["objectness"].shape == (2, 3, 16, 16)
    assert out["bbox_pred"].shape == (2, 12, 16, 16)
    print("KERNEL_OK")
</pallas_src>

<mosaic_0001>
module attributes {stable_mosaic.version = 11 : i64} {
  func.func @_fused_rcnn_kernel(%arg0: i32, %arg1: memref<1x18x18x4xf32, #tpu.memory_space<vmem>>, %arg2: memref<36x32xbf16, #tpu.memory_space<vmem>>, %arg3: memref<1x32xf32, #tpu.memory_space<vmem>>, %arg4: memref<288x32xbf16, #tpu.memory_space<vmem>>, %arg5: memref<1x32xf32, #tpu.memory_space<vmem>>, %arg6: memref<288x32xbf16, #tpu.memory_space<vmem>>, %arg7: memref<1x32xf32, #tpu.memory_space<vmem>>, %arg8: memref<32x16xbf16, #tpu.memory_space<vmem>>, %arg9: memref<1x16xf32, #tpu.memory_space<vmem>>, %arg10: memref<1x32x256xf32, #tpu.memory_space<vmem>>, %arg11: memref<1x16x256xf32, #tpu.memory_space<vmem>>, %arg12: memref<18x18x32xf32, #tpu.memory_space<vmem>>, %arg13: memref<18x18x32xf32, #tpu.memory_space<vmem>>) attributes {dimension_semantics = [#tpu.dimension_semantics<parallel>], iteration_bounds = array<i64: 2>, scalar_prefetch = 0 : i64, scratch_operands = 2 : i64, tpu.core_type = #tpu.core_type<tc>, window_params = [{transform_indices = @transform_0, window_bounds = array<i64: 1, 18, 18, 4>}, {pipeline_mode = #tpu.pipeline_mode<synchronous>, transform_indices = @transform_1, window_bounds = array<i64: 36, 32>}, {pipeline_mode = #tpu.pipeline_mode<synchronous>, transform_indices = @transform_2, window_bounds = array<i64: 1, 32>}, {pipeline_mode = #tpu.pipeline_mode<synchronous>, transform_indices = @transform_3, window_bounds = array<i64: 288, 32>}, {pipeline_mode = #tpu.pipeline_mode<synchronous>, transform_indices = @transform_4, window_bounds = array<i64: 1, 32>}, {pipeline_mode = #tpu.pipeline_mode<synchronous>, transform_indices = @transform_5, window_bounds = array<i64: 288, 32>}, {pipeline_mode = #tpu.pipeline_mode<synchronous>, transform_indices = @transform_6, window_bounds = array<i64: 1, 32>}, {pipeline_mode = #tpu.pipeline_mode<synchronous>, transform_indices = @transform_7, window_bounds = array<i64: 32, 16>}, {pipeline_mode = #tpu.pipeline_mode<synchronous>, transform_indices = @transform_8, window_bounds = array<i64: 1, 16>}, {transform_indices = @transform_9, window_bounds = array<i64: 1, 32, 256>}, {transform_indices = @transform_10, window_bounds = array<i64: 1, 16, 256>}]} {
    %cst = arith.constant 0.000000e+00 : f32
    %0 = vector.broadcast %cst : f32 to vector<18x18x32xf32>
    %c0 = arith.constant 0 : index
    %c0_0 = arith.constant 0 : index
    %c0_1 = arith.constant 0 : index
    %1 = vector.load %arg12[%c0, %c0_0, %c0_1] : memref<18x18x32xf32, #tpu.memory_space<vmem>>, vector<18x18x32xf32>
    tpu.vector_store %arg12[%c0, %c0_0, %c0_1], %0 {strides = array<i32>} : memref<18x18x32xf32, #tpu.memory_space<vmem>>, vector<18x18x32xf32>,
    %cst_2 = arith.constant 0.000000e+00 : f32
    %2 = vector.broadcast %cst_2 : f32 to vector<18x18x32xf32>
    %c0_3 = arith.constant 0 : index
    %c0_4 = arith.constant 0 : index
    %c0_5 = arith.constant 0 : index
    %3 = vector.load %arg13[%c0_3, %c0_4, %c0_5] : memref<18x18x32xf32, #tpu.memory_space<vmem>>, vector<18x18x32xf32>
    tpu.vector_store %arg13[%c0_3, %c0_4, %c0_5], %2 {strides = array<i32>} : memref<18x18x32xf32, #tpu.memory_space<vmem>>, vector<18x18x32xf32>,
    %c0_6 = arith.constant 0 : index
    %c0_7 = arith.constant 0 : index
    %c0_8 = arith.constant 0 : index
    %c0_9 = arith.constant 0 : index
    %4 = vector.load %arg1[%c0_6, %c0_7, %c0_8, %c0_9] : memref<1x18x18x4xf32, #tpu.memory_space<vmem>>, vector<1x18x18x4xf32>
    %5 = vector.shape_cast %4 : vector<1x18x18x4xf32> to vector<18x18x4xf32>
    %6 = vector.extract_strided_slice %5 {offsets = [0, 0, 0], sizes = [16, 16, 4], strides = [1, 1, 1]} : vector<18x18x4xf32> to vector<16x16x4xf32>
    %7 = vector.shape_cast %6 : vector<16x16x4xf32> to vector<256x4xf32>
    %8 = vector.extract_strided_slice %5 {offsets = [0, 1, 0], sizes = [16, 16, 4], strides = [1, 1, 1]} : vector<18x18x4xf32> to vector<16x16x4xf32>
    %9 = vector.shape_cast %8 : vector<16x16x4xf32> to vector<256x4xf32>
    %10 = vector.extract_strided_slice %5 {offsets = [0, 2, 0], sizes = [16, 16, 4], strides = [1, 1, 1]} : vector<18x18x4xf32> to vector<16x16x4xf32>
    %11 = vector.shape_cast %10 : vector<16x16x4xf32> to vector<256x4xf32>
    %12 = vector.extract_strided_slice %5 {offsets = [1, 0, 0], sizes = [16, 16, 4], strides = [1, 1, 1]} : vector<18x18x4xf32> to vector<16x16x4xf32>
    %13 = vector.shape_cast %12 : vector<16x16x4xf32> to vector<256x4xf32>
    %14 = vector.extract_strided_slice %5 {offsets = [1, 1, 0], sizes = [16, 16, 4], strides = [1, 1, 1]} : vector<18x18x4xf32> to vector<16x16x4xf32>
    %15 = vector.shape_cast %14 : vector<16x16x4xf32> to vector<256x4xf32>
    %16 = vector.extract_strided_slice %5 {offsets = [1, 2, 0], sizes = [16, 16, 4], strides = [1, 1, 1]} : vector<18x18x4xf32> to vector<16x16x4xf32>
    %17 = vector.shape_cast %16 : vector<16x16x4xf32> to vector<256x4xf32>
    %18 = vector.extract_strided_slice %5 {offsets = [2, 0, 0], sizes = [16, 16, 4], strides = [1, 1, 1]} : vector<18x18x4xf32> to vector<16x16x4xf32>
    %19 = vector.shape_cast %18 : vector<16x16x4xf32> to vector<256x4xf32>
    %20 = vector.extract_strided_slice %5 {offsets = [2, 1, 0], sizes = [16, 16, 4], strides = [1, 1, 1]} : vector<18x18x4xf32> to vector<16x16x4xf32>
    %21 = vector.shape_cast %20 : vector<16x16x4xf32> to vector<256x4xf32>
    %22 = vector.extract_strided_slice %5 {offsets = [2, 2, 0], sizes = [16, 16, 4], strides = [1, 1, 1]} : vector<18x18x4xf32> to vector<16x16x4xf32>
    %23 = vector.shape_cast %22 : vector<16x16x4xf32> to vector<256x4xf32>
    %24 = tpu.concatenate %7, %9, %11, %13, %15, %17, %19, %21, %23 in 1 : vector<256x4xf32>, vector<256x4xf32>, vector<256x4xf32>, vector<256x4xf32>, vector<256x4xf32>, vector<256x4xf32>, vector<256x4xf32>, vector<256x4xf32>, vector<256x4xf32> -> vector<256x36xf32>
    %25 = arith.truncf %24 : vector<256x36xf32> to vector<256x36xbf16>
    %c0_10 = arith.constant 0 : index
    %c0_11 = arith.constant 0 : index
    %26 = vector.load %arg2[%c0_10, %c0_11] : memref<36x32xbf16, #tpu.memory_space<vmem>>, vector<36x32xbf16>
    %cst_12 = arith.constant dense<0.000000e+00> : vector<256x32xf32>
    %27 = tpu.matmul %25, %26, %cst_12 {dimension_numbers = #tpu.dot_dimension_numbers<[1], [0], [0], [1], [0, 0, 1, 1], [], []>} : vector<256x36xbf16>, vector<36x32xbf16>, vector<256x32xf32> -> vector<256x32xf32>
    %c0_13 = arith.constant 0 : index
    %c0_14 = arith.constant 0 : index
    %28 = vector.load %arg3[%c0_13, %c0_14] : memref<1x32xf32, #tpu.memory_space<vmem>>, vector<1x32xf32>
    %29 = vector.broadcast %28 : vector<1x32xf32> to vector<256x32xf32>
    %30 = arith.addf %27, %29 : vector<256x32xf32>
    %cst_15 = arith.constant 0.000000e+00 : f32
    %31 = vector.broadcast %cst_15 : f32 to vector<256x32xf32>
    %32 = arith.maximumf %30, %31 : vector<256x32xf32>
    %33 = vector.shape_cast %32 : vector<256x32xf32> to vector<16x16x32xf32>
    %c1 = arith.constant 1 : index
    %c1_16 = arith.constant 1 : index
    %c0_17 = arith.constant 0 : index
    %34 = vector.load %arg12[%c1, %c1_16, %c0_17] : memref<18x18x32xf32, #tpu.memory_space<vmem>>, vector<16x16x32xf32>
    tpu.vector_store %arg12[%c1, %c1_16, %c0_17], %33 {strides = array<i32>} : memref<18x18x32xf32, #tpu.memory_space<vmem>>, vector<16x16x32xf32>,
    %c0_18 = arith.constant 0 : index
    %c0_19 = arith.constant 0 : index
    %c0_20 = arith.constant 0 : index
    %35 = vector.load %arg12[%c0_18, %c0_19, %c0_20] : memref<18x18x32xf32, #tpu.memory_space<vmem>>, vector<18x18x32xf32>
    %36 = vector.extract_strided_slice %35 {offsets = [0, 0, 0], sizes = [16, 16, 32], strides = [1, 1, 1]} : vector<18x18x32xf32> to vector<16x16x32xf32>
    %37 = vector.shape_cast %36 : vector<16x16x32xf32> to vector<256x32xf32>
    %38 = vector.extract_strided_slice %35 {offsets = [0, 1, 0], sizes = [16, 16, 32], strides = [1, 1, 1]} : vector<18x18x32xf32> to vector<16x16x32xf32>
    %39 = vector.shape_cast %38 : vector<16x16x32xf32> to vector<256x32xf32>
    %40 = vector.extract_strided_slice %35 {offsets = [0, 2, 0], sizes = [16, 16, 32], strides = [1, 1, 1]} : vector<18x18x32xf32> to vector<16x16x32xf32>
    %41 = vector.shape_cast %40 : vector<16x16x32xf32> to vector<256x32xf32>
    %42 = vector.extract_strided_slice %35 {offsets = [1, 0, 0], sizes = [16, 16, 32], strides = [1, 1, 1]} : vector<18x18x32xf32> to vector<16x16x32xf32>
    %43 = vector.shape_cast %42 : vector<16x16x32xf32> to vector<256x32xf32>
    %44 = vector.extract_strided_slice %35 {offsets = [1, 1, 0], sizes = [16, 16, 32], strides = [1, 1, 1]} : vector<18x18x32xf32> to vector<16x16x32xf32>
    %45 = vector.shape_cast %44 : vector<16x16x32xf32> to vector<256x32xf32>
    %46 = vector.extract_strided_slice %35 {offsets = [1, 2, 0], sizes = [16, 16, 32], strides = [1, 1, 1]} : vector<18x18x32xf32> to vector<16x16x32xf32>
    %47 = vector.shape_cast %46 : vector<16x16x32xf32> to vector<256x32xf32>
    %48 = vector.extract_strided_slice %35 {offsets = [2, 0, 0], sizes = [16, 16, 32], strides = [1, 1, 1]} : vector<18x18x32xf32> to vector<16x16x32xf32>
    %49 = vector.shape_cast %48 : vector<16x16x32xf32> to vector<256x32xf32>
    %50 = vector.extract_strided_slice %35 {offsets = [2, 1, 0], sizes = [16, 16, 32], strides = [1, 1, 1]} : vector<18x18x32xf32> to vector<16x16x32xf32>
    %51 = vector.shape_cast %50 : vector<16x16x32xf32> to vector<256x32xf32>
    %52 = vector.extract_strided_slice %35 {offsets = [2, 2, 0], sizes = [16, 16, 32], strides = [1, 1, 1]} : vector<18x18x32xf32> to vector<16x16x32xf32>
    %53 = vector.shape_cast %52 : vector<16x16x32xf32> to vector<256x32xf32>
    %54 = tpu.concatenate %37, %39, %41, %43, %45, %47, %49, %51, %53 in 1 : vector<256x32xf32>, vector<256x32xf32>, vector<256x32xf32>, vector<256x32xf32>, vector<256x32xf32>, vector<256x32xf32>, vector<256x32xf32>, vector<256x32xf32>, vector<256x32xf32> -> vector<256x288xf32>
    %55 = arith.truncf %54 : vector<256x288xf32> to vector<256x288xbf16>
    %c0_21 = arith.constant 0 : index
    %c0_22 = arith.constant 0 : index
    %56 = vector.load %arg4[%c0_21, %c0_22] : memref<288x32xbf16, #tpu.memory_space<vmem>>, vector<288x32xbf16>
    %cst_23 = arith.constant dense<0.000000e+00> : vector<256x32xf32>
    %57 = tpu.matmul %55, %56, %cst_23 {dimension_numbers = #tpu.dot_dimension_numbers<[1], [0], [0], [1], [0, 0, 1, 1], [], []>} : vector<256x288xbf16>, vector<288x32xbf16>, vector<256x32xf32> -> vector<256x32xf32>
    %c0_24 = arith.constant 0 : index
    %c0_25 = arith.constant 0 : index
    %58 = vector.load %arg5[%c0_24, %c0_25] : memref<1x32xf32, #tpu.memory_space<vmem>>, vector<1x32xf32>
    %59 = vector.broadcast %58 : vector<1x32xf32> to vector<256x32xf32>
    %60 = arith.addf %57, %59 : vector<256x32xf32>
    %cst_26 = arith.constant 0.000000e+00 : f32
    %61 = vector.broadcast %cst_26 : f32 to vector<256x32xf32>
    %62 = arith.maximumf %60, %61 : vector<256x32xf32>
    %63 = vector.shape_cast %62 : vector<256x32xf32> to vector<16x16x32xf32>
    %c1_27 = arith.constant 1 : index
    %c1_28 = arith.constant 1 : index
    %c0_29 = arith.constant 0 : index
    %64 = vector.load %arg13[%c1_27, %c1_28, %c0_29] : memref<18x18x32xf32, #tpu.memory_space<vmem>>, vector<16x16x32xf32>
    tpu.vector_store %arg13[%c1_27, %c1_28, %c0_29], %63 {strides = array<i32>} : memref<18x18x32xf32, #tpu.memory_space<vmem>>, vector<16x16x32xf32>,
    %65 = tpu.transpose %62, [1, 0] : vector<256x32xf32> -> vector<32x256xf32>
    %c0_30 = arith.constant 0 : index
    %c0_31 = arith.constant 0 : index
    %c0_32 = arith.constant 0 : index
    %66 = vector.load %arg10[%c0_30, %c0_31, %c0_32] : memref<1x32x256xf32, #tpu.memory_space<vmem>>, vector<1x32x256xf32>
    %67 = vector.shape_cast %66 : vector<1x32x256xf32> to vector<32x256xf32>
    %68 = vector.shape_cast %65 : vector<32x256xf32> to vector<1x32x256xf32>
    tpu.vector_store %arg10[%c0_30, %c0_31, %c0_32], %68 {strides = array<i32>} : memref<1x32x256xf32, #tpu.memory_space<vmem>>, vector<1x32x256xf32>,
    %c0_33 = arith.constant 0 : index
    %c0_34 = arith.constant 0 : index
    %c0_35 = arith.constant 0 : index
    %69 = vector.load %arg13[%c0_33, %c0_34, %c0_35] : memref<18x18x32xf32, #tpu.memory_space<vmem>>, vector<18x18x32xf32>
    %70 = vector.extract_strided_slice %69 {offsets = [0, 0, 0], sizes = [16, 16, 32], strides = [1, 1, 1]} : vector<18x18x32xf32> to vector<16x16x32xf32>
    %71 = vector.shape_cast %70 : vector<16x16x32xf32> to vector<256x32xf32>
    %72 = vector.extract_strided_slice %69 {offsets = [0, 1, 0], sizes = [16, 16, 32], strides = [1, 1, 1]} : vector<18x18x32xf32> to vector<16x16x32xf32>
    %73 = vector.shape_cast %72 : vector<16x16x32xf32> to vector<256x32xf32>
    %74 = vector.extract_strided_slice %69 {offsets = [0, 2, 0], sizes = [16, 16, 32], strides = [1, 1, 1]} : vector<18x18x32xf32> to vector<16x16x32xf32>
    %75 = vector.shape_cast %74 : vector<16x16x32xf32> to vector<256x32xf32>
    %76 = vector.extract_strided_slice %69 {offsets = [1, 0, 0], sizes = [16, 16, 32], strides = [1, 1, 1]} : vector<18x18x32xf32> to vector<16x16x32xf32>
    %77 = vector.shape_cast %76 : vector<16x16x32xf32> to vector<256x32xf32>
    %78 = vector.extract_strided_slice %69 {offsets = [1, 1, 0], sizes = [16, 16, 32], strides = [1, 1, 1]} : vector<18x18x32xf32> to vector<16x16x32xf32>
    %79 = vector.shape_cast %78 : vector<16x16x32xf32> to vector<256x32xf32>
    %80 = vector.extract_strided_slice %69 {offsets = [1, 2, 0], sizes = [16, 16, 32], strides = [1, 1, 1]} : vector<18x18x32xf32> to vector<16x16x32xf32>
    %81 = vector.shape_cast %80 : vector<16x16x32xf32> to vector<256x32xf32>
    %82 = vector.extract_strided_slice %69 {offsets = [2, 0, 0], sizes = [16, 16, 32], strides = [1, 1, 1]} : vector<18x18x32xf32> to vector<16x16x32xf32>
    %83 = vector.shape_cast %82 : vector<16x16x32xf32> to vector<256x32xf32>
    %84 = vector.extract_strided_slice %69 {offsets = [2, 1, 0], sizes = [16, 16, 32], strides = [1, 1, 1]} : vector<18x18x32xf32> to vector<16x16x32xf32>
    %85 = vector.shape_cast %84 : vector<16x16x32xf32> to vector<256x32xf32>
    %86 = vector.extract_strided_slice %69 {offsets = [2, 2, 0], sizes = [16, 16, 32], strides = [1, 1, 1]} : vector<18x18x32xf32> to vector<16x16x32xf32>
    %87 = vector.shape_cast %86 : vector<16x16x32xf32> to vector<256x32xf32>
    %88 = tpu.concatenate %71, %73, %75, %77, %79, %81, %83, %85, %87 in 1 : vector<256x32xf32>, vector<256x32xf32>, vector<256x32xf32>, vector<256x32xf32>, vector<256x32xf32>, vector<256x32xf32>, vector<256x32xf32>, vector<256x32xf32>, vector<256x32xf32> -> vector<256x288xf32>
    %89 = arith.truncf %88 : vector<256x288xf32> to vector<256x288xbf16>
    %c0_36 = arith.constant 0 : index
    %c0_37 = arith.constant 0 : index
    %90 = vector.load %arg6[%c0_36, %c0_37] : memref<288x32xbf16, #tpu.memory_space<vmem>>, vector<288x32xbf16>
    %cst_38 = arith.constant dense<0.000000e+00> : vector<256x32xf32>
    %91 = tpu.matmul %89, %90, %cst_38 {dimension_numbers = #tpu.dot_dimension_numbers<[1], [0], [0], [1], [0, 0, 1, 1], [], []>} : vector<256x288xbf16>, vector<288x32xbf16>, vector<256x32xf32> -> vector<256x32xf32>
    %c0_39 = arith.constant 0 : index
    %c0_40 = arith.constant 0 : index
    %92 = vector.load %arg7[%c0_39, %c0_40] : memref<1x32xf32, #tpu.memory_space<vmem>>, vector<1x32xf32>
    %93 = vector.broadcast %92 : vector<1x32xf32> to vector<256x32xf32>
    %94 = arith.addf %91, %93 : vector<256x32xf32>
    %cst_41 = arith.constant 0.000000e+00 : f32
    %95 = vector.broadcast %cst_41 : f32 to vector<256x32xf32>
    %96 = arith.maximumf %94, %95 : vector<256x32xf32>
    %97 = arith.truncf %96 : vector<256x32xf32> to vector<256x32xbf16>
    %c0_42 = arith.constant 0 : index
    %c0_43 = arith.constant 0 : index
    %98 = vector.load %arg8[%c0_42, %c0_43] : memref<32x16xbf16, #tpu.memory_space<vmem>>, vector<32x16xbf16>
    %cst_44 = arith.constant dense<0.000000e+00> : vector<256x16xf32>
    %99 = tpu.matmul %97, %98, %cst_44 {dimension_numbers = #tpu.dot_dimension_numbers<[1], [0], [0], [1], [0, 0, 1, 1], [], []>} : vector<256x32xbf16>, vector<32x16xbf16>, vector<256x16xf32> -> vector<256x16xf32>
    %c0_45 = arith.constant 0 : index
    %c0_46 = arith.constant 0 : index
    %100 = vector.load %arg9[%c0_45, %c0_46] : memref<1x16xf32, #tpu.memory_space<vmem>>, vector<1x16xf32>
    %101 = vector.broadcast %100 : vector<1x16xf32> to vector<256x16xf32>
    %102 = arith.addf %99, %101 : vector<256x16xf32>
    %103 = tpu.transpose %102, [1, 0] : vector<256x16xf32> -> vector<16x256xf32>
    %c0_47 = arith.constant 0 : index
    %c0_48 = arith.constant 0 : index
    %c0_49 = arith.constant 0 : index
    %104 = vector.load %arg11[%c0_47, %c0_48, %c0_49] : memref<1x16x256xf32, #tpu.memory_space<vmem>>, vector<1x16x256xf32>
    %105 = vector.shape_cast %104 : vector<1x16x256xf32> to vector<16x256xf32>
    %106 = vector.shape_cast %103 : vector<16x256xf32> to vector<1x16x256xf32>
    tpu.vector_store %arg11[%c0_47, %c0_48, %c0_49], %106 {strides = array<i32>} : memref<1x16x256xf32, #tpu.memory_space<vmem>>, vector<1x16x256xf32>,
    return
  }
  func.func @transform_0(%arg0: i32) -> (i32, i32, i32, i32) {
    %c0_i32 = arith.constant 0 : i32
    %c0_i32_0 = arith.constant 0 : i32
    %c0_i32_1 = arith.constant 0 : i32
    %c0_i32_2 = arith.constant 0 : i32
    return %arg0, %c0_i32, %c0_i32_0, %c0_i32_1 : i32, i32, i32, i32
  }
  func.func @transform_1(%arg0: i32) -> (i32, i32) {
    %c0_i32 = arith.constant 0 : i32
    %c0_i32_0 = arith.constant 0 : i32
    %c0_i32_1 = arith.constant 0 : i32
    return %c0_i32, %c0_i32_0 : i32, i32
  }
  func.func @transform_2(%arg0: i32) -> (i32, i32) {
    %c0_i32 = arith.constant 0 : i32
    %c0_i32_0 = arith.constant 0 : i32
    %c0_i32_1 = arith.constant 0 : i32
    return %c0_i32, %c0_i32_0 : i32, i32
  }
  func.func @transform_3(%arg0: i32) -> (i32, i32) {
    %c0_i32 = arith.constant 0 : i32
    %c0_i32_0 = arith.constant 0 : i32
    %c0_i32_1 = arith.constant 0 : i32
    return %c0_i32, %c0_i32_0 : i32, i32
  }
  func.func @transform_4(%arg0: i32) -> (i32, i32) {
    %c0_i32 = arith.constant 0 : i32
    %c0_i32_0 = arith.constant 0 : i32
    %c0_i32_1 = arith.constant 0 : i32
    return %c0_i32, %c0_i32_0 : i32, i32
  }
  func.func @transform_5(%arg0: i32) -> (i32, i32) {
    %c0_i32 = arith.constant 0 : i32
    %c0_i32_0 = arith.constant 0 : i32
    %c0_i32_1 = arith.constant 0 : i32
    return %c0_i32, %c0_i32_0 : i32, i32
  }
  func.func @transform_6(%arg0: i32) -> (i32, i32) {
    %c0_i32 = arith.constant 0 : i32
    %c0_i32_0 = arith.constant 0 : i32
    %c0_i32_1 = arith.constant 0 : i32
    return %c0_i32, %c0_i32_0 : i32, i32
  }
  func.func @transform_7(%arg0: i32) -> (i32, i32) {
    %c0_i32 = arith.constant 0 : i32
    %c0_i32_0 = arith.constant 0 : i32
    %c0_i32_1 = arith.constant 0 : i32
    return %c0_i32, %c0_i32_0 : i32, i32
  }
  func.func @transform_8(%arg0: i32) -> (i32, i32) {
    %c0_i32 = arith.constant 0 : i32
    %c0_i32_0 = arith.constant 0 : i32
    %c0_i32_1 = arith.constant 0 : i32
    return %c0_i32, %c0_i32_0 : i32, i32
  }
  func.func @transform_9(%arg0: i32) -> (i32, i32, i32) {
    %c0_i32 = arith.constant 0 : i32
    %c0_i32_0 = arith.constant 0 : i32
    %c0_i32_1 = arith.constant 0 : i32
    return %arg0, %c0_i32, %c0_i32_0 : i32, i32, i32
  }
  func.func @transform_10(%arg0: i32) -> (i32, i32, i32) {
    %c0_i32 = arith.constant 0 : i32
    %c0_i32_0 = arith.constant 0 : i32
    %c0_i32_1 = arith.constant 0 : i32
    return %arg0, %c0_i32, %c0_i32_0 : i32, i32, i32
  }
}

</mosaic_0001>

<bundles_post_ra>
// kernel: tpu_custom_call.1
= control target key start
LH: loop header
LB: loop body
LE: loop exit
PB: predicated region body
PF: predicated region fallthrough
CT: control target
= control target key end

     0   :  { %s12851_s0 = inlined_call_operand.vmem [shape: f32[2,18,18,4], index: 0, kind: input, shape index: {}]   ;;  %s12852_s1 = inlined_call_operand.vmem [shape: bf16[36,32], index: 1, kind: input, shape index: {}]   ;;  %s12853_s2 = inlined_call_operand.vmem [shape: f32[1,32], index: 2, kind: input, shape index: {}]   ;;  %s12854_s3 = inlined_call_operand.vmem [shape: bf16[288,32], index: 3, kind: input, shape index: {}]   ;;  %s12855_s4 = inlined_call_operand.vmem [shape: f32[1,32], index: 4, kind: input, shape index: {}]   ;;  %s12856_s5 = inlined_call_operand.vmem [shape: bf16[288,32], index: 5, kind: input, shape index: {}]   ;;  %s12857_s6 = inlined_call_operand.vmem [shape: f32[1,32], index: 6, kind: input, shape index: {}]   ;;  %s12858_s7 = inlined_call_operand.vmem [shape: bf16[32,16], index: 7, kind: input, shape index: {}]   ;;  %s12859_s8 = inlined_call_operand.vmem [shape: f32[1,16], index: 8, kind: input, shape index: {}]   ;;  %s12860_s9 = inlined_call_operand.hbm [shape: f32[2,32,256], index: 9, kind: output, shape index: {0}]   ;;  %s12861_s10 = inlined_call_operand.hbm [shape: f32[2,16,256], index: 10, kind: output, shape index: {1}]  }
   0x1   :  { %13086 = sst [smem:[#allocation74_spill]] %s12851_s0 }
   0x2   :  { %13087 = sst [smem:[#allocation75_spill]] %s12852_s1 }
   0x3   :  { %13088 = sst [smem:[#allocation76_spill]] %s12853_s2 }
   0x4   :  { %16 = vsyncpa [#allocation5], 0 }
   0x5   :  { %18 = vsyncpa [#allocation5 + $0x1], 0 }
   0x6   :  { %19 = vsyncpa [#allocation7], 0 }
   0x7   :  { %21 = vsyncpa [#allocation7 + $0x1], 0  ;;  %s8050_s13 = smov 0   ;;  %s8052_s14 = smov 0  }
   0x8   :  { %s8054_s15 = smov 0   ;;  %s8056_s16 = smov 0  }
   0x9 LB: > { %s8071_s17 = sadd.s32 4294967295, %s7981_s16   ;;  %s5855_s18 = sadd.s32 4294967294, %s7981_s16   ;;  %s7981_s16 = sphi %s8056_s16, %s13524_s16   ;;  %s7977_s15 = sphi %s8054_s15, %s13523_s15   ;;  %s7973_s14 = sphi %s8052_s14, %s13522_s14   ;;  %s7969_s13 = sphi %s8050_s13, %s13521_s13  }
   0xa   : > { %s8075_s19 = sadd.s32 1, %s7981_s16   ;;  %s228_s20 = sadd.s32 1, %s7977_s15 }
   0xb   : > { %s225_s21 = ssub.s32 %s7981_s16, %s8075_s19  ;;  %p238_p0 = scmp.ne.s32.totalorder %s7977_s15, %s7973_s14 }
   0xc   : > { %p226_p1 = scmp.eq.s32.totalorder %s225_s21, 0  ;;  %p239_p2 = scmp.eq.s32.totalorder %s8071_s17, 1 }
   0xd   : > { %p244_p3 = scmp.ne.s32.totalorder %s7973_s14, %s7969_s13  ;;  %p245_p4 = scmp.eq.s32.totalorder %s5855_s18, 1 }
   0xe   : > { %s8086_s22 = scalar_select %p226_p1, %s7977_s15, %s228_s20  }
   0xf   : > { %p8088_p5 = por %p239_p2, %p238_p0  ;;  %p8092_p6 = por %p245_p4, %p244_p3 }
  0x10   : > { %p5858_p7 = scmp.ge.s32.totalorder %s7981_s16, 1  ;;  %p321_p8 = scmp.lt.s32.totalorder %s7981_s16, 3 }
  0x12   : > { %p322_p9 = pnand %p5858_p7, %p321_p8 }
  0x14   : > { %325 = sbr.rel (%p322_p9) target bundleno = 2092 (0x82c), region = 56 }
  0x19   : > { %p364_p10 = scmp.lt.s32.totalorder %s8071_s17, 1  ;;  %s13091_s0 = sld [smem:[#allocation74_spill]]  ;;  %vm582_vm0 = vcmask 1046528   ;;  %vm663_vm1 = vcmask 1045504   ;;  %vm1890_vm2 = vcmask 1041408   ;;  %vm1538_vm3 = vcmask 31744  }
  0x1a   : > { %s7983_s30 = smov 4   ;;  %s7984_s11 = smov 8   ;;  %vm1604_vm4 = vcmask 97280   ;;  %vm1571_vm5 = vcmask 64512   ;;  %vm1637_vm6 = vcmask 130048   ;;  %vm1703_vm7 = vcmask 195584  }
  0x1b   : > { %s365_s25 = scalar_select %p364_p10, %s8071_s17, 1  ;;  %vm1670_vm8 = vcmask 162816   ;;  %vm1736_vm9 = vcmask 228352   ;;  %vm370_vm10 = vcmask 261120   ;;  %vm1841_vm11 = vcmask 293888  }
  0x1c   : > { %s7985_s12 = smov 12   ;;  %s13083_s18 = smov 16   ;;  %vm373_vm12 = vcmask 254976   ;;  %vm3008_vm13 = vcmask 523264   ;;  %vm3041_vm14 = vcmask 785408  }
  0x1d   : > { %s6136_s26 = smul.u32 432, %s365_s25  ;;  %s7987_s20 = smov 20  }
  0x1e   : > { %s7988_s21 = smov 24   ;;  %s7989_s25 = smov 28  }
  0x1f   : > { %s8103_s29 = scalar_lea.vmem %s13091_s0, %s6136_s26  ;;  %s7990_s26 = smov 32  }
  0x20   : > { %v8106_v0 = vld [vmem:[%s8103_s29 + $0x60] sm:$0xff]  ;;  %v8109_v1 = vld [vmem:[%s8103_s29 + $0x68] sm:$0xff]  ;;  %v8112_v2 = vld [vmem:[%s8103_s29 + $0x70] sm:$0x3]  ;;  %s13169_s1 = sld [smem:[#allocation75_spill]]  ;;  %s12789_s28 = sand.u32 1, %s7973_s14  }
  0x21   : > { %v603_v3 = vrot.slane %v8106_v0, 1  ;;  %v604_v4 = vrot.slane %v8109_v1, 1  ;;  %v606_v5 = vrot.slane %v8112_v2, 1  ;;  %v8118_v6 = vld [vmem:[%s8103_s29 + $0x30] sm:$0xff]  ;;  %v8121_v7 = vld [vmem:[%s8103_s29 + $0x38] sm:$0xff]  ;;  %v8129_v11 = vld [vmem:[%s8103_s29] sm:$0xff] }
  0x22   : > { %v8124_v8 = vld [vmem:[%s8103_s29 + $0x40] sm:$0x3]  ;;  %v593_v9 = vrot.slane %v8118_v6, 1  ;;  %v594_v10 = vrot.slane %v8121_v7, 1  ;;  %v8132_v12 = vld [vmem:[%s8103_s29 + $0x8] sm:$0xff]  ;;  %v8141_v17 = vld [vmem:[%s8103_s29 + $0x78] sm:$0xff] }
  0x23   : > { %v605_v13 = vsel %vm582_vm0, %v603_v3, %v604_v4  ;;  %v607_v14 = vsel %vm582_vm0, %v604_v4, %v606_v5  ;;  %v596_v15 = vrot.slane %v8124_v8, 1  ;;  %v8138_v16 = vld [vmem:[%s8103_s29 + $0x10] sm:$0x3]  ;;  %v8144_v18 = vld [vmem:[%s8103_s29 + $0x80] sm:$0xff]  ;;  %v583_v21 = vrot.slane %v8129_v11, 1  ;;  %v8155_v24 = vld [vmem:[%s8103_s29 + $0x48] sm:$0xff] }
  0x24   : > { %v8146_v19 = vpack.i.bf16 %v607_v14, %v605_v13  ;;  %v595_v20 = vsel %vm582_vm0, %v593_v9, %v594_v10  ;;  %v584_v22 = vrot.slane %v8132_v12, 1  ;;  %v8152_v23 = vld [vmem:[%s8103_s29 + $0x88] sm:$0x3]  ;;  %v8158_v25 = vld [vmem:[%s8103_s29 + $0x50] sm:$0xff]  ;;  %v586_v27 = vrot.slane %v8138_v16, 1  ;;  %v8167_v30 = vld [vmem:[%s8103_s29 + $0x18] sm:$0xff] }
  0x25   : > { %v597_v26 = vsel %vm582_vm0, %v594_v10, %v596_v15  ;;  %v608_v28 = vrot.slane %v8141_v17, 1  ;;  %v8164_v29 = vld [vmem:[%s8103_s29 + $0x58] sm:$0x3]  ;;  %v609_v33 = vrot.slane %v8144_v18, 1  ;;  %v611_v34 = vrot.slane %v8152_v23, 1  ;;  %v8177_v35 = vld [vmem:[%s8103_s29 + $0x20] sm:$0xff] }
  0x26   : > { %13092 = vst [vmem:[#allocation10_spill] sm:$0xff] %v8146_v19  ;;  %6214 = vrot.lane.b32.xlu2 %v8146_v19, %s7983_s30  ;;  %v8171_v31 = vpack.i.bf16 %v597_v26, %v595_v20  ;;  %v585_v32 = vsel %vm582_vm0, %v583_v21, %v584_v22  ;;  %v8180_v36 = vld [vmem:[%s8103_s29 + $0x28] sm:$0x3]  ;;  %v587_v37 = vsel %vm582_vm0, %v584_v22, %v586_v27  ;;  %v598_v38 = vrot.slane %v8155_v24, 1  ;;  %v8187_v41 = vld [vmem:[%s8103_s29 + $0xc0] sm:$0xff]  ;;  %v8213_v56 = vld [vmem:[%s8103_s29 + $0xb0] sm:$0xff] }
  0x27   : > { %v599_v39 = vrot.slane %v8158_v25, 1  ;;  %v601_v40 = vrot.slane %v8164_v29, 1  ;;  %v8190_v42 = vld [vmem:[%s8103_s29 + $0xc8] sm:$0xff]  ;;  %v6193_v43 = vpack.i.bf16 %v587_v37, %v585_v32  ;;  %v610_v44 = vsel %vm582_vm0, %v608_v28, %v609_v33  ;;  %v8198_v47 = vld [vmem:[%s8103_s29 + $0xd0] sm:$0x3]  ;;  %v8227_v63 = vld [vmem:[%s8103_s29 + $0x98] sm:$0xff] }
  0x28   : > { %13093 = vst [vmem:[#allocation11_spill] sm:$0xff] %v8171_v31  ;;  %6204 = vrot.lane.b32.xlu1 %v8171_v31, %s7983_s30  ;;  %v612_v45 = vsel %vm582_vm0, %v609_v33, %v611_v34  ;;  %v588_v46 = vrot.slane %v8167_v30, 1  ;;  %v589_v50 = vrot.slane %v8177_v35, 1  ;;  %v8204_v51 = vld [vmem:[%s8103_s29 + $0xa8] sm:$0xff]  ;;  %v591_v53 = vrot.slane %v8180_v36, 1  ;;  %v8224_v62 = vld [vmem:[%s8103_s29 + $0x90] sm:$0xff] }
  0x29   : > { %v600_v48 = vsel %vm582_vm0, %v598_v38, %v599_v39  ;;  %v602_v49 = vsel %vm582_vm0, %v599_v39, %v601_v40  ;;  %6194 = vrot.lane.b32.xlu0 %v6193_v43, %s7983_s30  ;;  %v8207_v52 = vpack.i.bf16 %v612_v45, %v610_v44  ;;  %v623_v54 = vrot.slane %v8187_v41, 1  ;;  %v8216_v57 = vld [vmem:[%s8103_s29 + $0xb8] sm:$0x3]  ;;  %v8230_v3 = vld [vmem:[%s8103_s29 + $0xa0] sm:$0x3]  ;;  %v8245_v22 = vld [vmem:[%s8103_s29 + $0x108] sm:$0xff] }
  0x2a   : > { %v624_v55 = vrot.slane %v8190_v42, 1  ;;  %v590_v58 = vsel %vm582_vm0, %v588_v46, %v589_v50  ;;  %v626_v59 = vrot.slane %v8198_v47, 1  ;;  %v8220_v60 = vpack.i.bf16 %v602_v49, %v600_v48  ;;  %v8248_v26 = vld [vmem:[%s8103_s29 + $0x110] sm:$0xff]  ;;  %v8253_v27 = vld [vmem:[%s8103_s29 + $0x118] sm:$0x3]  ;;  %v8281_v49 = vld [vmem:[%s8103_s29 + $0xe0] sm:$0xff] }
  0x2b   : > { %13094 = vst [vmem:[#allocation12_spill] sm:$0xff] %v8207_v52  ;;  %v592_v61 = vsel %vm582_vm0, %v589_v50, %v591_v53  ;;  %v618_v4 = vrot.slane %v8204_v51, 1  ;;  %v619_v5 = vrot.slane %v8213_v56, 1  ;;  %v621_v9 = vrot.slane %v8216_v57, 1  ;;  %v8264_v38 = vld [vmem:[%s8103_s29 + $0xf0] sm:$0xff]  ;;  %v8267_v39 = vld [vmem:[%s8103_s29 + $0xf8] sm:$0xff] }
  0x2c   : > { %v8237_v10 = vpack.i.bf16 %v592_v61, %v590_v58  ;;  %v625_v13 = vsel %vm582_vm0, %v623_v54, %v624_v55  ;;  %v627_v14 = vsel %vm582_vm0, %v624_v55, %v626_v59  ;;  %v613_v15 = vrot.slane %v8224_v62, 1  ;;  %v8270_v40 = vld [vmem:[%s8103_s29 + $0x100] sm:$0x3]  ;;  %v8278_v48 = vld [vmem:[%s8103_s29 + $0xd8] sm:$0xff]  ;;  %v8284_v50 = vld [vmem:[%s8103_s29 + $0xe8] sm:$0x3] }
  0x2d   : > { %v614_v20 = vrot.slane %v8227_v63, 1  ;;  %v616_v21 = vrot.slane %v8230_v3, 1  ;;  %v620_v28 = vsel %vm582_vm0, %v618_v4, %v619_v5  ;;  %v622_v32 = vsel %vm582_vm0, %v619_v5, %v621_v9  ;;  %s13188_s2 = sld [smem:[#allocation76_spill]]  ;;  %s5723_s27 = scalar_lea.sflag [#allocation5], %s12789_s28 }
  0x2e   : > { %6219 = vrot.lane.b32.xlu2 %v8207_v52, %s7983_s30  ;;  %13095 = vst [vmem:[#allocation13_spill] sm:$0xff] %v8237_v10  ;;  %v8259_v33 = vpack.i.bf16 %v627_v14, %v625_v13  ;;  %v638_v34 = vrot.slane %v8245_v22, 1  ;;  %v639_v37 = vrot.slane %v8248_v26, 1  ;;  %v641_v45 = vrot.slane %v8253_v27, 1  ;;  %v8299_v13 = vld [vmem:[%s8103_s29 + $0x150] sm:$0xff]  ;;  %v8302_v14 = vld [vmem:[%s8103_s29 + $0x158] sm:$0xff] }
  0x2f   : > { %v615_v43 = vsel %vm582_vm0, %v613_v15, %v614_v20  ;;  %v617_v44 = vsel %vm582_vm0, %v614_v20, %v616_v21  ;;  %v8275_v46 = vpack.i.bf16 %v622_v32, %v620_v28  ;;  %v633_v53 = vrot.slane %v8264_v38, 1  ;;  %v8307_v15 = vld [vmem:[%s8103_s29 + $0x160] sm:$0x3] }
  0x30   : > { %6209 = vrot.lane.b32.xlu1 %v8220_v60, %s7983_s30  ;;  %13096 = vst [vmem:[#allocation14_spill] sm:$0xff] %v8259_v33  ;;  %v634_v54 = vrot.slane %v8267_v39, 1  ;;  %v636_v55 = vrot.slane %v8270_v40, 1  ;;  %v8291_v58 = vpack.i.bf16 %v617_v44, %v615_v43  ;;  %v640_v59 = vsel %vm582_vm0, %v638_v34, %v639_v37  ;;  %v8321_v43 = vld [vmem:[%s8103_s29 + $0x140] sm:$0xff]  ;;  %v8324_v44 = vld [vmem:[%s8103_s29 + $0x148] sm:$0x3] }
  0x31   : > { %6199 = vrot.lane.b32.xlu0 %v8237_v10, %s7983_s30  ;;  %13097 = vst [vmem:[#allocation15_spill] sm:$0xff] %v8275_v46  ;;  %v642_v61 = vsel %vm582_vm0, %v639_v37, %v641_v45  ;;  %v628_v4 = vrot.slane %v8278_v48, 1  ;;  %v629_v5 = vrot.slane %v8281_v49, 1  ;;  %v631_v9 = vrot.slane %v8284_v50, 1  ;;  %v8318_v37 = vld [vmem:[%s8103_s29 + $0x138] sm:$0xff] }
  0x32   : > { %13098 = vst [vmem:[#allocation16_spill] sm:$0xff] %v8291_v58  ;;  %v635_v20 = vsel %vm582_vm0, %v633_v53, %v634_v54  ;;  %v637_v21 = vsel %vm582_vm0, %v634_v54, %v636_v55  ;;  %v8313_v28 = vpack.i.bf16 %v642_v61, %v640_v59  ;;  %v653_v32 = vrot.slane %v8299_v13, 1  ;;  %v8332_v59 = vld [vmem:[%s8103_s29 + $0x120] sm:$0xff]  ;;  %v8335_v61 = vld [vmem:[%s8103_s29 + $0x128] sm:$0xff] }
  0x33   : > { %v654_v34 = vrot.slane %v8302_v14, 1  ;;  %v630_v45 = vsel %vm582_vm0, %v628_v4, %v629_v5  ;;  %v632_v53 = vsel %vm582_vm0, %v629_v5, %v631_v9  ;;  %v656_v54 = vrot.slane %v8307_v15, 1 }
  0x34   : > { %13099 = vst [vmem:[#allocation17_spill] sm:$0xff] %v8313_v28  ;;  %v8329_v55 = vpack.i.bf16 %v637_v21, %v635_v20  ;;  %v649_v19 = vrot.slane %v8321_v43, 1  ;;  %v651_v52 = vrot.slane %v8324_v44, 1  ;;  %v8345_v4 = vpack.i.bf16 %v632_v53, %v630_v45 }
  0x35   : > { %v655_v5 = vsel %vm582_vm0, %v653_v32, %v654_v34  ;;  %v657_v9 = vsel %vm582_vm0, %v654_v34, %v656_v54  ;;  %v643_v20 = vrot.slane %v8332_v59, 1  ;;  %v644_v21 = vrot.slane %v8335_v61, 1 }
  0x36   : > { %6234 = vrot.lane.b32.xlu2 %v8259_v33, %s7983_s30  ;;  %13100 = vst [vmem:[#allocation18_spill] sm:$0xff] %v8329_v55  ;;  %v648_v33 = vrot.slane %v8318_v37, 1  ;;  %v652_v45 = vsel %vm582_vm0, %v649_v19, %v651_v52  ;;  %v8358_v32 = vpack.i.bf16 %v657_v9, %v655_v5  ;;  %v669_v34 = vrot.slane %v8167_v30, 2  ;;  %v8374_v52 = vld [vmem:[%s8103_s29 + $0x178] sm:$0x3] }
  0x37   : > { %13101 = vst [vmem:[#allocation19_spill] sm:$0xff] %v8345_v4  ;;  %v670_v53 = vrot.slane %v8177_v35, 2  ;;  %v645_v54 = vsel %vm582_vm0, %v643_v20, %v644_v21  ;;  %v667_v5 = vrot.slane %v8138_v16, 2  ;;  %v664_v9 = vrot.slane %v8129_v11, 2 }
  0x38   : > { %6229 = vrot.lane.b32.xlu1 %v8275_v46, %s7983_s30  ;;  %v8338_v46 = vld [vmem:[%s8103_s29 + $0x130] sm:$0x3]  ;;  %v687_v16 = vrot.slane %v8112_v2, 2  ;;  %v682_v2 = vrot.slane %v8164_v29, 2 }
  0x39   : > { %6224 = vrot.lane.b32.xlu0 %v8291_v58, %s7983_s30  ;;  %v646_v58 = vrot.slane %v8338_v46, 1 }
  0x3b   : > { %v647_v10 = vsel %vm582_vm0, %v644_v21, %v646_v58 }
  0x3c   : > { %v8381_v58 = vpack.i.bf16 %v647_v10, %v645_v54  ;;  %v685_v54 = vrot.slane %v8109_v1, 2 }
  0x3e   : > { %6249 = vrot.lane.b32.xlu2 %v8313_v28, %s7983_s30  ;;  %v650_v28 = vsel %vm582_vm0, %v648_v33, %v649_v19  ;;  %v8368_v33 = vld [vmem:[%s8103_s29 + $0x168] sm:$0xff]  ;;  %v8371_v19 = vld [vmem:[%s8103_s29 + $0x170] sm:$0xff] }
  0x3f   : > { %v8365_v31 = vpack.i.bf16 %v652_v45, %v650_v28  ;;  %v658_v20 = vrot.slane %v8368_v33, 1  ;;  %v659_v21 = vrot.slane %v8371_v19, 1  ;;  %v661_v45 = vrot.slane %v8374_v52, 1 }
  0x40   : > { %6244 = vrot.lane.b32.xlu1 %v8329_v55, %s7983_s30  ;;  %v672_v55 = vrot.slane %v8180_v36, 2  ;;  %v671_v36 = vsel %vm663_vm1, %v669_v34, %v670_v53 }
  0x41   : > { %6239 = vrot.lane.b32.xlu0 %v8345_v4, %s7983_s30  ;;  %13102 = vst [vmem:[#allocation20_spill] sm:$0xff] %v8365_v31  ;;  %v665_v4 = vrot.slane %v8132_v12, 2  ;;  %v662_v34 = vsel %vm582_vm0, %v659_v21, %v661_v45  ;;  %v675_v45 = vrot.slane %v8121_v7, 2 }
  0x42   : > { %v673_v28 = vsel %vm663_vm1, %v670_v53, %v672_v55  ;;  %v660_v55 = vsel %vm582_vm0, %v658_v20, %v659_v21  ;;  %v684_v53 = vrot.slane %v8106_v0, 2  ;;  %v688_v20 = vsel %vm663_vm1, %v685_v54, %v687_v16 }
  0x43   : > { %v666_v11 = vsel %vm663_vm1, %v664_v9, %v665_v4  ;;  %v668_v12 = vsel %vm663_vm1, %v665_v4, %v667_v5  ;;  %v8395_v10 = vpack.i.bf16 %v673_v28, %v671_v36  ;;  %v679_v9 = vrot.slane %v8155_v24, 2 }
  0x44   : > { %v680_v4 = vrot.slane %v8158_v25, 2  ;;  %v677_v5 = vrot.slane %v8124_v8, 2  ;;  %v8407_v36 = vpack.i.bf16 %v662_v34, %v660_v55  ;;  %v686_v28 = vsel %vm663_vm1, %v684_v53, %v685_v54 }
  0x45   : > { %v674_v21 = vrot.slane %v8118_v6, 2  ;;  %v700_v34 = vrot.slane %v8213_v56, 2  ;;  %v702_v53 = vrot.slane %v8216_v57, 2  ;;  %v694_v54 = vrot.slane %v8224_v62, 2 }
  0x46   : > { %6264 = vrot.lane.b32.xlu2 %v8358_v32, %s7983_s30  ;;  %v681_v29 = vsel %vm663_vm1, %v679_v9, %v680_v4  ;;  %v683_v8 = vsel %vm663_vm1, %v680_v4, %v682_v2  ;;  %v678_v16 = vsel %vm663_vm1, %v675_v45, %v677_v5  ;;  %v695_v9 = vrot.slane %v8227_v63, 2 }
  0x47   : > { %v676_v55 = vsel %vm663_vm1, %v674_v21, %v675_v45  ;;  %v697_v4 = vrot.slane %v8230_v3, 2  ;;  %v690_v57 = vrot.slane %v8144_v18, 2  ;;  %v692_v21 = vrot.slane %v8152_v23, 2 }
  0x48   : > { %6259 = vrot.lane.b32.xlu1 %v8365_v31, %s7983_s30  ;;  %v6273_v31 = vpack.i.bf16 %v668_v12, %v666_v11  ;;  %v8418_v11 = vpack.i.bf16 %v688_v20, %v686_v28  ;;  %v699_v12 = vrot.slane %v8204_v51, 2  ;;  %v8432_v2 = vpack.i.bf16 %v678_v16, %v676_v55 }
  0x49   : > { %6254 = vrot.lane.b32.xlu0 %v8381_v58, %s7983_s30  ;;  %v689_v28 = vrot.slane %v8141_v17, 2  ;;  %v703_v20 = vsel %vm663_vm1, %v700_v34, %v702_v53  ;;  %v696_v3 = vsel %vm663_vm1, %v694_v54, %v695_v9  ;;  %v698_v45 = vsel %vm663_vm1, %v695_v9, %v697_v4 }
  0x4a   : > { %v701_v5 = vsel %vm663_vm1, %v699_v12, %v700_v34  ;;  %v715_v12 = vrot.slane %v8267_v39, 2  ;;  %v693_v23 = vsel %vm663_vm1, %v690_v57, %v692_v21  ;;  %v717_v16 = vrot.slane %v8270_v40, 2 }
  0x4b   : > { %v691_v55 = vsel %vm663_vm1, %v689_v28, %v690_v57  ;;  %v8452_v34 = vpack.i.bf16 %v698_v45, %v696_v3  ;;  %v709_v53 = vrot.slane %v8278_v48, 2  ;;  %v710_v54 = vrot.slane %v8281_v49, 2 }
  0x4c   : > { %v712_v9 = vrot.slane %v8284_v50, 2  ;;  %v8459_v4 = vpack.i.bf16 %v693_v23, %v691_v55  ;;  %v718_v28 = vsel %vm663_vm1, %v715_v12, %v717_v16  ;;  %v705_v40 = vrot.slane %v8190_v42, 2 }
  0x4d   : > { %v707_v57 = vrot.slane %v8198_v47, 2  ;;  %v711_v50 = vsel %vm663_vm1, %v709_v53, %v710_v54  ;;  %v729_v45 = vrot.slane %v8318_v37, 2  ;;  %v732_v55 = vrot.slane %v8324_v44, 2 }
  0x4e   : > { %6279 = vrot.lane.b32.xlu2 %v8395_v10, %s7984_s11  ;;  %v713_v21 = vsel %vm663_vm1, %v710_v54, %v712_v9  ;;  %v724_v16 = vrot.slane %v8332_v59, 2  ;;  %v725_v53 = vrot.slane %v8335_v61, 2  ;;  %v727_v54 = vrot.slane %v8338_v46, 2 }
  0x4f   : > { %v708_v47 = vsel %vm663_vm1, %v705_v40, %v707_v57  ;;  %v8479_v23 = vpack.i.bf16 %v713_v21, %v711_v50  ;;  %v720_v44 = vrot.slane %v8248_v26, 2 }
  0x50   : > { %6274 = vrot.lane.b32.xlu1 %v6273_v31, %s7984_s11  ;;  %v8425_v31 = vpack.i.bf16 %v683_v8, %v681_v29  ;;  %v8445_v29 = vpack.i.bf16 %v703_v20, %v701_v5  ;;  %v714_v8 = vrot.slane %v8264_v38, 2  ;;  %v704_v20 = vrot.slane %v8187_v41, 2 }
  0x51   : > { %6269 = vrot.lane.b32.xlu0 %v8407_v36, %s7983_s30  ;;  %v726_v46 = vsel %vm663_vm1, %v724_v16, %v725_v53  ;;  %v728_v57 = vsel %vm663_vm1, %v725_v53, %v727_v54  ;;  %v734_v16 = vrot.slane %v8299_v13, 2  ;;  %v735_v53 = vrot.slane %v8302_v14, 2  ;;  %s5859_s30 = sshll.u32 %s12789_s28, 6 }
  0x52   : > { %v716_v5 = vsel %vm663_vm1, %v714_v8, %v715_v12  ;;  %v730_v8 = vrot.slane %v8321_v43, 2  ;;  %v706_v12 = vsel %vm663_vm1, %v704_v20, %v705_v40  ;;  %v719_v20 = vrot.slane %v8245_v22, 2 }
  0x53   : > { %v8472_v3 = vpack.i.bf16 %v718_v28, %v716_v5  ;;  %v8486_v9 = vpack.i.bf16 %v708_v47, %v706_v12  ;;  %v722_v40 = vrot.slane %v8253_v27, 2  ;;  %v739_v27 = vrot.slane %v8368_v33, 2 }
  0x54   : > { %v731_v5 = vsel %vm663_vm1, %v729_v45, %v730_v8  ;;  %v733_v28 = vsel %vm663_vm1, %v730_v8, %v732_v55  ;;  %v721_v21 = vsel %vm663_vm1, %v719_v20, %v720_v44  ;;  %v8503_v8 = vpack.i.bf16 %v728_v57, %v726_v46 }
  0x55   : > { %v8499_v50 = vpack.i.bf16 %v733_v28, %v731_v5  ;;  %v723_v45 = vsel %vm663_vm1, %v720_v44, %v722_v40  ;;  %v740_v12 = vrot.slane %v8371_v19, 2  ;;  %v742_v47 = vrot.slane %v8374_v52, 2 }
  0x56   : > { %6294 = vrot.lane.b32.xlu2 %v8418_v11, %s7984_s11  ;;  %v8510_v55 = vpack.i.bf16 %v723_v45, %v721_v21  ;;  %v737_v54 = vrot.slane %v8307_v15, 2  ;;  %v6353_v52 = vpack.i.bf16 %v8177_v35, %v8167_v30  ;;  %v736_v20 = vsel %vm663_vm1, %v734_v16, %v735_v53  ;;  %v13113_v21 = vld [vmem:[#allocation12_spill] sm:$0xff]  ;;  %v13118_v16 = vld [vmem:[#allocation19_spill] sm:$0xff] }
  0x57   : > { %v741_v5 = vsel %vm663_vm1, %v739_v27, %v740_v12  ;;  %v743_v28 = vsel %vm663_vm1, %v740_v12, %v742_v47  ;;  %v8536_v30 = vpack.i.bf16 %v8109_v1, %v8106_v0  ;;  %v8540_v35 = vpack.i.bf16 %v8158_v25, %v8155_v24  ;;  %v13115_v27 = vld [vmem:[#allocation10_spill] sm:$0xff] }
  0x58   : > { %6289 = vrot.lane.b32.xlu1 %v8425_v31, %s7984_s11  ;;  %v738_v44 = vsel %vm663_vm1, %v735_v53, %v737_v54  ;;  %v8525_v40 = vpack.i.bf16 %v743_v28, %v741_v5  ;;  %v8546_v46 = vpack.i.bf16 %v8121_v7, %v8118_v6  ;;  %v8556_v0 = vpack.i.bf16 %v8213_v56, %v8204_v51  ;;  %v13119_v53 = vld [vmem:[#allocation14_spill] sm:$0xff]  ;;  %v13121_v5 = vld [vmem:[#allocation15_spill] sm:$0xff] }
  0x59   : > { %6284 = vrot.lane.b32.xlu0 %v8432_v2, %s7984_s11  ;;  %v8528_v15 = vpack.i.bf16 %v738_v44, %v736_v20  ;;  %v8560_v1 = vpack.i.bf16 %v8227_v63, %v8224_v62  ;;  %v8566_v6 = vpack.i.bf16 %v8144_v18, %v8141_v17  ;;  %v8576_v24 = vpack.i.bf16 %v8267_v39, %v8264_v38  ;;  %v8612_v62 = vld [vmem:[%s8103_s29 + $0x188] sm:$0xff]  ;;  %v13124_v20 = vld [vmem:[#allocation17_spill] sm:$0xff] }
  0x5a   : > { %v8580_v25 = vpack.i.bf16 %v8281_v49, %v8278_v48  ;;  %v8586_v17 = vpack.i.bf16 %v8190_v42, %v8187_v41  ;;  %v8596_v51 = vpack.i.bf16 %v8321_v43, %v8318_v37  ;;  %v8600_v56 = vpack.i.bf16 %v8335_v61, %v8332_v59  ;;  %v8609_v42 = vld [vmem:[%s8103_s29 + $0x180] sm:$0xff]  ;;  %v13108_v59 = vld [vmem:[#allocation11_spill] sm:$0xff] }
  0x5b   : > { %v8606_v41 = vpack.i.bf16 %v8248_v26, %v8245_v22  ;;  %v8624_v39 = vpack.i.bf16 %v8612_v62, %v8609_v42  ;;  %v8630_v26 = vpack.i.bf16 %v8371_v19, %v8368_v33  ;;  %v8636_v48 = vpack.i.bf16 %v8302_v14, %v8299_v13  ;;  %v13109_v14 = vld [vmem:[#allocation13_spill] sm:$0xff]  ;;  %v13112_v19 = vld [vmem:[#allocation16_spill] sm:$0xff] }
  0x5e   : > { %6309 = vrot.lane.b32.xlu2 %v8445_v29, %s7984_s11 }
  0x60   : > { %6304 = vrot.lane.b32.xlu1 %v8452_v34, %s7984_s11 }
  0x61   : > { %6299 = vrot.lane.b32.xlu0 %v8459_v4, %s7984_s11 }
  0x66   : > { %6324 = vrot.lane.b32.xlu2 %v8472_v3, %s7984_s11 }
  0x68   : > { %6319 = vrot.lane.b32.xlu1 %v8479_v23, %s7984_s11 }
  0x69   : > { %6314 = vrot.lane.b32.xlu0 %v8486_v9, %s7984_s11 }
  0x6e   : > { %6339 = vrot.lane.b32.xlu2 %v8499_v50, %s7984_s11 }
  0x70   : > { %6334 = vrot.lane.b32.xlu1 %v8503_v8, %s7984_s11 }
  0x71   : > { %6329 = vrot.lane.b32.xlu0 %v8510_v55, %s7984_s11 }
  0x76   : > { %6354 = vrot.lane.b32.xlu2 %v6353_v52, %s7985_s12 }
  0x78   : > { %6349 = vrot.lane.b32.xlu1 %v8525_v40, %s7984_s11 }
  0x79   : > { %6344 = vrot.lane.b32.xlu0 %v8528_v15, %s7984_s11  ;;  %s356_s11 = scalar_lea.vmem [#allocation4], %s5859_s30 }
  0x7e   : > { %6369 = vrot.lane.b32.xlu2 %v8536_v30, %s7985_s12 }
  0x80   : > { %6364 = vrot.lane.b32.xlu1 %v8540_v35, %s7985_s12  ;;  %v8550_v57 = vpop.permute.xlu2 %6214 }
  0x81   : > { %13103 = vst [vmem:[#allocation21_spill] sm:$0xff] %v8550_v57  ;;  %6359 = vrot.lane.b32.xlu0 %v8546_v46, %s7985_s12 }
  0x86   : > { %6384 = vrot.lane.b32.xlu2 %v8556_v0, %s7985_s12 }
  0x88   : > { %6379 = vrot.lane.b32.xlu1 %v8560_v1, %s7985_s12  ;;  %v8570_v7 = vpop.permute.xlu2 %6219 }
  0x89   : > { %13104 = vst [vmem:[#allocation22_spill] sm:$0xff] %v8570_v7  ;;  %6374 = vrot.lane.b32.xlu0 %v8566_v6, %s7985_s12 }
  0x8e   : > { %6399 = vrot.lane.b32.xlu2 %v8576_v24, %s7985_s12 }
  0x90   : > { %6394 = vrot.lane.b32.xlu1 %v8580_v25, %s7985_s12  ;;  %v8590_v18 = vpop.permute.xlu2 %6234 }
  0x91   : > { %13105 = vst [vmem:[#allocation23_spill] sm:$0xff] %v8590_v18  ;;  %6389 = vrot.lane.b32.xlu0 %v8586_v17, %s7985_s12  ;;  %v13129_v18 = vld [vmem:[#allocation20_spill] sm:$0xff] }
  0x96   : > { %6414 = vrot.lane.b32.xlu2 %v8596_v51, %s7985_s12 }
  0x98   : > { %6409 = vrot.lane.b32.xlu1 %v8600_v56, %s7985_s12  ;;  %v8616_v63 = vpop.permute.xlu2 %6249 }
  0x99   : > { %13106 = vst [vmem:[#allocation24_spill] sm:$0xff] %v8616_v63  ;;  %6404 = vrot.lane.b32.xlu0 %v8606_v41, %s7985_s12 }
  0x9a   : > { %v8620_v38 = vpop.permute.xlu1 %6204 }
  0x9b   : > { %v8626_v22 = vpop.permute.xlu0 %6194 }
  0x9e   : > { %6429 = vrot.lane.b32.xlu2 %v8624_v39, %s7985_s12 }
  0xa0   : > { %6424 = vrot.lane.b32.xlu1 %v8630_v26, %s7985_s12  ;;  %v8640_v49 = vpop.permute.xlu2 %6264 }
  0xa1   : > { %13107 = vst [vmem:[#allocation25_spill] sm:$0xff] %v8640_v49  ;;  %6419 = vrot.lane.b32.xlu0 %v8636_v48, %s7985_s12  ;;  %s7992_s12 = smov 64  }
  0xa2   : > { %v8644_v37 = vpop.permute.xlu1 %6209 }
  0xa3   : > { %v8646_v43 = vpop.permute.xlu0 %6199 }
  0xa6   : > { %6444 = vrot.lane.b32.xlu2 %v8220_v60, %s13083_s18 }
  0xa8   : > { %6439 = vrot.lane.b32.xlu1 %v13108_v59, %s13083_s18  ;;  %v8652_v13 = vpop.permute.xlu2 %6279 }
  0xa9   : > { %6434 = vrot.lane.b32.xlu0 %v13109_v14, %s13083_s18  ;;  %v13126_v14 = vld [vmem:[#allocation18_spill] sm:$0xff] }
  0xaa   : > { %v8656_v61 = vpop.permute.xlu1 %6229 }
  0xab   : > { %13110 = vst [vmem:[#allocation11_spill] sm:$0xff] %v8656_v61  ;;  %v8658_v33 = vpop.permute.xlu0 %6224 }
  0xac   : > { %13111 = vst [vmem:[#allocation13_spill] sm:$0xff] %v8658_v33 }
  0xae   : > { %6459 = vrot.lane.b32.xlu2 %v13112_v19, %s13083_s18 }
  0xb0   : > { %6454 = vrot.lane.b32.xlu1 %v13113_v21, %s13083_s18  ;;  %v8664_v45 = vpop.permute.xlu2 %6294 }
  0xb1   : > { %13114 = vst [vmem:[#allocation16_spill] sm:$0xff] %v8664_v45  ;;  %6449 = vrot.lane.b32.xlu0 %v13115_v27, %s13083_s18 }
  0xb2   : > { %v8668_v12 = vpop.permute.xlu1 %6244 }
  0xb3   : > { %13116 = vst [vmem:[#allocation12_spill] sm:$0xff] %v8668_v12  ;;  %v8670_v47 = vpop.permute.xlu0 %6239  ;;  %v530_v12 = vld [vmem:[%s8103_s29 + $0x190] sm:$0x3] }
  0xb4   : > { %13117 = vst [vmem:[#allocation10_spill] sm:$0xff] %v8670_v47  ;;  %v750_v47 = vrot.slane %v530_v12, 1 }
  0xb6   : > { %6474 = vrot.lane.b32.xlu2 %v13118_v16, %s13083_s18 }
  0xb8   : > { %6469 = vrot.lane.b32.xlu1 %v13119_v53, %s13083_s18  ;;  %v8676_v54 = vpop.permute.xlu2 %6309 }
  0xb9   : > { %13120 = vst [vmem:[#allocation19_spill] sm:$0xff] %v8676_v54  ;;  %6464 = vrot.lane.b32.xlu0 %v13121_v5, %s13083_s18 }
  0xba   : > { %v8680_v28 = vpop.permute.xlu1 %6259 }
  0xbb   : > { %13122 = vst [vmem:[#allocation14_spill] sm:$0xff] %v8680_v28  ;;  %v8682_v52 = vpop.permute.xlu0 %6254  ;;  %v747_v28 = vrot.slane %v8609_v42, 1 }
  0xbc   : > { %13123 = vst [vmem:[#allocation15_spill] sm:$0xff] %v8682_v52  ;;  %v748_v52 = vrot.slane %v8612_v62, 1 }
  0xbe   : > { %6489 = vrot.lane.b32.xlu2 %v8381_v58, %s13083_s18  ;;  %v751_v61 = vsel %vm582_vm0, %v748_v52, %v750_v47 }
  0xc0   : > { %6484 = vrot.lane.b32.xlu1 %v13124_v20, %s13083_s18  ;;  %v8688_v44 = vpop.permute.xlu2 %6324 }
  0xc1   : > { %13125 = vst [vmem:[#allocation17_spill] sm:$0xff] %v8688_v44  ;;  %6479 = vrot.lane.b32.xlu0 %v13126_v14, %s13083_s18 }
  0xc2   : > { %v8692_v49 = vpop.permute.xlu1 %6274 }
  0xc3   : > { %v8694_v63 = vpop.permute.xlu0 %6269 }
  0xc4   : > { %13127 = vst [vmem:[#allocation18_spill] sm:$0xff] %v8694_v63  ;;  %v749_v63 = vsel %vm582_vm0, %v747_v28, %v748_v52 }
  0xc5   : > { %v8715_v7 = vpack.i.bf16 %v751_v61, %v749_v63 }
  0xc6   : > { %6504 = vrot.lane.b32.xlu2 %v8407_v36, %s13083_s18 }
  0xc8   : > { %6499 = vrot.lane.b32.xlu1 %v8358_v32, %s13083_s18  ;;  %v8703_v44 = vpop.permute.xlu2 %6339 }
  0xc9   : > { %13128 = vst [vmem:[#allocation26_spill] sm:$0xff] %v8703_v44  ;;  %6494 = vrot.lane.b32.xlu0 %v13129_v18, %s13083_s18 }
  0xca   : > { %v8707_v54 = vpop.permute.xlu1 %6289 }
  0xcb   : > { %v8711_v33 = vpop.permute.xlu0 %6284 }
  0xce   : > { %6519 = vrot.lane.b32.xlu2 %v8432_v2, %s7987_s20 }
  0xd0   : > { %6514 = vrot.lane.b32.xlu1 %v8395_v10, %s7987_s20  ;;  %v8719_v44 = vpop.permute.xlu2 %6354 }
  0xd1   : > { %6509 = vrot.lane.b32.xlu0 %v8715_v7, %s13083_s18 }
  0xd2   : > { %v8723_v45 = vpop.permute.xlu1 %6304 }
  0xd3   : > { %13130 = vst [vmem:[#allocation20_spill] sm:$0xff] %v8723_v45  ;;  %v8725_v28 = vpop.permute.xlu0 %6299 }
  0xd4   : > { %13131 = vst [vmem:[#allocation27_spill] sm:$0xff] %v8725_v28  ;;  %v752_v28 = vrot.slane %v8609_v42, 2 }
  0xd6   : > { %6534 = vrot.lane.b32.xlu2 %v8459_v4, %s7987_s20 }
  0xd8   : > { %6529 = vrot.lane.b32.xlu1 %v8418_v11, %s7987_s20  ;;  %v8731_v63 = vpop.permute.xlu2 %6369 }
  0xd9   : > { %13132 = vst [vmem:[#allocation28_spill] sm:$0xff] %v8731_v63  ;;  %6524 = vrot.lane.b32.xlu0 %v8425_v31, %s7987_s20 }
  0xda   : > { %v8735_v10 = vpop.permute.xlu1 %6319 }
  0xdb   : > { %13133 = vst [vmem:[#allocation29_spill] sm:$0xff] %v8735_v10  ;;  %v8737_v61 = vpop.permute.xlu0 %6314 }
  0xdc   : > { %13134 = vst [vmem:[#allocation30_spill] sm:$0xff] %v8737_v61 }
  0xde   : > { %6549 = vrot.lane.b32.xlu2 %v8486_v9, %s7987_s20 }
  0xe0   : > { %6544 = vrot.lane.b32.xlu1 %v8445_v29, %s7987_s20  ;;  %v8743_v47 = vpop.permute.xlu2 %6384 }
  0xe1   : > { %13135 = vst [vmem:[#allocation31_spill] sm:$0xff] %v8743_v47  ;;  %6539 = vrot.lane.b32.xlu0 %v8452_v34, %s7987_s20 }
  0xe2   : > { %v8747_v52 = vpop.permute.xlu1 %6334 }
  0xe3   : > { %13136 = vst [vmem:[#allocation32_spill] sm:$0xff] %v8747_v52  ;;  %v8749_v45 = vpop.permute.xlu0 %6329  ;;  %v753_v52 = vrot.slane %v8612_v62, 2 }
  0xe4   : > { %13137 = vst [vmem:[#allocation33_spill] sm:$0xff] %v8749_v45  ;;  %v755_v45 = vrot.slane %v530_v12, 2 }
  0xe6   : > { %6564 = vrot.lane.b32.xlu2 %v8510_v55, %s7987_s20  ;;  %v756_v63 = vsel %vm663_vm1, %v753_v52, %v755_v45 }
  0xe8   : > { %6559 = vrot.lane.b32.xlu1 %v8472_v3, %s7987_s20  ;;  %v8755_v10 = vpop.permute.xlu2 %6399 }
  0xe9   : > { %13138 = vst [vmem:[#allocation34_spill] sm:$0xff] %v8755_v10  ;;  %6554 = vrot.lane.b32.xlu0 %v8479_v23, %s7987_s20  ;;  %v754_v10 = vsel %vm663_vm1, %v752_v28, %v753_v52 }
  0xea   : > { %v8759_v61 = vpop.permute.xlu1 %6349  ;;  %v8779_v62 = vpack.i.bf16 %v756_v63, %v754_v10 }
  0xeb   : > { %13139 = vst [vmem:[#allocation35_spill] sm:$0xff] %v8759_v61  ;;  %v8761_v47 = vpop.permute.xlu0 %6344 }
  0xec   : > { %13140 = vst [vmem:[#allocation36_spill] sm:$0xff] %v8761_v47 }
  0xee   : > { %6579 = vrot.lane.b32.xlu2 %v8528_v15, %s7987_s20 }
  0xf0   : > { %6574 = vrot.lane.b32.xlu1 %v8499_v50, %s7987_s20  ;;  %v8769_v57 = vpop.permute.xlu2 %6414 }
  0xf1   : > { %13141 = vst [vmem:[#allocation37_spill] sm:$0xff] %v8769_v57  ;;  %6569 = vrot.lane.b32.xlu0 %v8503_v8, %s7987_s20  ;;  %v6094_v57 = vld [vmem:[%s13169_s1] sm:$0xff] }
  0xf2   : > { %v8775_v61 = vpop.permute.xlu1 %6364 }
  0xf3   : > { %v8777_v42 = vpop.permute.xlu0 %6359 }
  0xf6   : > { %6594 = vrot.lane.b32.xlu2 %v8546_v46, %s7988_s21 }
  0xf8   : > { %6589 = vrot.lane.b32.xlu1 %v8779_v62, %s7987_s20  ;;  %v8785_v12 = vpop.permute.xlu2 %6429 }
  0xf9   : > { %13142 = vst [vmem:[#allocation38_spill] sm:$0xff] %v8785_v12  ;;  %6584 = vrot.lane.b32.xlu0 %v8525_v40, %s7987_s20  ;;  %v8835_v12 = vld [vmem:[%s8103_s29 + $0x1a0] sm:$0xff]  ;;  %s5740_s20 = sshll.u32 %s356_s11, 4  ;;  %s5741_s20 = int_to_ptr.vmem [resolvable:$true] %s5740_s20 }
  0xfa   : > { %v8789_v45 = vpop.permute.xlu1 %6379 }
  0xfb   : > { %v8791_v28 = vpop.permute.xlu0 %6374 }
  0xfe   : > { %6609 = vrot.lane.b32.xlu2 %v8566_v6, %s7988_s21 }
 0x100   : > { %6604 = vrot.lane.b32.xlu1 %v8536_v30, %s7988_s21  ;;  %v8797_v63 = vpop.permute.xlu2 %6444 }
 0x101   : > { %6599 = vrot.lane.b32.xlu0 %v8540_v35, %s7988_s21 }
 0x102   : > { %v8801_v46 = vpop.permute.xlu1 %6394 }
 0x103   : > { %v8803_v10 = vpop.permute.xlu0 %6389 }
 0x106   : > { %6624 = vrot.lane.b32.xlu2 %v8586_v17, %s7988_s21 }
 0x108   : > { %6619 = vrot.lane.b32.xlu1 %v8556_v0, %s7988_s21  ;;  %v8809_v6 = vpop.permute.xlu2 %6459 }
 0x109   : > { %6614 = vrot.lane.b32.xlu0 %v8560_v1, %s7988_s21  ;;  %v8832_v1 = vld [vmem:[%s8103_s29 + $0x198] sm:$0xff] }
 0x10a   : > { %v8813_v30 = vpop.permute.xlu1 %6409 }
 0x10b   : > { %13143 = vst [vmem:[#allocation39_spill] sm:$0xff] %v8813_v30  ;;  %v8815_v35 = vpop.permute.xlu0 %6404  ;;  %v6277_v30 = vunpack.i.h.bf16 %v8692_v49 }
 0x10c   : > { %13144 = vst [vmem:[#allocation40_spill] sm:$0xff] %v8815_v35 }
 0x10e   : > { %6639 = vrot.lane.b32.xlu2 %v8606_v41, %s7988_s21  ;;  %v6668_v41 = vpack.i.bf16 %v8835_v12, %v8832_v1 }
 0x110   : > { %6634 = vrot.lane.b32.xlu1 %v8576_v24, %s7988_s21  ;;  %v8821_v52 = vpop.permute.xlu2 %6474 }
 0x111   : > { %6629 = vrot.lane.b32.xlu0 %v8580_v25, %s7988_s21 }
 0x112   : > { %v8825_v0 = vpop.permute.xlu1 %6424 }
 0x113   : > { %13145 = vst [vmem:[#allocation41_spill] sm:$0xff] %v8825_v0  ;;  %v8827_v17 = vpop.permute.xlu0 %6419 }
 0x114   : > { %13146 = vst [vmem:[#allocation42_spill] sm:$0xff] %v8827_v17 }
 0x116   : > { %6654 = vrot.lane.b32.xlu2 %v8636_v48, %s7988_s21 }
 0x118   : > { %6649 = vrot.lane.b32.xlu1 %v8596_v51, %s7988_s21  ;;  %v8839_v24 = vpop.permute.xlu2 %6489 }
 0x119   : > { %13147 = vst [vmem:[#allocation43_spill] sm:$0xff] %v8839_v24  ;;  %6644 = vrot.lane.b32.xlu0 %v8600_v56, %s7988_s21  ;;  %v6197_v24 = vunpack.i.h.bf16 %v8626_v22 }
 0x11a   : > { %v8843_v25 = vpop.permute.xlu1 %6439 }
 0x11b   : > { %v8847_v0 = vpop.permute.xlu0 %6434 }
 0x11e   : > { %6669 = vrot.lane.b32.xlu2 %v6668_v41, %s7988_s21 }
 0x120   : > { %6664 = vrot.lane.b32.xlu1 %v8624_v39, %s7988_s21  ;;  %v8854_v51 = vpop.permute.xlu2 %6504 }
 0x121   : > { %6659 = vrot.lane.b32.xlu0 %v8630_v26, %s7988_s21  ;;  %13148 = vst [vmem:[#allocation44_spill] sm:$0xff] %v8854_v51  ;;  %v761_v51 = vrot.slane %v8835_v12, 1  ;;  %s7993_s21 = smov 96  }
 0x122   : > { %v8856_v48 = vpop.permute.xlu1 %6454 }
 0x123   : > { %v8858_v56 = vpop.permute.xlu0 %6449 }
 0x126   : > { %6684 = vrot.lane.b32.xlu2 %v13115_v27, %s7989_s25 }
 0x128   : > { %6679 = vrot.lane.b32.xlu1 %v8220_v60, %s7989_s25  ;;  %v8868_v41 = vpop.permute.xlu2 %6519 }
 0x129   : > { %6674 = vrot.lane.b32.xlu0 %v13108_v59, %s7989_s25 }
 0x12a   : > { %v8866_v39 = vpop.permute.xlu1 %6469 }
 0x12b   : > { %v8870_v26 = vpop.permute.xlu0 %6464 }
 0x12e   : > { %6699 = vrot.lane.b32.xlu2 %v13121_v5, %s7989_s25 }
 0x130   : > { %6694 = vrot.lane.b32.xlu1 %v13112_v19, %s7989_s25  ;;  %v8882_v59 = vpop.permute.xlu2 %6534 }
 0x131   : > { %6689 = vrot.lane.b32.xlu0 %v13113_v21, %s7989_s25 }
 0x132   : > { %v8878_v60 = vpop.permute.xlu1 %6484 }
 0x133   : > { %13149 = vst [vmem:[#allocation45_spill] sm:$0xff] %v8878_v60  ;;  %v8880_v27 = vpop.permute.xlu0 %6479  ;;  %v7797_v60 = vld [vmem:[%s8103_s29] sm:$0xff] }
 0x134   : > { %13150 = vst [vmem:[#allocation46_spill] sm:$0xff] %v8880_v27 }
 0x136   : > { %6714 = vrot.lane.b32.xlu2 %v13126_v14, %s7989_s25 }
 0x138   : > { %6709 = vrot.lane.b32.xlu1 %v13118_v16, %s7989_s25  ;;  %v8896_v21 = vpop.permute.xlu2 %6549 }
 0x139   : > { %6704 = vrot.lane.b32.xlu0 %v13119_v53, %s7989_s25  ;;  %v533_v53 = vld [vmem:[%s8103_s29 + $0x1a8] sm:$0x3] }
 0x13a   : > { %v8890_v19 = vpop.permute.xlu1 %6499  ;;  %v763_v47 = vrot.slane %v533_v53, 1 }
 0x13b   : > { %13151 = vst [vmem:[#allocation47_spill] sm:$0xff] %v8890_v19  ;;  %v8892_v5 = vpop.permute.xlu0 %6494 }
 0x13c   : > { %13152 = vst [vmem:[#allocation48_spill] sm:$0xff] %v8892_v5  ;;  %v764_v19 = vsel %vm582_vm0, %v761_v51, %v763_v47 }
 0x13e   : > { %6729 = vrot.lane.b32.xlu2 %v13129_v18, %s7989_s25  ;;  %v760_v18 = vrot.slane %v8832_v1, 1 }
 0x140   : > { %6724 = vrot.lane.b32.xlu1 %v8381_v58, %s7989_s25  ;;  %v8913_v58 = vpop.permute.xlu2 %6564 }
 0x141   : > { %6719 = vrot.lane.b32.xlu0 %v13124_v20, %s7989_s25  ;;  %13154 = vst [vmem:[#allocation50_spill] sm:$0xff] %v8913_v58 }
 0x142   : > { %v8902_v14 = vpop.permute.xlu1 %6514 }
 0x143   : > { %v8904_v16 = vpop.permute.xlu0 %6509  ;;  %v6516_v27 = vunpack.i.l.bf16 %v8902_v14 }
 0x144   : > { %13153 = vst [vmem:[#allocation49_spill] sm:$0xff] %v8904_v16  ;;  %v762_v16 = vsel %vm582_vm0, %v760_v18, %v761_v51  ;;  %v765_v18 = vrot.slane %v8832_v1, 2 }
 0x145   : > { %v6748_v17 = vpack.i.bf16 %v764_v19, %v762_v16 }
 0x146   : > { %6744 = vrot.lane.b32.xlu2 %v8715_v7, %s7989_s25 }
 0x148   : > { %6739 = vrot.lane.b32.xlu1 %v8407_v36, %s7989_s25  ;;  %v8932_v5 = vpop.permute.xlu2 %6579 }
 0x149   : > { %6734 = vrot.lane.b32.xlu0 %v8358_v32, %s7989_s25  ;;  %v766_v32 = vrot.slane %v8835_v12, 2  ;;  %13155 = vst [vmem:[#allocation51_spill] sm:$0xff] %v8932_v5 }
 0x14a   : > { %v8917_v20 = vpop.permute.xlu1 %6529 }
 0x14b   : > { %v8921_v7 = vpop.permute.xlu0 %6524  ;;  %v767_v51 = vsel %vm663_vm1, %v765_v18, %v766_v32 }
 0x14e   : > { %6759 = vrot.lane.b32.xlu2 %v8425_v31, %s7990_s26  ;;  %v768_v31 = vrot.slane %v533_v53, 2 }
 0x150   : > { %6754 = vrot.lane.b32.xlu1 %v8432_v2, %s7990_s26  ;;  %v769_v2 = vsel %vm663_vm1, %v766_v32, %v768_v31  ;;  %v8948_v19 = vpop.permute.xlu2 %6594 }
 0x151   : > { %6749 = vrot.lane.b32.xlu0 %v6748_v17, %s7989_s25  ;;  %v6828_v17 = vpack.i.bf16 %v769_v2, %v767_v51  ;;  %v1821_v2 = vld [vmem:[%s13169_s1 + $0x10] sm:$0x3] }
 0x152   : > { %v8928_v36 = vpop.permute.xlu1 %6544 }
 0x153   : > { %v8934_v47 = vpop.permute.xlu0 %6539 }
 0x156   : > { %6774 = vrot.lane.b32.xlu2 %v8452_v34, %s7990_s26 }
 0x158   : > { %6769 = vrot.lane.b32.xlu1 %v8459_v4, %s7990_s26 }
 0x159   : > { %6764 = vrot.lane.b32.xlu0 %v8418_v11, %s7990_s26  ;;  %v8962_v11 = vpop.permute.xlu2 %6609 }
 0x15a   : > { %v8944_v12 = vpop.permute.xlu1 %6559 }
 0x15b   : > { %13156 = vst [vmem:[#allocation52_spill] sm:$0xff] %v8944_v12  ;;  %v8946_v1 = vpop.permute.xlu0 %6554 }
 0x15e   : > { %6789 = vrot.lane.b32.xlu2 %v8479_v23, %s7990_s26 }
 0x160   : > { %6784 = vrot.lane.b32.xlu1 %v8486_v9, %s7990_s26 }
 0x161   : > { %6779 = vrot.lane.b32.xlu0 %v8445_v29, %s7990_s26  ;;  %v8976_v29 = vpop.permute.xlu2 %6624 }
 0x162   : > { %v8956_v34 = vpop.permute.xlu1 %6574 }
 0x163   : > { %13157 = vst [vmem:[#allocation53_spill] sm:$0xff] %v8956_v34  ;;  %v8958_v4 = vpop.permute.xlu0 %6569 }
 0x164   : > { %13158 = vst [vmem:[#allocation54_spill] sm:$0xff] %v8958_v4 }
 0x166   : > { %6804 = vrot.lane.b32.xlu2 %v8503_v8, %s7990_s26 }
 0x168   : > { %6799 = vrot.lane.b32.xlu1 %v8510_v55, %s7990_s26 }
 0x169   : > { %6794 = vrot.lane.b32.xlu0 %v8472_v3, %s7990_s26 }
 0x16a   : > { %v8968_v23 = vpop.permute.xlu1 %6589 }
 0x16b   : > { %13159 = vst [vmem:[#allocation55_spill] sm:$0xff] %v8968_v23  ;;  %v8970_v9 = vpop.permute.xlu0 %6584 }
 0x16c   : > { %13160 = vst [vmem:[#allocation56_spill] sm:$0xff] %v8970_v9  ;;  %v1835_v9 = vunpack.c.l.b16 %v1821_v2 }
 0x16e   : > { %6819 = vrot.lane.b32.xlu2 %v8525_v40, %s7990_s26  ;;  %v8989_v40 = vpop.permute.xlu2 %6639  ;;  %v1838_v5 = vpack.c.b16 %v1835_v9, %v1835_v9 }
 0x16f   : > { %13161 = vst [vmem:[#allocation57_spill] sm:$0xff] %v8989_v40  ;;  %v7798_v40 = vld [vmem:[%s8103_s29 + $0x8] sm:$0xff] }
 0x170   : > { %6814 = vrot.lane.b32.xlu1 %v8528_v15, %s7990_s26 }
 0x171   : > { %6809 = vrot.lane.b32.xlu0 %v8499_v50, %s7990_s26 }
 0x172   : > { %v8980_v8 = vpop.permute.xlu1 %6604 }
 0x173   : > { %v8982_v55 = vpop.permute.xlu0 %6599 }
 0x176   : > { %v8997_v50 = vpop.permute.xlu2 %6654 }
 0x177   : > { %13163 = vst [vmem:[#allocation59_spill] sm:$0xff] %v8997_v50  ;;  %v1892_v50 = vsel %vm1890_vm2, %v1838_v5, 0 }
 0x178   : > { %6829 = vrot.lane.b32.xlu1 %v6828_v17, %s7990_s26  ;;  %1899 = vmatpush.bf16.msra.mxu0 %v1892_v50 }
 0x179   : > { %6824 = vrot.lane.b32.xlu0 %v8779_v62, %s7990_s26 }
 0x17a   : > { %v8987_v3 = vpop.permute.xlu1 %6619 }
 0x17b   : > { %v8991_v16 = vpop.permute.xlu0 %6614 }
 0x17e   : > { %v9003_v31 = vpop.permute.xlu2 %6669 }
 0x17f   : > { %13166 = vst [vmem:[#allocation62_spill] sm:$0xff] %v9003_v31  ;;  %v6095_v31 = vld [vmem:[%s13169_s1 + $0x8] sm:$0xff] }
 0x180   : > { %1900 = vmatpush.bf16.msra.mxu0 %v6095_v31  ;;  %v6196_v31 = vunpack.i.l.bf16 %v8626_v22  ;;  %v1540_v22 = vsel %vm1538_vm3, %v7798_v40, %v6197_v24 }
 0x182   : > { %v8993_v15 = vpop.permute.xlu1 %6634  ;;  %v1539_v35 = vsel %vm1538_vm3, %v7797_v60, %v6196_v31  ;;  %v6596_v60 = vunpack.i.l.bf16 %v8948_v19 }
 0x183   : > { %13162 = vst [vmem:[#allocation58_spill] sm:$0xff] %v8993_v15  ;;  %v8995_v53 = vpop.permute.xlu0 %6629 }
 0x184   : > { %1901 = vmatpush.bf16.msra.mxu0 %v6094_v57  ;;  %v6276_v57 = vunpack.i.l.bf16 %v8692_v49  ;;  %v6437_v49 = vunpack.i.h.bf16 %v8847_v0 }
 0x186   : > { %v9012_v17 = vpop.permute.xlu2 %6684  ;;  %v1572_v12 = vsel %vm1571_vm5, %v1539_v35, %v6276_v57  ;;  %v6597_v35 = vunpack.i.h.bf16 %v8948_v19 }
 0x18a   : > { %v8999_v32 = vpop.permute.xlu1 %6649 }
 0x18b   : > { %13164 = vst [vmem:[#allocation60_spill] sm:$0xff] %v8999_v32  ;;  %v9001_v18 = vpop.permute.xlu0 %6644 }
 0x18c   : > { %13165 = vst [vmem:[#allocation61_spill] sm:$0xff] %v9001_v18  ;;  %v6356_v18 = vunpack.i.l.bf16 %v8719_v44 }
 0x192   : > { %v9005_v51 = vpop.permute.xlu1 %6664 }
 0x193   : > { %13167 = vst [vmem:[#allocation63_spill] sm:$0xff] %v9005_v51  ;;  %v9007_v62 = vpop.permute.xlu0 %6659 }
 0x194   : > { %13168 = vst [vmem:[#allocation64_spill] sm:$0xff] %v9007_v62  ;;  %v9021_v62 = vpop.permute.xlu2 %6699 }
 0x19a   : > { %v9014_v23 = vpop.permute.xlu1 %6679 }
 0x19b   : > { %v6675_v51 = vpop.permute.xlu0 %6674 }
 0x19c   : > { %v9030_v50 = vpop.permute.xlu2 %6714  ;;  %v6677_v24 = vunpack.i.h.bf16 %v6675_v51  ;;  %v6676_v40 = vunpack.i.l.bf16 %v6675_v51 }
 0x19d   : > { %13170 = vst [vmem:[#allocation65_spill] sm:$0xff] %v9030_v50  ;;  %v1605_v50 = vsel %vm1604_vm4, %v1572_v12, %v6356_v18 }
 0x1a2   : > { %v9019_v34 = vpop.permute.xlu1 %6694 }
 0x1a3   : > { %v9026_v9 = vpop.permute.xlu0 %6689 }
 0x1a4   : > { %v9037_v4 = vpop.permute.xlu2 %6729 }
 0x1a5   : > { %13172 = vst [vmem:[#allocation67_spill] sm:$0xff] %v9037_v4  ;;  %v6436_v4 = vunpack.i.l.bf16 %v8847_v0 }
 0x1a7   : > { %v1638_v0 = vsel %vm1637_vm6, %v1605_v50, %v6436_v4 }
 0x1a8   : > { %v1671_v12 = vsel %vm1670_vm8, %v1638_v0, %v6516_v27  ;;  %v6281_v0 = vunpack.i.l.bf16 %v8652_v13 }
 0x1a9   : > { %v1704_v18 = vsel %vm1703_vm7, %v1671_v12, %v6596_v60 }
 0x1aa   : > { %v9028_v5 = vpop.permute.xlu1 %6709  ;;  %v1737_v51 = vsel %vm1736_vm9, %v1704_v18, %v6676_v40  ;;  %v7799_v40 = vld [vmem:[%s8103_s29 + $0x20] sm:$0xff]  ;;  %v6361_v18 = vunpack.i.l.bf16 %v8777_v42 }
 0x1ab   : > { %v9034_v32 = vpop.permute.xlu0 %6704 }
 0x1ac   : > { %v9067_v57 = vpop.permute.xlu2 %6744 }
 0x1b2   : > { %v9032_v2 = vpop.permute.xlu1 %6724 }
 0x1b3   : > { %13171 = vst [vmem:[#allocation66_spill] sm:$0xff] %v9032_v2  ;;  %v6357_v2 = vunpack.i.h.bf16 %v8719_v44  ;;  %v6517_v44 = vunpack.i.h.bf16 %v8902_v14  ;;  %v9058_v31 = vpop.permute.xlu0 %6719 }
 0x1ba   : > { %v9043_v58 = vpop.permute.xlu1 %6739 }
 0x1bb   : > { %13173 = vst [vmem:[#allocation68_spill] sm:$0xff] %v9043_v58  ;;  %v1573_v58 = vsel %vm1571_vm5, %v1540_v22, %v6277_v30  ;;  %v6202_v22 = vunpack.i.h.bf16 %v8646_v43  ;;  %v9076_v60 = vpop.permute.xlu0 %6734 }
 0x1bc   : > { %v1606_v15 = vsel %vm1604_vm4, %v1573_v58, %v6357_v2 }
 0x1bd   : > { %v1639_v30 = vsel %vm1637_vm6, %v1606_v15, %v6437_v49  ;;  %v6201_v49 = vunpack.i.l.bf16 %v8646_v43  ;;  %v6442_v43 = vunpack.i.h.bf16 %v8843_v25 }
 0x1be   : > { %v1672_v14 = vsel %vm1670_vm8, %v1639_v30, %v6517_v44  ;;  %v7800_v30 = vld [vmem:[%s8103_s29 + $0x18] sm:$0xff] }
 0x1bf   : > { %v1705_v2 = vsel %vm1703_vm7, %v1672_v14, %v6597_v35  ;;  %v6282_v35 = vunpack.i.h.bf16 %v8652_v13  ;;  %v1541_v12 = vsel %vm1538_vm3, %v7800_v30, %v6201_v49  ;;  %v6362_v14 = vunpack.i.h.bf16 %v8777_v42 }
 0x1c0   : > { %v1738_v15 = vsel %vm1736_vm9, %v1705_v2, %v6677_v24  ;;  %v1542_v24 = vsel %vm1538_vm3, %v7799_v40, %v6202_v22  ;;  %v6522_v2 = vunpack.i.h.bf16 %v8868_v41  ;;  %v1574_v13 = vsel %vm1571_vm5, %v1541_v12, %v6281_v0 }
 0x1c1   : > { %v6682_v22 = vunpack.i.h.bf16 %v9014_v23 }
 0x1c2   : > { %v6755_v58 = vpop.permute.xlu1 %6754 }
 0x1c3   : > { %v6757_v19 = vunpack.i.h.bf16 %v6755_v58  ;;  %v6756_v4 = vunpack.i.l.bf16 %v6755_v58  ;;  %v6441_v58 = vunpack.i.l.bf16 %v8843_v25  ;;  %v6681_v25 = vunpack.i.l.bf16 %v9014_v23  ;;  %v9105_v30 = vpop.permute.xlu0 %6749 }
 0x1c5   : > { %v1769_v27 = vsel %vm370_vm10, %v1737_v51, %v6756_v4  ;;  %v1770_v50 = vsel %vm370_vm10, %v1738_v15, %v6757_v19  ;;  %v6521_v19 = vunpack.i.l.bf16 %v8868_v41  ;;  %v6760_v4 = vpop.permute.xlu2 %6759  ;;  %v1575_v51 = vsel %vm1571_vm5, %v1542_v24, %v6282_v35 }
 0x1c6   : > { %v1801_v44 = vpack.c.bf16 %v1770_v50, %v1769_v27  ;;  %v6602_v15 = vunpack.i.h.bf16 %v8982_v55  ;;  %v6601_v27 = vunpack.i.l.bf16 %v8982_v55  ;;  %v1607_v50 = vsel %vm1604_vm4, %v1574_v13, %v6361_v18 }
 0x1c7   : > { %v1608_v42 = vsel %vm1604_vm4, %v1575_v51, %v6362_v14  ;;  %v1640_v49 = vsel %vm1637_vm6, %v1607_v50, %v6441_v58  ;;  %v6761_v0 = vunpack.i.l.bf16 %v6760_v4  ;;  %v6207_v58 = vunpack.i.h.bf16 %v8620_v38  ;;  %v7801_v50 = vld [vmem:[%s8103_s29 + $0x38] sm:$0xff] }
 0x1c8   : > { %5870 = vmatmul.msk.bf16.vlgmr.msra.gmra.mxu0 %vm1841_vm11, %v1801_v44  ;;  %v1641_v41 = vsel %vm1637_vm6, %v1608_v42, %v6442_v43  ;;  %v6762_v44 = vunpack.i.h.bf16 %v6760_v4  ;;  %v1673_v35 = vsel %vm1670_vm8, %v1640_v49, %v6521_v19  ;;  %v6287_v19 = vunpack.i.h.bf16 %v8711_v33 }
 0x1c9   : > { %v1674_v40 = vsel %vm1670_vm8, %v1641_v41, %v6522_v2  ;;  %v1706_v55 = vsel %vm1703_vm7, %v1673_v35, %v6601_v27  ;;  %v6206_v2 = vunpack.i.l.bf16 %v8620_v38  ;;  %v6286_v4 = vunpack.i.l.bf16 %v8711_v33 }
 0x1ca   : > { %v1707_v24 = vsel %vm1703_vm7, %v1674_v40, %v6602_v15  ;;  %v1739_v12 = vsel %vm1736_vm9, %v1706_v55, %v6681_v25  ;;  %v6367_v13 = vunpack.i.h.bf16 %v8775_v61  ;;  %v6366_v51 = vunpack.i.l.bf16 %v8775_v61 }
 0x1cb   : > { %v1740_v23 = vsel %vm1736_vm9, %v1707_v24, %v6682_v22  ;;  %v1771_v14 = vsel %vm370_vm10, %v1739_v12, %v6761_v0  ;;  %v6447_v15 = vunpack.i.h.bf16 %v8797_v63  ;;  %v6446_v27 = vunpack.i.l.bf16 %v8797_v63  ;;  %v7802_v22 = vld [vmem:[%s8103_s29 + $0x30] sm:$0xff]  ;;  %v6765_v41 = vpop.permute.xlu0 %6764 }
 0x1cc   : > { %v1772_v18 = vsel %vm370_vm10, %v1740_v23, %v6762_v44  ;;  %v1544_v42 = vsel %vm1538_vm3, %v7801_v50, %v6207_v58  ;;  %v1543_v38 = vsel %vm1538_vm3, %v7802_v22, %v6206_v2  ;;  %v6527_v25 = vunpack.i.h.bf16 %v8921_v7  ;;  %v13174_v50 = vld [vmem:[#allocation28_spill] sm:$0xff] }
 0x1cd   : > { %v1802_v43 = vpack.c.bf16 %v1772_v18, %v1771_v14  ;;  %v6526_v49 = vunpack.i.l.bf16 %v8921_v7  ;;  %v1577_v33 = vsel %vm1571_vm5, %v1544_v42, %v6287_v19  ;;  %v1576_v44 = vsel %vm1571_vm5, %v1543_v38, %v6286_v4 }
 0x1ce   : > { %v6607_v61 = vunpack.i.h.bf16 %v8980_v8  ;;  %v6606_v0 = vunpack.i.l.bf16 %v8980_v8  ;;  %v1609_v63 = vsel %vm1604_vm4, %v1576_v44, %v6366_v51  ;;  %v1610_v35 = vsel %vm1604_vm4, %v1577_v33, %v6367_v13  ;;  %v7804_v33 = vld [vmem:[%s8103_s29 + $0x48] sm:$0xff] }
 0x1cf   : > { %v6687_v40 = vunpack.i.h.bf16 %v9012_v17  ;;  %v6686_v55 = vunpack.i.l.bf16 %v9012_v17  ;;  %v1642_v24 = vsel %vm1637_vm6, %v1609_v63, %v6446_v27  ;;  %v1643_v7 = vsel %vm1637_vm6, %v1610_v35, %v6447_v15 }
 0x1d0   : > { %v6767_v12 = vunpack.i.h.bf16 %v6765_v41  ;;  %v6766_v23 = vunpack.i.l.bf16 %v6765_v41  ;;  %v1675_v14 = vsel %vm1670_vm8, %v1642_v24, %v6526_v49  ;;  %v1676_v18 = vsel %vm1670_vm8, %v1643_v7, %v6527_v25  ;;  %v7803_v49 = vld [vmem:[%s8103_s29 + $0x50] sm:$0xff] }
 0x1d1   : > { %v1708_v8 = vsel %vm1703_vm7, %v1675_v14, %v6606_v0  ;;  %v6212_v13 = vunpack.i.h.bf16 %v8644_v37  ;;  %v6211_v51 = vunpack.i.l.bf16 %v8644_v37  ;;  %v6292_v15 = vunpack.i.h.bf16 %v8707_v54  ;;  %v6770_v0 = vpop.permute.xlu1 %6769 }
 0x1d2   : > { %v1741_v58 = vsel %vm1736_vm9, %v1708_v8, %v6686_v55  ;;  %v6291_v27 = vunpack.i.l.bf16 %v8707_v54  ;;  %v6372_v42 = vunpack.i.h.bf16 %v13174_v50  ;;  %v6371_v22 = vunpack.i.l.bf16 %v13174_v50 }
 0x1d3   : > { %v1773_v2 = vsel %vm370_vm10, %v1741_v58, %v6766_v23  ;;  %v6452_v38 = vunpack.i.h.bf16 %v8858_v56  ;;  %v6451_v25 = vunpack.i.l.bf16 %v8858_v56  ;;  %v1546_v41 = vsel %vm1538_vm3, %v7803_v49, %v6212_v13  ;;  %v7805_v49 = vld [vmem:[%s8103_s29 + $0x68] sm:$0xff] }
 0x1d4   : > { %v1545_v37 = vsel %vm1538_vm3, %v7804_v33, %v6211_v51  ;;  %v6532_v44 = vunpack.i.h.bf16 %v8917_v20  ;;  %v1579_v54 = vsel %vm1571_vm5, %v1546_v41, %v6292_v15  ;;  %v6612_v35 = vunpack.i.h.bf16 %v8962_v11  ;;  %v13176_v15 = vld [vmem:[#allocation16_spill] sm:$0xff]  ;;  %v7806_v33 = vld [vmem:[%s8103_s29 + $0x60] sm:$0xff] }
 0x1d5   : > { %v1578_v63 = vsel %vm1571_vm5, %v1545_v37, %v6291_v27  ;;  %v1612_v55 = vsel %vm1604_vm4, %v1579_v54, %v6372_v42  ;;  %v6692_v24 = vunpack.i.h.bf16 %v9026_v9  ;;  %v6691_v7 = vunpack.i.l.bf16 %v9026_v9 }
 0x1d6   : > { %v1611_v56 = vsel %vm1604_vm4, %v1578_v63, %v6371_v22  ;;  %v6772_v23 = vunpack.i.h.bf16 %v6770_v0  ;;  %v6771_v14 = vunpack.i.l.bf16 %v6770_v0  ;;  %v6297_v27 = vunpack.i.h.bf16 %v13176_v15  ;;  %v6775_v0 = vpop.permute.xlu2 %6774 }
 0x1d7   : > { %v6296_v50 = vunpack.i.l.bf16 %v13176_v15  ;;  %v6377_v42 = vunpack.i.h.bf16 %v8791_v28  ;;  %v6376_v22 = vunpack.i.l.bf16 %v8791_v28  ;;  %v6617_v28 = vunpack.i.h.bf16 %v8991_v16 }
 0x1d8   : > { %5871 = vmatmul.msk.bf16.gmra.mxu0 %vm1841_vm11, %v1802_v43  ;;  %v1709_v43 = vsel %vm1703_vm7, %v1676_v18, %v6607_v61  ;;  %v6531_v61 = vunpack.i.l.bf16 %v8917_v20  ;;  %v1644_v20 = vsel %vm1637_vm6, %v1611_v56, %v6451_v25  ;;  %v6456_v25 = vunpack.i.l.bf16 %v8856_v48 }
 0x1d9   : > { %v1742_v17 = vsel %vm1736_vm9, %v1709_v43, %v6687_v40  ;;  %v6611_v40 = vunpack.i.l.bf16 %v8962_v11  ;;  %v6697_v56 = vunpack.i.h.bf16 %v9019_v34  ;;  %v6462_v15 = vunpack.i.h.bf16 %v8809_v6 }
 0x1da   : > { %v1774_v19 = vsel %vm370_vm10, %v1742_v17, %v6767_v12  ;;  %v1645_v12 = vsel %vm1637_vm6, %v1612_v55, %v6452_v38  ;;  %v1677_v18 = vsel %vm1670_vm8, %v1644_v20, %v6531_v61  ;;  %v6457_v38 = vunpack.i.h.bf16 %v8856_v48 }
 0x1db   : > { %v1803_v4 = vpack.c.bf16 %v1774_v19, %v1773_v2  ;;  %v1678_v8 = vsel %vm1670_vm8, %v1645_v12, %v6532_v44  ;;  %v1710_v11 = vsel %vm1703_vm7, %v1677_v18, %v6611_v40  ;;  %v6537_v44 = vunpack.i.h.bf16 %v8882_v59 }
 0x1dc   : > { %v1711_v43 = vsel %vm1703_vm7, %v1678_v8, %v6612_v35  ;;  %v1743_v58 = vsel %vm1736_vm9, %v1710_v11, %v6691_v7  ;;  %v6536_v61 = vunpack.i.l.bf16 %v8882_v59  ;;  %v6616_v35 = vunpack.i.l.bf16 %v8991_v16 }
 0x1dd   : > { %v1744_v9 = vsel %vm1736_vm9, %v1711_v43, %v6692_v24  ;;  %v1775_v17 = vsel %vm370_vm10, %v1743_v58, %v6771_v14  ;;  %v6696_v55 = vunpack.i.l.bf16 %v9019_v34  ;;  %v6777_v7 = vunpack.i.h.bf16 %v6775_v0  ;;  %v13177_v58 = vld [vmem:[#allocation22_spill] sm:$0xff] }
 0x1de   : > { %v1776_v2 = vsel %vm370_vm10, %v1744_v9, %v6772_v23  ;;  %v6776_v12 = vunpack.i.l.bf16 %v6775_v0  ;;  %v6222_v9 = vunpack.i.h.bf16 %v13177_v58  ;;  %v6702_v0 = vunpack.i.h.bf16 %v9021_v62 }
 0x1df   : > { %v1804_v19 = vpack.c.bf16 %v1776_v2, %v1775_v17  ;;  %v6221_v17 = vunpack.i.l.bf16 %v13177_v58  ;;  %v13178_v2 = vld [vmem:[#allocation27_spill] sm:$0xff]  ;;  %v6467_v58 = vunpack.i.h.bf16 %v8870_v26 }
 0x1e8   : > { %5872 = vmatmul.msk.bf16.gmra.mxu0 %vm1841_vm11, %v1803_v4  ;;  %v13175_v4 = vld [vmem:[#allocation21_spill] sm:$0xff] }
 0x1e9   : > { %v6217_v13 = vunpack.i.h.bf16 %v13175_v4  ;;  %v6216_v51 = vunpack.i.l.bf16 %v13175_v4  ;;  %v6301_v4 = vunpack.i.l.bf16 %v13178_v2 }
 0x1eb   : > { %v1548_v41 = vsel %vm1538_vm3, %v7805_v49, %v6217_v13  ;;  %v1547_v37 = vsel %vm1538_vm3, %v7806_v33, %v6216_v51  ;;  %v6382_v13 = vunpack.i.h.bf16 %v8789_v45  ;;  %v6381_v51 = vunpack.i.l.bf16 %v8789_v45 }
 0x1ec   : > { %v1581_v54 = vsel %vm1571_vm5, %v1548_v41, %v6297_v27  ;;  %v1580_v63 = vsel %vm1571_vm5, %v1547_v37, %v6296_v50  ;;  %v6461_v27 = vunpack.i.l.bf16 %v8809_v6  ;;  %v7807_v50 = vld [vmem:[%s8103_s29 + $0x80] sm:$0xff]  ;;  %v6541_v49 = vunpack.i.l.bf16 %v8934_v47  ;;  %v6780_v41 = vpop.permute.xlu0 %6779 }
 0x1ed   : > { %v1614_v48 = vsel %vm1604_vm4, %v1581_v54, %v6377_v42  ;;  %v1613_v40 = vsel %vm1604_vm4, %v1580_v63, %v6376_v22  ;;  %v1550_v42 = vsel %vm1538_vm3, %v7807_v50, %v6222_v9  ;;  %v7808_v22 = vld [vmem:[%s8103_s29 + $0x78] sm:$0xff]  ;;  %v6622_v45 = vunpack.i.h.bf16 %v8987_v3 }
 0x1ee   : > { %v1646_v24 = vsel %vm1637_vm6, %v1613_v40, %v6456_v25  ;;  %v1647_v59 = vsel %vm1637_vm6, %v1614_v48, %v6457_v38  ;;  %v1549_v38 = vsel %vm1538_vm3, %v7808_v22, %v6221_v17  ;;  %v6542_v25 = vunpack.i.h.bf16 %v8934_v47  ;;  %v7809_v17 = vld [vmem:[%s8103_s29 + $0x98] sm:$0xff] }
 0x1ef   : > { %v1679_v20 = vsel %vm1670_vm8, %v1646_v24, %v6536_v61  ;;  %v1680_v23 = vsel %vm1670_vm8, %v1647_v59, %v6537_v44  ;;  %v1582_v37 = vsel %vm1571_vm5, %v1549_v38, %v6301_v4  ;;  %v6621_v44 = vunpack.i.l.bf16 %v8987_v3 }
 0x1f0   : > { %v1712_v16 = vsel %vm1703_vm7, %v1679_v20, %v6616_v35  ;;  %v1713_v14 = vsel %vm1703_vm7, %v1680_v23, %v6617_v28  ;;  %v1615_v6 = vsel %vm1604_vm4, %v1582_v37, %v6381_v51  ;;  %v6701_v54 = vunpack.i.l.bf16 %v9021_v62 }
 0x1f1   : > { %v1745_v18 = vsel %vm1736_vm9, %v1712_v16, %v6696_v55  ;;  %v1746_v34 = vsel %vm1736_vm9, %v1713_v14, %v6697_v56  ;;  %v1648_v63 = vsel %vm1637_vm6, %v1615_v6, %v6461_v27  ;;  %v6782_v28 = vunpack.i.h.bf16 %v6780_v41  ;;  %v13180_v16 = vld [vmem:[#allocation20_spill] sm:$0xff] }
 0x1f2   : > { %v1777_v8 = vsel %vm370_vm10, %v1745_v18, %v6776_v12  ;;  %v1778_v11 = vsel %vm370_vm10, %v1746_v34, %v6777_v7  ;;  %v6781_v35 = vunpack.i.l.bf16 %v6780_v41  ;;  %v1681_v48 = vsel %vm1670_vm8, %v1648_v63, %v6541_v49  ;;  %v13179_v12 = vld [vmem:[#allocation13_spill] sm:$0xff] }
 0x1f3   : > { %v1805_v43 = vpack.c.bf16 %v1778_v11, %v1777_v8  ;;  %v1714_v3 = vsel %vm1703_vm7, %v1681_v48, %v6621_v44  ;;  %v6227_v20 = vunpack.i.h.bf16 %v13179_v12  ;;  %v6226_v23 = vunpack.i.l.bf16 %v13179_v12  ;;  %v13181_v8 = vld [vmem:[#allocation31_spill] sm:$0xff] }
 0x1f4   : > { %v1747_v55 = vsel %vm1736_vm9, %v1714_v3, %v6701_v54  ;;  %v6307_v14 = vunpack.i.h.bf16 %v13180_v16  ;;  %v6306_v18 = vunpack.i.l.bf16 %v13180_v16  ;;  %v7991_v34 = vmov 0.0   ;;  %v13183_v48 = vld [vmem:[#allocation19_spill] sm:$0xff]  ;;  %v6790_v16 = vpop.permute.xlu2 %6789 }
 0x1f5   : > { %v1779_v62 = vsel %vm370_vm10, %v1747_v55, %v6781_v35  ;;  %375 = vst.msk [vmem:[#allocation2 + $0x18] sm:$0xff] %vm370_vm10, %v7991_v34  ;;  %v6387_v11 = vunpack.i.h.bf16 %v13181_v8  ;;  %v6466_v9 = vunpack.i.l.bf16 %v8870_v26  ;;  %v6546_v51 = vunpack.i.l.bf16 %v8928_v36  ;;  %v7812_v12 = vld [vmem:[%s8103_s29 + $0xa8] sm:$0xff] }
 0x1f6   : > { %376 = vst.msk [vmem:[#allocation2 + $0x20] sm:$0xff] %vm370_vm10, %v7991_v34  ;;  %v6627_v50 = vunpack.i.h.bf16 %v8976_v29  ;;  %v6311_v3 = vunpack.i.l.bf16 %v13183_v48  ;;  %v6391_v55 = vunpack.i.l.bf16 %v8803_v10 }
 0x1f7   : > { %371 = vst.msk [vmem:[#allocation2] sm:$0xff] %vm370_vm10, %v7991_v34 }
 0x1f8   : > { %5873 = vmatmul.msk.bf16.gmra.mxu0 %vm1841_vm11, %v1804_v19  ;;  %v6302_v19 = vunpack.i.h.bf16 %v13178_v2  ;;  %v1552_v2 = vsel %vm1538_vm3, %v7809_v17, %v6227_v20  ;;  %372 = vst.msk [vmem:[#allocation2 + $0x8] sm:$0xff] %vm370_vm10, %v7991_v34 }
 0x1f9   : > { %v1585_v26 = vsel %vm1571_vm5, %v1552_v2, %v6307_v14  ;;  %378 = vst.msk [vmem:[#allocation2 + $0x30] sm:$0xff] %vm370_vm10, %v7991_v34  ;;  %v6792_v2 = vunpack.i.h.bf16 %v6790_v16 }
 0x1fa   : > { %v1583_v33 = vsel %vm1571_vm5, %v1550_v42, %v6302_v19  ;;  %v7810_v19 = vld [vmem:[%s8103_s29 + $0x90] sm:$0xff]  ;;  %v6626_v42 = vunpack.i.l.bf16 %v8976_v29  ;;  %v1618_v38 = vsel %vm1604_vm4, %v1585_v26, %v6387_v11  ;;  %379 = vst.msk [vmem:[#allocation2 + $0x38] sm:$0xff] %vm370_vm10, %v7991_v34 }
 0x1fb   : > { %v1616_v61 = vsel %vm1604_vm4, %v1583_v33, %v6382_v13  ;;  %v1551_v4 = vsel %vm1538_vm3, %v7810_v19, %v6226_v23  ;;  %v6547_v13 = vunpack.i.h.bf16 %v8928_v36  ;;  %v6707_v36 = vunpack.i.h.bf16 %v9034_v32  ;;  %381 = vst.msk [vmem:[#allocation2 + $0x48] sm:$0xff] %vm370_vm10, %v7991_v34 }
 0x1fc   : > { %v1649_v47 = vsel %vm1637_vm6, %v1616_v61, %v6462_v15  ;;  %v6785_v15 = vpop.permute.xlu1 %6784  ;;  %v1584_v27 = vsel %vm1571_vm5, %v1551_v4, %v6306_v18  ;;  %v1651_v41 = vsel %vm1637_vm6, %v1618_v38, %v6467_v58  ;;  %382 = vst.msk [vmem:[#allocation2 + $0x50] sm:$0xff] %vm370_vm10, %v7991_v34  ;;  %v6552_v23 = vunpack.i.h.bf16 %v8896_v21 }
 0x1fd   : > { %v1682_v40 = vsel %vm1670_vm8, %v1649_v47, %v6542_v25  ;;  %v6706_v25 = vunpack.i.l.bf16 %v9034_v32  ;;  %v6787_v33 = vunpack.i.h.bf16 %v6785_v15  ;;  %v6786_v29 = vunpack.i.l.bf16 %v6785_v15  ;;  %384 = vst.msk [vmem:[#allocation2 + $0x60] sm:$0xff] %vm370_vm10, %v7991_v34  ;;  %v13182_v47 = vld [vmem:[#allocation11_spill] sm:$0xff] }
 0x1fe   : > { %v1715_v56 = vsel %vm1703_vm7, %v1682_v40, %v6622_v45  ;;  %v1684_v45 = vsel %vm1670_vm8, %v1651_v41, %v6547_v13  ;;  %385 = vst.msk [vmem:[#allocation2 + $0x68] sm:$0xff] %vm370_vm10, %v7991_v34  ;;  %v6231_v35 = vunpack.i.l.bf16 %v13182_v47  ;;  %v6312_v40 = vunpack.i.h.bf16 %v13183_v48 }
 0x1ff   : > { %v1748_v24 = vsel %vm1736_vm9, %v1715_v56, %v6702_v0  ;;  %v1717_v44 = vsel %vm1703_vm7, %v1684_v45, %v6627_v50  ;;  %387 = vst.msk [vmem:[#allocation2 + $0x78] sm:$0xff] %vm370_vm10, %v7991_v34  ;;  %v6392_v56 = vunpack.i.h.bf16 %v8803_v10  ;;  %v6551_v10 = vunpack.i.l.bf16 %v8896_v21  ;;  %v7813_v45 = vld [vmem:[%s8103_s29 + $0xc8] sm:$0xff] }
 0x200   : > { %v1780_v59 = vsel %vm370_vm10, %v1748_v24, %v6782_v28  ;;  %v1750_v61 = vsel %vm1736_vm9, %v1717_v44, %v6707_v36  ;;  %388 = vst.msk [vmem:[#allocation2 + $0x80] sm:$0xff] %vm370_vm10, %v7991_v34  ;;  %v6232_v28 = vunpack.i.h.bf16 %v13182_v47  ;;  %v6472_v24 = vunpack.i.h.bf16 %v8866_v39  ;;  %v13185_v36 = vld [vmem:[#allocation30_spill] sm:$0xff] }
 0x201   : > { %v1806_v7 = vpack.c.bf16 %v1780_v59, %v1779_v62  ;;  %v1782_v54 = vsel %vm370_vm10, %v1750_v61, %v6787_v33  ;;  %390 = vst.msk [vmem:[#allocation2 + $0x90] sm:$0xff] %vm370_vm10, %v7991_v34  ;;  %v6471_v62 = vunpack.i.l.bf16 %v8866_v39  ;;  %v7811_v59 = vld [vmem:[%s8103_s29 + $0xb0] sm:$0xff]  ;;  %v1553_v20 = vsel %vm1538_vm3, %v7812_v12, %v6231_v35  ;;  %v7814_v44 = vld [vmem:[%s8103_s29 + $0xc0] sm:$0xff] }
 0x202   : > { %391 = vst.msk [vmem:[#allocation2 + $0x98] sm:$0xff] %vm370_vm10, %v7991_v34  ;;  %v1586_v39 = vsel %vm1571_vm5, %v1553_v20, %v6311_v3  ;;  %v6632_v18 = vunpack.i.h.bf16 %v8995_v53  ;;  %v6712_v21 = vunpack.i.h.bf16 %v9028_v5  ;;  %v6711_v58 = vunpack.i.l.bf16 %v9028_v5 }
 0x203   : > { %393 = vst.msk [vmem:[#allocation2 + $0xa8] sm:$0xff] %vm370_vm10, %v7991_v34  ;;  %v6397_v41 = vunpack.i.h.bf16 %v8801_v46  ;;  %v6396_v33 = vunpack.i.l.bf16 %v8801_v46  ;;  %v6557_v61 = vunpack.i.h.bf16 %v8946_v1  ;;  %v6556_v46 = vunpack.i.l.bf16 %v8946_v1  ;;  %v13187_v1 = vld [vmem:[#allocation65_spill] sm:$0xff] }
 0x204   : > { %394 = vst.msk [vmem:[#allocation2 + $0xb0] sm:$0xff] %vm370_vm10, %v7991_v34  ;;  %v6716_v3 = vunpack.i.l.bf16 %v13187_v1 }
 0x205   : > { %396 = vst.msk [vmem:[#allocation2 + $0xc0] sm:$0xff] %vm370_vm10, %v7991_v34 }
 0x206   : > { %397 = vst.msk [vmem:[#allocation2 + $0xc8] sm:$0xff] %vm370_vm10, %v7991_v34 }
 0x207   : > { %399 = vst.msk [vmem:[#allocation2 + $0xd8] sm:$0xff] %vm370_vm10, %v7991_v34 }
 0x208   : > { %5874 = vmatmul.msk.bf16.gmra.mxu0 %vm1841_vm11, %v1805_v43  ;;  %v6386_v43 = vunpack.i.l.bf16 %v13181_v8  ;;  %400 = vst.msk [vmem:[#allocation2 + $0xe0] sm:$0xff] %vm370_vm10, %v7991_v34  ;;  %v6631_v8 = vunpack.i.l.bf16 %v8995_v53  ;;  %v6791_v53 = vunpack.i.l.bf16 %v6790_v16 }
 0x209   : > { %402 = vst.msk [vmem:[#allocation2 + $0xf0] sm:$0xff] %vm370_vm10, %v7991_v34 }
 0x20a   : > { %v1617_v22 = vsel %vm1604_vm4, %v1584_v27, %v6386_v43  ;;  %v1619_v43 = vsel %vm1604_vm4, %v1586_v39, %v6391_v55  ;;  %403 = vst.msk [vmem:[#allocation2 + $0xf8] sm:$0xff] %vm370_vm10, %v7991_v34 }
 0x20b   : > { %v1650_v49 = vsel %vm1637_vm6, %v1617_v22, %v6466_v9  ;;  %v1652_v9 = vsel %vm1637_vm6, %v1619_v43, %v6471_v62  ;;  %405 = vst.msk [vmem:[#allocation2 + $0x108] sm:$0xff] %vm370_vm10, %v7991_v34  ;;  %v13189_v43 = vld [vmem:[#allocation10_spill] sm:$0xff] }
 0x20c   : > { %v1683_v37 = vsel %vm1670_vm8, %v1650_v49, %v6546_v51  ;;  %v1685_v19 = vsel %vm1670_vm8, %v1652_v9, %v6551_v10  ;;  %406 = vst.msk [vmem:[#allocation2 + $0x110] sm:$0xff] %vm370_vm10, %v7991_v34  ;;  %v6316_v49 = vunpack.i.l.bf16 %v13185_v36 }
 0x20d   : > { %v1716_v32 = vsel %vm1703_vm7, %v1683_v37, %v6626_v42  ;;  %v1718_v5 = vsel %vm1703_vm7, %v1685_v19, %v6631_v8  ;;  %408 = vst.msk [vmem:[#allocation2 + $0x120] sm:$0xff] %vm370_vm10, %v7991_v34  ;;  %v13184_v42 = vld [vmem:[#allocation23_spill] sm:$0xff]  ;;  %v6476_v37 = vunpack.i.l.bf16 %v8821_v52  ;;  %v13191_v19 = vld [vmem:[#allocation34_spill] sm:$0xff] }
 0x20e   : > { %v1749_v6 = vsel %vm1736_vm9, %v1716_v32, %v6706_v25  ;;  %v1751_v51 = vsel %vm1736_vm9, %v1718_v5, %v6711_v58  ;;  %409 = vst.msk [vmem:[#allocation2 + $0x128] sm:$0xff] %vm370_vm10, %v7991_v34  ;;  %v6237_v22 = vunpack.i.h.bf16 %v13184_v42  ;;  %v6236_v38 = vunpack.i.l.bf16 %v13184_v42 }
 0x20f   : > { %v1781_v0 = vsel %vm370_vm10, %v1749_v6, %v6786_v29  ;;  %v1783_v27 = vsel %vm370_vm10, %v1751_v51, %v6791_v53  ;;  %411 = vst.msk [vmem:[#allocation2 + $0x138] sm:$0xff] %vm370_vm10, %v7991_v34  ;;  %v6317_v25 = vunpack.i.h.bf16 %v13185_v36  ;;  %v6477_v29 = vunpack.i.h.bf16 %v8821_v52 }
 0x210   : > { %v1807_v63 = vpack.c.bf16 %v1782_v54, %v1781_v0  ;;  %412 = vst.msk [vmem:[#allocation2 + $0x140] sm:$0xff] %vm370_vm10, %v7991_v34  ;;  %v1556_v32 = vsel %vm1538_vm3, %v7813_v45, %v6237_v22  ;;  %v1555_v6 = vsel %vm1538_vm3, %v7814_v44, %v6236_v38  ;;  %v6795_v0 = vpop.permute.xlu0 %6794  ;;  %v6241_v58 = vunpack.i.l.bf16 %v13189_v43  ;;  %v13193_v22 = vld [vmem:[#allocation52_spill] sm:$0xff] }
 0x211   : > { %414 = vst.msk [vmem:[#allocation2 + $0x150] sm:$0xff] %vm370_vm10, %v7991_v34  ;;  %v1589_v54 = vsel %vm1571_vm5, %v1556_v32, %v6317_v25  ;;  %v1588_v52 = vsel %vm1571_vm5, %v1555_v6, %v6316_v49  ;;  %v6796_v62 = vunpack.i.l.bf16 %v6795_v0  ;;  %v6401_v5 = vunpack.i.l.bf16 %v13191_v19  ;;  %v6800_v25 = vpop.permute.xlu1 %6799 }
 0x212   : > { %415 = vst.msk [vmem:[#allocation2 + $0x158] sm:$0xff] %vm370_vm10, %v7991_v34  ;;  %v1621_v35 = vsel %vm1604_vm4, %v1588_v52, %v6396_v33  ;;  %v1622_v48 = vsel %vm1604_vm4, %v1589_v54, %v6397_v41  ;;  %v6562_v38 = vunpack.i.h.bf16 %v13193_v22  ;;  %v6561_v36 = vunpack.i.l.bf16 %v13193_v22  ;;  %v13194_v33 = vld [vmem:[#allocation57_spill] sm:$0xff] }
 0x213   : > { %417 = vst.msk [vmem:[#allocation2 + $0x168] sm:$0xff] %vm370_vm10, %v7991_v34  ;;  %v1655_v55 = vsel %vm1637_vm6, %v1622_v48, %v6477_v29  ;;  %v6642_v29 = vunpack.i.h.bf16 %v13194_v33  ;;  %v6722_v44 = vunpack.i.h.bf16 %v9058_v31  ;;  %v6721_v6 = vunpack.i.l.bf16 %v9058_v31 }
 0x214   : > { %418 = vst.msk [vmem:[#allocation2 + $0x170] sm:$0xff] %vm370_vm10, %v7991_v34  ;;  %v6801_v54 = vunpack.i.l.bf16 %v6800_v25 }
 0x215   : > { %420 = vst.msk [vmem:[#allocation2 + $0x180] sm:$0xff] %vm370_vm10, %v7991_v34 }
 0x216   : > { %421 = vst.msk [vmem:[#allocation2 + $0x188] sm:$0xff] %vm370_vm10, %v7991_v34 }
 0x217   : > { %423 = vst.msk [vmem:[#allocation2 + $0x198] sm:$0xff] %vm370_vm10, %v7991_v34 }
 0x218   : > { %5875 = vmatmul.msk.bf16.gmra.mxu0 %vm1841_vm11, %v1806_v7  ;;  %v1554_v7 = vsel %vm1538_vm3, %v7811_v59, %v6232_v28  ;;  %424 = vst.msk [vmem:[#allocation2 + $0x1a0] sm:$0xff] %vm370_vm10, %v7991_v34 }
 0x219   : > { %v1587_v14 = vsel %vm1571_vm5, %v1554_v7, %v6312_v40  ;;  %426 = vst.msk [vmem:[#allocation3] sm:$0xff] %vm370_vm10, %v7991_v34  ;;  %v6717_v40 = vunpack.i.h.bf16 %v13187_v1  ;;  %v1688_v7 = vsel %vm1670_vm8, %v1655_v55, %v6557_v61 }
 0x21a   : > { %v1620_v11 = vsel %vm1604_vm4, %v1587_v14, %v6392_v56  ;;  %427 = vst.msk [vmem:[#allocation3 + $0x8] sm:$0xff] %vm370_vm10, %v7991_v34  ;;  %v1654_v56 = vsel %vm1637_vm6, %v1621_v35, %v6476_v37  ;;  %v6641_v37 = vunpack.i.l.bf16 %v13194_v33 }
 0x21b   : > { %v1653_v17 = vsel %vm1637_vm6, %v1620_v11, %v6472_v24  ;;  %v6797_v24 = vunpack.i.h.bf16 %v6795_v0  ;;  %429 = vst.msk [vmem:[#allocation3 + $0x18] sm:$0xff] %vm370_vm10, %v7991_v34  ;;  %v1687_v59 = vsel %vm1670_vm8, %v1654_v56, %v6556_v46  ;;  %v6802_v0 = vunpack.i.h.bf16 %v6800_v25  ;;  %v13195_v56 = vld [vmem:[#allocation12_spill] sm:$0xff] }
 0x21c   : > { %v1686_v4 = vsel %vm1670_vm8, %v1653_v17, %v6552_v23  ;;  %430 = vst.msk [vmem:[#allocation3 + $0x20] sm:$0xff] %vm370_vm10, %v7991_v34  ;;  %v9423_v23 = vld [vmem:[%s13188_s2] ss:$0 sm:$0xff]  ;;  %v13190_v17 = vld [vmem:[#allocation29_spill] sm:$0xff]  ;;  %v6247_v55 = vunpack.i.h.bf16 %v13195_v56 }
 0x21d   : > { %v1719_v13 = vsel %vm1703_vm7, %v1686_v4, %v6632_v18  ;;  %432 = vst.msk [vmem:[#allocation3 + $0x30] sm:$0xff] %vm370_vm10, %v7991_v34  ;;  %v6321_v53 = vunpack.i.l.bf16 %v13190_v17  ;;  %v6402_v4 = vunpack.i.h.bf16 %v13191_v19  ;;  %v6805_v19 = vpop.permute.xlu2 %6804 }
 0x21e   : > { %v1752_v15 = vsel %vm1736_vm9, %v1719_v13, %v6712_v21  ;;  %433 = vst.msk [vmem:[#allocation3 + $0x38] sm:$0xff] %vm370_vm10, %v7991_v34  ;;  %v6242_v21 = vunpack.i.h.bf16 %v13189_v43  ;;  %v13192_v13 = vld [vmem:[#allocation46_spill] sm:$0xff]  ;;  %v6806_v25 = vunpack.i.l.bf16 %v6805_v19 }
 0x21f   : > { %v1784_v26 = vsel %vm370_vm10, %v1752_v15, %v6792_v2  ;;  %435 = vst.msk [vmem:[#allocation3 + $0x48] sm:$0xff] %vm370_vm10, %v7991_v34  ;;  %v6322_v2 = vunpack.i.h.bf16 %v13190_v17  ;;  %v6482_v51 = vunpack.i.h.bf16 %v13192_v13  ;;  %v6481_v15 = vunpack.i.l.bf16 %v13192_v13  ;;  %v13199_v17 = vld [vmem:[#allocation50_spill] sm:$0xff]  ;;  %v13200_v13 = vld [vmem:[#allocation61_spill] sm:$0xff] }
 0x220   : > { %v1808_v50 = vpack.c.bf16 %v1784_v26, %v1783_v27  ;;  %436 = vst.msk [vmem:[#allocation3 + $0x50] sm:$0xff] %vm370_vm10, %v7991_v34  ;;  %v7815_v27 = vld [vmem:[%s8103_s29 + $0xe0] sm:$0xff] }
 0x221   : > { %438 = vst.msk [vmem:[#allocation3 + $0x60] sm:$0xff] %vm370_vm10, %v7991_v34  ;;  %v1558_v26 = vsel %vm1538_vm3, %v7815_v27, %v6242_v21 }
 0x222   : > { %439 = vst.msk [vmem:[#allocation3 + $0x68] sm:$0xff] %vm370_vm10, %v7991_v34  ;;  %v1591_v41 = vsel %vm1571_vm5, %v1558_v26, %v6322_v2  ;;  %v6567_v2 = vunpack.i.h.bf16 %v13199_v17 }
 0x223   : > { %441 = vst.msk [vmem:[#allocation3 + $0x78] sm:$0xff] %vm370_vm10, %v7991_v34  ;;  %v1624_v32 = vsel %vm1604_vm4, %v1591_v41, %v6402_v4 }
 0x224   : > { %442 = vst.msk [vmem:[#allocation3 + $0x80] sm:$0xff] %vm370_vm10, %v7991_v34  ;;  %v1657_v46 = vsel %vm1637_vm6, %v1624_v32, %v6482_v51  ;;  %v6647_v51 = vunpack.i.h.bf16 %v13200_v13 }
 0x225   : > { %444 = vst.msk [vmem:[#allocation3 + $0x90] sm:$0xff] %vm370_vm10, %v7991_v34 }
 0x226   : > { %445 = vst.msk [vmem:[#allocation3 + $0x98] sm:$0xff] %vm370_vm10, %v7991_v34 }
 0x227   : > { %447 = vst.msk [vmem:[#allocation3 + $0xa8] sm:$0xff] %vm370_vm10, %v7991_v34 }
 0x228   : > { %5876 = vmatmul.msk.bf16.gmra.mxu0 %vm1841_vm11, %v1807_v63  ;;  %v13186_v63 = vld [vmem:[#allocation58_spill] sm:$0xff]  ;;  %448 = vst.msk [vmem:[#allocation3 + $0xb0] sm:$0xff] %vm370_vm10, %v7991_v34 }
 0x229   : > { %v6637_v47 = vunpack.i.h.bf16 %v13186_v63  ;;  %v6636_v28 = vunpack.i.l.bf16 %v13186_v63  ;;  %450 = vst.msk [vmem:[#allocation3 + $0xc0] sm:$0xff] %vm370_vm10, %v7991_v34  ;;  %v1690_v63 = vsel %vm1670_vm8, %v1657_v46, %v6562_v38 }
 0x22a   : > { %451 = vst.msk [vmem:[#allocation3 + $0xc8] sm:$0xff] %vm370_vm10, %v7991_v34 }
 0x22b   : > { %v1720_v12 = vsel %vm1703_vm7, %v1687_v59, %v6636_v28  ;;  %v1721_v20 = vsel %vm1703_vm7, %v1688_v7, %v6637_v47  ;;  %453 = vst.msk [vmem:[#allocation3 + $0xd8] sm:$0xff] %vm370_vm10, %v7991_v34  ;;  %v1723_v47 = vsel %vm1703_vm7, %v1690_v63, %v6642_v29 }
 0x22c   : > { %v1753_v10 = vsel %vm1736_vm9, %v1720_v12, %v6716_v3  ;;  %v1754_v16 = vsel %vm1736_vm9, %v1721_v20, %v6717_v40  ;;  %454 = vst.msk [vmem:[#allocation3 + $0xe0] sm:$0xff] %vm370_vm10, %v7991_v34  ;;  %v1756_v35 = vsel %vm1736_vm9, %v1723_v47, %v6722_v44  ;;  %v13197_v12 = vld [vmem:[#allocation40_spill] sm:$0xff] }
 0x22d   : > { %v1785_v14 = vsel %vm370_vm10, %v1753_v10, %v6796_v62  ;;  %v1786_v39 = vsel %vm370_vm10, %v1754_v16, %v6797_v24  ;;  %456 = vst.msk [vmem:[#allocation3 + $0xf0] sm:$0xff] %vm370_vm10, %v7991_v34  ;;  %v1788_v40 = vsel %vm370_vm10, %v1756_v35, %v6802_v0  ;;  %v6246_v24 = vunpack.i.l.bf16 %v13195_v56  ;;  %v13196_v62 = vld [vmem:[#allocation17_spill] sm:$0xff]  ;;  %v7820_v56 = vld [vmem:[%s8103_s29 + $0x110] sm:$0xff] }
 0x22e   : > { %v1809_v11 = vpack.c.bf16 %v1786_v39, %v1785_v14  ;;  %457 = vst.msk [vmem:[#allocation3 + $0xf8] sm:$0xff] %vm370_vm10, %v7991_v34  ;;  %v6327_v59 = vunpack.i.h.bf16 %v13196_v62  ;;  %v6326_v7 = vunpack.i.l.bf16 %v13196_v62  ;;  %v6407_v20 = vunpack.i.h.bf16 %v13197_v12  ;;  %v13198_v16 = vld [vmem:[#allocation45_spill] sm:$0xff] }
 0x22f   : > { %459 = vst.msk [vmem:[#allocation3 + $0x108] sm:$0xff] %vm370_vm10, %v7991_v34  ;;  %v6406_v10 = vunpack.i.l.bf16 %v13197_v12  ;;  %v6487_v14 = vunpack.i.h.bf16 %v13198_v16  ;;  %v6486_v39 = vunpack.i.l.bf16 %v13198_v16 }
 0x230   : > { %460 = vst.msk [vmem:[#allocation3 + $0x110] sm:$0xff] %vm370_vm10, %v7991_v34 }
 0x231   : > { %462 = vst.msk [vmem:[#allocation3 + $0x120] sm:$0xff] %vm370_vm10, %v7991_v34 }
 0x232   : > { %463 = vst.msk [vmem:[#allocation3 + $0x128] sm:$0xff] %vm370_vm10, %v7991_v34 }
 0x233   : > { %465 = vst.msk [vmem:[#allocation3 + $0x138] sm:$0xff] %vm370_vm10, %v7991_v34 }
 0x234   : > { %466 = vst.msk [vmem:[#allocation3 + $0x140] sm:$0xff] %vm370_vm10, %v7991_v34 }
 0x235   : > { %468 = vst.msk [vmem:[#allocation3 + $0x150] sm:$0xff] %vm370_vm10, %v7991_v34 }
 0x236   : > { %469 = vst.msk [vmem:[#allocation3 + $0x158] sm:$0xff] %vm370_vm10, %v7991_v34 }
 0x237   : > { %471 = vst.msk [vmem:[#allocation3 + $0x168] sm:$0xff] %vm370_vm10, %v7991_v34 }
 0x238   : > { %5877 = vmatmul.msk.bf16.gmra.mxu0 %vm1841_vm11, %v1808_v50  ;;  %v7816_v50 = vld [vmem:[%s8103_s29 + $0xd8] sm:$0xff]  ;;  %472 = vst.msk [vmem:[#allocation3 + $0x170] sm:$0xff] %vm370_vm10, %v7991_v34 }
 0x239   : > { %v1557_v42 = vsel %vm1538_vm3, %v7816_v50, %v6241_v58  ;;  %474 = vst.msk [vmem:[#allocation3 + $0x180] sm:$0xff] %vm370_vm10, %v7991_v34 }
 0x23a   : > { %v1590_v49 = vsel %vm1571_vm5, %v1557_v42, %v6321_v53  ;;  %v6566_v53 = vunpack.i.l.bf16 %v13199_v17  ;;  %v13201_v42 = vld [vmem:[#allocation66_spill] sm:$0xff]  ;;  %475 = vst.msk [vmem:[#allocation3 + $0x188] sm:$0xff] %vm370_vm10, %v7991_v34  ;;  %v13207_v17 = vld [vmem:[#allocation60_spill] sm:$0xff] }
 0x23b   : > { %v1623_v45 = vsel %vm1604_vm4, %v1590_v49, %v6401_v5  ;;  %v6727_v22 = vunpack.i.h.bf16 %v13201_v42  ;;  %v6726_v38 = vunpack.i.l.bf16 %v13201_v42  ;;  %477 = vst.msk [vmem:[#allocation3 + $0x198] sm:$0xff] %vm370_vm10, %v7991_v34 }
 0x23c   : > { %v1656_v61 = vsel %vm1637_vm6, %v1623_v45, %v6481_v15  ;;  %v6646_v15 = vunpack.i.l.bf16 %v13200_v13  ;;  %478 = vst.msk [vmem:[#allocation3 + $0x1a0] sm:$0xff] %vm370_vm10, %v7991_v34  ;;  %v13210_v13 = vld [vmem:[#allocation67_spill] sm:$0xff] }
 0x23d   : > { %v1689_v52 = vsel %vm1670_vm8, %v1656_v61, %v6561_v36  ;;  %v6807_v36 = vunpack.i.h.bf16 %v6805_v19  ;;  %377 = vst.msk [vmem:[#allocation2 + $0x28] sm:$0x3] %vm373_vm12, %v7991_v34  ;;  %v13202_v61 = vld [vmem:[#allocation24_spill] sm:$0xff] }
 0x23e   : > { %v1722_v31 = vsel %vm1703_vm7, %v1689_v52, %v6641_v37  ;;  %374 = vst.msk [vmem:[#allocation2 + $0x10] sm:$0x3] %vm373_vm12, %v7991_v34  ;;  %v6251_v46 = vunpack.i.l.bf16 %v13202_v61  ;;  %v6252_v0 = vunpack.i.h.bf16 %v13202_v61 }
 0x23f   : > { %v1755_v28 = vsel %vm1736_vm9, %v1722_v31, %v6721_v6  ;;  %380 = vst.msk [vmem:[#allocation2 + $0x40] sm:$0x3] %vm373_vm12, %v7991_v34 }
 0x240   : > { %v1787_v1 = vsel %vm370_vm10, %v1755_v28, %v6801_v54  ;;  %v13203_v54 = vld [vmem:[#allocation33_spill] sm:$0xff]  ;;  %383 = vst.msk [vmem:[#allocation2 + $0x58] sm:$0x3] %vm373_vm12, %v7991_v34  ;;  %v13204_v28 = vld [vmem:[#allocation39_spill] sm:$0xff] }
 0x241   : > { %v1810_v3 = vpack.c.bf16 %v1788_v40, %v1787_v1  ;;  %v6331_v52 = vunpack.i.l.bf16 %v13203_v54  ;;  %386 = vst.msk [vmem:[#allocation2 + $0x70] sm:$0x3] %vm373_vm12, %v7991_v34  ;;  %v6332_v47 = vunpack.i.h.bf16 %v13203_v54  ;;  %v6411_v35 = vunpack.i.l.bf16 %v13204_v28  ;;  %v7819_v1 = vld [vmem:[%s8103_s29 + $0x108] sm:$0xff] }
 0x242   : > { %389 = vst.msk [vmem:[#allocation2 + $0x88] sm:$0x3] %vm373_vm12, %v7991_v34  ;;  %v1561_v40 = vsel %vm1538_vm3, %v7819_v1, %v6251_v46  ;;  %v6412_v62 = vunpack.i.h.bf16 %v13204_v28  ;;  %v13212_v1 = vld [vmem:[#allocation32_spill] sm:$0xff] }
 0x243   : > { %392 = vst.msk [vmem:[#allocation2 + $0xa0] sm:$0x3] %vm373_vm12, %v7991_v34 }
 0x244   : > { %395 = vst.msk [vmem:[#allocation2 + $0xb8] sm:$0x3] %vm373_vm12, %v7991_v34 }
 0x245   : > { %v1903_v18 = vpop.f32.mrf.mxu0  ;;  %398 = vst.msk [vmem:[#allocation2 + $0xd0] sm:$0x3] %vm373_vm12, %v7991_v34  ;;  %v9666_v61 = vld [vmem:[#allocation2 + $0x10] sm:$0x3] }
 0x246   : > { %v1904_v8 = vadd.f32 %v9423_v23, %v1903_v18  ;;  %v7817_v18 = vld [vmem:[%s8103_s29 + $0xf8] sm:$0xff]  ;;  %401 = vst.msk [vmem:[#allocation2 + $0xe8] sm:$0x3] %vm373_vm12, %v7991_v34  ;;  %v2153_v54 = vrot.slane %v9666_v61, 1 }
 0x247   : > { %404 = vst.msk [vmem:[#allocation2 + $0x100] sm:$0x3] %vm373_vm12, %v7991_v34 }
 0x248   : > { %v1983_v9 = vmax.f32 %v1904_v8, 0.0  ;;  %5878 = vmatmul.msk.bf16.gmra.mxu0 %vm1841_vm11, %v1809_v11  ;;  %v1560_v8 = vsel %vm1538_vm3, %v7817_v18, %v6247_v55  ;;  %v7818_v11 = vld [vmem:[%s8103_s29 + $0xf0] sm:$0xff]  ;;  %v1562_v55 = vsel %vm1538_vm3, %v7820_v56, %v6252_v0  ;;  %v6112_v18 = vld [vmem:[%s12854_s3 + $0x80] sm:$0xff]  ;;  %407 = vst.msk [vmem:[#allocation2 + $0x118] sm:$0x3] %vm373_vm12, %v7991_v34 }
 0x249   : > { %v1559_v43 = vsel %vm1538_vm3, %v7818_v11, %v6246_v24  ;;  %v1593_v58 = vsel %vm1571_vm5, %v1560_v8, %v6327_v59  ;;  %v1594_v24 = vsel %vm1571_vm5, %v1561_v40, %v6331_v52  ;;  %v13205_v59 = vld [vmem:[#allocation43_spill] sm:$0xff]  ;;  %v1595_v8 = vsel %vm1571_vm5, %v1562_v55, %v6332_v47  ;;  %410 = vst.msk [vmem:[#allocation2 + $0x130] sm:$0x3] %vm373_vm12, %v7991_v34 }
 0x24a   : > { %2016 = vst.msk [vmem:[#allocation2 + $0x19] sm:$0xff] %vm370_vm10, %v1983_v9  ;;  %v1592_v9 = vsel %vm1571_vm5, %v1559_v43, %v6326_v7  ;;  %v1626_v4 = vsel %vm1604_vm4, %v1593_v58, %v6407_v20  ;;  %v6492_v7 = vunpack.i.h.bf16 %v13205_v59  ;;  %v1627_v11 = vsel %vm1604_vm4, %v1594_v24, %v6411_v35  ;;  %v13206_v43 = vld [vmem:[#allocation54_spill] sm:$0xff]  ;;  %v13213_v24 = vld [vmem:[#allocation37_spill] sm:$0xff] }
 0x24b   : > { %v1625_v5 = vsel %vm1604_vm4, %v1592_v9, %v6406_v10  ;;  %v1659_v50 = vsel %vm1637_vm6, %v1626_v4, %v6487_v14  ;;  %v6491_v10 = vunpack.i.l.bf16 %v13205_v59  ;;  %v6571_v58 = vunpack.i.l.bf16 %v13206_v43  ;;  %v6810_v9 = vpop.permute.xlu0 %6809  ;;  %413 = vst.msk [vmem:[#allocation2 + $0x148] sm:$0x3] %vm373_vm12, %v7991_v34 }
 0x24c   : > { %v1658_v26 = vsel %vm1637_vm6, %v1625_v5, %v6486_v39  ;;  %v1692_v33 = vsel %vm1670_vm8, %v1659_v50, %v6567_v2  ;;  %v6652_v2 = vunpack.i.h.bf16 %v13207_v17  ;;  %v1628_v5 = vsel %vm1604_vm4, %v1595_v8, %v6412_v62  ;;  %416 = vst.msk [vmem:[#allocation2 + $0x160] sm:$0x3] %vm373_vm12, %v7991_v34  ;;  %v7822_v8 = vld [vmem:[%s8103_s29 + $0x128] sm:$0xff] }
 0x24d   : > { %v1905_v48 = vpop.f32.mrf.mxu0  ;;  %v1691_v41 = vsel %vm1670_vm8, %v1658_v26, %v6566_v53  ;;  %v1725_v37 = vsel %vm1703_vm7, %v1692_v33, %v6647_v51  ;;  %v6651_v53 = vunpack.i.l.bf16 %v13207_v17  ;;  %v6732_v51 = vunpack.i.h.bf16 %v13210_v13  ;;  %419 = vst.msk [vmem:[#allocation2 + $0x178] sm:$0x3] %vm373_vm12, %v7991_v34  ;;  %v6815_v17 = vpop.permute.xlu1 %6814 }
 0x24e   : > { %v1906_v21 = vadd.f32 %v9423_v23, %v1905_v48  ;;  %v1724_v29 = vsel %vm1703_vm7, %v1691_v41, %v6646_v15  ;;  %v1758_v32 = vsel %vm1736_vm9, %v1725_v37, %v6727_v22  ;;  %v6731_v15 = vunpack.i.l.bf16 %v13210_v13  ;;  %422 = vst.msk [vmem:[#allocation2 + $0x190] sm:$0x3] %vm373_vm12, %v7991_v34 }
 0x24f   : > { %v1757_v45 = vsel %vm1736_vm9, %v1724_v29, %v6726_v38  ;;  %v1790_v6 = vsel %vm370_vm10, %v1758_v32, %v6807_v36  ;;  %v1660_v50 = vsel %vm1637_vm6, %v1627_v11, %v6491_v10  ;;  %v1661_v42 = vsel %vm1637_vm6, %v1628_v5, %v6492_v7  ;;  %425 = vst.msk [vmem:[#allocation2 + $0x1a8] sm:$0x3] %vm373_vm12, %v7991_v34  ;;  %v13214_v10 = vld [vmem:[#allocation48_spill] sm:$0xff]  ;;  %v13216_v5 = vld [vmem:[#allocation59_spill] sm:$0xff] }
 0x250   : > { %v1984_v49 = vmax.f32 %v1906_v21, 0.0  ;;  %v1789_v44 = vsel %vm370_vm10, %v1757_v45, %v6806_v25  ;;  %v6572_v21 = vunpack.i.h.bf16 %v13206_v43  ;;  %v6812_v22 = vunpack.i.h.bf16 %v6810_v9  ;;  %428 = vst.msk [vmem:[#allocation3 + $0x10] sm:$0x3] %vm373_vm12, %v7991_v34 }
 0x251   : > { %v1811_v63 = vpack.c.bf16 %v1790_v6, %v1789_v44  ;;  %v9582_v48 = vld [vmem:[#allocation2 + $0x18] sm:$0xff]  ;;  %v6811_v38 = vunpack.i.l.bf16 %v6810_v9  ;;  %v1693_v25 = vsel %vm1670_vm8, %v1660_v50, %v6571_v58  ;;  %v9662_v44 = vld [vmem:[#allocation2] sm:$0xff]  ;;  %v9664_v6 = vld [vmem:[#allocation2 + $0x8] sm:$0xff]  ;;  %431 = vst.msk [vmem:[#allocation3 + $0x28] sm:$0x3] %vm373_vm12, %v7991_v34  ;;  %v6336_v40 = vunpack.i.l.bf16 %v13212_v1 }
 0x252   : > { %2017 = vst.msk [vmem:[#allocation2 + $0x21] sm:$0xff] %vm370_vm10, %v1984_v49  ;;  %v2155_v16 = vrot.slane %v9582_v48, 1  ;;  %v1694_v49 = vsel %vm1670_vm8, %v1661_v42, %v6572_v21  ;;  %v1726_v41 = vsel %vm1703_vm7, %v1693_v25, %v6651_v53  ;;  %v2150_v46 = vrot.slane %v9662_v44, 1  ;;  %v13215_v21 = vld [vmem:[#allocation53_spill] sm:$0xff] }
 0x253   : > { %v1727_v33 = vsel %vm1703_vm7, %v1694_v49, %v6652_v2  ;;  %v1759_v29 = vsel %vm1736_vm9, %v1726_v41, %v6731_v15  ;;  %v2151_v0 = vrot.slane %v9664_v6, 1  ;;  %434 = vst.msk [vmem:[#allocation3 + $0x40] sm:$0x3] %vm373_vm12, %v7991_v34  ;;  %v6337_v55 = vunpack.i.h.bf16 %v13212_v1 }
 0x254   : > { %v1760_v37 = vsel %vm1736_vm9, %v1727_v33, %v6732_v51  ;;  %v1791_v45 = vsel %vm370_vm10, %v1759_v29, %v6811_v38  ;;  %437 = vst.msk [vmem:[#allocation3 + $0x58] sm:$0x3] %vm373_vm12, %v7991_v34  ;;  %v6416_v62 = vunpack.i.l.bf16 %v13213_v24  ;;  %v6417_v7 = vunpack.i.h.bf16 %v13213_v24 }
 0x255   : > { %v9540_v27 = vpop.f32.mrf.mxu0  ;;  %v1792_v32 = vsel %vm370_vm10, %v1760_v37, %v6812_v22  ;;  %v2154_v56 = vsel %vm582_vm0, %v2151_v0, %v2153_v54  ;;  %440 = vst.msk [vmem:[#allocation3 + $0x70] sm:$0x3] %vm373_vm12, %v7991_v34  ;;  %v6577_v58 = vunpack.i.h.bf16 %v13215_v21  ;;  %v6576_v9 = vunpack.i.l.bf16 %v13215_v21  ;;  %v13217_v37 = vld [vmem:[#allocation25_spill] sm:$0xff] }
 0x256   : > { %v1812_v52 = vpack.c.bf16 %v1792_v32, %v1791_v45  ;;  %443 = vst.msk [vmem:[#allocation3 + $0x88] sm:$0x3] %vm373_vm12, %v7991_v34  ;;  %v6657_v13 = vunpack.i.h.bf16 %v13216_v5  ;;  %v6656_v51 = vunpack.i.l.bf16 %v13216_v5  ;;  %v6737_v50 = vunpack.i.h.bf16 %v9076_v60 }
 0x257   : > { %446 = vst.msk [vmem:[#allocation3 + $0xa0] sm:$0x3] %vm373_vm12, %v7991_v34  ;;  %v6736_v42 = vunpack.i.l.bf16 %v9076_v60  ;;  %v6817_v38 = vunpack.i.h.bf16 %v6815_v17  ;;  %v6816_v25 = vunpack.i.l.bf16 %v6815_v17  ;;  %v1909_v49 = vadd.f32 %v9423_v23, %v9540_v27  ;;  %v13221_v17 = vld [vmem:[#allocation47_spill] sm:$0xff] }
 0x258   : > { %5879 = vmatmul.msk.bf16.gmra.mxu0 %vm1841_vm11, %v1810_v3  ;;  %v6113_v3 = vld [vmem:[%s12854_s3 + $0x88] sm:$0xff]  ;;  %449 = vst.msk [vmem:[#allocation3 + $0xb8] sm:$0x3] %vm373_vm12, %v7991_v34  ;;  %v6267_v45 = vunpack.i.h.bf16 %v13217_v37 }
 0x259   : > { %v9599_v12 = vld [vmem:[#allocation2 + $0x20] sm:$0xff]  ;;  %v9601_v20 = vld [vmem:[#allocation2 + $0x28] sm:$0x3]  ;;  %3598 = vmatpush.bf16.msra.mxu3 %v6113_v3  ;;  %v2152_v3 = vsel %vm582_vm0, %v2150_v46, %v2151_v0  ;;  %452 = vst.msk [vmem:[#allocation3 + $0xd0] sm:$0x3] %vm373_vm12, %v7991_v34 }
 0x25a   : > { %v2156_v14 = vrot.slane %v9599_v12, 1  ;;  %v2158_v39 = vrot.slane %v9601_v20, 1  ;;  %v6833_v59 = vpack.i.bf16 %v2154_v56, %v2152_v3  ;;  %455 = vst.msk [vmem:[#allocation3 + $0xe8] sm:$0x3] %vm373_vm12, %v7991_v34  ;;  %v13218_v0 = vld [vmem:[#allocation14_spill] sm:$0xff] }
 0x25b   : > { %458 = vst.msk [vmem:[#allocation3 + $0x100] sm:$0x3] %vm373_vm12, %v7991_v34  ;;  %v6262_v54 = vunpack.i.h.bf16 %v13218_v0  ;;  %v13219_v56 = vld [vmem:[#allocation26_spill] sm:$0xff] }
 0x25c   : > { %v9623_v19 = vsel %vm582_vm0, %v2155_v16, %v2156_v14  ;;  %v9626_v4 = vsel %vm582_vm0, %v2156_v14, %v2158_v39  ;;  %v6496_v16 = vunpack.i.l.bf16 %v13214_v10  ;;  %v7821_v14 = vld [vmem:[%s8103_s29 + $0x120] sm:$0xff]  ;;  %6834 = vrot.lane.b32.xlu2 %v6833_v59, %s7990_s26  ;;  %461 = vst.msk [vmem:[#allocation3 + $0x118] sm:$0x3] %vm373_vm12, %v7991_v34 }
 0x25d   : > { %v9576_v31 = vpop.f32.mrf.mxu0  ;;  %13208 = vst [vmem:[#allocation28_spill] sm:$0xff] %v9623_v19  ;;  %v6838_v26 = vpack.i.bf16 %v9626_v4, %v9623_v19  ;;  %3599 = vmatpush.bf16.msra.mxu3 %v6112_v18  ;;  %v6497_v18 = vunpack.i.h.bf16 %v13214_v10 }
 0x25e   : > { %13209 = vst [vmem:[#allocation21_spill] sm:$0xff] %v9626_v4  ;;  %v1911_v60 = vadd.f32 %v9423_v23, %v9576_v31 }
 0x25f   : > { %6839 = vrot.lane.b32.xlu0 %v6838_v26, %s7990_s26  ;;  %464 = vst.msk [vmem:[#allocation3 + $0x130] sm:$0x3] %vm373_vm12, %v7991_v34 }
 0x260   : > { %467 = vst.msk [vmem:[#allocation3 + $0x148] sm:$0x3] %vm373_vm12, %v7991_v34  ;;  %v1986_v3 = vmax.f32 %v1911_v60, 0.0  ;;  %v13225_v60 = vld [vmem:[#allocation68_spill] sm:$0xff] }
 0x261   : > { %470 = vst.msk [vmem:[#allocation3 + $0x160] sm:$0x3] %vm373_vm12, %v7991_v34 }
 0x262   : > { %473 = vst.msk [vmem:[#allocation3 + $0x178] sm:$0x3] %vm373_vm12, %v7991_v34 }
 0x263   : > { %476 = vst.msk [vmem:[#allocation3 + $0x190] sm:$0x3] %vm373_vm12, %v7991_v34 }
 0x264   : > { %479 = vst.msk [vmem:[#allocation3 + $0x1a8] sm:$0x3] %vm373_vm12, %v7991_v34  ;;  %v6501_v34 = vunpack.i.l.bf16 %v13221_v17 }
 0x265   : > { %v9639_v36 = vpop.f32.mrf.mxu0  ;;  %2019 = vst.msk [vmem:[#allocation2 + $0x39] sm:$0xff] %vm370_vm10, %v1986_v3 }
 0x266   : > { %v1914_v27 = vadd.f32 %v9423_v23, %v9639_v36  ;;  %v1985_v36 = vmax.f32 %v1909_v49, 0.0  ;;  %v6820_v49 = vpop.permute.xlu2 %6819 }
 0x268   : > { %5880 = vmatmul.msk.bf16.gmra.mxu0 %vm1841_vm11, %v1811_v63  ;;  %v13211_v63 = vld [vmem:[#allocation15_spill] sm:$0xff]  ;;  %v1987_v24 = vmax.f32 %v1914_v27, 0.0  ;;  %2018 = vst.msk [vmem:[#allocation2 + $0x31] sm:$0xff] %vm370_vm10, %v1985_v36  ;;  %v13226_v36 = vld [vmem:[#allocation41_spill] sm:$0xff] }
 0x269   : > { %v6256_v47 = vunpack.i.l.bf16 %v13211_v63  ;;  %v6257_v35 = vunpack.i.h.bf16 %v13211_v63 }
 0x26a   : > { %2020 = vst.msk [vmem:[#allocation2 + $0x49] sm:$0xff] %vm370_vm10, %v1987_v24 }
 0x26b   : > { %v1563_v39 = vsel %vm1538_vm3, %v7821_v14, %v6256_v47  ;;  %v1564_v11 = vsel %vm1538_vm3, %v7822_v8, %v6257_v35  ;;  %v7824_v14 = vld [vmem:[%s8103_s29 + $0x140] sm:$0xff] }
 0x26c   : > { %v1596_v43 = vsel %vm1571_vm5, %v1563_v39, %v6336_v40  ;;  %v1597_v2 = vsel %vm1571_vm5, %v1564_v11, %v6337_v55  ;;  %v6261_v40 = vunpack.i.l.bf16 %v13218_v0  ;;  %v6342_v55 = vunpack.i.h.bf16 %v13219_v56 }
 0x26d   : > { %v1915_v28 = vpop.f32.mrf.mxu0  ;;  %v1629_v53 = vsel %vm1604_vm4, %v1596_v43, %v6416_v62  ;;  %v1630_v15 = vsel %vm1604_vm4, %v1597_v2, %v6417_v7  ;;  %v7823_v62 = vld [vmem:[%s8103_s29 + $0x158] sm:$0xff]  ;;  %v6266_v7 = vunpack.i.l.bf16 %v13217_v37  ;;  %v1566_v39 = vsel %vm1538_vm3, %v7824_v14, %v6262_v54 }
 0x26e   : > { %v1662_v26 = vsel %vm1637_vm6, %v1629_v53, %v6496_v16  ;;  %v1663_v22 = vsel %vm1637_vm6, %v1630_v15, %v6497_v18  ;;  %v1916_v31 = vadd.f32 %v9423_v23, %v1915_v28  ;;  %v6341_v28 = vunpack.i.l.bf16 %v13219_v56  ;;  %v13220_v18 = vld [vmem:[#allocation42_spill] sm:$0xff] }
 0x26f   : > { %v1695_v33 = vsel %vm1670_vm8, %v1662_v26, %v6576_v9  ;;  %v1696_v29 = vsel %vm1670_vm8, %v1663_v22, %v6577_v58  ;;  %v1568_v59 = vsel %vm1538_vm3, %v7823_v62, %v6267_v45  ;;  %v6422_v8 = vunpack.i.h.bf16 %v13220_v18  ;;  %v7825_v58 = vld [vmem:[%s8103_s29 + $0x138] sm:$0xff]  ;;  %v13224_v22 = vld [vmem:[#allocation64_spill] sm:$0xff]  ;;  %v2056_v62 = vld [vmem:[#allocation2 + $0x40] sm:$0x3] }
 0x270   : > { %v1728_v32 = vsel %vm1703_vm7, %v1695_v33, %v6656_v51  ;;  %v1729_v46 = vsel %vm1703_vm7, %v1696_v29, %v6657_v13  ;;  %v1988_v10 = vmax.f32 %v1916_v31, 0.0  ;;  %v6421_v11 = vunpack.i.l.bf16 %v13220_v18  ;;  %v13222_v51 = vld [vmem:[#allocation51_spill] sm:$0xff]  ;;  %v9797_v56 = vld [vmem:[#allocation2 + $0x30] sm:$0xff]  ;;  %v9801_v24 = vld [vmem:[#allocation2 + $0x38] sm:$0xff] }
 0x271   : > { %v1762_v63 = vsel %vm1736_vm9, %v1729_v46, %v6737_v50  ;;  %v1565_v9 = vsel %vm1538_vm3, %v7825_v58, %v6261_v40  ;;  %v6502_v2 = vunpack.i.h.bf16 %v13221_v17  ;;  %v1599_v5 = vsel %vm1571_vm5, %v1566_v39, %v6342_v55  ;;  %v13223_v50 = vld [vmem:[#allocation36_spill] sm:$0xff] }
 0x272   : > { %v1794_v35 = vsel %vm370_vm10, %v1762_v63, %v6817_v38  ;;  %v1598_v13 = vsel %vm1571_vm5, %v1565_v9, %v6341_v28  ;;  %v6582_v15 = vunpack.i.h.bf16 %v13222_v51  ;;  %v6581_v26 = vunpack.i.l.bf16 %v13222_v51  ;;  %2021 = vst.msk [vmem:[#allocation2 + $0x51] sm:$0xff] %vm370_vm10, %v1988_v10 }
 0x273   : > { %v6662_v38 = vunpack.i.h.bf16 %v13224_v22  ;;  %v1632_v33 = vsel %vm1604_vm4, %v1599_v5, %v6422_v8  ;;  %v1631_v29 = vsel %vm1604_vm4, %v1598_v13, %v6421_v11  ;;  %v6742_v37 = vunpack.i.h.bf16 %v13225_v60  ;;  %v9807_v8 = vld [vmem:[#allocation2 + $0x48] sm:$0xff] }
 0x274   : > { %v6741_v45 = vunpack.i.l.bf16 %v13225_v60  ;;  %v6346_v27 = vunpack.i.l.bf16 %v13223_v50  ;;  %v1664_v0 = vsel %vm1637_vm6, %v1631_v29, %v6501_v34  ;;  %v1665_v54 = vsel %vm1637_vm6, %v1632_v33, %v6502_v2 }
 0x275   : > { %v1918_v41 = vpop.f32.mrf.mxu0  ;;  %v1698_v63 = vsel %vm1670_vm8, %v1665_v54, %v6582_v15  ;;  %v6822_v31 = vunpack.i.h.bf16 %v6820_v49  ;;  %v2243_v14 = vrot.slane %v2056_v62, 2  ;;  %v2161_v39 = vrot.slane %v9801_v24, 1 }
 0x276   : > { %v1919_v1 = vadd.f32 %v9423_v23, %v1918_v41  ;;  %v1731_v3 = vsel %vm1703_vm7, %v1698_v63, %v6662_v38  ;;  %v2163_v18 = vrot.slane %v2056_v62, 1  ;;  %v2165_v9 = vrot.slane %v9807_v8, 1 }
 0x277   : > { %v1764_v28 = vsel %vm1736_vm9, %v1731_v3, %v6742_v37  ;;  %v6427_v33 = vunpack.i.h.bf16 %v13226_v36  ;;  %v2230_v62 = vrot.slane %v9662_v44, 2  ;;  %v13234_v44 = vld [vmem:[#allocation56_spill] sm:$0xff] }
 0x278   : > { %5881 = vmatmul.msk.bf16.gmra.mxu0 %vm1841_vm11, %v1812_v52  ;;  %v1761_v52 = vsel %vm1736_vm9, %v1728_v32, %v6736_v42  ;;  %v1989_v43 = vmax.f32 %v1919_v1, 0.0  ;;  %v6347_v42 = vunpack.i.h.bf16 %v13223_v50  ;;  %v7826_v32 = vld [vmem:[%s8103_s29 + $0x150] sm:$0xff]  ;;  %v6426_v1 = vunpack.i.l.bf16 %v13226_v36 }
 0x279   : > { %v1793_v47 = vsel %vm370_vm10, %v1761_v52, %v6816_v25  ;;  %v6661_v25 = vunpack.i.l.bf16 %v13224_v22  ;;  %v1567_v46 = vsel %vm1538_vm3, %v7826_v32, %v6266_v7  ;;  %v1697_v52 = vsel %vm1670_vm8, %v1664_v0, %v6581_v26  ;;  %v2059_v58 = vld [vmem:[#allocation2 + $0x58] sm:$0x3] }
 0x27a   : > { %v1813_v16 = vpack.c.bf16 %v1794_v35, %v1793_v47  ;;  %2022 = vst.msk [vmem:[#allocation2 + $0x61] sm:$0xff] %vm370_vm10, %v1989_v43  ;;  %v6821_v47 = vunpack.i.l.bf16 %v6820_v49  ;;  %v9792_v35 = vsel %vm1571_vm5, %v1568_v59, %v6347_v42  ;;  %v2240_v7 = vrot.slane %v9797_v56, 2 }
 0x27b   : > { %v1730_v40 = vsel %vm1703_vm7, %v1697_v52, %v6661_v25  ;;  %v2160_v59 = vrot.slane %v9797_v56, 1  ;;  %v1796_v43 = vsel %vm370_vm10, %v1764_v28, %v6822_v31  ;;  %v9821_v5 = vsel %vm582_vm0, %v2161_v39, %v2163_v18 }
 0x27c   : > { %v1763_v55 = vsel %vm1736_vm9, %v1730_v40, %v6741_v45  ;;  %13228 = vst [vmem:[#allocation22_spill] sm:$0xff] %v9821_v5  ;;  %v2168_v26 = vrot.slane %v2059_v58, 1  ;;  %v1600_v22 = vsel %vm1571_vm5, %v1567_v46, %v6346_v27  ;;  %v2248_v25 = vrot.slane %v2059_v58, 2 }
 0x27d   : > { %v1920_v21 = vpop.f32.mrf.mxu0  ;;  %v1795_v11 = vsel %vm370_vm10, %v1763_v55, %v6821_v47  ;;  %v2245_v32 = vrot.slane %v9807_v8, 2  ;;  %v1633_v0 = vsel %vm1604_vm4, %v1600_v22, %v6426_v1  ;;  %v6587_v58 = vunpack.i.h.bf16 %v13234_v44 }
 0x27e   : > { %v1921_v53 = vadd.f32 %v9423_v23, %v1920_v21  ;;  %v9811_v21 = vld [vmem:[#allocation2 + $0x50] sm:$0xff]  ;;  %v1814_v27 = vpack.c.bf16 %v1796_v43, %v1795_v11  ;;  %v6746_v22 = vunpack.i.l.bf16 %v9067_v57 }
 0x27f   : > { %v2166_v15 = vrot.slane %v9811_v21, 1  ;;  %v2246_v38 = vrot.slane %v9811_v21, 2 }
 0x280   : > { %v1990_v41 = vmax.f32 %v1921_v53, 0.0  ;;  %v9818_v53 = vsel %vm582_vm0, %v2160_v59, %v2161_v39  ;;  %v13233_v39 = vld [vmem:[#allocation44_spill] sm:$0xff] }
 0x281   : > { %13227 = vst [vmem:[#allocation16_spill] sm:$0xff] %v9818_v53  ;;  %v9825_v51 = vpack.i.bf16 %v9821_v5, %v9818_v53  ;;  %v9839_v29 = vsel %vm582_vm0, %v2165_v9, %v2166_v15  ;;  %v9842_v60 = vsel %vm582_vm0, %v2166_v15, %v2168_v26  ;;  %v2247_v47 = vsel %vm663_vm1, %v2245_v32, %v2246_v38  ;;  %v6102_v53 = vld [vmem:[%s12854_s3 + $0x30] sm:$0xff] }
 0x282   : > { %2023 = vst.msk [vmem:[#allocation2 + $0x69] sm:$0xff] %vm370_vm10, %v1990_v41  ;;  %v9832_v41 = vld [vmem:[#allocation2 + $0x60] sm:$0xff]  ;;  %v9847_v45 = vpack.i.bf16 %v9842_v60, %v9839_v29  ;;  %v2249_v36 = vsel %vm663_vm1, %v2246_v38, %v2248_v25  ;;  %v6507_v18 = vunpack.i.h.bf16 %v13233_v39  ;;  %v6506_v11 = vunpack.i.l.bf16 %v13233_v39 }
 0x283   : > { %6844 = vrot.lane.b32.xlu1 %v9825_v51, %s7990_s26  ;;  %13229 = vst [vmem:[#allocation27_spill] sm:$0xff] %v9839_v29  ;;  %v2250_v52 = vrot.slane %v9832_v41, 2  ;;  %v2170_v63 = vrot.slane %v9832_v41, 1  ;;  %v6586_v9 = vunpack.i.l.bf16 %v13234_v44  ;;  %v6747_v26 = vunpack.i.h.bf16 %v9067_v57 }
 0x284   : > { %13230 = vst [vmem:[#allocation13_spill] sm:$0xff] %v9842_v60  ;;  %6849 = vrot.lane.b32.xlu2 %v9847_v45, %s7990_s26 }
 0x285   : > { %v1923_v10 = vpop.f32.mrf.mxu0 }
 0x286   : > { %v1924_v17 = vadd.f32 %v9423_v23, %v1923_v10  ;;  %v2231_v10 = vrot.slane %v9664_v6, 2 }
 0x288   : > { %5882 = vmatmul.msk.bf16.gmra.mxu0 %vm1841_vm11, %v1813_v16  ;;  %v2241_v16 = vrot.slane %v9801_v24, 2  ;;  %v1991_v49 = vmax.f32 %v1924_v17, 0.0  ;;  %v6825_v17 = vpop.permute.xlu0 %6824  ;;  %v2232_v38 = vsel %vm663_vm1, %v2230_v62, %v2231_v10  ;;  %v13236_v62 = vld [vmem:[#allocation18_spill] sm:$0xff] }
 0x289   : > { %v9828_v50 = vld [vmem:[#allocation2 + $0x68] sm:$0xff]  ;;  %v2062_v42 = vld [vmem:[#allocation2 + $0x70] sm:$0x3] }
 0x28a   : > { %v2242_v2 = vsel %vm663_vm1, %v2240_v7, %v2241_v16  ;;  %v2244_v34 = vsel %vm663_vm1, %v2241_v16, %v2243_v14  ;;  %v2251_v37 = vrot.slane %v9828_v50, 2  ;;  %2024 = vst.msk [vmem:[#allocation2 + $0x79] sm:$0xff] %vm370_vm10, %v1991_v49  ;;  %v2253_v46 = vrot.slane %v2062_v42, 2 }
 0x28b   : > { %v3172_v13 = vpack.c.bf16 %v2244_v34, %v2242_v2  ;;  %v2171_v31 = vrot.slane %v9828_v50, 1  ;;  %v2173_v3 = vrot.slane %v2062_v42, 1  ;;  %v2233_v16 = vrot.slane %v9666_v61, 2 }
 0x28c   : > { %v9862_v1 = vsel %vm663_vm1, %v2250_v52, %v2251_v37  ;;  %v9865_v55 = vsel %vm663_vm1, %v2251_v37, %v2253_v46  ;;  %v1634_v14 = vsel %vm1604_vm4, %v9792_v35, %v6427_v33  ;;  %v9891_v61 = vpack.i.bf16 %v2244_v34, %v2242_v2  ;;  %v13235_v35 = vld [vmem:[#allocation63_spill] sm:$0xff] }
 0x28d   : > { %5958 = vmatmul.msk.bf16.vlgmr.msra.gmra.mxu3 %vm370_vm10, %v3172_v13  ;;  %v1925_v54 = vpop.f32.mrf.mxu0  ;;  %v9868_v28 = vsel %vm582_vm0, %v2170_v63, %v2171_v31  ;;  %v9872_v59 = vsel %vm582_vm0, %v2171_v31, %v2173_v3  ;;  %v9889_v6 = vpack.i.bf16 %v9865_v55, %v9862_v1  ;;  %v6667_v13 = vunpack.i.h.bf16 %v13235_v35 }
 0x28e   : > { %v1926_v40 = vadd.f32 %v9423_v23, %v1925_v54  ;;  %13231 = vst [vmem:[#allocation20_spill] sm:$0xff] %v9868_v28  ;;  %v9882_v43 = vpack.i.bf16 %v9872_v59, %v9868_v28  ;;  %v6666_v15 = vunpack.i.l.bf16 %v13235_v35  ;;  %v9898_v42 = vpack.i.bf16 %v2249_v36, %v2247_v47  ;;  %6874 = vrot.lane.b32.xlu2 %v9891_v61, %s7992_s12 }
 0x28f   : > { %13232 = vst [vmem:[#allocation31_spill] sm:$0xff] %v9872_v59  ;;  %v2234_v25 = vsel %vm663_vm1, %v2231_v10, %v2233_v16  ;;  %v1666_v2 = vsel %vm1637_vm6, %v1633_v0, %v6506_v11  ;;  %v1667_v34 = vsel %vm1637_vm6, %v1634_v14, %v6507_v18  ;;  %v6827_v49 = vunpack.i.h.bf16 %v6825_v17 }
 0x290   : > { %v1992_v7 = vmax.f32 %v1926_v40, 0.0  ;;  %6854 = vrot.lane.b32.xlu0 %v9882_v43, %s7990_s26  ;;  %v6826_v33 = vunpack.i.l.bf16 %v6825_v17  ;;  %v1699_v32 = vsel %vm1670_vm8, %v1666_v2, %v6586_v9  ;;  %v1700_v46 = vsel %vm1670_vm8, %v1667_v34, %v6587_v58  ;;  %v13237_v9 = vld [vmem:[#allocation35_spill] sm:$0xff] }
 0x291   : > { %v1733_v54 = vsel %vm1703_vm7, %v1700_v46, %v6667_v13  ;;  %v3175_v0 = vpack.c.bf16 %v2249_v36, %v2247_v47  ;;  %v6863_v52 = vpack.i.bf16 %v2234_v25, %v2232_v38  ;;  %v9912_v63 = vld [vmem:[#allocation2 + $0x78] sm:$0xff]  ;;  %v6271_v47 = vunpack.i.l.bf16 %v13236_v62  ;;  %v7827_v13 = vld [vmem:[%s8103_s29 + $0x170] sm:$0xff]  ;;  %v7828_v2 = vld [vmem:[%s8103_s29 + $0x168] sm:$0xff]  ;;  %s6134_s29 = sshll.u32 %s8071_s17, 6 }
 0x292   : > { %2025 = vst.msk [vmem:[#allocation2 + $0x81] sm:$0xff] %vm370_vm10, %v1992_v7  ;;  %v1766_v40 = vsel %vm1736_vm9, %v1733_v54, %v6747_v26  ;;  %v6272_v7 = vunpack.i.h.bf16 %v13236_v62  ;;  %v2175_v36 = vrot.slane %v9912_v63, 1  ;;  %v6351_v17 = vunpack.i.l.bf16 %v13237_v9 }
 0x293   : > { %v1798_v16 = vsel %vm370_vm10, %v1766_v40, %v6827_v49  ;;  %v1569_v34 = vsel %vm1538_vm3, %v7828_v2, %v6271_v47  ;;  %v6352_v49 = vunpack.i.h.bf16 %v13237_v9 }
 0x294   : > { %v1602_v54 = vsel %vm1571_vm5, %v1569_v34, %v6351_v17 }
 0x295   : > { %v1928_v37 = vpop.f32.mrf.mxu0 }
 0x296   : > { %v1929_v57 = vadd.f32 %v9423_v23, %v1928_v37 }
 0x298   : > { %5883 = vmatmul.msk.bf16.gmra.mxu0 %vm1841_vm11, %v1814_v27  ;;  %v1732_v27 = vsel %vm1703_vm7, %v1699_v32, %v6666_v15  ;;  %v1993_v3 = vmax.f32 %v1929_v57, 0.0  ;;  %6864 = vrot.lane.b32.xlu0 %v6863_v52, %s7992_s12  ;;  %v1570_v15 = vsel %vm1538_vm3, %v7827_v13, %v6272_v7  ;;  %v2236_v57 = vrot.slane %v9599_v12, 2 }
 0x299   : > { %v1765_v31 = vsel %vm1736_vm9, %v1732_v27, %v6746_v22  ;;  %v9919_v14 = vld [vmem:[#allocation2 + $0x80] sm:$0xff]  ;;  %v2065_v39 = vld [vmem:[#allocation2 + $0x88] sm:$0x3]  ;;  %v2255_v22 = vrot.slane %v9912_v63, 2  ;;  %v2238_v27 = vrot.slane %v9601_v20, 2 }
 0x29a   : > { %v1797_v10 = vsel %vm370_vm10, %v1765_v31, %v6826_v33  ;;  %2026 = vst.msk [vmem:[#allocation2 + $0x91] sm:$0xff] %vm370_vm10, %v1993_v3  ;;  %v2256_v18 = vrot.slane %v9919_v14, 2  ;;  %v2258_v11 = vrot.slane %v2065_v39, 2  ;;  %v2176_v44 = vrot.slane %v9919_v14, 1  ;;  %v13241_v3 = vld [vmem:[#allocation49_spill] sm:$0xff] }
 0x29b   : > { %v2178_v58 = vrot.slane %v2065_v39, 1  ;;  %v1815_v35 = vpack.c.bf16 %v1798_v16, %v1797_v10  ;;  %v6512_v62 = vunpack.i.h.bf16 %v13241_v3  ;;  %v6511_v7 = vunpack.i.l.bf16 %v13241_v3  ;;  %v13242_v39 = vld [vmem:[#allocation55_spill] sm:$0xff] }
 0x29c   : > { %v9933_v38 = vsel %vm582_vm0, %v2175_v36, %v2176_v44  ;;  %v9948_v32 = vsel %vm663_vm1, %v2255_v22, %v2256_v18  ;;  %v9951_v46 = vsel %vm663_vm1, %v2256_v18, %v2258_v11  ;;  %v2235_v10 = vrot.slane %v9582_v48, 2  ;;  %v6830_v36 = vpop.permute.xlu1 %6829  ;;  %v13243_v11 = vld [vmem:[#allocation62_spill] sm:$0xff] }
 0x29d   : > { %5959 = vmatmul.msk.bf16.gmra.mxu3 %vm370_vm10, %v3175_v0  ;;  %v1930_v26 = vpop.f32.mrf.mxu0  ;;  %13238 = vst [vmem:[#allocation11_spill] sm:$0xff] %v9933_v38  ;;  %v9936_v25 = vsel %vm582_vm0, %v2176_v44, %v2178_v58  ;;  %v13240_v0 = vld [vmem:[#allocation38_spill] sm:$0xff]  ;;  %v1603_v16 = vsel %vm1571_vm5, %v1570_v15, %v6352_v49  ;;  %v6592_v20 = vunpack.i.h.bf16 %v13242_v39  ;;  %v6591_v47 = vunpack.i.l.bf16 %v13242_v39 }
 0x29e   : > { %13239 = vst [vmem:[#allocation19_spill] sm:$0xff] %v9936_v25  ;;  %v1931_v33 = vadd.f32 %v9423_v23, %v1930_v26  ;;  %v9944_v37 = vpack.i.bf16 %v9936_v25, %v9933_v38  ;;  %v6432_v52 = vunpack.i.h.bf16 %v13240_v0  ;;  %v6431_v31 = vunpack.i.l.bf16 %v13240_v0 }
 0x29f   : > { %v9969_v18 = vpack.i.bf16 %v9951_v46, %v9948_v32  ;;  %v6672_v44 = vunpack.i.h.bf16 %v13243_v11  ;;  %v6671_v58 = vunpack.i.l.bf16 %v13243_v11  ;;  %v2237_v9 = vsel %vm663_vm1, %v2235_v10, %v2236_v57 }
 0x2a0   : > { %v1994_v40 = vmax.f32 %v1931_v33, 0.0  ;;  %6859 = vrot.lane.b32.xlu1 %v9944_v37, %s7990_s26  ;;  %6879 = vrot.lane.b32.xlu0 %v9898_v42, %s7992_s12  ;;  %v2239_v17 = vsel %vm663_vm1, %v2236_v57, %v2238_v27  ;;  %v1636_v13 = vsel %vm1604_vm4, %v1603_v16, %v6432_v52  ;;  %v6752_v15 = vunpack.i.h.bf16 %v9105_v30 }
 0x2a1   : > { %v6751_v26 = vunpack.i.l.bf16 %v9105_v30  ;;  %v1669_v2 = vsel %vm1637_vm6, %v1636_v13, %v6512_v62  ;;  %v6832_v34 = vunpack.i.h.bf16 %v6830_v36  ;;  %v6831_v49 = vunpack.i.l.bf16 %v6830_v36 }
 0x2a2   : > { %2027 = vst.msk [vmem:[#allocation2 + $0x99] sm:$0xff] %vm370_vm10, %v1994_v40  ;;  %v1702_v40 = vsel %vm1670_vm8, %v1669_v2, %v6592_v20  ;;  %v9986_v27 = vpack.i.bf16 %v2239_v17, %v2237_v9  ;;  %v3178_v30 = vpack.c.bf16 %v9865_v55, %v9862_v1 }
 0x2a3   : > { %v1735_v52 = vsel %vm1703_vm7, %v1702_v40, %v6672_v44 }
 0x2a4   : > { %v1768_v62 = vsel %vm1736_vm9, %v1735_v52, %v6752_v15 }
 0x2a5   : > { %v1933_v33 = vpop.f32.mrf.mxu0  ;;  %v1800_v16 = vsel %vm370_vm10, %v1768_v62, %v6832_v34 }
 0x2a6   : > { %v1934_v57 = vadd.f32 %v9423_v23, %v1933_v33 }
 0x2a8   : > { %5884 = vmatmul.msk.bf16.gmra.mxu0 %vm1841_vm11, %v1815_v35  ;;  %v1635_v35 = vsel %vm1604_vm4, %v1602_v54, %v6431_v31  ;;  %v9992_v31 = vld [vmem:[#allocation2 + $0x90] sm:$0xff]  ;;  %6869 = vrot.lane.b32.xlu1 %v9986_v27, %s7992_s12 }
 0x2a9   : > { %v1668_v22 = vsel %vm1637_vm6, %v1635_v35, %v6511_v7  ;;  %v1995_v7 = vmax.f32 %v1934_v57, 0.0  ;;  %v10000_v39 = vld [vmem:[#allocation2 + $0x98] sm:$0xff]  ;;  %v2068_v20 = vld [vmem:[#allocation2 + $0xa0] sm:$0x3]  ;;  %v2180_v1 = vrot.slane %v9992_v31, 1  ;;  %v2260_v13 = vrot.slane %v9992_v31, 2 }
 0x2aa   : > { %v1701_v0 = vsel %vm1670_vm8, %v1668_v22, %v6591_v47  ;;  %v2181_v55 = vrot.slane %v10000_v39, 1  ;;  %v2183_v47 = vrot.slane %v2068_v20, 1  ;;  %v2261_v36 = vrot.slane %v10000_v39, 2 }
 0x2ab   : > { %v1734_v54 = vsel %vm1703_vm7, %v1701_v0, %v6671_v58  ;;  %2028 = vst.msk [vmem:[#allocation2 + $0xa9] sm:$0xff] %vm370_vm10, %v1995_v7  ;;  %v2263_v11 = vrot.slane %v2068_v20, 2  ;;  %v3181_v0 = vpack.c.bf16 %v9951_v46, %v9948_v32  ;;  %v6918_v20 = vpack.i.bf16 %v9801_v24, %v9797_v56 }
 0x2ac   : > { %v1767_v3 = vsel %vm1736_vm9, %v1734_v54, %v6751_v26  ;;  %v10008_v44 = vsel %vm582_vm0, %v2180_v1, %v2181_v55  ;;  %v10011_v58 = vsel %vm582_vm0, %v2181_v55, %v2183_v47  ;;  %v2262_v26 = vsel %vm663_vm1, %v2260_v13, %v2261_v36 }
 0x2ad   : > { %v1799_v10 = vsel %vm370_vm10, %v1767_v3, %v6831_v49  ;;  %5960 = vmatmul.msk.bf16.gmra.mxu3 %vm370_vm10, %v3178_v30  ;;  %13244 = vst [vmem:[#allocation23_spill] sm:$0xff] %v10008_v44  ;;  %v1935_v17 = vpop.f32.mrf.mxu0  ;;  %v10015_v35 = vpack.i.bf16 %v10011_v58, %v10008_v44  ;;  %v2264_v22 = vsel %vm663_vm1, %v2261_v36, %v2263_v11  ;;  %v10065_v36 = vld [vmem:[%s13188_s2] ss:$0 sm:$0xff] }
 0x2ae   : > { %13245 = vst [vmem:[#allocation30_spill] sm:$0xff] %v10011_v58  ;;  %v1816_v9 = vpack.c.bf16 %v1800_v16, %v1799_v10  ;;  %v1936_v15 = vadd.f32 %v9423_v23, %v1935_v17  ;;  %v10027_v34 = vpack.i.bf16 %v2264_v22, %v2262_v26  ;;  %v10080_v17 = vpack.i.bf16 %v9919_v14, %v9912_v63 }
 0x2af   : > { %6889 = vrot.lane.b32.xlu2 %v10015_v35, %s7990_s26  ;;  %v6913_v13 = vpack.i.bf16 %v9599_v12, %v9582_v48 }
 0x2b0   : > { %v1996_v2 = vmax.f32 %v1936_v15, 0.0  ;;  %6884 = vrot.lane.b32.xlu1 %v9889_v6, %s7992_s12 }
 0x2b2   : > { %2029 = vst.msk [vmem:[#allocation2 + $0xb1] sm:$0xff] %vm370_vm10, %v1996_v2  ;;  %v10034_v40 = vld [vmem:[#allocation2 + $0xa8] sm:$0xff]  ;;  %v3184_v2 = vpack.c.bf16 %v2264_v22, %v2262_v26 }
 0x2b3   : > { %v2265_v30 = vrot.slane %v10034_v40, 2 }
 0x2b5   : > { %v1938_v49 = vpop.f32.mrf.mxu0 }
 0x2b6   : > { %v1939_v33 = vadd.f32 %v9423_v23, %v1938_v49  ;;  %v2185_v23 = vrot.slane %v10034_v40, 1 }
 0x2b7   : > { %6894 = vrot.lane.b32.xlu2 %v9969_v18, %s7992_s12 }
 0x2b8   : > { %5885 = vmatmul.msk.bf16.gmra.mxu0 %vm1841_vm11, %v1816_v9  ;;  %v1997_v57 = vmax.f32 %v1939_v33, 0.0 }
 0x2b9   : > { %v10036_v54 = vld [vmem:[#allocation2 + $0xb0] sm:$0xff]  ;;  %v2071_v52 = vld [vmem:[#allocation2 + $0xb8] sm:$0x3] }
 0x2ba   : > { %2030 = vst.msk [vmem:[#allocation2 + $0xc1] sm:$0xff] %vm370_vm10, %v1997_v57  ;;  %v2266_v3 = vrot.slane %v10036_v54, 2  ;;  %v2268_v62 = vrot.slane %v2071_v52, 2  ;;  %v2186_v32 = vrot.slane %v10036_v54, 1  ;;  %v2188_v46 = vrot.slane %v2071_v52, 1 }
 0x2bc   : > { %v10045_v7 = vsel %vm663_vm1, %v2265_v30, %v2266_v3  ;;  %v10048_v10 = vsel %vm663_vm1, %v2266_v3, %v2268_v62  ;;  %v10057_v55 = vsel %vm582_vm0, %v2185_v23, %v2186_v32  ;;  %v10060_v47 = vsel %vm582_vm0, %v2186_v32, %v2188_v46 }
 0x2bd   : > { %5961 = vmatmul.msk.bf16.gmra.mxu3 %vm370_vm10, %v3181_v0  ;;  %v1940_v16 = vpop.f32.mrf.mxu0  ;;  %v10054_v1 = vpack.i.bf16 %v10048_v10, %v10045_v7  ;;  %13246 = vst [vmem:[#allocation58_spill] sm:$0xff] %v10057_v55  ;;  %v10070_v56 = vpack.i.bf16 %v10060_v47, %v10057_v55 }
 0x2be   : > { %13247 = vst [vmem:[#allocation65_spill] sm:$0xff] %v10060_v47  ;;  %v1941_v11 = vadd.f32 %v10065_v36, %v1940_v16  ;;  %v6098_v47 = vld [vmem:[%s12854_s3 + $0x10] sm:$0xff] }
 0x2bf   : > { %6919 = vrot.lane.b32.xlu2 %v6918_v20, %s7993_s21  ;;  %6909 = vrot.lane.b32.xlu1 %v10054_v1, %s7992_s12  ;;  %v6923_v20 = vpack.i.bf16 %v9811_v21, %v9807_v8  ;;  %v10125_v8 = vpack.i.bf16 %v10000_v39, %v9992_v31 }
 0x2c0   : > { %v1998_v24 = vmax.f32 %v1941_v11, 0.0  ;;  %6899 = vrot.lane.b32.xlu0 %v10070_v56, %s7990_s26 }
 0x2c1   : > { %v2072_v49 = vld [vmem:[#allocation2 + $0xc0] sm:$0xff] }
 0x2c2   : > { %2031 = vst.msk [vmem:[#allocation2 + $0xc9] sm:$0xff] %vm370_vm10, %v1998_v24  ;;  %v2270_v63 = vrot.slane %v2072_v49, 2  ;;  %v2190_v12 = vrot.slane %v2072_v49, 1 }
 0x2c5   : > { %v1943_v9 = vpop.f32.mrf.mxu0 }
 0x2c6   : > { %v1944_v15 = vadd.f32 %v10065_v36, %v1943_v9 }
 0x2c7   : > { %6939 = vrot.lane.b32.xlu2 %v10080_v17, %s7993_s21  ;;  %6914 = vrot.lane.b32.xlu1 %v6913_v13, %s7993_s21 }
 0x2c8   : > { %v1999_v33 = vmax.f32 %v1944_v15, 0.0  ;;  %6904 = vrot.lane.b32.xlu0 %v10027_v34, %s7992_s12  ;;  %v6933_v15 = vpack.i.bf16 %v9828_v50, %v9832_v41 }
 0x2c9   : > { %v2073_v0 = vld [vmem:[#allocation2 + $0xc8] sm:$0xff]  ;;  %v2074_v57 = vld [vmem:[#allocation2 + $0xd0] sm:$0x3] }
 0x2ca   : > { %2032 = vst.msk [vmem:[#allocation2 + $0xd9] sm:$0xff] %vm370_vm10, %v1999_v33  ;;  %v2271_v14 = vrot.slane %v2073_v0, 2  ;;  %v2273_v48 = vrot.slane %v2074_v57, 2  ;;  %v2191_v26 = vrot.slane %v2073_v0, 1  ;;  %v2193_v22 = vrot.slane %v2074_v57, 1 }
 0x2cb   : > { %v10118_v9 = vpack.i.bf16 %v2073_v0, %v2072_v49  ;;  %v3187_v33 = vpack.c.bf16 %v10048_v10, %v10045_v7 }
 0x2cc   : > { %v10093_v52 = vsel %vm663_vm1, %v2270_v63, %v2271_v14  ;;  %v2274_v30 = vsel %vm663_vm1, %v2271_v14, %v2273_v48  ;;  %v10100_v23 = vsel %vm582_vm0, %v2190_v12, %v2191_v26  ;;  %v10103_v32 = vsel %vm582_vm0, %v2191_v26, %v2193_v22 }
 0x2cd   : > { %5962 = vmatmul.msk.bf16.gmra.mxu3 %vm370_vm10, %v3184_v2  ;;  %v1945_v3 = vpop.f32.mrf.mxu0  ;;  %v10097_v62 = vpack.i.bf16 %v2274_v30, %v10093_v52  ;;  %13248 = vst [vmem:[#allocation10_spill] sm:$0xff] %v10100_v23  ;;  %v10108_v16 = vpack.i.bf16 %v10103_v32, %v10100_v23 }
 0x2ce   : > { %13249 = vst [vmem:[#allocation29_spill] sm:$0xff] %v10103_v32  ;;  %v1946_v46 = vadd.f32 %v10065_v36, %v1945_v3 }
 0x2cf   : > { %6954 = vrot.lane.b32.xlu2 %v10097_v62, %s7992_s12  ;;  %6929 = vrot.lane.b32.xlu1 %v10108_v16, %s7990_s26 }
 0x2d0   : > { %v2000_v11 = vmax.f32 %v1946_v46, 0.0  ;;  %6924 = vrot.lane.b32.xlu0 %v6923_v20, %s7993_s21  ;;  %v10161_v20 = vpack.i.bf16 %v10036_v54, %v10034_v40  ;;  %v3190_v40 = vpack.c.bf16 %v2274_v30, %v10093_v52 }
 0x2d1   : > { %v10127_v2 = vld [vmem:[#allocation2 + $0xd8] sm:$0xff] }
 0x2d2   : > { %2033 = vst.msk [vmem:[#allocation2 + $0xe1] sm:$0xff] %vm370_vm10, %v2000_v11  ;;  %v2195_v41 = vrot.slane %v10127_v2, 1  ;;  %v2275_v31 = vrot.slane %v10127_v2, 2 }
 0x2d5   : > { %v1948_v24 = vpop.f32.mrf.mxu0 }
 0x2d6   : > { %v1949_v13 = vadd.f32 %v10065_v36, %v1948_v24 }
 0x2d7   : > { %6959 = vrot.lane.b32.xlu2 %v10118_v9, %s7993_s21  ;;  %6934 = vrot.lane.b32.xlu1 %v6933_v15, %s7993_s21 }
 0x2d8   : > { %v2001_v57 = vmax.f32 %v1949_v13, 0.0  ;;  %6944 = vrot.lane.b32.xlu0 %v10125_v8, %s7993_s21 }
 0x2d9   : > { %v10136_v49 = vld [vmem:[#allocation2 + $0xe0] sm:$0xff]  ;;  %v2077_v50 = vld [vmem:[#allocation2 + $0xe8] sm:$0x3] }
 0x2da   : > { %2034 = vst.msk [vmem:[#allocation2 + $0xf1] sm:$0xff] %vm370_vm10, %v2001_v57  ;;  %v2196_v39 = vrot.slane %v10136_v49, 1  ;;  %v2198_v7 = vrot.slane %v2077_v50, 1  ;;  %v2276_v10 = vrot.slane %v10136_v49, 2  ;;  %v2278_v0 = vrot.slane %v2077_v50, 2 }
 0x2db   : > { %v10173_v15 = vpack.i.bf16 %v10136_v49, %v10127_v2 }
 0x2dc   : > { %v10145_v63 = vsel %vm582_vm0, %v2195_v41, %v2196_v39  ;;  %v10148_v14 = vsel %vm582_vm0, %v2196_v39, %v2198_v7  ;;  %v2277_v48 = vsel %vm663_vm1, %v2275_v31, %v2276_v10  ;;  %v2279_v12 = vsel %vm663_vm1, %v2276_v10, %v2278_v0  ;;  %v10195_v7 = vpop.permute.xlu2 %6834 }
 0x2dd   : > { %5963 = vmatmul.msk.bf16.gmra.mxu3 %vm370_vm10, %v3187_v33  ;;  %13250 = vst [vmem:[#allocation34_spill] sm:$0xff] %v10145_v63  ;;  %v1950_v26 = vpop.f32.mrf.mxu0  ;;  %v10154_v22 = vpack.i.bf16 %v10148_v14, %v10145_v63  ;;  %v10156_v3 = vpack.i.bf16 %v2279_v12, %v2277_v48 }
 0x2de   : > { %13251 = vst [vmem:[#allocation46_spill] sm:$0xff] %v10148_v14  ;;  %v1951_v46 = vadd.f32 %v10065_v36, %v1950_v26 }
 0x2df   : > { %6964 = vrot.lane.b32.xlu2 %v10154_v22, %s7990_s26  ;;  %6949 = vrot.lane.b32.xlu1 %v10161_v20, %s7993_s21 }
 0x2e0   : > { %v2002_v11 = vmax.f32 %v1951_v46, 0.0  ;;  %6969 = vrot.lane.b32.xlu0 %v10156_v3, %s7992_s12 }
 0x2e1   : > { %v10180_v33 = vld [vmem:[#allocation2 + $0xf0] sm:$0xff] }
 0x2e2   : > { %2035 = vst.msk [vmem:[#allocation2 + $0xf9] sm:$0xff] %vm370_vm10, %v2002_v11  ;;  %v2200_v30 = vrot.slane %v10180_v33, 1  ;;  %v2280_v0 = vrot.slane %v10180_v33, 2 }
 0x2e5   : > { %v1953_v24 = vpop.f32.mrf.mxu0 }
 0x2e6   : > { %v1954_v13 = vadd.f32 %v10065_v36, %v1953_v24 }
 0x2e7   : > { %6979 = vrot.lane.b32.xlu2 %v9986_v27, %s7990_s26 }
 0x2e8   : > { %v2003_v54 = vmax.f32 %v1954_v13, 0.0  ;;  %6974 = vrot.lane.b32.xlu0 %v10173_v15, %s7993_s21 }
 0x2e9   : > { %v10182_v57 = vld [vmem:[#allocation2 + $0xf8] sm:$0xff]  ;;  %v2080_v50 = vld [vmem:[#allocation2 + $0x100] sm:$0x3] }
 0x2ea   : > { %2036 = vst.msk [vmem:[#allocation2 + $0x109] sm:$0xff] %vm370_vm10, %v2003_v54  ;;  %v10187_v41 = vpack.i.bf16 %v10182_v57, %v10180_v33  ;;  %v2203_v31 = vrot.slane %v2080_v50, 1  ;;  %v2281_v27 = vrot.slane %v10182_v57, 2  ;;  %v2283_v52 = vrot.slane %v2080_v50, 2 }
 0x2eb   : > { %v2201_v39 = vrot.slane %v10182_v57, 1 }
 0x2ec   : > { %6984 = vrot.lane.b32.xlu1 %v10187_v41, %s7993_s21  ;;  %v2282_v13 = vsel %vm663_vm1, %v2280_v0, %v2281_v27 }
 0x2ed   : > { %5964 = vmatmul.msk.bf16.gmra.mxu3 %vm370_vm10, %v3190_v40  ;;  %v1955_v10 = vpop.f32.mrf.mxu0  ;;  %v10199_v26 = vsel %vm582_vm0, %v2200_v30, %v2201_v39  ;;  %v10202_v46 = vsel %vm582_vm0, %v2201_v39, %v2203_v31  ;;  %v2284_v40 = vsel %vm663_vm1, %v2281_v27, %v2283_v52  ;;  %v10221_v39 = vpop.permute.xlu2 %6849  ;;  %v3193_v27 = vpack.c.bf16 %v2279_v12, %v2277_v48 }
 0x2ee   : > { %13252 = vst [vmem:[#allocation52_spill] sm:$0xff] %v10199_v26  ;;  %v1956_v11 = vadd.f32 %v10065_v36, %v1955_v10  ;;  %v10207_v24 = vpack.i.bf16 %v10202_v46, %v10199_v26  ;;  %v10216_v50 = vpack.i.bf16 %v2284_v40, %v2282_v13 }
 0x2ef   : > { %13253 = vst [vmem:[#allocation57_spill] sm:$0xff] %v10202_v46  ;;  %7009 = vrot.lane.b32.xlu2 %v9889_v6, %s7990_s26 }
 0x2f0   : > { %13254 = vst [vmem:[#allocation12_spill] sm:$0xff] %v10207_v24  ;;  %v2004_v54 = vmax.f32 %v1956_v11, 0.0  ;;  %6989 = vrot.lane.b32.xlu0 %v10207_v24, %s7990_s26 }
 0x2f1   : > { %v10225_v6 = vld [vmem:[#allocation2 + $0x108] sm:$0xff] }
 0x2f2   : > { %2037 = vst.msk [vmem:[#allocation2 + $0x111] sm:$0xff] %vm370_vm10, %v2004_v54  ;;  %v2205_v14 = vrot.slane %v10225_v6, 1 }
 0x2f4   : > { %6999 = vrot.lane.b32.xlu1 %v10216_v50, %s7992_s12 }
 0x2f5   : > { %v1958_v31 = vpop.f32.mrf.mxu0 }
 0x2f6   : > { %v1959_v30 = vadd.f32 %v10065_v36, %v1958_v31  ;;  %v2285_v31 = vrot.slane %v10225_v6, 2 }
 0x2f8   : > { %v2005_v52 = vmax.f32 %v1959_v30, 0.0  ;;  %6994 = vrot.lane.b32.xlu0 %v9891_v61, %s7990_s26 }
 0x2f9   : > { %v10227_v10 = vld [vmem:[#allocation2 + $0x110] sm:$0xff]  ;;  %v2083_v0 = vld [vmem:[#allocation2 + $0x118] sm:$0x3] }
 0x2fa   : > { %2038 = vst.msk [vmem:[#allocation2 + $0x121] sm:$0xff] %vm370_vm10, %v2005_v52  ;;  %v10232_v11 = vpack.i.bf16 %v10227_v10, %v10225_v6  ;;  %v2286_v54 = vrot.slane %v10227_v10, 2  ;;  %v2288_v48 = vrot.slane %v2083_v0, 2  ;;  %v2208_v12 = vrot.slane %v2083_v0, 1 }
 0x2fb   : > { %v2206_v63 = vrot.slane %v10227_v10, 1 }
 0x2fc   : > { %7019 = vrot.lane.b32.xlu2 %v10232_v11, %s7993_s21  ;;  %7004 = vrot.lane.b32.xlu1 %v9898_v42, %s7990_s26  ;;  %v10243_v52 = vsel %vm663_vm1, %v2285_v31, %v2286_v54  ;;  %v10250_v42 = vpop.permute.xlu2 %6874 }
 0x2fd   : > { %5965 = vmatmul.msk.bf16.gmra.mxu3 %vm370_vm10, %v3193_v27  ;;  %v1960_v61 = vpop.f32.mrf.mxu0  ;;  %v2289_v27 = vsel %vm663_vm1, %v2286_v54, %v2288_v48  ;;  %v10253_v0 = vsel %vm582_vm0, %v2205_v14, %v2206_v63 }
 0x2fe   : > { %v1961_v30 = vadd.f32 %v10065_v36, %v1960_v61  ;;  %13255 = vst [vmem:[#allocation17_spill] sm:$0xff] %v10253_v0  ;;  %v10256_v61 = vsel %vm582_vm0, %v2206_v63, %v2208_v12  ;;  %v10260_v54 = vpack.i.bf16 %v2289_v27, %v10243_v52  ;;  %v3196_v63 = vpack.c.bf16 %v2284_v40, %v2282_v13 }
 0x2ff   : > { %13256 = vst [vmem:[#allocation40_spill] sm:$0xff] %v10256_v61  ;;  %v10264_v48 = vpack.i.bf16 %v10256_v61, %v10253_v0  ;;  %v10292_v0 = vpop.permute.xlu0 %6839 }
 0x300   : > { %v2006_v23 = vmax.f32 %v1961_v30, 0.0  ;;  %7014 = vrot.lane.b32.xlu0 %v9969_v18, %s7990_s26 }
 0x301   : > { %13257 = vst [vmem:[#allocation45_spill] sm:$0xff] %v10264_v48 }
 0x302   : > { %2039 = vst.msk [vmem:[#allocation2 + $0x129] sm:$0xff] %vm370_vm10, %v2006_v23  ;;  %v10273_v23 = vld [vmem:[#allocation2 + $0x120] sm:$0xff] }
 0x303   : > { %v2290_v58 = vrot.slane %v10273_v23, 2 }
 0x304   : > { %7034 = vrot.lane.b32.xlu2 %v10260_v54, %s7992_s12  ;;  %7024 = vrot.lane.b32.xlu1 %v10264_v48, %s7990_s26 }
 0x305   : > { %v1963_v18 = vpop.f32.mrf.mxu0 }
 0x306   : > { %v1964_v14 = vadd.f32 %v10065_v36, %v1963_v18  ;;  %v10288_v18 = vpop.permute.xlu1 %6844 }
 0x308   : > { %v2007_v12 = vmax.f32 %v1964_v14, 0.0 }
 0x309   : > { %v10271_v31 = vpop.permute.xlu2 %6889  ;;  %v10275_v30 = vld [vmem:[#allocation2 + $0x128] sm:$0xff]  ;;  %v2086_v32 = vld [vmem:[#allocation2 + $0x130] sm:$0x3] }
 0x30a   : > { %13258 = vst [vmem:[#allocation50_spill] sm:$0xff] %v10271_v31  ;;  %v10280_v61 = vpack.i.bf16 %v10275_v30, %v10273_v23  ;;  %v2291_v13 = vrot.slane %v10275_v30, 2  ;;  %v2293_v40 = vrot.slane %v2086_v32, 2 }
 0x30b   : > { %2040 = vst.msk [vmem:[#allocation2 + $0x139] sm:$0xff] %vm370_vm10, %v2007_v12  ;;  %v2213_v12 = vrot.slane %v2086_v32, 1 }
 0x30c   : > { %7039 = vrot.lane.b32.xlu2 %v10054_v1, %s7990_s26  ;;  %7029 = vrot.lane.b32.xlu1 %v10027_v34, %s7990_s26  ;;  %v2210_v1 = vrot.slane %v10273_v23, 1  ;;  %v2211_v34 = vrot.slane %v10275_v30, 1  ;;  %v10299_v38 = vsel %vm663_vm1, %v2290_v58, %v2291_v13  ;;  %v10302_v25 = vsel %vm663_vm1, %v2291_v13, %v2293_v40  ;;  %v10329_v40 = vpop.permute.xlu0 %6854 }
 0x30d   : > { %5966 = vmatmul.msk.bf16.gmra.mxu3 %vm370_vm10, %v3196_v63  ;;  %7044 = vrot.lane.b32.xlu0 %v10280_v61, %s7993_s21  ;;  %v1965_v14 = vpop.f32.mrf.mxu0  ;;  %v10319_v58 = vpack.i.bf16 %v10302_v25, %v10299_v38 }
 0x30e   : > { %v1966_v63 = vadd.f32 %v10065_v36, %v1965_v14  ;;  %v10307_v32 = vsel %vm582_vm0, %v2210_v1, %v2211_v34  ;;  %v10310_v14 = vsel %vm582_vm0, %v2211_v34, %v2213_v12 }
 0x30f   : > { %13259 = vst [vmem:[#allocation61_spill] sm:$0xff] %v10307_v32  ;;  %v10315_v59 = vpack.i.bf16 %v10310_v14, %v10307_v32 }
 0x310   : > { %v2008_v44 = vmax.f32 %v1966_v63, 0.0  ;;  %13260 = vst [vmem:[#allocation66_spill] sm:$0xff] %v10310_v14  ;;  %v3199_v63 = vpack.c.bf16 %v2289_v27, %v10243_v52  ;;  %v6103_v52 = vld [vmem:[%s12854_s3 + $0x38] sm:$0xff] }
 0x311   : > { %v10304_v28 = vpop.permute.xlu2 %6894  ;;  %13261 = vst [vmem:[#allocation24_spill] sm:$0xff] %v10315_v59  ;;  %3414 = vmatpush.bf16.msra.mxu1 %v6103_v52 }
 0x312   : > { %2041 = vst.msk [vmem:[#allocation2 + $0x141] sm:$0xff] %vm370_vm10, %v2008_v44  ;;  %v10325_v13 = vpop.permute.xlu1 %6859  ;;  %v10335_v14 = vld [vmem:[#allocation2 + $0x138] sm:$0xff] }
 0x313   : > { %13262 = vst [vmem:[#allocation33_spill] sm:$0xff] %v10335_v14 }
 0x314   : > { %7049 = vrot.lane.b32.xlu2 %v10315_v59, %s7990_s26  ;;  %7064 = vrot.lane.b32.xlu1 %v10156_v3, %s7990_s26  ;;  %v10370_v19 = vpop.permute.xlu0 %6864 }
 0x315   : > { %7054 = vrot.lane.b32.xlu0 %v10319_v58, %s7992_s12  ;;  %v1968_v44 = vpop.f32.mrf.mxu0  ;;  %3415 = vmatpush.bf16.msra.mxu1 %v6102_v53 }
 0x316   : > { %v1969_v12 = vadd.f32 %v10065_v36, %v1968_v44 }
 0x318   : > { %v2009_v1 = vmax.f32 %v1969_v12, 0.0 }
 0x319   : > { %v10333_v34 = vpop.permute.xlu2 %6919  ;;  %v10337_v32 = vld [vmem:[#allocation2 + $0x140] sm:$0xff]  ;;  %v2089_v3 = vld [vmem:[#allocation2 + $0x148] sm:$0x3] }
 0x31a   : > { %13263 = vst [vmem:[#allocation39_spill] sm:$0xff] %v10337_v32  ;;  %v10342_v60 = vpack.i.bf16 %v10337_v32, %v10335_v14  ;;  %v2296_v44 = vrot.slane %v10337_v32, 2  ;;  %v2298_v29 = vrot.slane %v2089_v3, 2  ;;  %v2218_v12 = vrot.slane %v2089_v3, 1  ;;  %v10360_v5 = vpop.permute.xlu1 %6869 }
 0x31b   : > { %2042 = vst.msk [vmem:[#allocation2 + $0x151] sm:$0xff] %vm370_vm10, %v2009_v1  ;;  %v2216_v3 = vrot.slane %v10337_v32, 1 }
 0x31c   : > { %7069 = vrot.lane.b32.xlu2 %v10216_v50, %s7990_s26  ;;  %7074 = vrot.lane.b32.xlu1 %v10342_v60, %s7993_s21  ;;  %v10366_v4 = vsel %vm663_vm1, %v2296_v44, %v2298_v29  ;;  %v10406_v55 = vpop.permute.xlu0 %6879 }
 0x31d   : > { %5967 = vmatmul.msk.bf16.gmra.mxu3 %vm370_vm10, %v3199_v63  ;;  %7059 = vrot.lane.b32.xlu0 %v10097_v62, %s7990_s26  ;;  %v1970_v27 = vpop.f32.mrf.mxu0  ;;  %v2295_v63 = vrot.slane %v10335_v14, 2  ;;  %v2215_v62 = vrot.slane %v10335_v14, 1  ;;  %v10376_v26 = vsel %vm582_vm0, %v2216_v3, %v2218_v12 }
 0x31e   : > { %v1971_v1 = vadd.f32 %v10065_v36, %v1970_v27  ;;  %13265 = vst [vmem:[#allocation54_spill] sm:$0xff] %v10376_v26 }
 0x31f   : > { %v10363_v50 = vsel %vm663_vm1, %v2295_v63, %v2296_v44  ;;  %v10373_v27 = vsel %vm582_vm0, %v2215_v62, %v2216_v3  ;;  %v6101_v63 = vld [vmem:[%s12854_s3 + $0x28] sm:$0xff]  ;;  %v6100_v62 = vld [vmem:[%s12854_s3 + $0x20] sm:$0xff]  ;;  %v3202_v3 = vpack.c.bf16 %v10302_v25, %v10299_v38 }
 0x320   : > { %v2010_v52 = vmax.f32 %v1971_v1, 0.0  ;;  %13264 = vst [vmem:[#allocation43_spill] sm:$0xff] %v10373_v27  ;;  %v7098_v44 = vpack.i.bf16 %v10366_v4, %v10363_v50  ;;  %v10388_v53 = vpack.i.bf16 %v10376_v26, %v10373_v27  ;;  %3416 = vmatpush.bf16.msra.mxu1 %v6101_v63 }
 0x321   : > { %v10382_v29 = vpop.permute.xlu2 %6939 }
 0x322   : > { %2043 = vst.msk [vmem:[#allocation2 + $0x159] sm:$0xff] %vm370_vm10, %v2010_v52  ;;  %v10400_v27 = vpop.permute.xlu1 %6884  ;;  %v10402_v26 = vld [vmem:[#allocation2 + $0x150] sm:$0xff] }
 0x323   : > { %13266 = vst [vmem:[#allocation60_spill] sm:$0xff] %v10388_v53 }
 0x324   : > { %7099 = vrot.lane.b32.xlu2 %v7098_v44, %s7990_s26  ;;  %7089 = vrot.lane.b32.xlu1 %v7098_v44, %s7992_s12  ;;  %13267 = vst [vmem:[#allocation67_spill] sm:$0xff] %v10402_v26 }
 0x325   : > { %7079 = vrot.lane.b32.xlu0 %v10388_v53, %s7990_s26  ;;  %v1973_v12 = vpop.f32.mrf.mxu0  ;;  %3417 = vmatpush.bf16.msra.mxu1 %v6100_v62 }
 0x326   : > { %v1974_v1 = vadd.f32 %v10065_v36, %v1973_v12  ;;  %v6099_v12 = vld [vmem:[%s12854_s3 + $0x18] sm:$0xff] }
 0x328   : > { %v2011_v52 = vmax.f32 %v1974_v1, 0.0 }
 0x329   : > { %v10404_v44 = vld [vmem:[#allocation2 + $0x158] sm:$0xff]  ;;  %v2092_v46 = vld [vmem:[#allocation2 + $0x160] sm:$0x3]  ;;  %v10418_v1 = vpop.permute.xlu2 %6954  ;;  %3418 = vmatpush.bf16.msra.mxu1 %v6099_v12 }
 0x32a   : > { %13268 = vst [vmem:[#allocation15_spill] sm:$0xff] %v10404_v44  ;;  %v10411_v63 = vpack.i.bf16 %v10404_v44, %v10402_v26  ;;  %v2301_v38 = vrot.slane %v10404_v44, 2  ;;  %v2303_v25 = vrot.slane %v2092_v46, 2  ;;  %v2221_v14 = vrot.slane %v10404_v44, 1  ;;  %v7830_v44 = vld [vmem:[#allocation2] sm:$0xff] }
 0x32b   : > { %2044 = vst.msk [vmem:[#allocation2 + $0x169] sm:$0xff] %vm370_vm10, %v2011_v52 }
 0x32c   : > { %13269 = vst [vmem:[#allocation32_spill] sm:$0xff] %v10418_v1  ;;  %7104 = vrot.lane.b32.xlu2 %v10411_v63, %s7993_s21  ;;  %7094 = vrot.lane.b32.xlu1 %v10319_v58, %s7990_s26  ;;  %v2220_v1 = vrot.slane %v10402_v26, 1  ;;  %v10437_v58 = vsel %vm663_vm1, %v2301_v38, %v2303_v25 }
 0x32d   : > { %5968 = vmatmul.msk.bf16.gmra.mxu3 %vm370_vm10, %v3202_v3  ;;  %7084 = vrot.lane.b32.xlu0 %v10260_v54, %s7990_s26  ;;  %v1975_v62 = vpop.f32.mrf.mxu0  ;;  %v2300_v3 = vrot.slane %v10402_v26, 2  ;;  %v2223_v54 = vrot.slane %v2092_v46, 1  ;;  %v6097_v46 = vld [vmem:[%s12854_s3 + $0x8] sm:$0xff] }
 0x32e   : > { %v1976_v52 = vadd.f32 %v10065_v36, %v1975_v62  ;;  %v10440_v12 = vsel %vm582_vm0, %v2220_v1, %v2221_v14  ;;  %3419 = vmatpush.bf16.msra.mxu1 %v6098_v47  ;;  %v6837_v47 = vunpack.i.h.bf16 %v10195_v7 }
 0x32f   : > { %v10434_v32 = vsel %vm663_vm1, %v2300_v3, %v2301_v38  ;;  %13270 = vst [vmem:[#allocation37_spill] sm:$0xff] %v10440_v12  ;;  %v10445_v31 = vsel %vm582_vm0, %v2221_v14, %v2223_v54  ;;  %v6836_v14 = vunpack.i.l.bf16 %v10195_v7  ;;  %v6867_v54 = vunpack.i.h.bf16 %v10370_v19 }
 0x330   : > { %v2012_v53 = vmax.f32 %v1976_v52, 0.0  ;;  %13272 = vst [vmem:[#allocation53_spill] sm:$0xff] %v10445_v31  ;;  %v7113_v3 = vpack.i.bf16 %v10437_v58, %v10434_v32  ;;  %v10457_v38 = vpack.i.bf16 %v10445_v31, %v10440_v12  ;;  %v6096_v52 = vld [vmem:[%s12854_s3] sm:$0xff]  ;;  %v6866_v7 = vunpack.i.l.bf16 %v10370_v19 }
 0x331   : > { %v10442_v62 = vpop.permute.xlu1 %6909  ;;  %v10465_v25 = vpop.permute.xlu2 %6959  ;;  %v3205_v31 = vpack.c.bf16 %v10366_v4, %v10363_v50  ;;  %v10486_v50 = vld [vmem:[#allocation2 + $0x48] sm:$0xff] }
 0x332   : > { %13271 = vst [vmem:[#allocation48_spill] sm:$0xff] %v10442_v62  ;;  %v10448_v26 = vpop.permute.xlu0 %6899  ;;  %3420 = vmatpush.bf16.msra.mxu1 %v6097_v46  ;;  %v7831_v62 = vld [vmem:[#allocation2 + $0x8] sm:$0xff] }
 0x333   : > { %2045 = vst.msk [vmem:[#allocation2 + $0x171] sm:$0xff] %vm370_vm10, %v2012_v53 }
 0x334   : > { %13273 = vst [vmem:[#allocation59_spill] sm:$0xff] %v10448_v26  ;;  %7114 = vrot.lane.b32.xlu2 %v7113_v3, %s7992_s12  ;;  %7109 = vrot.lane.b32.xlu1 %v10457_v38, %s7990_s26  ;;  %v10479_v26 = vld [vmem:[#allocation2 + $0x168] sm:$0xff] }
 0x335   : > { %13274 = vst [vmem:[#allocation25_spill] sm:$0xff] %v10457_v38  ;;  %7119 = vrot.lane.b32.xlu0 %v7113_v3, %s7990_s26  ;;  %v1978_v53 = vpop.f32.mrf.mxu0  ;;  %v2976_v3 = vsel %vm370_vm10, %v7830_v44, %v6836_v14  ;;  %v7143_v44 = vpack.i.bf16 %v9811_v21, %v10486_v50 }
 0x336   : > { %13275 = vst [vmem:[#allocation14_spill] sm:$0xff] %v10465_v25  ;;  %v1979_v1 = vadd.f32 %v10065_v36, %v1978_v53  ;;  %v2977_v25 = vsel %vm370_vm10, %v7831_v62, %v6837_v47  ;;  %v10477_v53 = vpop.f32.mrf.mxu3  ;;  %3421 = vmatpush.bf16.msra.mxu1 %v6096_v52  ;;  %v3009_v47 = vsel %vm3008_vm13, %v2976_v3, %v6866_v7  ;;  %v2225_v52 = vrot.slane %v10479_v26, 1 }
 0x337   : > { %13276 = vst [vmem:[#allocation26_spill] sm:$0xff] %v10477_v53 }
 0x338   : > { %v2013_v12 = vmax.f32 %v1979_v1, 0.0  ;;  %13277 = vst [vmem:[#allocation42_spill] sm:$0xff] %v10479_v26 }
 0x339   : > { %v6915_v46 = vpop.permute.xlu1 %6914 }
 0x33a   : > { %v10481_v38 = vld [vmem:[#allocation2 + $0x170] sm:$0xff]  ;;  %v2095_v59 = vld [vmem:[#allocation2 + $0x178] sm:$0x3]  ;;  %2046 = vst.msk [vmem:[#allocation2 + $0x181] sm:$0xff] %vm370_vm10, %v2013_v12  ;;  %v6917_v19 = vunpack.i.h.bf16 %v6915_v46  ;;  %v6916_v24 = vunpack.i.l.bf16 %v6915_v46  ;;  %v10484_v4 = vpop.permute.xlu0 %6904  ;;  %v3010_v12 = vsel %vm3008_vm13, %v2977_v25, %v6867_v54  ;;  %v2305_v54 = vrot.slane %v10479_v26, 2 }
 0x33b   : > { %13278 = vst [vmem:[#allocation47_spill] sm:$0xff] %v10481_v38  ;;  %v10493_v62 = vpack.i.bf16 %v10481_v38, %v10479_v26  ;;  %v2306_v14 = vrot.slane %v10481_v38, 2  ;;  %v2308_v1 = vrot.slane %v2095_v59, 2  ;;  %v2226_v46 = vrot.slane %v10481_v38, 1 }
 0x33c   : > { %13279 = vst [vmem:[#allocation51_spill] sm:$0xff] %v10484_v4  ;;  %7144 = vrot.lane.b32.xlu1 %v7143_v44, %s7992_s12  ;;  %v3042_v53 = vsel %vm3041_vm14, %v3009_v47, %v6916_v24  ;;  %v3043_v7 = vsel %vm3041_vm14, %v3010_v12, %v6917_v19  ;;  %v10513_v44 = vpop.permute.xlu2 %6964  ;;  %v6841_v19 = vunpack.i.l.bf16 %v10292_v0  ;;  %v6842_v47 = vunpack.i.h.bf16 %v10292_v0 }
 0x33d   : > { %5969 = vmatmul.msk.bf16.gmra.mxu3 %vm370_vm10, %v3205_v31  ;;  %7124 = vrot.lane.b32.xlu0 %v10493_v62, %s7993_s21  ;;  %v1980_v21 = vpop.f32.mrf.mxu0  ;;  %v2228_v31 = vrot.slane %v2095_v59, 1  ;;  %v10508_v3 = vsel %vm582_vm0, %v2225_v52, %v2226_v46  ;;  %v3170_v4 = vpack.c.bf16 %v3043_v7, %v3042_v53  ;;  %v10516_v59 = vsel %vm663_vm1, %v2305_v54, %v2306_v14  ;;  %v7834_v7 = vld [vmem:[#allocation2 + $0x20] sm:$0xff]  ;;  %v10548_v54 = vld [vmem:[#allocation2 + $0x68] sm:$0xff] }
 0x33e   : > { %v1981_v25 = vadd.f32 %v10065_v36, %v1980_v21  ;;  %13280 = vst [vmem:[#allocation36_spill] sm:$0xff] %v10508_v3  ;;  %v10519_v24 = vsel %vm663_vm1, %v2306_v14, %v2308_v1  ;;  %v10532_v12 = vpop.f32.mrf.mxu3  ;;  %v6871_v52 = vunpack.i.l.bf16 %v10360_v5  ;;  %v6922_v0 = vunpack.i.h.bf16 %v10333_v34 }
 0x33f   : > { %v10511_v38 = vsel %vm582_vm0, %v2226_v46, %v2228_v31  ;;  %3422 = vmatmul.bf16.vlgmr.msra.gmra.mxu1 %v3170_v4  ;;  %13282 = vst [vmem:[#allocation68_spill] sm:$0xff] %v10532_v12  ;;  %v7158_v1 = vpack.i.bf16 %v10519_v24, %v10516_v59  ;;  %v6872_v4 = vunpack.i.h.bf16 %v10360_v5  ;;  %v6921_v21 = vunpack.i.l.bf16 %v10333_v34  ;;  %v10550_v5 = vld [vmem:[#allocation2 + $0x60] sm:$0xff] }
 0x340   : > { %13281 = vst [vmem:[#allocation64_spill] sm:$0xff] %v10511_v38  ;;  %v2014_v48 = vmax.f32 %v1981_v25, 0.0  ;;  %v10523_v36 = vpack.i.bf16 %v10511_v38, %v10508_v3  ;;  %v3208_v31 = vpack.c.bf16 %v10437_v58, %v10434_v32  ;;  %v2979_v25 = vsel %vm370_vm10, %v7834_v7, %v6842_v47  ;;  %v7837_v32 = vld [vmem:[#allocation2 + $0x30] sm:$0xff]  ;;  %v7838_v58 = vld [vmem:[#allocation2 + $0x38] sm:$0xff] }
 0x341   : > { %v10534_v14 = vpop.permute.xlu1 %6929  ;;  %v7138_v47 = vpack.i.bf16 %v7838_v58, %v7837_v32 }
 0x342   : > { %2047 = vst.msk [vmem:[#allocation2 + $0x189] sm:$0xff] %vm370_vm10, %v2014_v48  ;;  %7129 = vrot.lane.b32.xlu2 %v10523_v36, %s7990_s26  ;;  %v10529_v53 = vpop.permute.xlu0 %6924  ;;  %v7833_v48 = vld [vmem:[#allocation2 + $0x18] sm:$0xff] }
 0x343   : > { %13283 = vst [vmem:[#allocation41_spill] sm:$0xff] %v10534_v14  ;;  %v2978_v46 = vsel %vm370_vm10, %v7833_v48, %v6841_v19  ;;  %v3012_v19 = vsel %vm3008_vm13, %v2979_v25, %v6872_v4 }
 0x344   : > { %7159 = vrot.lane.b32.xlu1 %v7158_v1, %s7990_s26  ;;  %v3011_v38 = vsel %vm3008_vm13, %v2978_v46, %v6871_v52  ;;  %v10556_v48 = vpop.permute.xlu2 %6979  ;;  %v3045_v3 = vsel %vm3041_vm14, %v3012_v19, %v6922_v0 }
 0x345   : > { %7134 = vrot.lane.b32.xlu0 %v7158_v1, %s7992_s12  ;;  %v7148_v1 = vpack.i.bf16 %v10548_v54, %v10550_v5  ;;  %13284 = vst [vmem:[#allocation44_spill] sm:$0xff] %v10556_v48  ;;  %v3044_v7 = vsel %vm3041_vm14, %v3011_v38, %v6921_v21  ;;  %v6846_v38 = vunpack.i.l.bf16 %v10288_v18  ;;  %v6847_v21 = vunpack.i.h.bf16 %v10288_v18 }
 0x346   : > { %v10564_v12 = vpop.f32.mrf.mxu3  ;;  %v3173_v25 = vpack.c.bf16 %v3045_v3, %v3044_v7  ;;  %v6877_v7 = vunpack.i.h.bf16 %v10250_v42 }
 0x347   : > { %13285 = vst [vmem:[#allocation56_spill] sm:$0xff] %v10564_v12  ;;  %v2980_v18 = vsel %vm370_vm10, %v7837_v32, %v6846_v38  ;;  %v6966_v32 = vunpack.i.l.bf16 %v10513_v44 }
 0x349   : > { %v10566_v52 = vpop.permute.xlu1 %6934  ;;  %v2097_v4 = vld [vmem:[#allocation2 + $0x188] sm:$0xff]  ;;  %v2098_v46 = vld [vmem:[#allocation2 + $0x190] sm:$0x3] }
 0x34a   : > { %7149 = vrot.lane.b32.xlu2 %v7148_v1, %s7992_s12  ;;  %v10559_v34 = vpop.permute.xlu0 %6944  ;;  %v2351_v1 = vrot.slane %v2097_v4, 2  ;;  %v2353_v48 = vrot.slane %v2098_v46, 2  ;;  %v2314_v26 = vrot.slane %v2097_v4, 1  ;;  %v2316_v3 = vrot.slane %v2098_v46, 1 }
 0x34c   : > { %7164 = vrot.lane.b32.xlu1 %v10125_v8, %s7992_s12  ;;  %v10577_v8 = vpop.permute.xlu2 %7009  ;;  %v2354_v14 = vsel %vm663_vm1, %v2351_v1, %v2353_v48  ;;  %v3211_v48 = vpack.c.bf16 %v10519_v24, %v10516_v59 }
 0x34d   : > { %5970 = vmatmul.msk.bf16.gmra.mxu3 %vm370_vm10, %v3208_v31  ;;  %7139 = vrot.lane.b32.xlu0 %v7138_v47, %s7992_s12  ;;  %v2096_v31 = vld [vmem:[#allocation2 + $0x180] sm:$0xff] }
 0x34e   : > { %v2350_v19 = vrot.slane %v2096_v31, 2  ;;  %v10575_v12 = vpack.i.bf16 %v2097_v4, %v2096_v31  ;;  %v2313_v47 = vrot.slane %v2096_v31, 1  ;;  %v10592_v4 = vsel %vm582_vm0, %v2314_v26, %v2316_v3  ;;  %v10594_v46 = vpop.f32.mrf.mxu3 }
 0x34f   : > { %3427 = vmatmul.bf16.gmra.mxu1 %v3173_v25  ;;  %13286 = vst [vmem:[#allocation63_spill] sm:$0xff] %v10594_v46 }
 0x350   : > { %v2352_v25 = vsel %vm663_vm1, %v2350_v19, %v2351_v1  ;;  %v10589_v31 = vsel %vm582_vm0, %v2313_v47, %v2314_v26  ;;  %v6927_v1 = vunpack.i.h.bf16 %v10529_v53  ;;  %v6926_v19 = vunpack.i.l.bf16 %v10529_v53 }
 0x351   : > { %v7188_v38 = vpack.i.bf16 %v2354_v14, %v2352_v25  ;;  %v6967_v47 = vunpack.i.h.bf16 %v10513_v44 }
 0x352   : > { %7169 = vrot.lane.b32.xlu2 %v10161_v20, %s7992_s12  ;;  %v6970_v0 = vpop.permute.xlu0 %6969  ;;  %v6876_v20 = vunpack.i.l.bf16 %v10250_v42  ;;  %v2981_v42 = vsel %vm370_vm10, %v7838_v58, %v6847_v21  ;;  %v2994_v21 = vsel %vm370_vm10, %v10127_v2, %v6966_v32 }
 0x353   : > { %v6971_v26 = vunpack.i.l.bf16 %v6970_v0  ;;  %v6972_v3 = vunpack.i.h.bf16 %v6970_v0  ;;  %v3014_v24 = vsel %vm3008_vm13, %v2981_v42, %v6877_v7  ;;  %v2995_v0 = vsel %vm370_vm10, %v10136_v49, %v6967_v47 }
 0x354   : > { %7179 = vrot.lane.b32.xlu1 %v10575_v12, %s7993_s21  ;;  %v3013_v59 = vsel %vm3008_vm13, %v2980_v18, %v6876_v20  ;;  %v3047_v58 = vsel %vm3041_vm14, %v3014_v24, %v6927_v1  ;;  %v6851_v49 = vunpack.i.l.bf16 %v10221_v39  ;;  %v6936_v47 = vunpack.i.l.bf16 %v10566_v52 }
 0x355   : > { %7154 = vrot.lane.b32.xlu0 %v10080_v17, %s7992_s12  ;;  %v10600_v17 = vpop.permute.xlu1 %6949  ;;  %v3046_v53 = vsel %vm3041_vm14, %v3013_v59, %v6926_v19  ;;  %v3027_v7 = vsel %vm3008_vm13, %v2994_v21, %v6971_v26  ;;  %v3028_v18 = vsel %vm3008_vm13, %v2995_v0, %v6972_v3  ;;  %v6881_v19 = vunpack.i.l.bf16 %v10406_v55  ;;  %v7839_v59 = vld [vmem:[#allocation2 + $0x50] sm:$0xff] }
 0x356   : > { %v10615_v44 = vpop.permute.xlu2 %7019  ;;  %v3176_v20 = vpack.c.bf16 %v3047_v58, %v3046_v53  ;;  %v10625_v1 = vpop.f32.mrf.mxu3  ;;  %v3214_v26 = vpack.c.bf16 %v2354_v14, %v2352_v25  ;;  %v2982_v3 = vsel %vm370_vm10, %v10486_v50, %v6851_v49 }
 0x35a   : > { %7189 = vrot.lane.b32.xlu2 %v7188_v38, %s7990_s26  ;;  %v10606_v46 = vpop.permute.xlu0 %6974 }
 0x35c   : > { %7184 = vrot.lane.b32.xlu1 %v10173_v15, %s7992_s12  ;;  %v6852_v15 = vunpack.i.h.bf16 %v10221_v39 }
 0x35d   : > { %5971 = vmatmul.msk.bf16.gmra.mxu3 %vm370_vm10, %v3211_v48  ;;  %7174 = vrot.lane.b32.xlu0 %v10118_v9, %s7992_s12  ;;  %v6882_v9 = vunpack.i.h.bf16 %v10406_v55 }
 0x35e   : > { %v6985_v48 = vpop.permute.xlu1 %6984  ;;  %v10637_v42 = vpop.permute.xlu2 %7034 }
 0x35f   : > { %3432 = vmatmul.bf16.gmra.mxu1 %v3176_v20  ;;  %v6987_v32 = vunpack.i.h.bf16 %v6985_v48  ;;  %v6986_v38 = vunpack.i.l.bf16 %v6985_v48  ;;  %v10654_v14 = vpop.f32.mrf.mxu3  ;;  %v10669_v48 = vld [vmem:[#allocation2 + $0x1a0] sm:$0xff] }
 0x361   : > { %v10649_v24 = vsel %vm3041_vm14, %v3027_v7, %v6986_v38 }
 0x362   : > { %7194 = vrot.lane.b32.xlu2 %v10187_v41, %s7992_s12  ;;  %v6990_v2 = vpop.permute.xlu0 %6989  ;;  %v6937_v41 = vunpack.i.h.bf16 %v10566_v52  ;;  %v10652_v52 = vsel %vm3041_vm14, %v3028_v18, %v6987_v32  ;;  %v10667_v18 = vld [vmem:[#allocation2 + $0x198] sm:$0xff] }
 0x363   : > { %v3197_v53 = vpack.c.bf16 %v10652_v52, %v10649_v24  ;;  %v6991_v58 = vunpack.i.l.bf16 %v6990_v2 }
 0x364   : > { %7204 = vrot.lane.b32.xlu1 %v10280_v61, %s7992_s12  ;;  %v2983_v61 = vsel %vm370_vm10, %v7839_v59, %v6852_v15  ;;  %v7022_v15 = vunpack.i.h.bf16 %v10615_v44 }
 0x365   : > { %7199 = vrot.lane.b32.xlu0 %v10232_v11, %s7992_s12  ;;  %v3015_v11 = vsel %vm3008_vm13, %v2982_v3, %v6881_v19  ;;  %v3016_v55 = vsel %vm3008_vm13, %v2983_v61, %v6882_v9  ;;  %v7021_v19 = vunpack.i.l.bf16 %v10615_v44  ;;  %v7228_v9 = vpack.i.bf16 %v10669_v48, %v10667_v18 }
 0x366   : > { %v7000_v39 = vpop.permute.xlu1 %6999  ;;  %v3048_v50 = vsel %vm3041_vm14, %v3015_v11, %v6936_v47  ;;  %v3049_v25 = vsel %vm3041_vm14, %v3016_v55, %v6937_v41  ;;  %v6857_v41 = vunpack.i.h.bf16 %v10329_v40  ;;  %v6856_v44 = vunpack.i.l.bf16 %v10329_v40 }
 0x367   : > { %v7002_v0 = vunpack.i.h.bf16 %v7000_v39  ;;  %v7001_v7 = vunpack.i.l.bf16 %v7000_v39  ;;  %v3179_v20 = vpack.c.bf16 %v3049_v25, %v3048_v50  ;;  %v6942_v40 = vunpack.i.h.bf16 %v10382_v29 }
 0x368   : > { %v6941_v39 = vunpack.i.l.bf16 %v10382_v29  ;;  %v2984_v61 = vsel %vm370_vm10, %v10550_v5, %v6856_v44 }
 0x36a   : > { %7209 = vrot.lane.b32.xlu2 %v10342_v60, %s7992_s12  ;;  %v6992_v60 = vunpack.i.h.bf16 %v6990_v2  ;;  %v10661_v21 = vpop.permute.xlu0 %6994  ;;  %v10674_v2 = vpop.permute.xlu2 %7039 }
 0x36b   : > { %v7042_v24 = vunpack.i.h.bf16 %v10674_v2  ;;  %v7041_v52 = vunpack.i.l.bf16 %v10674_v2 }
 0x36c   : > { %7219 = vrot.lane.b32.xlu1 %v10493_v62, %s7992_s12  ;;  %v2997_v62 = vsel %vm370_vm10, %v10182_v57, %v6992_v60  ;;  %v6862_v60 = vunpack.i.h.bf16 %v10325_v13 }
 0x36d   : > { %5972 = vmatmul.msk.bf16.gmra.mxu3 %vm370_vm10, %v3214_v26  ;;  %7214 = vrot.lane.b32.xlu0 %v10411_v63, %s7992_s12  ;;  %v2996_v63 = vsel %vm370_vm10, %v10180_v33, %v6991_v58  ;;  %v3030_v38 = vsel %vm3008_vm13, %v2997_v62, %v7002_v0  ;;  %v6887_v33 = vunpack.i.h.bf16 %v10400_v27  ;;  %v6886_v26 = vunpack.i.l.bf16 %v10400_v27  ;;  %v7841_v62 = vld [vmem:[#allocation2 + $0x80] sm:$0xff] }
 0x36e   : > { %v10671_v49 = vpop.permute.xlu1 %7004  ;;  %v3029_v32 = vsel %vm3008_vm13, %v2996_v63, %v7001_v7  ;;  %v10693_v57 = vsel %vm3041_vm14, %v3030_v38, %v7022_v15  ;;  %v2985_v27 = vsel %vm370_vm10, %v10548_v54, %v6857_v41  ;;  %v6861_v58 = vunpack.i.l.bf16 %v10325_v13  ;;  %v7840_v13 = vld [vmem:[#allocation2 + $0x78] sm:$0xff] }
 0x36f   : > { %3437 = vmatmul.bf16.gmra.mxu1 %v3179_v20  ;;  %v10690_v47 = vsel %vm3041_vm14, %v3029_v32, %v7021_v19  ;;  %v3017_v11 = vsel %vm3008_vm13, %v2984_v61, %v6886_v26  ;;  %v3018_v55 = vsel %vm3008_vm13, %v2985_v27, %v6887_v33  ;;  %v6897_v7 = vunpack.i.h.bf16 %v10304_v28 }
 0x370   : > { %v3050_v50 = vsel %vm3041_vm14, %v3017_v11, %v6941_v39  ;;  %v3051_v29 = vsel %vm3041_vm14, %v3018_v55, %v6942_v40  ;;  %v2986_v19 = vsel %vm370_vm10, %v7840_v13, %v6861_v58  ;;  %v6947_v38 = vunpack.i.h.bf16 %v10559_v34  ;;  %v13289_v58 = vld [vmem:[#allocation24_spill] sm:$0xff] }
 0x371   : > { %v3182_v5 = vpack.c.bf16 %v3051_v29, %v3050_v50  ;;  %v7036_v41 = vunpack.i.l.bf16 %v10637_v42  ;;  %v13287_v50 = vld [vmem:[#allocation45_spill] sm:$0xff]  ;;  %v13288_v29 = vld [vmem:[#allocation12_spill] sm:$0xff] }
 0x372   : > { %7224 = vrot.lane.b32.xlu2 %v10575_v12, %s7992_s12  ;;  %v3200_v12 = vpack.c.bf16 %v10693_v57, %v10690_v47  ;;  %v10704_v3 = vpop.permute.xlu0 %7014  ;;  %v13292_v13 = vld [vmem:[#allocation60_spill] sm:$0xff] }
 0x374   : > { %7234 = vrot.lane.b32.xlu1 %v9825_v51, %s7993_s21  ;;  %v7050_v51 = vpop.permute.xlu2 %7049 }
 0x375   : > { %7229 = vrot.lane.b32.xlu0 %v7228_v9, %s7992_s12  ;;  %v7051_v15 = vunpack.i.l.bf16 %v7050_v51 }
 0x376   : > { %v7025_v59 = vpop.permute.xlu1 %7024 }
 0x377   : > { %v7026_v0 = vunpack.i.l.bf16 %v7025_v59 }
 0x37a   : > { %7239 = vrot.lane.b32.xlu2 %v9847_v45, %s7993_s21  ;;  %v7027_v45 = vunpack.i.h.bf16 %v7025_v59  ;;  %v3000_v59 = vsel %vm370_vm10, %v10273_v23, %v7051_v15  ;;  %v13291_v15 = vld [vmem:[#allocation25_spill] sm:$0xff] }
 0x37c   : > { %7249 = vrot.lane.b32.xlu1 %v9944_v37, %s7993_s21  ;;  %v6896_v37 = vunpack.i.l.bf16 %v10304_v28  ;;  %v10728_v20 = vpop.permute.xlu2 %7069  ;;  %v2998_v28 = vsel %vm370_vm10, %v10225_v6, %v7026_v0  ;;  %v2999_v32 = vsel %vm370_vm10, %v10227_v10, %v7027_v45  ;;  %v2359_v45 = vrot.slane %v10669_v48, 1  ;;  %v2101_v48 = vld [vmem:[#allocation2 + $0x1a8] sm:$0x3] }
 0x37d   : > { %7244 = vrot.lane.b32.xlu0 %v9882_v43, %s7993_s21  ;;  %v7052_v43 = vunpack.i.h.bf16 %v7050_v51  ;;  %v2358_v0 = vrot.slane %v10667_v18, 1  ;;  %v6951_v18 = vunpack.i.l.bf16 %v10600_v17 }
 0x37e   : > { %v10720_v54 = vpop.permute.xlu1 %7029  ;;  %v3019_v39 = vsel %vm3008_vm13, %v2986_v19, %v6896_v37  ;;  %v13293_v19 = vld [vmem:[#allocation51_spill] sm:$0xff] }
 0x37f   : > { %v7045_v25 = vpop.permute.xlu0 %7044  ;;  %3442 = vmatmul.bf16.gmra.mxu1 %v3182_v5  ;;  %v3001_v10 = vsel %vm370_vm10, %v10275_v30, %v7052_v43 }
 0x380   : > { %v7047_v63 = vunpack.i.h.bf16 %v7045_v25  ;;  %v7046_v9 = vunpack.i.l.bf16 %v7045_v25 }
 0x382   : > { %7254 = vrot.lane.b32.xlu2 %v10015_v35, %s7993_s21  ;;  %v2987_v35 = vsel %vm370_vm10, %v7841_v62, %v6862_v60  ;;  %v6907_v62 = vunpack.i.h.bf16 %v13293_v19 }
 0x383   : > { %v3020_v6 = vsel %vm3008_vm13, %v2987_v35, %v6897_v7  ;;  %v13290_v7 = vld [vmem:[#allocation50_spill] sm:$0xff]  ;;  %v6906_v35 = vunpack.i.l.bf16 %v13293_v19 }
 0x384   : > { %7264 = vrot.lane.b32.xlu1 %v10108_v16, %s7993_s21  ;;  %v6946_v16 = vunpack.i.l.bf16 %v10559_v34  ;;  %v3031_v34 = vsel %vm3008_vm13, %v2998_v28, %v7036_v41  ;;  %v3053_v23 = vsel %vm3041_vm14, %v3020_v6, %v6947_v38  ;;  %v6892_v37 = vunpack.i.h.bf16 %v13290_v7 }
 0x385   : > { %7259 = vrot.lane.b32.xlu0 %v10070_v56, %s7993_s21  ;;  %v7037_v56 = vunpack.i.h.bf16 %v10637_v42  ;;  %v10759_v11 = vsel %vm3041_vm14, %v3031_v34, %v7046_v9  ;;  %v6891_v43 = vunpack.i.l.bf16 %v13290_v7  ;;  %v13294_v7 = vld [vmem:[#allocation39_spill] sm:$0xff] }
 0x386   : > { %v10744_v44 = vpop.permute.xlu1 %7064  ;;  %v3052_v30 = vsel %vm3041_vm14, %v3019_v39, %v6946_v16  ;;  %v2360_v16 = vsel %vm582_vm0, %v2358_v0, %v2359_v45  ;;  %v7843_v39 = vld [vmem:[#allocation2 + $0x98] sm:$0xff] }
 0x387   : > { %v7055_v33 = vpop.permute.xlu0 %7054  ;;  %v3032_v61 = vsel %vm3008_vm13, %v2999_v32, %v7037_v56  ;;  %v3185_v5 = vpack.c.bf16 %v3053_v23, %v3052_v30  ;;  %v2361_v56 = vrot.slane %v2101_v48, 1  ;;  %v2989_v6 = vsel %vm370_vm10, %v7843_v39, %v6892_v37  ;;  %v13295_v37 = vld [vmem:[#allocation33_spill] sm:$0xff] }
 0x388   : > { %v7057_v26 = vunpack.i.h.bf16 %v7055_v33  ;;  %v7056_v40 = vunpack.i.l.bf16 %v7055_v33  ;;  %v10762_v55 = vsel %vm3041_vm14, %v3032_v61, %v7047_v63  ;;  %v6952_v63 = vunpack.i.h.bf16 %v10600_v17 }
 0x389   : > { %v3203_v51 = vpack.c.bf16 %v10762_v55, %v10759_v11  ;;  %v2362_v33 = vsel %vm582_vm0, %v2359_v45, %v2361_v56  ;;  %v7303_v61 = vpack.i.bf16 %v10592_v4, %v10589_v31  ;;  %v7844_v56 = vld [vmem:[#allocation2 + $0xb0] sm:$0xff] }
 0x38a   : > { %v3034_v42 = vsel %vm3008_vm13, %v3001_v10, %v7057_v26  ;;  %v3033_v27 = vsel %vm3008_vm13, %v3000_v59, %v7056_v40  ;;  %7269 = vrot.lane.b32.xlu2 %v10154_v22, %s7993_s21  ;;  %v10772_v22 = vpop.permute.xlu2 %7099  ;;  %v7842_v26 = vld [vmem:[#allocation2 + $0x90] sm:$0xff]  ;;  %v7308_v10 = vpack.i.bf16 %v2362_v33, %v2360_v16  ;;  %v3022_v59 = vsel %vm3008_vm13, %v2989_v6, %v6907_v62 }
 0x38b   : > { %v2988_v40 = vsel %vm370_vm10, %v7842_v26, %v6891_v43  ;;  %v3055_v23 = vsel %vm3041_vm14, %v3022_v59, %v6952_v63  ;;  %v7845_v26 = vld [vmem:[#allocation2 + $0xa8] sm:$0xff]  ;;  %v13298_v59 = vld [vmem:[#allocation14_spill] sm:$0xff] }
 0x38c   : > { %7279 = vrot.lane.b32.xlu1 %v13287_v50, %s7993_s21  ;;  %v3021_v17 = vsel %vm3008_vm13, %v2988_v40, %v6906_v35 }
 0x38d   : > { %7274 = vrot.lane.b32.xlu0 %v13288_v29, %s7993_s21  ;;  %v3054_v30 = vsel %vm3041_vm14, %v3021_v17, %v6951_v18  ;;  %v13297_v18 = vld [vmem:[#allocation48_spill] sm:$0xff] }
 0x38e   : > { %v7075_v25 = vpop.permute.xlu1 %7074 }
 0x38f   : > { %v10774_v60 = vpop.permute.xlu0 %7059  ;;  %3447 = vmatmul.bf16.gmra.mxu1 %v3185_v5  ;;  %v7076_v9 = vunpack.i.l.bf16 %v7075_v25  ;;  %v7077_v28 = vunpack.i.h.bf16 %v7075_v25 }
 0x391   : > { %v10799_v34 = vsel %vm3041_vm14, %v3033_v27, %v7076_v9  ;;  %v10806_v50 = vsel %vm3041_vm14, %v3034_v42, %v7077_v28  ;;  %v3188_v27 = vpack.c.bf16 %v3055_v23, %v3054_v30  ;;  %v6912_v28 = vunpack.i.h.bf16 %v13297_v18 }
 0x392   : > { %7284 = vrot.lane.b32.xlu2 %v13289_v58, %s7993_s21  ;;  %v7105_v41 = vpop.permute.xlu2 %7104  ;;  %v6961_v30 = vunpack.i.l.bf16 %v13298_v59 }
 0x393   : > { %v7107_v62 = vunpack.i.h.bf16 %v7105_v41  ;;  %v7106_v35 = vunpack.i.l.bf16 %v7105_v41 }
 0x394   : > { %7294 = vrot.lane.b32.xlu1 %v13291_v15, %s7993_s21  ;;  %v13296_v15 = vld [vmem:[#allocation59_spill] sm:$0xff] }
 0x395   : > { %7289 = vrot.lane.b32.xlu0 %v13292_v13, %s7993_s21  ;;  %v6902_v13 = vunpack.i.h.bf16 %v13296_v15  ;;  %v6901_v19 = vunpack.i.l.bf16 %v13296_v15 }
 0x396   : > { %v7090_v32 = vpop.permute.xlu1 %7089 }
 0x397   : > { %v7080_v38 = vpop.permute.xlu0 %7079  ;;  %v7092_v25 = vunpack.i.h.bf16 %v7090_v32  ;;  %v7091_v58 = vunpack.i.l.bf16 %v7090_v32  ;;  %v6911_v32 = vunpack.i.l.bf16 %v13297_v18  ;;  %v2991_v33 = vsel %vm370_vm10, %v7844_v56, %v6902_v13 }
 0x398   : > { %v7082_v29 = vunpack.i.h.bf16 %v7080_v38  ;;  %v2990_v41 = vsel %vm370_vm10, %v7845_v26, %v6901_v19  ;;  %v3024_v17 = vsel %vm3008_vm13, %v2991_v33, %v6912_v28  ;;  %v13300_v19 = vld [vmem:[#allocation32_spill] sm:$0xff]  ;;  %v6977_v18 = vunpack.i.h.bf16 %v10606_v46  ;;  %v7847_v33 = vld [vmem:[#allocation2 + $0xc8] sm:$0xff] }
 0x399   : > { %v6976_v28 = vunpack.i.l.bf16 %v10606_v46 }
 0x39a   : > { %7299 = vrot.lane.b32.xlu2 %v10523_v36, %s7993_s21  ;;  %v7081_v36 = vunpack.i.l.bf16 %v7080_v38  ;;  %v3003_v42 = vsel %vm370_vm10, %v13294_v7, %v7082_v29  ;;  %v7115_v63 = vpop.permute.xlu2 %7114  ;;  %v13299_v7 = vld [vmem:[#allocation41_spill] sm:$0xff] }
 0x39b   : > { %v3036_v48 = vsel %vm3008_vm13, %v3003_v42, %v7092_v25  ;;  %v6932_v42 = vunpack.i.h.bf16 %v13299_v7 }
 0x39c   : > { %7309 = vrot.lane.b32.xlu1 %v7308_v10, %s7993_s21  ;;  %v3002_v43 = vsel %vm370_vm10, %v13295_v37, %v7081_v36  ;;  %v10830_v16 = vsel %vm3041_vm14, %v3036_v48, %v7107_v62  ;;  %v3023_v10 = vsel %vm3008_vm13, %v2990_v41, %v6911_v32  ;;  %v6931_v37 = vunpack.i.l.bf16 %v13299_v7  ;;  %v7846_v32 = vld [vmem:[#allocation2 + $0xc0] sm:$0xff]  ;;  %v13301_v41 = vld [vmem:[#allocation15_spill] sm:$0xff] }
 0x39d   : > { %7304 = vrot.lane.b32.xlu0 %v7303_v61, %s7993_s21  ;;  %v3035_v9 = vsel %vm3008_vm13, %v3002_v43, %v7091_v58  ;;  %v6962_v61 = vunpack.i.h.bf16 %v13298_v59  ;;  %v3056_v29 = vsel %vm3041_vm14, %v3023_v10, %v6961_v30  ;;  %v6957_v62 = vunpack.i.h.bf16 %v13300_v19  ;;  %v13302_v10 = vld [vmem:[#allocation67_spill] sm:$0xff] }
 0x39e   : > { %v10812_v45 = vpop.permute.xlu1 %7094  ;;  %v10827_v38 = vsel %vm3041_vm14, %v3035_v9, %v7106_v35  ;;  %v6956_v35 = vunpack.i.l.bf16 %v13300_v19  ;;  %v2992_v56 = vsel %vm370_vm10, %v7846_v32, %v6931_v37  ;;  %v2993_v26 = vsel %vm370_vm10, %v7847_v33, %v6932_v42  ;;  %v13303_v7 = vld [vmem:[#allocation47_spill] sm:$0xff]  ;;  %v13304_v19 = vld [vmem:[#allocation42_spill] sm:$0xff] }
 0x39f   : > { %v10814_v0 = vpop.permute.xlu0 %7084  ;;  %3452 = vmatmul.bf16.gmra.mxu1 %v3188_v27  ;;  %v3057_v36 = vsel %vm3041_vm14, %v3024_v17, %v6962_v61  ;;  %v3026_v32 = vsel %vm3008_vm13, %v2993_v26, %v6957_v62 }
 0x3a0   : > { %v3191_v27 = vpack.c.bf16 %v3057_v36, %v3056_v29  ;;  %v7117_v29 = vunpack.i.h.bf16 %v7115_v63  ;;  %v7116_v36 = vunpack.i.l.bf16 %v7115_v63 }
 0x3a2   : > { %v7130_v23 = vpop.permute.xlu2 %7129 }
 0x3a3   : > { %v7132_v9 = vunpack.i.h.bf16 %v7130_v23  ;;  %v7131_v48 = vunpack.i.l.bf16 %v7130_v23 }
 0x3a5   : > { %v3007_v37 = vsel %vm370_vm10, %v13303_v7, %v7132_v9  ;;  %v3006_v42 = vsel %vm370_vm10, %v13304_v19, %v7131_v48  ;;  %v6108_v7 = vld [vmem:[%s12854_s3 + $0x60] sm:$0xff] }
 0x3a6   : > { %v7110_v39 = vpop.permute.xlu1 %7109 }
 0x3a7   : > { %v10836_v6 = vpop.permute.xlu0 %7119  ;;  %v7112_v43 = vunpack.i.h.bf16 %v7110_v39  ;;  %v7111_v15 = vunpack.i.l.bf16 %v7110_v39 }
 0x3a9   : > { %v3005_v39 = vsel %vm370_vm10, %v13301_v41, %v7112_v43  ;;  %v3004_v17 = vsel %vm370_vm10, %v13302_v10, %v7111_v15  ;;  %v3025_v43 = vsel %vm3008_vm13, %v2992_v56, %v6956_v35  ;;  %v3059_v10 = vsel %vm3041_vm14, %v3026_v32, %v6977_v18  ;;  %v6111_v18 = vld [vmem:[%s12854_s3 + $0x78] sm:$0xff] }
 0x3aa   : > { %v10848_v13 = vpop.permute.xlu2 %7149  ;;  %v3037_v33 = vsel %vm3008_vm13, %v3004_v17, %v7116_v36  ;;  %v3038_v63 = vsel %vm3008_vm13, %v3005_v39, %v7117_v29  ;;  %v3058_v41 = vsel %vm3041_vm14, %v3025_v43, %v6976_v28  ;;  %3503 = vmatpush.bf16.msra.mxu2 %v6111_v18  ;;  %v6109_v36 = vld [vmem:[%s12854_s3 + $0x68] sm:$0xff] }
 0x3ab   : > { %v3194_v56 = vpack.c.bf16 %v3059_v10, %v3058_v41  ;;  %v13305_v41 = vld [vmem:[#allocation65_spill] sm:$0xff]  ;;  %v13310_v43 = vld [vmem:[#allocation43_spill] sm:$0xff] }
 0x3ac   : > { %v3087_v10 = vsel %vm370_vm10, %v13305_v41, %v7042_v24 }
 0x3ae   : > { %v10844_v25 = vpop.permute.xlu1 %7144 }
 0x3af   : > { %v7125_v58 = vpop.permute.xlu0 %7124  ;;  %3457 = vmatmul.bf16.gmra.mxu1 %v3191_v27 }
 0x3b0   : > { %v7127_v59 = vunpack.i.h.bf16 %v7125_v58  ;;  %v7126_v61 = vunpack.i.l.bf16 %v7125_v58 }
 0x3b2   : > { %v10875_v9 = vsel %vm3041_vm14, %v3037_v33, %v7126_v61  ;;  %v10878_v48 = vsel %vm3041_vm14, %v3038_v63, %v7127_v59  ;;  %v10882_v35 = vpop.permute.xlu2 %7169  ;;  %v6110_v61 = vld [vmem:[%s12854_s3 + $0x70] sm:$0xff]  ;;  %v6107_v33 = vld [vmem:[%s12854_s3 + $0x58] sm:$0xff] }
 0x3b3   : > { %3504 = vmatpush.bf16.msra.mxu2 %v6110_v61 }
 0x3b6   : > { %v10860_v30 = vpop.permute.xlu1 %7159 }
 0x3b7   : > { %v7135_v23 = vpop.permute.xlu0 %7134  ;;  %3505 = vmatpush.bf16.msra.mxu2 %v6109_v36  ;;  %v7071_v36 = vunpack.i.l.bf16 %v10728_v20 }
 0x3b8   : > { %v7137_v46 = vunpack.i.h.bf16 %v7135_v23  ;;  %v7136_v27 = vunpack.i.l.bf16 %v7135_v23 }
 0x3ba   : > { %v3040_v15 = vsel %vm3008_vm13, %v3007_v37, %v7137_v46  ;;  %v3039_v58 = vsel %vm3008_vm13, %v3006_v42, %v7136_v27  ;;  %v10893_v59 = vpop.permute.xlu2 %7189 }
 0x3bb   : > { %3506 = vmatpush.bf16.msra.mxu2 %v6108_v7  ;;  %v7101_v7 = vunpack.i.l.bf16 %v10772_v22 }
 0x3bc   : > { %v10994_v5 = vpop.f32.mrf.mxu1 }
 0x3be   : > { %v10884_v26 = vpop.permute.xlu1 %7164 }
 0x3bf   : > { %v10886_v17 = vpop.permute.xlu0 %7139  ;;  %3462 = vmatmul.bf16.gmra.mxu1 %v3194_v56  ;;  %3507 = vmatpush.bf16.msra.mxu2 %v6107_v33  ;;  %v13306_v56 = vld [vmem:[#allocation58_spill] sm:$0xff] }
 0x3c0   : > { %v3086_v2 = vsel %vm370_vm10, %v13306_v56, %v7041_v52  ;;  %v13309_v56 = vld [vmem:[#allocation54_spill] sm:$0xff] }
 0x3c2   : > { %v10909_v37 = vpop.permute.xlu2 %7194 }
 0x3c6   : > { %v7180_v28 = vpop.permute.xlu1 %7179 }
 0x3c7   : > { %v10891_v39 = vpop.permute.xlu0 %7154  ;;  %v7182_v23 = vunpack.i.h.bf16 %v7180_v28  ;;  %v7181_v29 = vunpack.i.l.bf16 %v7180_v28 }
 0x3c9   : > { %v10912_v19 = vsel %vm3041_vm14, %v3039_v58, %v7181_v29  ;;  %v10915_v42 = vsel %vm3041_vm14, %v3040_v15, %v7182_v23  ;;  %v6106_v15 = vld [vmem:[%s12854_s3 + $0x50] sm:$0xff]  ;;  %v6105_v23 = vld [vmem:[%s12854_s3 + $0x48] sm:$0xff]  ;;  %v7072_v29 = vunpack.i.h.bf16 %v10728_v20  ;;  %v6104_v20 = vld [vmem:[%s12854_s3 + $0x40] sm:$0xff] }
 0x3ca   : > { %v10939_v61 = vpop.permute.xlu2 %7209  ;;  %3508 = vmatpush.bf16.msra.mxu2 %v6106_v15  ;;  %v13307_v15 = vld [vmem:[#allocation57_spill] sm:$0xff] }
 0x3ce   : > { %v10901_v46 = vpop.permute.xlu1 %7184  ;;  %3509 = vmatpush.bf16.msra.mxu2 %v6105_v23 }
 0x3cf   : > { %v7175_v27 = vpop.permute.xlu0 %7174  ;;  %3467 = vmatmul.bf16.gmra.mxu1 %v3197_v53 }
 0x3d0   : > { %v7177_v53 = vunpack.i.h.bf16 %v7175_v27  ;;  %v7176_v32 = vunpack.i.l.bf16 %v7175_v27  ;;  %v7102_v27 = vunpack.i.h.bf16 %v10772_v22  ;;  %v13308_v22 = vld [vmem:[#allocation52_spill] sm:$0xff] }
 0x3d2   : > { %v10934_v18 = vsel %vm3008_vm13, %v3086_v2, %v7176_v32  ;;  %v10937_v28 = vsel %vm3008_vm13, %v3087_v10, %v7177_v53  ;;  %v3093_v10 = vsel %vm370_vm10, %v13307_v15, %v7072_v29  ;;  %v3099_v2 = vsel %vm370_vm10, %v13309_v56, %v7102_v27  ;;  %v13311_v29 = vld [vmem:[#allocation44_spill] sm:$0xff]  ;;  %3510 = vmatpush.bf16.msra.mxu2 %v6104_v20 }
 0x3d3   : > { %v6981_v15 = vunpack.i.l.bf16 %v13311_v29  ;;  %v7192_v27 = vunpack.i.h.bf16 %v10893_v59 }
 0x3d6   : > { %v10924_v63 = vpop.permute.xlu1 %7204 }
 0x3d7   : > { %v7200_v58 = vpop.permute.xlu0 %7199 }
 0x3d8   : > { %v7202_v24 = vunpack.i.h.bf16 %v7200_v58  ;;  %v7201_v52 = vunpack.i.l.bf16 %v7200_v58  ;;  %v3092_v58 = vsel %vm370_vm10, %v13308_v22, %v7071_v36  ;;  %v6982_v36 = vunpack.i.h.bf16 %v13311_v29 }
 0x3da   : > { %v10974_v23 = vsel %vm3008_vm13, %v3093_v10, %v7202_v24  ;;  %v13313_v10 = vld [vmem:[#allocation21_spill] sm:$0xff] }
 0x3db   : > { %v3075_v56 = vsel %vm370_vm10, %v13313_v10, %v6982_v36  ;;  %v13314_v10 = vld [vmem:[#allocation22_spill] sm:$0xff] }
 0x3de   : > { %v10948_v32 = vpop.permute.xlu1 %7219 }
 0x3df   : > { %v7215_v53 = vpop.permute.xlu0 %7214  ;;  %3472 = vmatmul.bf16.gmra.mxu1 %v3200_v12  ;;  %v10971_v12 = vsel %vm3008_vm13, %v3092_v58, %v7201_v52  ;;  %v13312_v58 = vld [vmem:[#allocation28_spill] sm:$0xff] }
 0x3e0   : > { %v7217_v33 = vunpack.i.h.bf16 %v7215_v53  ;;  %v7216_v41 = vunpack.i.l.bf16 %v7215_v53  ;;  %v3098_v53 = vsel %vm370_vm10, %v13310_v43, %v7101_v7  ;;  %v7191_v43 = vunpack.i.l.bf16 %v10893_v59 }
 0x3e1   : > { %v7142_v7 = vunpack.i.h.bf16 %v10886_v17  ;;  %v3074_v24 = vsel %vm370_vm10, %v13312_v58, %v6981_v15  ;;  %v3105_v59 = vsel %vm370_vm10, %v10592_v4, %v7192_v27  ;;  %v7146_v58 = vunpack.i.l.bf16 %v10844_v25 }
 0x3e2   : > { %v10965_v47 = vsel %vm3008_vm13, %v3099_v2, %v7217_v33  ;;  %v10968_v57 = vsel %vm3008_vm13, %v3098_v53, %v7216_v41  ;;  %v7141_v33 = vunpack.i.l.bf16 %v10886_v17  ;;  %v10982_v41 = vpop.permute.xlu2 %7224  ;;  %v3104_v17 = vsel %vm370_vm10, %v10589_v31, %v7191_v43 }
 0x3e3   : > { %v3107_v40 = vsel %vm3008_vm13, %v3075_v56, %v7142_v7  ;;  %v6997_v43 = vunpack.i.h.bf16 %v10661_v21  ;;  %v6996_v7 = vunpack.i.l.bf16 %v10661_v21 }
 0x3e4   : > { %v3106_v62 = vsel %vm3008_vm13, %v3074_v24, %v7141_v33  ;;  %v7147_v33 = vunpack.i.h.bf16 %v10844_v25 }
 0x3e5   : > { %v3077_v56 = vsel %vm370_vm10, %v13314_v10, %v6997_v43  ;;  %v7006_v43 = vunpack.i.l.bf16 %v10671_v49 }
 0x3e6   : > { %v7235_v52 = vpop.permute.xlu1 %7234 }
 0x3e7   : > { %v7230_v22 = vpop.permute.xlu0 %7229  ;;  %v7237_v2 = vunpack.i.h.bf16 %v7235_v52  ;;  %v7236_v20 = vunpack.i.l.bf16 %v7235_v52 }
 0x3e8   : > { %v7232_v53 = vunpack.i.h.bf16 %v7230_v22  ;;  %v7231_v29 = vunpack.i.l.bf16 %v7230_v22 }
 0x3e9   : > { %v3138_v52 = vsel %vm3041_vm14, %v3106_v62, %v7236_v20  ;;  %v3139_v22 = vsel %vm3041_vm14, %v3107_v40, %v7237_v2  ;;  %v11013_v62 = vpop.f32.mrf.mxu1  ;;  %v13315_v2 = vld [vmem:[#allocation16_spill] sm:$0xff]  ;;  %v3109_v20 = vsel %vm3008_vm13, %v3077_v56, %v7147_v33 }
 0x3ea   : > { %v10997_v15 = vsel %vm3008_vm13, %v3105_v59, %v7232_v53  ;;  %v11000_v36 = vsel %vm3008_vm13, %v3104_v17, %v7231_v29  ;;  %v3171_v4 = vpack.c.bf16 %v3139_v22, %v3138_v52  ;;  %v7240_v31 = vpop.permute.xlu2 %7239  ;;  %v3076_v11 = vsel %vm370_vm10, %v13315_v2, %v6996_v7 }
 0x3eb   : > { %v7242_v40 = vunpack.i.h.bf16 %v7240_v31  ;;  %v7241_v24 = vunpack.i.l.bf16 %v7240_v31  ;;  %v13316_v22 = vpack.c.bf16 %v10806_v50, %v10799_v34  ;;  %v7007_v31 = vunpack.i.h.bf16 %v10671_v49  ;;  %v13317_v49 = vld [vmem:[#allocation27_spill] sm:$0xff] }
 0x3ec   : > { %3511 = vmatmul.bf16.vlgmr.msra.gmra.mxu2 %v3171_v4  ;;  %v3078_v2 = vsel %vm370_vm10, %v13317_v49, %v7006_v43 }
 0x3ed   : > { %v3141_v53 = vsel %vm3041_vm14, %v3109_v20, %v7242_v40  ;;  %v7151_v40 = vunpack.i.l.bf16 %v10848_v13 }
 0x3ee   : > { %v11004_v27 = vpop.permute.xlu1 %7249 }
 0x3ef   : > { %3477 = vmatmul.bf16.gmra.mxu1 %v3203_v51  ;;  %v3108_v51 = vsel %vm3008_vm13, %v3076_v11, %v7146_v58  ;;  %v7245_v4 = vpop.permute.xlu0 %7244  ;;  %v7152_v58 = vunpack.i.h.bf16 %v10848_v13 }
 0x3f0   : > { %v3140_v21 = vsel %vm3041_vm14, %v3108_v51, %v7241_v24  ;;  %v7247_v50 = vunpack.i.h.bf16 %v7245_v4  ;;  %v7246_v24 = vunpack.i.l.bf16 %v7245_v4  ;;  %v13319_v4 = vpack.c.bf16 %v10830_v16, %v10827_v38 }
 0x3f1   : > { %v3174_v25 = vpack.c.bf16 %v3141_v53, %v3140_v21  ;;  %v11023_v29 = vpop.f32.mrf.mxu1 }
 0x3f6   : > { %v7265_v55 = vpop.permute.xlu1 %7264 }
 0x3f7   : > { %v7267_v59 = vunpack.i.h.bf16 %v7265_v55  ;;  %v7266_v17 = vunpack.i.l.bf16 %v7265_v55 }
 0x3f9   : > { %v11032_v7 = vsel %vm3041_vm14, %v10934_v18, %v7266_v17  ;;  %v11036_v33 = vsel %vm3041_vm14, %v10937_v28, %v7267_v59  ;;  %v13318_v18 = vld [vmem:[#allocation13_spill] sm:$0xff]  ;;  %v3110_v28 = vsel %vm3008_vm13, %v3078_v2, %v7151_v40  ;;  %v11048_v51 = vpop.f32.mrf.mxu1  ;;  %v7157_v40 = vunpack.i.h.bf16 %v10891_v39 }
 0x3fa   : > { %v3189_v34 = vpack.c.bf16 %v11036_v33, %v11032_v7  ;;  %v3079_v11 = vsel %vm370_vm10, %v13318_v18, %v7007_v31  ;;  %v3142_v13 = vsel %vm3041_vm14, %v3110_v28, %v7246_v24  ;;  %v7012_v31 = vunpack.i.h.bf16 %v10577_v8 }
 0x3fb   : > { %v3111_v55 = vsel %vm3008_vm13, %v3079_v11, %v7152_v58  ;;  %v7251_v24 = vunpack.i.l.bf16 %v11004_v27 }
 0x3fc   : > { %3516 = vmatmul.bf16.gmra.mxu2 %v3174_v25  ;;  %v3143_v20 = vsel %vm3041_vm14, %v3111_v55, %v7247_v50  ;;  %v7156_v50 = vunpack.i.l.bf16 %v10891_v39 }
 0x3fd   : > { %v3177_v59 = vpack.c.bf16 %v3143_v20, %v3142_v13  ;;  %v13346_v20 = vld [vmem:[#allocation53_spill] sm:$0xff] }
 0x3fe   : > { %v7280_v52 = vpop.permute.xlu1 %7279 }
 0x3ff   : > { %3482 = vmatmul.bf16.gmra.mxu1 %v13316_v22  ;;  %v7282_v10 = vunpack.i.h.bf16 %v7280_v52  ;;  %v7281_v56 = vunpack.i.l.bf16 %v7280_v52 }
 0x401   : > { %v11054_v53 = vsel %vm3041_vm14, %v10971_v12, %v7281_v56  ;;  %v11058_v25 = vsel %vm3041_vm14, %v10974_v23, %v7282_v10  ;;  %v7011_v12 = vunpack.i.l.bf16 %v10577_v8  ;;  %v11067_v43 = vpop.f32.mrf.mxu1  ;;  %v7252_v8 = vunpack.i.h.bf16 %v11004_v27  ;;  %v13320_v10 = vld [vmem:[#allocation31_spill] sm:$0xff]  ;;  %v13321_v56 = vld [vmem:[#allocation20_spill] sm:$0xff] }
 0x402   : > { %v3198_v17 = vpack.c.bf16 %v11058_v25, %v11054_v53  ;;  %v7087_v53 = vunpack.i.h.bf16 %v10814_v0  ;;  %v7207_v25 = vunpack.i.h.bf16 %v10924_v63 }
 0x403   : > { %v3080_v49 = vsel %vm370_vm10, %v13321_v56, %v7011_v12  ;;  %v13325_v56 = vpack.c.bf16 %v10915_v42, %v10912_v19 }
 0x404   : > { %v3112_v18 = vsel %vm3008_vm13, %v3080_v49, %v7156_v50  ;;  %v7260_v49 = vpop.permute.xlu0 %7259 }
 0x405   : > { %v3144_v11 = vsel %vm3041_vm14, %v3112_v18, %v7251_v24  ;;  %v7172_v18 = vunpack.i.h.bf16 %v10882_v35 }
 0x406   : > { %v7295_v21 = vpop.permute.xlu1 %7294 }
 0x407   : > { %v7297_v52 = vunpack.i.h.bf16 %v7295_v21  ;;  %v7296_v22 = vunpack.i.l.bf16 %v7295_v21 }
 0x409   : > { %v11071_v23 = vsel %vm3041_vm14, %v10968_v57, %v7296_v22  ;;  %v11075_v58 = vsel %vm3041_vm14, %v10965_v47, %v7297_v52  ;;  %v3081_v57 = vsel %vm370_vm10, %v13320_v10, %v7012_v31  ;;  %v11101_v21 = vpop.f32.mrf.mxu1  ;;  %v7255_v52 = vpop.permute.xlu2 %7254  ;;  %v7017_v22 = vunpack.i.h.bf16 %v10704_v3 }
 0x40a   : > { %v3207_v16 = vpack.c.bf16 %v11075_v58, %v11071_v23  ;;  %v3113_v39 = vsel %vm3008_vm13, %v3081_v57, %v7157_v40  ;;  %v7257_v31 = vunpack.i.h.bf16 %v7255_v52  ;;  %v7256_v12 = vunpack.i.l.bf16 %v7255_v52  ;;  %v13323_v40 = vld [vmem:[#allocation19_spill] sm:$0xff]  ;;  %v13327_v52 = vld [vmem:[#allocation30_spill] sm:$0xff] }
 0x40b   : > { %v3145_v28 = vsel %vm3041_vm14, %v3113_v39, %v7252_v8  ;;  %v3083_v50 = vsel %vm370_vm10, %v13323_v40, %v7017_v22  ;;  %v7171_v39 = vunpack.i.l.bf16 %v10882_v35  ;;  %v7186_v40 = vunpack.i.l.bf16 %v10901_v46 }
 0x40c   : > { %3521 = vmatmul.bf16.gmra.mxu2 %v3177_v59  ;;  %v3180_v13 = vpack.c.bf16 %v3145_v28, %v3144_v11  ;;  %v13322_v59 = vpack.c.bf16 %v10878_v48, %v10875_v9  ;;  %v7262_v11 = vunpack.i.h.bf16 %v7260_v49  ;;  %v7261_v28 = vunpack.i.l.bf16 %v7260_v49 }
 0x40d   : > { %v7067_v49 = vunpack.i.h.bf16 %v10744_v44  ;;  %v7222_v23 = vunpack.i.h.bf16 %v10948_v32 }
 0x40e   : > { %v7310_v38 = vpop.permute.xlu1 %7309 }
 0x40f   : > { %3487 = vmatmul.bf16.gmra.mxu1 %v13319_v4  ;;  %v7312_v47 = vunpack.i.h.bf16 %v7310_v38  ;;  %v7311_v2 = vunpack.i.l.bf16 %v7310_v38  ;;  %v7167_v4 = vunpack.i.h.bf16 %v10884_v26  ;;  %v13324_v38 = vld [vmem:[#allocation11_spill] sm:$0xff] }
 0x411   : > { %v11093_v55 = vsel %vm3041_vm14, %v11000_v36, %v7311_v2  ;;  %v11097_v27 = vsel %vm3041_vm14, %v10997_v15, %v7312_v47  ;;  %v7016_v36 = vunpack.i.l.bf16 %v10704_v3  ;;  %v7166_v15 = vunpack.i.l.bf16 %v10884_v26  ;;  %v11114_v24 = vpop.f32.mrf.mxu1  ;;  %v7270_v35 = vpop.permute.xlu2 %7269 }
 0x412   : > { %v3115_v48 = vsel %vm3008_vm13, %v3083_v50, %v7167_v4  ;;  %v7032_v47 = vunpack.i.h.bf16 %v10720_v54  ;;  %v7031_v2 = vunpack.i.l.bf16 %v10720_v54  ;;  %v7272_v50 = vunpack.i.h.bf16 %v7270_v35 }
 0x413   : > { %v3082_v8 = vsel %vm370_vm10, %v13324_v38, %v7016_v36  ;;  %v3147_v10 = vsel %vm3041_vm14, %v3115_v48, %v7257_v31  ;;  %v7061_v31 = vunpack.i.l.bf16 %v10774_v60  ;;  %v7271_v38 = vunpack.i.l.bf16 %v7270_v35  ;;  %v13329_v48 = vld [vmem:[#allocation10_spill] sm:$0xff] }
 0x414   : > { %v3114_v9 = vsel %vm3008_vm13, %v3082_v8, %v7166_v15  ;;  %v3085_v22 = vsel %vm370_vm10, %v13327_v52, %v7032_v47  ;;  %v7062_v15 = vunpack.i.h.bf16 %v10774_v60  ;;  %v13328_v8 = vld [vmem:[#allocation29_spill] sm:$0xff]  ;;  %v7196_v47 = vunpack.i.l.bf16 %v10909_v37 }
 0x415   : > { %v3146_v3 = vsel %vm3041_vm14, %v3114_v9, %v7256_v12  ;;  %v3117_v42 = vsel %vm3008_vm13, %v3085_v22, %v7172_v18  ;;  %v7187_v12 = vunpack.i.h.bf16 %v10901_v46  ;;  %v7066_v46 = vunpack.i.l.bf16 %v10744_v44  ;;  %v11167_v44 = vld [vmem:[#allocation3 + $0x8] sm:$0xff] }
 0x416   : > { %v3183_v57 = vpack.c.bf16 %v3147_v10, %v3146_v3  ;;  %v3149_v54 = vsel %vm3041_vm14, %v3117_v42, %v7262_v11  ;;  %v3089_v9 = vsel %vm370_vm10, %v13328_v8, %v7062_v15  ;;  %v3088_v3 = vsel %vm370_vm10, %v13329_v48, %v7061_v31  ;;  %v13330_v11 = vld [vmem:[#allocation34_spill] sm:$0xff]  ;;  %v11165_v42 = vld [vmem:[#allocation3] sm:$0xff]  ;;  %v11187_v48 = vpop.f32.mrf.mxu3 }
 0x417   : > { %v3120_v7 = vsel %vm3008_vm13, %v3088_v3, %v7186_v40  ;;  %v3121_v33 = vsel %vm3008_vm13, %v3089_v9, %v7187_v12  ;;  %v11180_v12 = vld [vmem:[%s12855_s4] ss:$0 sm:$0xff] }
 0x418   : > { %v3153_v60 = vsel %vm3041_vm14, %v3121_v33, %v7272_v50  ;;  %v3424_v8 = vadd.f32 %v11180_v12, %v10994_v5  ;;  %v6131_v5 = vld [vmem:[%s12856_s5 + $0x88] sm:$0xff] }
 0x419   : > { %v11120_v26 = vpop.f32.mrf.mxu1  ;;  %5366 = vmatpush.bf16.msrb.mxu1 %v6131_v5 }
 0x41c   : > { %3526 = vmatmul.bf16.gmra.mxu2 %v3180_v13  ;;  %v13326_v13 = vld [vmem:[#allocation23_spill] sm:$0xff] }
 0x41f   : > { %3492 = vmatmul.bf16.gmra.mxu1 %v13322_v59  ;;  %v3084_v59 = vsel %vm370_vm10, %v13326_v13, %v7031_v2  ;;  %v7197_v2 = vunpack.i.h.bf16 %v10909_v37  ;;  %v13331_v13 = vld [vmem:[#allocation46_spill] sm:$0xff] }
 0x420   : > { %v3116_v19 = vsel %vm3008_vm13, %v3084_v59, %v7171_v39  ;;  %v3091_v59 = vsel %vm370_vm10, %v13331_v13, %v7067_v49  ;;  %v11203_v49 = vpop.f32.mrf.mxu3  ;;  %v7086_v13 = vunpack.i.l.bf16 %v10814_v0 }
 0x421   : > { %v3148_v36 = vsel %vm3041_vm14, %v3116_v19, %v7261_v28  ;;  %v3090_v28 = vsel %vm370_vm10, %v13330_v11, %v7066_v46  ;;  %v3123_v22 = vsel %vm3008_vm13, %v3091_v59, %v7197_v2  ;;  %v6130_v11 = vld [vmem:[%s12856_s5 + $0x80] sm:$0xff]  ;;  %v7285_v59 = vpop.permute.xlu2 %7284 }
 0x422   : > { %v3186_v4 = vpack.c.bf16 %v3149_v54, %v3148_v36  ;;  %v3122_v52 = vsel %vm3008_vm13, %v3090_v28, %v7196_v47  ;;  %v11169_v36 = vld [vmem:[#allocation3 + $0x10] sm:$0x3]  ;;  %v3920_v54 = vrot.slane %v11165_v42, 1  ;;  %v13333_v47 = vld [vmem:[#allocation68_spill] sm:$0xff]  ;;  %5367 = vmatpush.bf16.msrb.mxu1 %v6130_v11 }
 0x423   : > { %v3923_v35 = vrot.slane %v11169_v36, 1 }
 0x42c   : > { %3531 = vmatmul.bf16.gmra.mxu2 %v3183_v57  ;;  %v7275_v57 = vpop.permute.xlu0 %7274 }
 0x42d   : > { %v7276_v18 = vunpack.i.l.bf16 %v7275_v57  ;;  %v7277_v39 = vunpack.i.h.bf16 %v7275_v57 }
 0x42f   : > { %3497 = vmatmul.bf16.gmra.mxu1 %v13325_v56  ;;  %v11153_v56 = vpop.f32.mrf.mxu1  ;;  %v3154_v19 = vsel %vm3041_vm14, %v3122_v52, %v7276_v18  ;;  %v3155_v37 = vsel %vm3041_vm14, %v3123_v22, %v7277_v39 }
 0x430   : > { %v3195_v50 = vpack.c.bf16 %v3155_v37, %v3154_v19  ;;  %v7287_v19 = vunpack.i.h.bf16 %v7285_v59  ;;  %v7286_v37 = vunpack.i.l.bf16 %v7285_v59  ;;  %v13337_v59 = vld [vmem:[#allocation63_spill] sm:$0xff] }
 0x437   : > { %v11182_v40 = vpop.f32.mrf.mxu1 }
 0x438   : > { %v3446_v58 = vadd.f32 %v11180_v12, %v11182_v40 }
 0x43c   : > { %3536 = vmatmul.bf16.gmra.mxu2 %v3186_v4  ;;  %v3921_v4 = vrot.slane %v11167_v44, 1 }
 0x43e   : > { %v3922_v15 = vsel %vm582_vm0, %v3920_v54, %v3921_v4  ;;  %v3924_v31 = vsel %vm582_vm0, %v3921_v4, %v3923_v35  ;;  %v11231_v4 = vpop.f32.mrf.mxu3  ;;  %v13335_v35 = vld [vmem:[#allocation17_spill] sm:$0xff] }
 0x44c   : > { %3541 = vmatmul.bf16.gmra.mxu2 %v3189_v34  ;;  %v3152_v34 = vsel %vm3041_vm14, %v3120_v7, %v7271_v38  ;;  %v7313_v38 = vpack.i.bf16 %v3924_v31, %v3922_v15  ;;  %v13332_v7 = vld [vmem:[#allocation26_spill] sm:$0xff]  ;;  %v3094_v15 = vsel %vm370_vm10, %v13335_v35, %v7086_v13  ;;  %v7097_v35 = vunpack.i.h.bf16 %v10812_v45 }
 0x44d   : > { %v3192_v10 = vpack.c.bf16 %v3153_v60, %v3152_v34  ;;  %v11192_v34 = vpop.f32.mrf.mxu1 }
 0x44e   : > { %7314 = vrot.lane.b32.xlu1 %v7313_v38, %s7990_s26 }
 0x455   : > { %v11214_v39 = vpop.f32.mrf.mxu1 }
 0x45c   : > { %3546 = vmatmul.bf16.gmra.mxu2 %v3192_v10  ;;  %v3426_v10 = vadd.f32 %v11180_v12, %v11013_v62  ;;  %v3429_v62 = vadd.f32 %v11180_v12, %v11023_v29  ;;  %v7206_v29 = vunpack.i.l.bf16 %v10924_v63  ;;  %v3431_v63 = vadd.f32 %v11180_v12, %v11048_v51 }
 0x46c   : > { %3551 = vmatmul.bf16.gmra.mxu2 %v3195_v50  ;;  %v13336_v50 = vld [vmem:[#allocation40_spill] sm:$0xff] }
 0x46d   : > { %v3095_v0 = vsel %vm370_vm10, %v13336_v50, %v7087_v53  ;;  %v7290_v50 = vpop.permute.xlu0 %7289 }
 0x46e   : > { %v3127_v5 = vsel %vm3008_vm13, %v3095_v0, %v7207_v25  ;;  %v11269_v25 = vpop.f32.mrf.mxu3 }
 0x46f   : > { %v3512_v9 = vpop.f32.mrf.mxu2 }
 0x470   : > { %v3513_v3 = vadd.f32 %v3512_v9, %v3424_v8  ;;  %v3126_v9 = vsel %vm3008_vm13, %v3094_v15, %v7206_v29  ;;  %v7211_v15 = vunpack.i.l.bf16 %v10939_v61 }
 0x471   : > { %v3158_v51 = vsel %vm3041_vm14, %v3126_v9, %v7286_v37 }
 0x472   : > { %v11190_v33 = vadd.f32 %v13332_v7, %v3513_v3 }
 0x474   : > { %v12997_v60 = vmax.f32 %v11190_v33, 0.0 }
 0x476   : > { %3714 = vst.msk [vmem:[#allocation3 + $0x19] sm:$0xff] %vm370_vm10, %v12997_v60 }
 0x477   : > { %v3514_v57 = vpop.f32.mrf.mxu2 }
 0x478   : > { %v3515_v46 = vadd.f32 %v3514_v57, %v3426_v10 }
 0x47a   : > { %v11206_v2 = vadd.f32 %v13333_v47, %v3515_v46  ;;  %v3159_v46 = vsel %vm3041_vm14, %v3127_v5, %v7287_v19  ;;  %v11254_v47 = vpop.f32.mrf.mxu1  ;;  %v7096_v19 = vunpack.i.l.bf16 %v10812_v45  ;;  %v13338_v5 = vld [vmem:[#allocation61_spill] sm:$0xff]  ;;  %v13339_v45 = vld [vmem:[#allocation66_spill] sm:$0xff] }
 0x47b   : > { %v3201_v53 = vpack.c.bf16 %v3159_v46, %v3158_v51  ;;  %v3097_v46 = vsel %vm370_vm10, %v13339_v45, %v7097_v35 }
 0x47c   : > { %v12995_v18 = vmax.f32 %v11206_v2, 0.0  ;;  %3556 = vmatmul.bf16.gmra.mxu2 %v3198_v17  ;;  %v13334_v17 = vld [vmem:[#allocation56_spill] sm:$0xff] }
 0x47d   : > { %v11229_v54 = vld [vmem:[#allocation3 + $0x18] sm:$0xff] }
 0x47e   : > { %3715 = vst.msk [vmem:[#allocation3 + $0x21] sm:$0xff] %vm370_vm10, %v12995_v18  ;;  %v3925_v3 = vrot.slane %v11229_v54, 1 }
 0x47f   : > { %v3517_v28 = vpop.f32.mrf.mxu2 }
 0x480   : > { %v3518_v52 = vadd.f32 %v3517_v28, %v3429_v62 }
 0x482   : > { %v11227_v22 = vadd.f32 %v13334_v17, %v3518_v52  ;;  %v3434_v17 = vadd.f32 %v11180_v12, %v11067_v43  ;;  %v11280_v9 = vpop.f32.mrf.mxu1 }
 0x484   : > { %v12994_v31 = vmax.f32 %v11227_v22, 0.0 }
 0x485   : > { %v11240_v38 = vld [vmem:[#allocation3 + $0x20] sm:$0xff]  ;;  %v11242_v8 = vld [vmem:[#allocation3 + $0x28] sm:$0x3] }
 0x486   : > { %3716 = vst.msk [vmem:[#allocation3 + $0x31] sm:$0xff] %vm370_vm10, %v12994_v31  ;;  %v3926_v7 = vrot.slane %v11240_v38, 1  ;;  %v3928_v10 = vrot.slane %v11242_v8, 1 }
 0x487   : > { %v3519_v57 = vpop.f32.mrf.mxu2 }
 0x488   : > { %v3520_v62 = vadd.f32 %v3519_v57, %v3431_v63  ;;  %v11257_v11 = vsel %vm582_vm0, %v3925_v3, %v3926_v7  ;;  %v11260_v28 = vsel %vm582_vm0, %v3926_v7, %v3928_v10  ;;  %v7212_v63 = vunpack.i.h.bf16 %v10939_v61 }
 0x489   : > { %v7318_v13 = vpack.i.bf16 %v11260_v28, %v11257_v11  ;;  %v7292_v7 = vunpack.i.h.bf16 %v7290_v50  ;;  %v7291_v10 = vunpack.i.l.bf16 %v7290_v50  ;;  %v3096_v57 = vsel %vm370_vm10, %v13338_v5, %v7096_v19 }
 0x48a   : > { %v11265_v52 = vadd.f32 %v13337_v59, %v3520_v62  ;;  %v3128_v62 = vsel %vm3008_vm13, %v3096_v57, %v7211_v15  ;;  %v3436_v61 = vadd.f32 %v11180_v12, %v11101_v21  ;;  %v11301_v57 = vpop.f32.mrf.mxu3 }
 0x48b   : > { %7319 = vrot.lane.b32.xlu1 %v7318_v13, %s7990_s26  ;;  %v3160_v5 = vsel %vm3041_vm14, %v3128_v62, %v7291_v10 }
 0x48c   : > { %v12993_v29 = vmax.f32 %v11265_v52, 0.0  ;;  %3561 = vmatmul.bf16.gmra.mxu2 %v3201_v53 }
 0x48d   : > { %v3824_v43 = vld [vmem:[#allocation3 + $0x30] sm:$0xff] }
 0x48e   : > { %3717 = vst.msk [vmem:[#allocation3 + $0x39] sm:$0xff] %vm370_vm10, %v12993_v29  ;;  %v3930_v53 = vrot.slane %v3824_v43, 1 }
 0x48f   : > { %v3522_v37 = vpop.f32.mrf.mxu2 }
 0x490   : > { %v3523_v0 = vadd.f32 %v3522_v37, %v3434_v17  ;;  %v3129_v17 = vsel %vm3008_vm13, %v3097_v46, %v7212_v63 }
 0x491   : > { %v3161_v21 = vsel %vm3041_vm14, %v3129_v17, %v7292_v7  ;;  %v4008_v17 = vrot.slane %v11242_v8, 2 }
 0x492   : > { %v11283_v3 = vadd.f32 %v10625_v1, %v3523_v0  ;;  %v4010_v1 = vrot.slane %v3824_v43, 2 }
 0x494   : > { %v12992_v51 = vmax.f32 %v11283_v3, 0.0 }
 0x495   : > { %v3825_v13 = vld [vmem:[#allocation3 + $0x38] sm:$0xff]  ;;  %v3826_v59 = vld [vmem:[#allocation3 + $0x40] sm:$0x3] }
 0x496   : > { %3718 = vst.msk [vmem:[#allocation3 + $0x49] sm:$0xff] %vm370_vm10, %v12992_v51  ;;  %v11297_v19 = vpack.i.bf16 %v3825_v13, %v3824_v43  ;;  %v4011_v37 = vrot.slane %v3825_v13, 2  ;;  %v4013_v50 = vrot.slane %v3826_v59, 2  ;;  %v3931_v35 = vrot.slane %v3825_v13, 1 }
 0x497   : > { %v3524_v0 = vpop.f32.mrf.mxu2  ;;  %v3933_v15 = vrot.slane %v3826_v59, 1  ;;  %v3204_v13 = vpack.c.bf16 %v3161_v21, %v3160_v5  ;;  %v11325_v59 = vpop.f32.mrf.mxu1 }
 0x498   : > { %v3525_v45 = vadd.f32 %v3524_v0, %v3436_v61  ;;  %7394 = vrot.lane.b32.xlu0 %v11297_v19, %s7993_s21  ;;  %v11306_v63 = vsel %vm663_vm1, %v4010_v1, %v4011_v37  ;;  %v11309_v43 = vsel %vm663_vm1, %v4011_v37, %v4013_v50  ;;  %v11312_v46 = vsel %vm582_vm0, %v3930_v53, %v3931_v35 }
 0x499   : > { %v4940_v10 = vpack.c.bf16 %v11309_v43, %v11306_v63  ;;  %v11317_v7 = vsel %vm582_vm0, %v3931_v35, %v3933_v15  ;;  %v12999_v53 = vrot.slane %v11240_v38, 2  ;;  %v11346_v15 = vpop.f32.mrf.mxu3 }
 0x49a   : > { %v11320_v62 = vadd.f32 %v10654_v14, %v3525_v45  ;;  %v7378_v61 = vpack.i.bf16 %v11317_v7, %v11312_v46  ;;  %v3439_v14 = vadd.f32 %v11180_v12, %v11114_v24  ;;  %v3441_v45 = vadd.f32 %v11180_v12, %v11120_v26 }
 0x49b   : > { %6046 = vmatmul.msk.bf16.vlgmr.msrb.gmra.mxu1 %vm370_vm10, %v4940_v10  ;;  %v11340_v35 = vsel %vm663_vm1, %v12999_v53, %v4008_v17 }
 0x49c   : > { %v12991_v1 = vmax.f32 %v11320_v62, 0.0  ;;  %7379 = vrot.lane.b32.xlu2 %v7378_v61, %s7993_s21  ;;  %7324 = vrot.lane.b32.xlu1 %v7378_v61, %s7990_s26 }
 0x49d   : > { %3566 = vmatmul.bf16.gmra.mxu2 %v3204_v13  ;;  %v11351_v5 = vld [vmem:[#allocation3 + $0x48] sm:$0xff] }
 0x49e   : > { %3719 = vst.msk [vmem:[#allocation3 + $0x51] sm:$0xff] %vm370_vm10, %v12991_v1  ;;  %v4015_v13 = vrot.slane %v11351_v5, 2  ;;  %v3935_v17 = vrot.slane %v11351_v5, 1 }
 0x49f   : > { %v3527_v37 = vpop.f32.mrf.mxu2 }
 0x4a0   : > { %v3528_v50 = vadd.f32 %v3527_v37, %v3439_v14  ;;  %v11360_v14 = vpop.f32.mrf.mxu1 }
 0x4a2   : > { %v11349_v24 = vadd.f32 %v11187_v48, %v3528_v50 }
 0x4a4   : > { %13340 = vst [vmem:[#allocation18_spill] sm:$0xff] %v11349_v24  ;;  %v12996_v21 = vmax.f32 %v11349_v24, 0.0 }
 0x4a5   : > { %v11356_v10 = vld [vmem:[#allocation3 + $0x50] sm:$0xff]  ;;  %v3829_v61 = vld [vmem:[#allocation3 + $0x58] sm:$0x3] }
 0x4a6   : > { %3720 = vst.msk [vmem:[#allocation3 + $0x61] sm:$0xff] %vm370_vm10, %v12996_v21  ;;  %v4016_v48 = vrot.slane %v11356_v10, 2  ;;  %v4018_v37 = vrot.slane %v3829_v61, 2  ;;  %v3936_v50 = vrot.slane %v11356_v10, 1  ;;  %v3938_v1 = vrot.slane %v3829_v61, 1  ;;  %v11389_v61 = vpop.f32.mrf.mxu3 }
 0x4a7   : > { %v3529_v26 = vpop.f32.mrf.mxu2 }
 0x4a8   : > { %v3530_v51 = vadd.f32 %v3529_v26, %v3441_v45  ;;  %v11368_v29 = vsel %vm663_vm1, %v4015_v13, %v4016_v48  ;;  %v11371_v31 = vsel %vm663_vm1, %v4016_v48, %v4018_v37  ;;  %v11374_v18 = vsel %vm582_vm0, %v3935_v17, %v3936_v50  ;;  %v7300_v48 = vpop.permute.xlu2 %7299  ;;  %v11405_v37 = vpop.f32.mrf.mxu1 }
 0x4a9   : > { %13341 = vst [vmem:[#allocation35_spill] sm:$0xff] %v11374_v18  ;;  %v4943_v21 = vpack.c.bf16 %v11371_v31, %v11368_v29  ;;  %v11379_v60 = vsel %vm582_vm0, %v3936_v50, %v3938_v1  ;;  %v7221_v17 = vunpack.i.l.bf16 %v10948_v32  ;;  %v7302_v53 = vunpack.i.h.bf16 %v7300_v48 }
 0x4aa   : > { %13342 = vst [vmem:[#allocation38_spill] sm:$0xff] %v11379_v60  ;;  %v11382_v8 = vadd.f32 %v11203_v49, %v3530_v51  ;;  %v11386_v45 = vpack.i.bf16 %v11379_v60, %v11374_v18  ;;  %v3444_v49 = vadd.f32 %v11180_v12, %v11153_v56  ;;  %v7121_v51 = vunpack.i.l.bf16 %v10836_v6 }
 0x4ab   : > { %6047 = vmatmul.msk.bf16.gmra.mxu1 %vm370_vm10, %v4943_v21  ;;  %v7122_v21 = vunpack.i.h.bf16 %v10836_v6  ;;  %v7301_v0 = vunpack.i.l.bf16 %v7300_v48 }
 0x4ac   : > { %13343 = vst [vmem:[#allocation49_spill] sm:$0xff] %v11382_v8  ;;  %v12998_v13 = vmax.f32 %v11382_v8, 0.0  ;;  %7329 = vrot.lane.b32.xlu1 %v11386_v45, %s7990_s26 }
 0x4ad   : > { %3571 = vmatmul.bf16.gmra.mxu2 %v3207_v16  ;;  %v3830_v26 = vld [vmem:[#allocation3 + $0x60] sm:$0xff] }
 0x4ae   : > { %3721 = vst.msk [vmem:[#allocation3 + $0x69] sm:$0xff] %vm370_vm10, %v12998_v13  ;;  %v13345_v13 = vld [vmem:[#allocation37_spill] sm:$0xff]  ;;  %v11424_v8 = vpop.f32.mrf.mxu3 }
 0x4af   : > { %v3532_v1 = vpop.f32.mrf.mxu2  ;;  %v3100_v6 = vsel %vm370_vm10, %v13345_v13, %v7121_v51 }
 0x4b0   : > { %v3533_v50 = vadd.f32 %v3532_v1, %v3444_v49  ;;  %v3101_v49 = vsel %vm370_vm10, %v13346_v20, %v7122_v21  ;;  %v3132_v1 = vsel %vm3008_vm13, %v3100_v6, %v7221_v17 }
 0x4b1   : > { %v3133_v18 = vsel %vm3008_vm13, %v3101_v49, %v7222_v23  ;;  %v3164_v48 = vsel %vm3041_vm14, %v3132_v1, %v7301_v0  ;;  %v7849_v1 = vld [vmem:[#allocation2 + $0x198] sm:$0xff] }
 0x4b2   : > { %v11413_v56 = vadd.f32 %v11231_v4, %v3533_v50  ;;  %v4020_v4 = vrot.slane %v3830_v26, 2  ;;  %v3940_v50 = vrot.slane %v3830_v26, 1  ;;  %v3165_v40 = vsel %vm3041_vm14, %v3133_v18, %v7302_v53  ;;  %v11445_v53 = vpop.f32.mrf.mxu1 }
 0x4b3   : > { %v2363_v18 = vrot.slane %v7849_v1, 2 }
 0x4b4   : > { %13344 = vst [vmem:[#allocation55_spill] sm:$0xff] %v11413_v56  ;;  %v13003_v32 = vmax.f32 %v11413_v56, 0.0 }
 0x4b5   : > { %v3831_v16 = vld [vmem:[#allocation3 + $0x68] sm:$0xff]  ;;  %v3832_v60 = vld [vmem:[#allocation3 + $0x70] sm:$0x3] }
 0x4b6   : > { %3722 = vst.msk [vmem:[#allocation3 + $0x79] sm:$0xff] %vm370_vm10, %v13003_v32  ;;  %v4021_v20 = vrot.slane %v3831_v16, 2  ;;  %v4023_v13 = vrot.slane %v3832_v60, 2  ;;  %v3941_v51 = vrot.slane %v3831_v16, 1  ;;  %v3943_v21 = vrot.slane %v3832_v60, 1  ;;  %v7848_v16 = vld [vmem:[#allocation2 + $0x1a0] sm:$0xff] }
 0x4b7   : > { %v3534_v17 = vpop.f32.mrf.mxu2  ;;  %v2364_v0 = vrot.slane %v7848_v16, 2  ;;  %v7305_v16 = vpop.permute.xlu0 %7304 }
 0x4b8   : > { %v3535_v6 = vadd.f32 %v3534_v17, %v3446_v58  ;;  %v11432_v26 = vsel %vm663_vm1, %v4020_v4, %v4021_v20  ;;  %v11435_v23 = vsel %vm663_vm1, %v4021_v20, %v4023_v13  ;;  %v11438_v49 = vsel %vm582_vm0, %v3940_v50, %v3941_v51 }
 0x4b9   : > { %13347 = vst [vmem:[#allocation62_spill] sm:$0xff] %v11438_v49  ;;  %v4946_v32 = vpack.c.bf16 %v11435_v23, %v11432_v26  ;;  %v11443_v60 = vsel %vm582_vm0, %v3941_v51, %v3943_v21  ;;  %v3210_v50 = vpack.c.bf16 %v3165_v40, %v3164_v48  ;;  %v3449_v13 = vadd.f32 %v11180_v12, %v11192_v34  ;;  %v7850_v51 = vld [vmem:[#allocation2 + $0x1a8] sm:$0x3]  ;;  %v11468_v40 = vpop.f32.mrf.mxu3 }
 0x4ba   : > { %13348 = vst [vmem:[#allocation45_spill] sm:$0xff] %v11443_v60  ;;  %v11448_v58 = vadd.f32 %v11269_v25, %v3535_v6  ;;  %v11452_v4 = vpack.i.bf16 %v11443_v60, %v11438_v49  ;;  %v6121_v25 = vld [vmem:[%s12856_s5 + $0x38] sm:$0xff]  ;;  %v2366_v21 = vrot.slane %v7850_v51, 2  ;;  %v7161_v17 = vunpack.i.l.bf16 %v10860_v30 }
 0x4bb   : > { %6048 = vmatmul.msk.bf16.gmra.mxu1 %vm370_vm10, %v4946_v32  ;;  %v2365_v32 = vsel %vm663_vm1, %v2363_v18, %v2364_v0  ;;  %v7162_v6 = vunpack.i.h.bf16 %v10860_v30  ;;  %v7226_v34 = vunpack.i.l.bf16 %v10982_v41  ;;  %5182 = vmatpush.bf16.msrb.mxu3 %v6121_v25  ;;  %v7306_v25 = vunpack.i.l.bf16 %v7305_v16 }
 0x4bc   : > { %13349 = vst [vmem:[#allocation12_spill] sm:$0xff] %v11448_v58  ;;  %v13004_v20 = vmax.f32 %v11448_v58, 0.0  ;;  %7334 = vrot.lane.b32.xlu1 %v11452_v4, %s7990_s26  ;;  %v13351_v58 = vld [vmem:[#allocation36_spill] sm:$0xff]  ;;  %v4000_v51 = vrot.slane %v11165_v42, 2  ;;  %v4003_v42 = vrot.slane %v11169_v36, 2 }
 0x4bd   : > { %3576 = vmatmul.bf16.gmra.mxu2 %v3210_v50  ;;  %v2367_v50 = vsel %vm663_vm1, %v2364_v0, %v2366_v21  ;;  %v3833_v30 = vld [vmem:[#allocation3 + $0x78] sm:$0xff]  ;;  %v3102_v56 = vsel %vm370_vm10, %v13351_v58, %v7161_v17  ;;  %v13352_v0 = vld [vmem:[#allocation64_spill] sm:$0xff]  ;;  %v11487_v21 = vpop.f32.mrf.mxu1 }
 0x4be   : > { %3723 = vst.msk [vmem:[#allocation3 + $0x81] sm:$0xff] %vm370_vm10, %v13004_v20  ;;  %v7227_v20 = vunpack.i.h.bf16 %v10982_v41  ;;  %v3217_v60 = vpack.c.bf16 %v2367_v50, %v2365_v32  ;;  %v3103_v41 = vsel %vm370_vm10, %v13352_v0, %v7162_v6  ;;  %v3134_v32 = vsel %vm3008_vm13, %v3102_v56, %v7226_v34  ;;  %v6129_v0 = vld [vmem:[%s12856_s5 + $0x78] sm:$0xff] }
 0x4bf   : > { %v3537_v48 = vpop.f32.mrf.mxu2  ;;  %v4025_v17 = vrot.slane %v3833_v30, 2  ;;  %5271 = vmatpush.bf16.msrb.mxu0 %v6129_v0 }
 0x4c0   : > { %v3538_v1 = vadd.f32 %v3537_v48, %v3449_v13  ;;  %v7307_v13 = vunpack.i.h.bf16 %v7305_v16  ;;  %5973 = vmatmul.msk.bf16.gmra.mxu3 %vm370_vm10, %v3217_v60  ;;  %v3945_v16 = vrot.slane %v3833_v30, 1 }
 0x4c2   : > { %v11479_v49 = vadd.f32 %v11301_v57, %v3538_v1  ;;  %v3135_v57 = vsel %vm3008_vm13, %v3103_v41, %v7227_v20  ;;  %v3451_v1 = vadd.f32 %v11180_v12, %v11214_v39  ;;  %v3166_v41 = vsel %vm3041_vm14, %v3134_v32, %v7306_v25  ;;  %v11518_v32 = vpop.f32.mrf.mxu3 }
 0x4c3   : > { %v3167_v39 = vsel %vm3041_vm14, %v3135_v57, %v7307_v13  ;;  %v4001_v13 = vrot.slane %v11167_v44, 2 }
 0x4c4   : > { %13350 = vst [vmem:[#allocation24_spill] sm:$0xff] %v11479_v49  ;;  %v13010_v48 = vmax.f32 %v11479_v49, 0.0 }
 0x4c5   : > { %v3834_v50 = vld [vmem:[#allocation3 + $0x80] sm:$0xff]  ;;  %v3835_v58 = vld [vmem:[#allocation3 + $0x88] sm:$0x3]  ;;  %v4002_v44 = vsel %vm663_vm1, %v4000_v51, %v4001_v13  ;;  %v4004_v36 = vsel %vm663_vm1, %v4001_v13, %v4003_v42 }
 0x4c6   : > { %3724 = vst.msk [vmem:[#allocation3 + $0x91] sm:$0xff] %vm370_vm10, %v13010_v48  ;;  %v4026_v60 = vrot.slane %v3834_v50, 2  ;;  %v4028_v6 = vrot.slane %v3835_v58, 2  ;;  %v3946_v56 = vrot.slane %v3834_v50, 1  ;;  %v3948_v34 = vrot.slane %v3835_v58, 1 }
 0x4c7   : > { %v3539_v20 = vpop.f32.mrf.mxu2  ;;  %v7493_v51 = vpack.i.bf16 %v3834_v50, %v3833_v30 }
 0x4c8   : > { %v3540_v18 = vadd.f32 %v3539_v20, %v3451_v1  ;;  %v11503_v49 = vsel %vm663_vm1, %v4025_v17, %v4026_v60  ;;  %v11506_v48 = vsel %vm663_vm1, %v4026_v60, %v4028_v6  ;;  %v11509_v58 = vsel %vm582_vm0, %v3945_v16, %v3946_v56 }
 0x4c9   : > { %13353 = vst [vmem:[#allocation50_spill] sm:$0xff] %v11509_v58  ;;  %v4949_v24 = vpack.c.bf16 %v11506_v48, %v11503_v49  ;;  %v11514_v25 = vsel %vm582_vm0, %v3946_v56, %v3948_v34  ;;  %v3213_v17 = vpack.c.bf16 %v3167_v39, %v3166_v41  ;;  %v7343_v6 = vpack.i.bf16 %v4004_v36, %v4002_v44 }
 0x4ca   : > { %13354 = vst [vmem:[#allocation25_spill] sm:$0xff] %v11514_v25  ;;  %v11521_v57 = vadd.f32 %v11346_v15, %v3540_v18  ;;  %v7483_v1 = vpack.i.bf16 %v11514_v25, %v11509_v58  ;;  %v3454_v15 = vadd.f32 %v11180_v12, %v11254_v47  ;;  %v11533_v18 = vpop.f32.mrf.mxu1  ;;  %v11543_v20 = vpop.f32.mrf.mxu3  ;;  %v3456_v41 = vadd.f32 %v11180_v12, %v11280_v9 }
 0x4cb   : > { %6049 = vmatmul.msk.bf16.gmra.mxu1 %vm370_vm10, %v4949_v24 }
 0x4cc   : > { %13355 = vst [vmem:[#allocation60_spill] sm:$0xff] %v11521_v57  ;;  %v13015_v16 = vmax.f32 %v11521_v57, 0.0  ;;  %7484 = vrot.lane.b32.xlu2 %v7483_v1, %s7993_s21  ;;  %7339 = vrot.lane.b32.xlu1 %v7483_v1, %s7990_s26 }
 0x4cd   : > { %3581 = vmatmul.bf16.gmra.mxu2 %v3213_v17  ;;  %v3836_v0 = vld [vmem:[#allocation3 + $0x90] sm:$0xff] }
 0x4ce   : > { %3725 = vst.msk [vmem:[#allocation3 + $0x99] sm:$0xff] %vm370_vm10, %v13015_v16  ;;  %v4030_v13 = vrot.slane %v3836_v0, 2  ;;  %v3950_v1 = vrot.slane %v3836_v0, 1 }
 0x4cf   : > { %v3542_v24 = vpop.f32.mrf.mxu2 }
 0x4d0   : > { %v3543_v60 = vadd.f32 %v3542_v24, %v3454_v15 }
 0x4d2   : > { %v11541_v34 = vadd.f32 %v11389_v61, %v3543_v60  ;;  %v11553_v36 = vpop.f32.mrf.mxu1 }
 0x4d4   : > { %13356 = vst [vmem:[#allocation51_spill] sm:$0xff] %v11541_v34  ;;  %v13013_v47 = vmax.f32 %v11541_v34, 0.0  ;;  %7494 = vrot.lane.b32.xlu2 %v7493_v51, %s7993_s21  ;;  %7344 = vrot.lane.b32.xlu1 %v7343_v6, %s7992_s12 }
 0x4d5   : > { %v3837_v39 = vld [vmem:[#allocation3 + $0x98] sm:$0xff]  ;;  %v3838_v42 = vld [vmem:[#allocation3 + $0xa0] sm:$0x3] }
 0x4d6   : > { %3726 = vst.msk [vmem:[#allocation3 + $0xa9] sm:$0xff] %vm370_vm10, %v13013_v47  ;;  %v4031_v61 = vrot.slane %v3837_v39, 2  ;;  %v4033_v30 = vrot.slane %v3838_v42, 2  ;;  %v3951_v50 = vrot.slane %v3837_v39, 1  ;;  %v3953_v17 = vrot.slane %v3838_v42, 1 }
 0x4d7   : > { %v3544_v44 = vpop.f32.mrf.mxu2  ;;  %v13360_v42 = vpack.c.bf16 %v11097_v27, %v11093_v55  ;;  %v7513_v55 = vpack.i.bf16 %v11506_v48, %v11503_v49 }
 0x4d8   : > { %v3545_v15 = vadd.f32 %v3544_v44, %v3456_v41  ;;  %v11556_v24 = vsel %vm663_vm1, %v4030_v13, %v4031_v61  ;;  %v11559_v9 = vsel %vm663_vm1, %v4031_v61, %v4033_v30  ;;  %v11562_v60 = vsel %vm582_vm0, %v3950_v1, %v3951_v50  ;;  %v11584_v1 = vpop.f32.mrf.mxu3  ;;  %v6120_v61 = vld [vmem:[%s12856_s5 + $0x30] sm:$0xff] }
 0x4d9   : > { %13357 = vst [vmem:[#allocation39_spill] sm:$0xff] %v11562_v60  ;;  %v7498_v6 = vpack.i.bf16 %v11556_v24, %v11506_v48  ;;  %v4952_v51 = vpack.c.bf16 %v11559_v9, %v11556_v24  ;;  %v11569_v0 = vsel %vm582_vm0, %v3951_v50, %v3953_v17  ;;  %5183 = vmatpush.bf16.msrb.mxu3 %v6120_v61 }
 0x4da   : > { %13358 = vst [vmem:[#allocation33_spill] sm:$0xff] %v11569_v0  ;;  %v11572_v41 = vadd.f32 %v11424_v8, %v3545_v15  ;;  %v7508_v39 = vpack.i.bf16 %v11569_v0, %v11562_v60  ;;  %v3459_v8 = vadd.f32 %v11180_v12, %v11325_v59  ;;  %v11596_v27 = vpop.f32.mrf.mxu1  ;;  %v7353_v59 = vpack.i.bf16 %v11240_v38, %v11229_v54 }
 0x4db   : > { %7499 = vrot.lane.b32.xlu0 %v7498_v6, %s7990_s26  ;;  %6050 = vmatmul.msk.bf16.gmra.mxu1 %vm370_vm10, %v4952_v51  ;;  %v3461_v6 = vadd.f32 %v11180_v12, %v11360_v14 }
 0x4dc   : > { %13359 = vst [vmem:[#allocation59_spill] sm:$0xff] %v11572_v41  ;;  %v13012_v13 = vmax.f32 %v11572_v41, 0.0  ;;  %7509 = vrot.lane.b32.xlu2 %v7508_v39, %s7993_s21  ;;  %7349 = vrot.lane.b32.xlu1 %v7508_v39, %s7990_s26 }
 0x4dd   : > { %3586 = vmatmul.bf16.gmra.mxu2 %v13360_v42  ;;  %v3839_v44 = vld [vmem:[#allocation3 + $0xa8] sm:$0xff] }
 0x4de   : > { %3727 = vst.msk [vmem:[#allocation3 + $0xb1] sm:$0xff] %vm370_vm10, %v13012_v13  ;;  %v4035_v39 = vrot.slane %v3839_v44, 2 }
 0x4df   : > { %v3547_v30 = vpop.f32.mrf.mxu2 }
 0x4e0   : > { %v3548_v50 = vadd.f32 %v3547_v30, %v3459_v8  ;;  %v3955_v8 = vrot.slane %v3839_v44, 1  ;;  %v6128_v30 = vld [vmem:[%s12856_s5 + $0x70] sm:$0xff] }
 0x4e1   : > { %5272 = vmatpush.bf16.msrb.mxu0 %v6128_v30  ;;  %v7538_v30 = vpack.i.bf16 %v11559_v9, %v11556_v24 }
 0x4e2   : > { %v11599_v17 = vadd.f32 %v11468_v40, %v3548_v50 }
 0x4e3   : > { %7514 = vrot.lane.b32.xlu0 %v7513_v55, %s7992_s12 }
 0x4e4   : > { %13361 = vst [vmem:[#allocation48_spill] sm:$0xff] %v11599_v17  ;;  %v13014_v15 = vmax.f32 %v11599_v17, 0.0  ;;  %7354 = vrot.lane.b32.xlu1 %v7353_v59, %s7993_s21  ;;  %v11614_v59 = vpop.f32.mrf.mxu3 }
 0x4e5   : > { %v3840_v51 = vld [vmem:[#allocation3 + $0xb0] sm:$0xff]  ;;  %v3841_v48 = vld [vmem:[#allocation3 + $0xb8] sm:$0x3] }
 0x4e6   : > { %3728 = vst.msk [vmem:[#allocation3 + $0xc1] sm:$0xff] %vm370_vm10, %v13014_v15  ;;  %v4036_v40 = vrot.slane %v3840_v51, 2  ;;  %v4038_v42 = vrot.slane %v3841_v48, 2  ;;  %v3956_v61 = vrot.slane %v3840_v51, 1  ;;  %v3958_v55 = vrot.slane %v3841_v48, 1 }
 0x4e7   : > { %v3549_v50 = vpop.f32.mrf.mxu2  ;;  %v7528_v16 = vpack.i.bf16 %v3840_v51, %v3839_v44  ;;  %v11641_v44 = vpop.f32.mrf.mxu1 }
 0x4e8   : > { %v3550_v14 = vadd.f32 %v3549_v50, %v3461_v6  ;;  %v11617_v13 = vsel %vm663_vm1, %v4035_v39, %v4036_v40  ;;  %v11620_v47 = vsel %vm663_vm1, %v4036_v40, %v4038_v42  ;;  %v11623_v15 = vsel %vm582_vm0, %v3955_v8, %v3956_v61 }
 0x4e9   : > { %13362 = vst [vmem:[#allocation14_spill] sm:$0xff] %v11623_v15  ;;  %v4955_v56 = vpack.c.bf16 %v11620_v47, %v11617_v13  ;;  %v7523_v48 = vpack.i.bf16 %v11617_v13, %v11559_v9  ;;  %v11630_v60 = vsel %vm582_vm0, %v3956_v61, %v3958_v55  ;;  %v13365_v55 = vpack.i.bf16 %v11306_v63, %v11340_v35 }
 0x4ea   : > { %13363 = vst [vmem:[#allocation41_spill] sm:$0xff] %v11630_v60  ;;  %v11633_v6 = vadd.f32 %v11518_v32, %v3550_v14  ;;  %v11637_v39 = vpack.i.bf16 %v11630_v60, %v11623_v15  ;;  %v3464_v32 = vadd.f32 %v11180_v12, %v11405_v37  ;;  %v3466_v14 = vadd.f32 %v11180_v12, %v11445_v53 }
 0x4eb   : > { %7529 = vrot.lane.b32.xlu0 %v7528_v16, %s7992_s12  ;;  %6051 = vmatmul.msk.bf16.gmra.mxu1 %vm370_vm10, %v4955_v56 }
 0x4ec   : > { %13364 = vst [vmem:[#allocation32_spill] sm:$0xff] %v11633_v6  ;;  %v13017_v51 = vmax.f32 %v11633_v6, 0.0  ;;  %7524 = vrot.lane.b32.xlu2 %v7523_v48, %s7990_s26  ;;  %7359 = vrot.lane.b32.xlu1 %v11637_v39, %s7990_s26  ;;  %v11654_v8 = vpop.f32.mrf.mxu3 }
 0x4ed   : > { %v3842_v50 = vld [vmem:[#allocation3 + $0xc0] sm:$0xff] }
 0x4ee   : > { %3729 = vst.msk [vmem:[#allocation3 + $0xc9] sm:$0xff] %vm370_vm10, %v13017_v51 }
 0x4ef   : > { %v3552_v40 = vpop.f32.mrf.mxu2  ;;  %v11670_v24 = vpop.f32.mrf.mxu1 }
 0x4f0   : > { %v3553_v42 = vadd.f32 %v3552_v40, %v3464_v32  ;;  %v3960_v32 = vrot.slane %v3842_v50, 1  ;;  %v4040_v40 = vrot.slane %v3842_v50, 2 }
 0x4f2   : > { %v11657_v61 = vadd.f32 %v11543_v20, %v3553_v42 }
 0x4f3   : > { %7544 = vrot.lane.b32.xlu0 %v7528_v16, %s7993_s21 }
 0x4f4   : > { %v13020_v37 = vmax.f32 %v11657_v61, 0.0  ;;  %7539 = vrot.lane.b32.xlu2 %v7538_v30, %s7992_s12  ;;  %7364 = vrot.lane.b32.xlu1 %v13365_v55, %s7990_s26 }
 0x4f5   : > { %v3843_v20 = vld [vmem:[#allocation3 + $0xc8] sm:$0xff]  ;;  %v3844_v48 = vld [vmem:[#allocation3 + $0xd0] sm:$0x3] }
 0x4f6   : > { %3730 = vst.msk [vmem:[#allocation3 + $0xd9] sm:$0xff] %vm370_vm10, %v13020_v37  ;;  %v3961_v16 = vrot.slane %v3843_v20, 1  ;;  %v3963_v9 = vrot.slane %v3844_v48, 1  ;;  %v4041_v42 = vrot.slane %v3843_v20, 2  ;;  %v4043_v30 = vrot.slane %v3844_v48, 2 }
 0x4f7   : > { %v3554_v51 = vpop.f32.mrf.mxu2 }
 0x4f8   : > { %v3555_v56 = vadd.f32 %v3554_v51, %v3466_v14  ;;  %v11676_v55 = vsel %vm582_vm0, %v3960_v32, %v3961_v16  ;;  %v11679_v53 = vsel %vm582_vm0, %v3961_v16, %v3963_v9  ;;  %v11682_v15 = vsel %vm663_vm1, %v4040_v40, %v4041_v42  ;;  %v3651_v14 = vpop.f32.mrf.mxu3 }
 0x4f9   : > { %13366 = vst [vmem:[#allocation15_spill] sm:$0xff] %v11676_v55  ;;  %v7558_v60 = vpack.i.bf16 %v11679_v53, %v11676_v55  ;;  %v4044_v37 = vsel %vm663_vm1, %v4041_v42, %v4043_v30  ;;  %v7553_v51 = vpack.i.bf16 %v3843_v20, %v3842_v50  ;;  %v3469_v40 = vadd.f32 %v11180_v12, %v11487_v21  ;;  %v11704_v50 = vpop.f32.mrf.mxu1 }
 0x4fa   : > { %13367 = vst [vmem:[#allocation67_spill] sm:$0xff] %v11679_v53  ;;  %v11688_v0 = vadd.f32 %v11584_v1, %v3555_v56  ;;  %v4958_v48 = vpack.c.bf16 %v4044_v37, %v11682_v15  ;;  %v6119_v1 = vld [vmem:[%s12856_s5 + $0x28] sm:$0xff]  ;;  %v3471_v42 = vadd.f32 %v11180_v12, %v11533_v18 }
 0x4fb   : > { %7559 = vrot.lane.b32.xlu0 %v7558_v60, %s7993_s21  ;;  %5184 = vmatpush.bf16.msrb.mxu3 %v6119_v1 }
 0x4fc   : > { %v13022_v32 = vmax.f32 %v11688_v0, 0.0  ;;  %6052 = vmatmul.msk.bf16.gmra.mxu1 %vm370_vm10, %v4958_v48  ;;  %7554 = vrot.lane.b32.xlu2 %v7553_v51, %s7992_s12 }
 0x4fd   : > { %7369 = vrot.lane.b32.xlu1 %v7558_v60, %s7990_s26  ;;  %v11711_v21 = vld [vmem:[#allocation3 + $0xd8] sm:$0xff] }
 0x4fe   : > { %3731 = vst.msk [vmem:[#allocation3 + $0xe1] sm:$0xff] %vm370_vm10, %v13022_v32  ;;  %v4045_v48 = vrot.slane %v11711_v21, 2 }
 0x4ff   : > { %v3557_v56 = vpop.f32.mrf.mxu2 }
 0x500   : > { %v3558_v20 = vadd.f32 %v3557_v56, %v3469_v40  ;;  %v3653_v1 = vpop.f32.mrf.mxu3 }
 0x501   : > { %v11746_v6 = vpop.f32.mrf.mxu1 }
 0x502   : > { %v11709_v60 = vadd.f32 %v11614_v59, %v3558_v20  ;;  %v3965_v59 = vrot.slane %v11711_v21, 1 }
 0x504   : > { %v13025_v9 = vmax.f32 %v11709_v60, 0.0  ;;  %7569 = vrot.lane.b32.xlu2 %v7553_v51, %s7993_s21 }
 0x505   : > { %7374 = vrot.lane.b32.xlu1 %v11297_v19, %s7992_s12  ;;  %v11719_v30 = vld [vmem:[#allocation3 + $0xe0] sm:$0xff]  ;;  %v3847_v40 = vld [vmem:[#allocation3 + $0xe8] sm:$0x3]  ;;  %v6127_v19 = vld [vmem:[%s12856_s5 + $0x68] sm:$0xff] }
 0x506   : > { %3732 = vst.msk [vmem:[#allocation3 + $0xf1] sm:$0xff] %vm370_vm10, %v13025_v9  ;;  %v4046_v51 = vrot.slane %v11719_v30, 2  ;;  %v4048_v56 = vrot.slane %v3847_v40, 2  ;;  %v3966_v18 = vrot.slane %v11719_v30, 1  ;;  %v3968_v20 = vrot.slane %v3847_v40, 1  ;;  %5273 = vmatpush.bf16.msrb.mxu0 %v6127_v19 }
 0x507   : > { %v3559_v16 = vpop.f32.mrf.mxu2 }
 0x508   : > { %v3560_v32 = vadd.f32 %v3559_v16, %v3471_v42  ;;  %v11732_v55 = vsel %vm663_vm1, %v4045_v48, %v4046_v51  ;;  %v11735_v53 = vsel %vm663_vm1, %v4046_v51, %v4048_v56  ;;  %v11738_v9 = vsel %vm582_vm0, %v3965_v59, %v3966_v18  ;;  %v3656_v51 = vpop.f32.mrf.mxu3 }
 0x509   : > { %13368 = vst [vmem:[#allocation47_spill] sm:$0xff] %v11738_v9  ;;  %v7573_v58 = vpack.i.bf16 %v11732_v55, %v4044_v37  ;;  %v4961_v40 = vpack.c.bf16 %v11735_v53, %v11732_v55  ;;  %v11744_v25 = vsel %vm582_vm0, %v3966_v18, %v3968_v20  ;;  %v3474_v59 = vadd.f32 %v11180_v12, %v11553_v36 }
 0x50a   : > { %13369 = vst [vmem:[#allocation42_spill] sm:$0xff] %v11744_v25  ;;  %v11749_v16 = vadd.f32 %v11654_v8, %v3560_v32  ;;  %v7583_v42 = vpack.i.bf16 %v11744_v25, %v11738_v9  ;;  %v4005_v8 = vrot.slane %v11229_v54, 2  ;;  %v13370_v56 = vrot.slane %v11240_v38, 2  ;;  %v11777_v54 = vpop.permute.xlu1 %7314 }
 0x50b   : > { %7574 = vrot.lane.b32.xlu0 %v7573_v58, %s7990_s26  ;;  %v7588_v20 = vpack.i.bf16 %v4044_v37, %v11682_v15  ;;  %v3476_v38 = vadd.f32 %v11180_v12, %v11596_v27 }
 0x50c   : > { %v13029_v48 = vmax.f32 %v11749_v16, 0.0  ;;  %6053 = vmatmul.msk.bf16.gmra.mxu1 %vm370_vm10, %v4961_v40  ;;  %7584 = vrot.lane.b32.xlu2 %v7583_v42, %s7993_s21  ;;  %v11767_v18 = vsel %vm663_vm1, %v4005_v8, %v13370_v56 }
 0x50d   : > { %7384 = vrot.lane.b32.xlu1 %v7583_v42, %s7990_s26  ;;  %v3848_v40 = vld [vmem:[#allocation3 + $0xf0] sm:$0xff]  ;;  %v7388_v36 = vpack.i.bf16 %v11340_v35, %v11767_v18  ;;  %v11775_v42 = vpop.f32.mrf.mxu1 }
 0x50e   : > { %3733 = vst.msk [vmem:[#allocation3 + $0xf9] sm:$0xff] %vm370_vm10, %v13029_v48  ;;  %v4050_v8 = vrot.slane %v3848_v40, 2 }
 0x50f   : > { %v3562_v32 = vpop.f32.mrf.mxu2 }
 0x510   : > { %v3563_v58 = vadd.f32 %v3562_v32, %v3474_v59 }
 0x512   : > { %v11770_v19 = vadd.f32 %v3651_v14, %v3563_v58  ;;  %v3970_v58 = vrot.slane %v3848_v40, 1 }
 0x513   : > { %7589 = vrot.lane.b32.xlu0 %v7588_v20, %s7992_s12 }
 0x514   : > { %v13033_v59 = vmax.f32 %v11770_v19, 0.0 }
 0x515   : > { %7389 = vrot.lane.b32.xlu1 %v7388_v36, %s7992_s12  ;;  %v3849_v37 = vld [vmem:[#allocation3 + $0xf8] sm:$0xff]  ;;  %v3850_v14 = vld [vmem:[#allocation3 + $0x100] sm:$0x3] }
 0x516   : > { %3734 = vst.msk [vmem:[#allocation3 + $0x109] sm:$0xff] %vm370_vm10, %v13033_v59  ;;  %v4051_v32 = vrot.slane %v3849_v37, 2  ;;  %v4053_v35 = vrot.slane %v3850_v14, 2  ;;  %v3971_v56 = vrot.slane %v3849_v37, 1  ;;  %v3973_v48 = vrot.slane %v3850_v14, 1 }
 0x517   : > { %v3564_v20 = vpop.f32.mrf.mxu2  ;;  %v7603_v17 = vpack.i.bf16 %v3849_v37, %v3848_v40  ;;  %v11816_v37 = vpop.permute.xlu1 %7319 }
 0x518   : > { %v3565_v9 = vadd.f32 %v3564_v20, %v3476_v38  ;;  %v11787_v25 = vsel %vm663_vm1, %v4050_v8, %v4051_v32  ;;  %v11790_v27 = vsel %vm663_vm1, %v4051_v32, %v4053_v35  ;;  %v11793_v36 = vsel %vm582_vm0, %v3970_v58, %v3971_v56  ;;  %v3658_v38 = vpop.f32.mrf.mxu3 }
 0x519   : > { %13371 = vst [vmem:[#allocation65_spill] sm:$0xff] %v11787_v25  ;;  %v4964_v59 = vpack.c.bf16 %v11790_v27, %v11787_v25  ;;  %v7598_v41 = vpack.i.bf16 %v11787_v25, %v11735_v53  ;;  %v11800_v34 = vsel %vm582_vm0, %v3971_v56, %v3973_v48  ;;  %v11814_v48 = vpop.f32.mrf.mxu1  ;;  %v7613_v32 = vpack.i.bf16 %v11735_v53, %v11732_v55 }
 0x51a   : > { %13372 = vst [vmem:[#allocation58_spill] sm:$0xff] %v11790_v27  ;;  %v11802_v14 = vadd.f32 %v3653_v1, %v3565_v9  ;;  %v11806_v8 = vpack.i.bf16 %v11800_v34, %v11793_v36  ;;  %v3479_v9 = vadd.f32 %v11180_v12, %v11641_v44  ;;  %v13377_v20 = vpack.i.bf16 %v11368_v29, %v11309_v43 }
 0x51b   : > { %13373 = vst [vmem:[#allocation57_spill] sm:$0xff] %v11793_v36  ;;  %7604 = vrot.lane.b32.xlu0 %v7603_v17, %s7992_s12  ;;  %7599 = vrot.lane.b32.xlu2 %v7598_v41, %s7990_s26  ;;  %v6118_v41 = vld [vmem:[%s12856_s5 + $0x20] sm:$0xff] }
 0x51c   : > { %13374 = vst [vmem:[#allocation52_spill] sm:$0xff] %v11800_v34  ;;  %v13036_v40 = vmax.f32 %v11802_v14, 0.0  ;;  %6054 = vmatmul.msk.bf16.gmra.mxu1 %vm370_vm10, %v4964_v59  ;;  %5185 = vmatpush.bf16.msrb.mxu3 %v6118_v41  ;;  %v6126_v36 = vld [vmem:[%s12856_s5 + $0x60] sm:$0xff] }
 0x51d   : > { %13375 = vst [vmem:[#allocation54_spill] sm:$0xff] %v11806_v8  ;;  %7399 = vrot.lane.b32.xlu1 %v11806_v8, %s7990_s26  ;;  %v3851_v35 = vld [vmem:[#allocation3 + $0x108] sm:$0xff]  ;;  %5274 = vmatpush.bf16.msrb.mxu0 %v6126_v36 }
 0x51e   : > { %3735 = vst.msk [vmem:[#allocation3 + $0x111] sm:$0xff] %vm370_vm10, %v13036_v40  ;;  %v4055_v41 = vrot.slane %v3851_v35, 2 }
 0x520   : > { %v3567_v1 = vpop.f32.mrf.mxu2  ;;  %v3661_v12 = vpop.f32.mrf.mxu3 }
 0x521   : > { %v3568_v59 = vadd.f32 %v3567_v1, %v3479_v9  ;;  %v3975_v9 = vrot.slane %v3851_v35, 1  ;;  %v11839_v1 = vpop.permute.xlu1 %7324  ;;  %v11854_v34 = vpop.f32.mrf.mxu1 }
 0x523   : > { %v11830_v56 = vadd.f32 %v3656_v51, %v3568_v59  ;;  %7619 = vrot.lane.b32.xlu0 %v7603_v17, %s7993_s21  ;;  %7614 = vrot.lane.b32.xlu2 %v7613_v32, %s7992_s12  ;;  %v11844_v32 = vld [vmem:[%s12855_s4] ss:$0 sm:$0xff] }
 0x524   : > { %v3481_v40 = vadd.f32 %v11844_v32, %v11670_v24 }
 0x525   : > { %13376 = vst [vmem:[#allocation43_spill] sm:$0xff] %v11830_v56  ;;  %v13042_v44 = vmax.f32 %v11830_v56, 0.0  ;;  %7404 = vrot.lane.b32.xlu1 %v13377_v20, %s7990_s26  ;;  %v3852_v55 = vld [vmem:[#allocation3 + $0x110] sm:$0xff]  ;;  %v3853_v53 = vld [vmem:[#allocation3 + $0x118] sm:$0x3] }
 0x526   : > { %v3976_v51 = vrot.slane %v3852_v55, 1  ;;  %v3978_v59 = vrot.slane %v3853_v53, 1  ;;  %v4056_v58 = vrot.slane %v3852_v55, 2  ;;  %v4058_v17 = vrot.slane %v3853_v53, 2 }
 0x527   : > { %3736 = vst.msk [vmem:[#allocation3 + $0x121] sm:$0xff] %vm370_vm10, %v13042_v44  ;;  %v7628_v20 = vpack.i.bf16 %v3852_v55, %v3851_v35 }
 0x528   : > { %v3569_v53 = vpop.f32.mrf.mxu2  ;;  %v11857_v57 = vsel %vm582_vm0, %v3975_v9, %v3976_v51  ;;  %v11860_v25 = vsel %vm582_vm0, %v3976_v51, %v3978_v59  ;;  %v11863_v24 = vsel %vm663_vm1, %v4055_v41, %v4056_v58  ;;  %v11866_v8 = vsel %vm663_vm1, %v4056_v58, %v4058_v17 }
 0x529   : > { %13378 = vst [vmem:[#allocation44_spill] sm:$0xff] %v11857_v57  ;;  %v3570_v35 = vadd.f32 %v3569_v53, %v3481_v40  ;;  %v7633_v55 = vpack.i.bf16 %v11860_v25, %v11857_v57  ;;  %v4967_v44 = vpack.c.bf16 %v11866_v8, %v11863_v24  ;;  %v3663_v40 = vpop.f32.mrf.mxu3  ;;  %v11879_v58 = vpop.permute.xlu1 %7329  ;;  %v3484_v41 = vadd.f32 %v11844_v32, %v11704_v50 }
 0x52a   : > { %13379 = vst [vmem:[#allocation28_spill] sm:$0xff] %v11860_v25  ;;  %v11891_v59 = vpop.f32.mrf.mxu1  ;;  %v7413_v50 = vpack.i.bf16 %v11356_v10, %v11351_v5 }
 0x52b   : > { %13380 = vst [vmem:[#allocation21_spill] sm:$0xff] %v11863_v24  ;;  %v11872_v56 = vadd.f32 %v3658_v38, %v3570_v35  ;;  %7634 = vrot.lane.b32.xlu0 %v7633_v55, %s7993_s21  ;;  %7629 = vrot.lane.b32.xlu2 %v7628_v20, %s7992_s12  ;;  %v6117_v38 = vld [vmem:[%s12856_s5 + $0x18] sm:$0xff] }
 0x52c   : > { %6055 = vmatmul.msk.bf16.gmra.mxu1 %vm370_vm10, %v4967_v44  ;;  %13381 = vst [vmem:[#allocation22_spill] sm:$0xff] %v11879_v58  ;;  %5186 = vmatpush.bf16.msrb.mxu3 %v6117_v38  ;;  %v6116_v38 = vld [vmem:[%s12856_s5 + $0x10] sm:$0xff] }
 0x52d   : > { %v13044_v9 = vmax.f32 %v11872_v56, 0.0  ;;  %7409 = vrot.lane.b32.xlu1 %v7633_v55, %s7990_s26 }
 0x52e   : > { %v11898_v53 = vld [vmem:[#allocation3 + $0x120] sm:$0xff] }
 0x52f   : > { %3737 = vst.msk [vmem:[#allocation3 + $0x129] sm:$0xff] %vm370_vm10, %v13044_v9  ;;  %v4060_v5 = vrot.slane %v11898_v53, 2  ;;  %v3980_v51 = vrot.slane %v11898_v53, 1 }
 0x530   : > { %v3572_v36 = vpop.f32.mrf.mxu2  ;;  %13383 = vst [vmem:[#allocation27_spill] sm:$0xff] %v11898_v53  ;;  %5187 = vmatpush.bf16.msrb.mxu3 %v6116_v38  ;;  %v7663_v38 = vpack.i.bf16 %v11866_v8, %v11863_v24 }
 0x531   : > { %v3573_v44 = vadd.f32 %v3572_v36, %v3484_v41  ;;  %v11902_v55 = vpop.permute.xlu1 %7334 }
 0x532   : > { %13384 = vst [vmem:[#allocation13_spill] sm:$0xff] %v11902_v55 }
 0x533   : > { %v11893_v17 = vadd.f32 %v3661_v12, %v3573_v44  ;;  %7644 = vrot.lane.b32.xlu2 %v7628_v20, %s7993_s21  ;;  %v3486_v12 = vadd.f32 %v11844_v32, %v11746_v6  ;;  %v3666_v44 = vpop.f32.mrf.mxu3 }
 0x535   : > { %13382 = vst [vmem:[#allocation16_spill] sm:$0xff] %v11893_v17  ;;  %v13047_v35 = vmax.f32 %v11893_v17, 0.0  ;;  %7414 = vrot.lane.b32.xlu1 %v7413_v50, %s7992_s12 }
 0x536   : > { %v11904_v41 = vld [vmem:[#allocation3 + $0x128] sm:$0xff]  ;;  %v3856_v36 = vld [vmem:[#allocation3 + $0x130] sm:$0x3] }
 0x537   : > { %13385 = vst [vmem:[#allocation31_spill] sm:$0xff] %v11904_v41  ;;  %v4061_v10 = vrot.slane %v11904_v41, 2  ;;  %v4063_v20 = vrot.slane %v3856_v36, 2  ;;  %v3981_v9 = vrot.slane %v11904_v41, 1  ;;  %v3983_v6 = vrot.slane %v3856_v36, 1  ;;  %v6115_v36 = vld [vmem:[%s12856_s5 + $0x8] sm:$0xff] }
 0x538   : > { %3738 = vst.msk [vmem:[#allocation3 + $0x139] sm:$0xff] %vm370_vm10, %v13047_v35  ;;  %v3574_v50 = vpop.f32.mrf.mxu2  ;;  %5188 = vmatpush.bf16.msrb.mxu3 %v6115_v36 }
 0x539   : > { %v3575_v57 = vadd.f32 %v3574_v50, %v3486_v12  ;;  %v11919_v25 = vsel %vm663_vm1, %v4060_v5, %v4061_v10  ;;  %v11922_v35 = vsel %vm663_vm1, %v4061_v10, %v4063_v20  ;;  %v11929_v27 = vsel %vm582_vm0, %v3980_v51, %v3981_v9  ;;  %v11941_v10 = vpop.f32.mrf.mxu1 }
 0x53a   : > { %v7648_v55 = vpack.i.bf16 %v11919_v25, %v11866_v8  ;;  %v4970_v58 = vpack.c.bf16 %v11922_v35, %v11919_v25  ;;  %13386 = vst [vmem:[#allocation20_spill] sm:$0xff] %v11929_v27  ;;  %v11932_v41 = vsel %vm582_vm0, %v3981_v9, %v3983_v6  ;;  %v3491_v8 = vadd.f32 %v11844_v32, %v11814_v48 }
 0x53b   : > { %13387 = vst [vmem:[#allocation19_spill] sm:$0xff] %v11932_v41  ;;  %v11937_v12 = vadd.f32 %v3663_v40, %v3575_v57  ;;  %v7658_v5 = vpack.i.bf16 %v11932_v41, %v11929_v27  ;;  %v3489_v57 = vadd.f32 %v11844_v32, %v11775_v42  ;;  %v6114_v40 = vld [vmem:[%s12856_s5] sm:$0xff]  ;;  %v3668_v20 = vpop.f32.mrf.mxu3 }
 0x53c   : > { %7649 = vrot.lane.b32.xlu0 %v7648_v55, %s7990_s26  ;;  %6056 = vmatmul.msk.bf16.gmra.mxu1 %vm370_vm10, %v4970_v58 }
 0x53d   : > { %13388 = vst [vmem:[#allocation11_spill] sm:$0xff] %v11937_v12  ;;  %v13053_v51 = vmax.f32 %v11937_v12, 0.0  ;;  %7659 = vrot.lane.b32.xlu2 %v7658_v5, %s7993_s21  ;;  %7419 = vrot.lane.b32.xlu1 %v7658_v5, %s7990_s26 }
 0x53e   : > { %v11948_v9 = vpop.permute.xlu1 %7339  ;;  %5189 = vmatpush.bf16.msrb.mxu3 %v6114_v40 }
 0x53f   : > { %13389 = vst [vmem:[#allocation23_spill] sm:$0xff] %v11948_v9  ;;  %v3857_v6 = vld [vmem:[#allocation3 + $0x138] sm:$0xff] }
 0x540   : > { %3739 = vst.msk [vmem:[#allocation3 + $0x141] sm:$0xff] %vm370_vm10, %v13053_v51  ;;  %v3577_v58 = vpop.f32.mrf.mxu2  ;;  %v4065_v40 = vrot.slane %v3857_v6, 2  ;;  %v3985_v27 = vrot.slane %v3857_v6, 1 }
 0x541   : > { %v3578_v55 = vadd.f32 %v3577_v58, %v3489_v57  ;;  %v11966_v36 = vpop.f32.mrf.mxu1 }
 0x543   : > { %v11960_v50 = vadd.f32 %v3666_v44, %v3578_v55  ;;  %v3671_v17 = vpop.f32.mrf.mxu3 }
 0x544   : > { %7664 = vrot.lane.b32.xlu0 %v7663_v38, %s7992_s12 }
 0x545   : > { %13390 = vst [vmem:[#allocation30_spill] sm:$0xff] %v11960_v50  ;;  %v13058_v42 = vmax.f32 %v11960_v50, 0.0  ;;  %7424 = vrot.lane.b32.xlu1 %v11386_v45, %s7993_s21  ;;  %v6125_v45 = vld [vmem:[%s12856_s5 + $0x58] sm:$0xff] }
 0x546   : > { %v11968_v5 = vpop.permute.xlu1 %7344  ;;  %5275 = vmatpush.bf16.msrb.mxu0 %v6125_v45 }
 0x547   : > { %v3858_v57 = vld [vmem:[#allocation3 + $0x140] sm:$0xff]  ;;  %v3859_v58 = vld [vmem:[#allocation3 + $0x148] sm:$0x3]  ;;  %3740 = vst.msk [vmem:[#allocation3 + $0x151] sm:$0xff] %vm370_vm10, %v13058_v42  ;;  %v7346_v45 = vunpack.i.l.bf16 %v11968_v5 }
 0x548   : > { %v3579_v44 = vpop.f32.mrf.mxu2  ;;  %v4066_v55 = vrot.slane %v3858_v57, 2  ;;  %v4068_v38 = vrot.slane %v3859_v58, 2  ;;  %v3986_v51 = vrot.slane %v3858_v57, 1  ;;  %v7678_v9 = vpack.i.bf16 %v3858_v57, %v3857_v6 }
 0x549   : > { %v3580_v41 = vadd.f32 %v3579_v44, %v3491_v8  ;;  %v3988_v24 = vrot.slane %v3859_v58, 1  ;;  %v11999_v57 = vpop.f32.mrf.mxu1 }
 0x54a   : > { %v11979_v53 = vsel %vm663_vm1, %v4065_v40, %v4066_v55  ;;  %v11982_v48 = vsel %vm663_vm1, %v4066_v55, %v4068_v38  ;;  %v11989_v12 = vsel %vm582_vm0, %v3985_v27, %v3986_v51  ;;  %13394 = vst [vmem:[#allocation46_spill] sm:$0xff] %v11999_v57  ;;  %v7347_v40 = vunpack.i.h.bf16 %v11968_v5 }
 0x54b   : > { %13391 = vst [vmem:[#allocation29_spill] sm:$0xff] %v11979_v53  ;;  %v4973_v42 = vpack.c.bf16 %v11982_v48, %v11979_v53  ;;  %v7673_v50 = vpack.i.bf16 %v11979_v53, %v11922_v35  ;;  %v11991_v8 = vadd.f32 %v3668_v20, %v3580_v41  ;;  %v11997_v6 = vsel %vm582_vm0, %v3986_v51, %v3988_v24 }
 0x54c   : > { %13392 = vst [vmem:[#allocation10_spill] sm:$0xff] %v11989_v12  ;;  %7679 = vrot.lane.b32.xlu0 %v7678_v9, %s7992_s12  ;;  %v12004_v27 = vpack.i.bf16 %v11997_v6, %v11989_v12  ;;  %v3494_v41 = vadd.f32 %v11844_v32, %v11854_v34  ;;  %v7317_v20 = vunpack.i.h.bf16 %v11777_v54  ;;  %v7316_v34 = vunpack.i.l.bf16 %v11777_v54  ;;  %v7853_v12 = vld [vmem:[#allocation3] sm:$0xff] }
 0x54d   : > { %6057 = vmatmul.msk.bf16.gmra.mxu1 %vm370_vm10, %v4973_v42  ;;  %7674 = vrot.lane.b32.xlu2 %v7673_v50, %s7990_s26  ;;  %13393 = vst [vmem:[#allocation34_spill] sm:$0xff] %v11997_v6  ;;  %v13063_v44 = vmax.f32 %v11991_v8, 0.0  ;;  %v6133_v50 = vld [vmem:[%s12858_s7 + $0x8] sm:$0xff]  ;;  %v7688_v38 = vpack.i.bf16 %v11922_v35, %v11919_v25  ;;  %v3673_v42 = vpop.f32.mrf.mxu3  ;;  %v3496_v54 = vadd.f32 %v11844_v32, %v11891_v59 }
 0x54e   : > { %v12006_v58 = vpop.permute.xlu1 %7349  ;;  %7429 = vrot.lane.b32.xlu1 %v12004_v27, %s7990_s26  ;;  %5571 = vmatpush.bf16.msrb.mxu2 %v6133_v50  ;;  %v4746_v25 = vsel %vm370_vm10, %v7853_v12, %v7316_v34 }
 0x54f   : > { %13395 = vst [vmem:[#allocation26_spill] sm:$0xff] %v12006_v58  ;;  %v4778_v59 = vsel %vm3008_vm13, %v4746_v25, %v7346_v45 }
 0x550   : > { %3741 = vst.msk [vmem:[#allocation3 + $0x159] sm:$0xff] %vm370_vm10, %v13063_v44  ;;  %v3582_v24 = vpop.f32.mrf.mxu2  ;;  %v7852_v44 = vld [vmem:[#allocation3 + $0x8] sm:$0xff] }
 0x551   : > { %v3583_v51 = vadd.f32 %v3582_v24, %v3494_v41  ;;  %v3860_v24 = vld [vmem:[#allocation3 + $0x150] sm:$0xff]  ;;  %v12039_v6 = vpop.f32.mrf.mxu1 }
 0x552   : > { %13396 = vst [vmem:[#allocation68_spill] sm:$0xff] %v12039_v6  ;;  %v4070_v57 = vrot.slane %v3860_v24, 2 }
 0x553   : > { %v12023_v55 = vadd.f32 %v3671_v17, %v3583_v51  ;;  %v4747_v17 = vsel %vm370_vm10, %v7852_v44, %v7317_v20  ;;  %v13397_v44 = vpack.i.bf16 %v11309_v43, %v11306_v63  ;;  %v3990_v20 = vrot.slane %v3860_v24, 1 }
 0x554   : > { %7694 = vrot.lane.b32.xlu0 %v7678_v9, %s7993_s21  ;;  %v4779_v35 = vsel %vm3008_vm13, %v4747_v17, %v7347_v40 }
 0x555   : > { %v13066_v41 = vmax.f32 %v12023_v55, 0.0  ;;  %7689 = vrot.lane.b32.xlu2 %v7688_v38, %s7992_s12 }
 0x556   : > { %v7355_v51 = vpop.permute.xlu1 %7354  ;;  %7434 = vrot.lane.b32.xlu1 %v13397_v44, %s7992_s12 }
 0x557   : > { %3742 = vst.msk [vmem:[#allocation3 + $0x169] sm:$0xff] %vm370_vm10, %v13066_v41  ;;  %v7357_v9 = vunpack.i.h.bf16 %v7355_v51  ;;  %v7356_v5 = vunpack.i.l.bf16 %v7355_v51  ;;  %v3861_v50 = vld [vmem:[#allocation3 + $0x158] sm:$0xff]  ;;  %v3862_v38 = vld [vmem:[#allocation3 + $0x160] sm:$0x3] }
 0x558   : > { %v3584_v12 = vpop.f32.mrf.mxu2  ;;  %v3991_v34 = vrot.slane %v3861_v50, 1  ;;  %v3993_v40 = vrot.slane %v3862_v38, 1  ;;  %v4071_v25 = vrot.slane %v3861_v50, 2  ;;  %v4073_v44 = vrot.slane %v3862_v38, 2 }
 0x559   : > { %v4810_v17 = vsel %vm3041_vm14, %v4778_v59, %v7356_v5  ;;  %v4811_v41 = vsel %vm3041_vm14, %v4779_v35, %v7357_v9  ;;  %v3585_v51 = vadd.f32 %v3584_v12, %v3496_v54  ;;  %v7703_v53 = vpack.i.bf16 %v3861_v50, %v3860_v24  ;;  %v3676_v24 = vpop.f32.mrf.mxu3  ;;  %v12077_v50 = vpop.f32.mrf.mxu1 }
 0x55a   : > { %v4938_v58 = vpack.c.bf16 %v4811_v41, %v4810_v17  ;;  %v12049_v6 = vsel %vm582_vm0, %v3990_v20, %v3991_v34  ;;  %v12052_v45 = vsel %vm582_vm0, %v3991_v34, %v3993_v40  ;;  %v12059_v5 = vsel %vm663_vm1, %v4070_v57, %v4071_v25  ;;  %13401 = vst [vmem:[#allocation63_spill] sm:$0xff] %v12077_v50  ;;  %v12089_v34 = vld [vmem:[#allocation3 + $0x48] sm:$0xff]  ;;  %v12091_v40 = vld [vmem:[#allocation3 + $0x50] sm:$0xff] }
 0x55b   : > { %13398 = vst [vmem:[#allocation56_spill] sm:$0xff] %v12049_v6  ;;  %v12054_v63 = vadd.f32 %v3673_v42, %v3585_v51  ;;  %v7708_v43 = vpack.i.bf16 %v12052_v45, %v12049_v6  ;;  %v7438_v41 = vpack.i.bf16 %v11767_v18, %v12049_v6  ;;  %v4074_v35 = vsel %vm663_vm1, %v4071_v25, %v4073_v44 }
 0x55c   : > { %13399 = vst [vmem:[#allocation17_spill] sm:$0xff] %v12052_v45  ;;  %5190 = vmatmul.bf16.vlgmr.msrb.gmra.mxu3 %v4938_v58  ;;  %v4976_v42 = vpack.c.bf16 %v4074_v35, %v12059_v5  ;;  %v3499_v57 = vadd.f32 %v11844_v32, %v11941_v10  ;;  %v7723_v12 = vpack.i.bf16 %v12052_v45, %v4074_v35 }
 0x55d   : > { %v13070_v54 = vmax.f32 %v12054_v63, 0.0  ;;  %7709 = vrot.lane.b32.xlu0 %v7708_v43, %s7993_s21  ;;  %7704 = vrot.lane.b32.xlu2 %v7703_v53, %s7992_s12  ;;  %v7443_v17 = vpack.i.bf16 %v12091_v40, %v12089_v34  ;;  %v3501_v44 = vadd.f32 %v11844_v32, %v11966_v36  ;;  %v6124_v32 = vld [vmem:[%s12856_s5 + $0x50] sm:$0xff] }
 0x55e   : > { %v12068_v9 = vpop.permute.xlu1 %7359  ;;  %6058 = vmatmul.msk.bf16.gmra.mxu1 %vm370_vm10, %v4976_v42  ;;  %7439 = vrot.lane.b32.xlu1 %v7438_v41, %s7990_s26  ;;  %v12084_v10 = vld [vmem:[#allocation3 + $0x168] sm:$0xff] }
 0x55f   : > { %13400 = vst [vmem:[#allocation40_spill] sm:$0xff] %v12068_v9  ;;  %v3995_v41 = vrot.slane %v12084_v10, 1  ;;  %5276 = vmatpush.bf16.msrb.mxu0 %v6124_v32 }
 0x560   : > { %3743 = vst.msk [vmem:[#allocation3 + $0x171] sm:$0xff] %vm370_vm10, %v13070_v54  ;;  %v3587_v18 = vpop.f32.mrf.mxu2 }
 0x561   : > { %v3588_v58 = vadd.f32 %v3587_v18, %v3499_v57  ;;  %13403 = vst [vmem:[#allocation66_spill] sm:$0xff] %v12084_v10  ;;  %v12125_v50 = vpop.f32.mrf.mxu1 }
 0x562   : > { %13408 = vst [vmem:[#allocation69_spill] sm:$0xff] %v12125_v50 }
 0x563   : > { %v12081_v59 = vadd.f32 %v3676_v24, %v3588_v58  ;;  %v3678_v24 = vpop.f32.mrf.mxu3 }
 0x565   : > { %13402 = vst [vmem:[#allocation61_spill] sm:$0xff] %v12081_v59  ;;  %v13069_v20 = vmax.f32 %v12081_v59, 0.0  ;;  %7724 = vrot.lane.b32.xlu0 %v7723_v12, %s7990_s26  ;;  %7719 = vrot.lane.b32.xlu2 %v7703_v53, %s7993_s21  ;;  %v4075_v53 = vrot.slane %v12084_v10, 2 }
 0x566   : > { %v12095_v51 = vpop.permute.xlu1 %7364  ;;  %7444 = vrot.lane.b32.xlu1 %v7443_v17, %s7993_s21 }
 0x567   : > { %v12097_v25 = vld [vmem:[#allocation3 + $0x170] sm:$0xff]  ;;  %v3865_v43 = vld [vmem:[#allocation3 + $0x178] sm:$0x3]  ;;  %3744 = vst.msk [vmem:[#allocation3 + $0x181] sm:$0xff] %vm370_vm10, %v13069_v20 }
 0x568   : > { %13404 = vst [vmem:[#allocation37_spill] sm:$0xff] %v12097_v25  ;;  %v3589_v42 = vpop.f32.mrf.mxu2  ;;  %v4076_v57 = vrot.slane %v12097_v25, 2  ;;  %v4078_v18 = vrot.slane %v3865_v43, 2  ;;  %v3996_v58 = vrot.slane %v12097_v25, 1  ;;  %v3998_v12 = vrot.slane %v3865_v43, 1 }
 0x569   : > { %v3590_v36 = vadd.f32 %v3589_v42, %v3501_v44  ;;  %v7738_v43 = vpack.i.bf16 %v4074_v35, %v12059_v5  ;;  %v13410_v35 = vpack.i.bf16 %v11432_v26, %v11371_v31 }
 0x56a   : > { %v4077_v20 = vsel %vm663_vm1, %v4075_v53, %v4076_v57  ;;  %v4079_v38 = vsel %vm663_vm1, %v4076_v57, %v4078_v18  ;;  %v12115_v54 = vsel %vm582_vm0, %v3995_v41, %v3996_v58  ;;  %v12118_v17 = vsel %vm582_vm0, %v3996_v58, %v3998_v12  ;;  %v12142_v18 = vpop.f32.mrf.mxu1  ;;  %v12144_v58 = vld [vmem:[#allocation3 + $0x60] sm:$0xff]  ;;  %v12146_v12 = vld [vmem:[#allocation3 + $0x68] sm:$0xff] }
 0x56b   : > { %13405 = vst [vmem:[#allocation53_spill] sm:$0xff] %v12115_v54  ;;  %v12120_v6 = vadd.f32 %v3678_v24, %v3590_v36  ;;  %v7733_v45 = vpack.i.bf16 %v12118_v17, %v12115_v54  ;;  %v4979_v44 = vpack.c.bf16 %v4079_v38, %v4077_v20  ;;  %v7748_v42 = vpack.i.bf16 %v4079_v38, %v4077_v20 }
 0x56c   : > { %13406 = vst [vmem:[#allocation36_spill] sm:$0xff] %v12118_v17  ;;  %v7366_v57 = vunpack.i.l.bf16 %v12095_v51  ;;  %v7453_v32 = vpack.i.bf16 %v12146_v12, %v12144_v58 }
 0x56d   : > { %13407 = vst [vmem:[#allocation64_spill] sm:$0xff] %v12120_v6  ;;  %v13073_v53 = vmax.f32 %v12120_v6, 0.0  ;;  %7739 = vrot.lane.b32.xlu0 %v7738_v43, %s7992_s12  ;;  %7734 = vrot.lane.b32.xlu2 %v7733_v45, %s7993_s21 }
 0x56e   : > { %6059 = vmatmul.msk.bf16.gmra.mxu1 %vm370_vm10, %v4979_v44  ;;  %7449 = vrot.lane.b32.xlu1 %v13410_v35, %s7990_s26  ;;  %v3866_v24 = vld [vmem:[#allocation3 + $0x180] sm:$0xff]  ;;  %13411 = vst [vmem:[#allocation71_spill] sm:$0xff] %v12142_v18  ;;  %v4843_v17 = vsel %vm370_vm10, %v11260_v28, %v7366_v57 }
 0x56f   : > { %3745 = vst.msk [vmem:[#allocation3 + $0x189] sm:$0xff] %vm370_vm10, %v13073_v53  ;;  %v12133_v41 = vpop.permute.xlu1 %7369  ;;  %v4120_v38 = vrot.slane %v3866_v24, 2  ;;  %v4083_v10 = vrot.slane %v3866_v24, 1  ;;  %v7858_v57 = vld [vmem:[#allocation3 + $0x20] sm:$0xff] }
 0x570   : > { %13409 = vst [vmem:[#allocation70_spill] sm:$0xff] %v12133_v41 }
 0x571   : > { %13412 = vst [vmem:[#allocation72_spill] sm:$0xff] %v12144_v58 }
 0x572   : > { %v12168_v58 = vpop.f32.mrf.mxu1 }
 0x573   : > { %13413 = vst [vmem:[#allocation73_spill] sm:$0xff] %v12168_v58 }
 0x575   : > { %7749 = vrot.lane.b32.xlu2 %v7748_v42, %s7990_s26 }
 0x576   : > { %v3867_v36 = vld [vmem:[#allocation3 + $0x188] sm:$0xff]  ;;  %v3868_v43 = vld [vmem:[#allocation3 + $0x190] sm:$0x3]  ;;  %7454 = vrot.lane.b32.xlu1 %v7453_v32, %s7992_s12 }
 0x577   : > { %v12150_v44 = vpop.permute.xlu1 %7374  ;;  %v12152_v35 = vpack.i.bf16 %v3867_v36, %v3866_v24  ;;  %v4121_v20 = vrot.slane %v3867_v36, 2  ;;  %v4123_v53 = vrot.slane %v3868_v43, 2  ;;  %v4084_v6 = vrot.slane %v3867_v36, 1 }
 0x578   : > { %v7377_v54 = vunpack.i.h.bf16 %v12150_v44  ;;  %v4086_v59 = vrot.slane %v3868_v43, 1  ;;  %v7322_v24 = vunpack.i.h.bf16 %v11816_v37 }
 0x579   : > { %7754 = vrot.lane.b32.xlu0 %v12152_v35, %s7992_s12  ;;  %v4122_v18 = vsel %vm663_vm1, %v4120_v38, %v4121_v20  ;;  %v4124_v50 = vsel %vm663_vm1, %v4121_v20, %v4123_v53  ;;  %v12175_v28 = vsel %vm582_vm0, %v4083_v10, %v4084_v6 }
 0x57a   : > { %v12163_v41 = vsel %vm3008_vm13, %v4843_v17, %v7377_v54  ;;  %v4982_v9 = vpack.c.bf16 %v4124_v50, %v4122_v18  ;;  %v12178_v54 = vsel %vm582_vm0, %v4084_v6, %v4086_v59  ;;  %v12182_v17 = vld [vmem:[#allocation3 + $0x1a0] sm:$0xff]  ;;  %v7778_v53 = vpack.i.bf16 %v4124_v50, %v4122_v18  ;;  %v6123_v50 = vld [vmem:[%s12856_s5 + $0x48] sm:$0xff] }
 0x57b   : > { %v13414_v6 = vpack.i.bf16 %v11371_v31, %v11368_v29  ;;  %v4749_v18 = vsel %vm370_vm10, %v7858_v57, %v7322_v24  ;;  %5277 = vmatpush.bf16.msrb.mxu0 %v6123_v50  ;;  %v13417_v57 = vmax.f32 %v11190_v33, 0.0  ;;  %v13420_v33 = vmax.f32 %v11688_v0, 0.0 }
 0x57d   : > { %7764 = vrot.lane.b32.xlu2 %v7733_v45, %s7990_s26  ;;  %v12180_v45 = vld [vmem:[#allocation3 + $0x198] sm:$0xff] }
 0x57e   : > { %6060 = vmatmul.msk.bf16.gmra.mxu1 %vm370_vm10, %v4982_v9  ;;  %7459 = vrot.lane.b32.xlu1 %v11452_v4, %s7993_s21  ;;  %v7783_v4 = vpack.i.bf16 %v12182_v17, %v12180_v45  ;;  %v7321_v9 = vunpack.i.l.bf16 %v11816_v37  ;;  %v7859_v37 = vld [vmem:[#allocation3 + $0x18] sm:$0xff] }
 0x57f   : > { %v12166_v25 = vpop.permute.xlu1 %7384 }
 0x580   : > { %v4748_v38 = vsel %vm370_vm10, %v7859_v37, %v7321_v9  ;;  %v13415_v9 = vpack.i.bf16 %v11503_v49, %v11435_v23  ;;  %v6122_v49 = vld [vmem:[%s12856_s5 + $0x40] sm:$0xff] }
 0x581   : > { %7769 = vrot.lane.b32.xlu0 %v7748_v42, %s7992_s12  ;;  %v7395_v42 = vpop.permute.xlu0 %7394  ;;  %5278 = vmatpush.bf16.msrb.mxu0 %v6122_v49 }
 0x582   : > { %v7397_v36 = vunpack.i.h.bf16 %v7395_v42  ;;  %v7396_v20 = vunpack.i.l.bf16 %v7395_v42  ;;  %v12212_v42 = vld [vmem:[#allocation3 + $0x78] sm:$0xff] }
 0x585   : > { %7779 = vrot.lane.b32.xlu2 %v7778_v53, %s7990_s26 }
 0x586   : > { %7464 = vrot.lane.b32.xlu1 %v13414_v6, %s7992_s12 }
 0x587   : > { %v7390_v10 = vpop.permute.xlu1 %7389 }
 0x588   : > { %v7392_v59 = vunpack.i.h.bf16 %v7390_v10  ;;  %v7391_v43 = vunpack.i.l.bf16 %v7390_v10  ;;  %v12214_v10 = vld [vmem:[#allocation3 + $0x80] sm:$0xff] }
 0x589   : > { %7784 = vrot.lane.b32.xlu0 %v7783_v4, %s7992_s12 }
 0x58a   : > { %v4781_v53 = vsel %vm3008_vm13, %v4749_v18, %v7392_v59  ;;  %v4780_v31 = vsel %vm3008_vm13, %v4748_v38, %v7391_v43  ;;  %v7478_v59 = vpack.i.bf16 %v12214_v10, %v12212_v42  ;;  %v13418_v18 = vmax.f32 %v11657_v61, 0.0  ;;  %v12234_v43 = vld [vmem:[#allocation3 + $0x98] sm:$0xff] }
 0x58b   : > { %v4813_v29 = vsel %vm3041_vm14, %v4781_v53, %v7397_v36  ;;  %v4812_v6 = vsel %vm3041_vm14, %v4780_v31, %v7396_v20  ;;  %v12232_v36 = vld [vmem:[#allocation3 + $0x90] sm:$0xff]  ;;  %v7367_v38 = vunpack.i.h.bf16 %v12095_v51 }
 0x58c   : > { %v4941_v58 = vpack.c.bf16 %v4813_v29, %v4812_v6  ;;  %v7503_v37 = vpack.i.bf16 %v12234_v43, %v12232_v36  ;;  %v13421_v29 = vmax.f32 %v11227_v22, 0.0  ;;  %v13422_v6 = vmax.f32 %v11709_v60, 0.0 }
 0x58d   : > { %v4844_v0 = vsel %vm370_vm10, %v11312_v46, %v7367_v38  ;;  %v13424_v46 = vmax.f32 %v11749_v16, 0.0 }
 0x58e   : > { %5195 = vmatmul.bf16.gmra.mxu3 %v4941_v58  ;;  %7469 = vrot.lane.b32.xlu1 %v7453_v32, %s7993_s21  ;;  %v13416_v32 = vpack.i.bf16 %v11435_v23, %v11432_v26  ;;  %v13419_v23 = vmax.f32 %v11206_v2, 0.0 }
 0x58f   : > { %v12203_v24 = vpop.permute.xlu1 %7399 }
 0x596   : > { %7474 = vrot.lane.b32.xlu1 %v13415_v9, %s7990_s26 }
 0x597   : > { %v12206_v4 = vpop.permute.xlu1 %7404 }
 0x598   : > { %v7406_v20 = vunpack.i.l.bf16 %v12206_v4 }
 0x59e   : > { %7479 = vrot.lane.b32.xlu1 %v7478_v59, %s7992_s12  ;;  %v4845_v59 = vsel %vm370_vm10, %v11317_v7, %v7406_v20  ;;  %v13425_v7 = vpack.i.bf16 %v11682_v15, %v11620_v47  ;;  %v13429_v15 = vmax.f32 %v11320_v62, 0.0  ;;  %v7578_v62 = vpack.i.bf16 %v11719_v30, %v11711_v21  ;;  %v7865_v21 = vld [vmem:[#allocation3 + $0x30] sm:$0xff] }
 0x59f   : > { %v12218_v50 = vpop.permute.xlu1 %7409 }
 0x5a6   : > { %7489 = vrot.lane.b32.xlu1 %v13416_v32, %s7992_s12 }
 0x5a7   : > { %v7415_v58 = vpop.permute.xlu1 %7414 }
 0x5a8   : > { %v7417_v53 = vunpack.i.h.bf16 %v7415_v58  ;;  %v7416_v31 = vunpack.i.l.bf16 %v7415_v58 }
 0x5aa   : > { %v4876_v51 = vsel %vm3008_vm13, %v4844_v0, %v7416_v31  ;;  %v4877_v32 = vsel %vm3008_vm13, %v4845_v59, %v7417_v53  ;;  %v7327_v53 = vunpack.i.h.bf16 %v11839_v1 }
 0x5ab   : > { %3746 = vxpose.xlu2.b32.start [1/16] (narrow) %v13417_v57, 32  ;;  %3778 = vxpose.xlu0.b32.start [1/16] (narrow) %v13418_v18, 32  ;;  %v13423_v57 = vmax.f32 %v11265_v52, 0.0  ;;  %v13428_v52 = vpack.i.bf16 %v11620_v47, %v11617_v13  ;;  %v6132_v47 = vld [vmem:[%s12858_s7] sm:$0xff] }
 0x5ac   : > { %5572 = vmatpush.bf16.msrb.mxu2 %v6132_v47  ;;  %v7407_v47 = vunpack.i.h.bf16 %v12206_v4 }
 0x5ae   : > { %7504 = vrot.lane.b32.xlu1 %v7503_v37, %s7992_s12 }
 0x5af   : > { %v12238_v26 = vpop.permute.xlu1 %7419 }
 0x5b3   : > { %3747 = vxpose.xlu2.b32.cont [2/16] (narrow) %v13419_v23, 32  ;;  %3779 = vxpose.xlu0.b32.cont [2/16] (narrow) %v13420_v33, 32  ;;  %v7380_v23 = vpop.permute.xlu2 %7379 }
 0x5b4   : > { %v7382_v13 = vunpack.i.h.bf16 %v7380_v23 }
 0x5b6   : > { %7519 = vrot.lane.b32.xlu1 %v7503_v37, %s7993_s21  ;;  %v13427_v37 = vmax.f32 %v11770_v19, 0.0  ;;  %v7381_v19 = vunpack.i.l.bf16 %v7380_v23  ;;  %v13437_v23 = vmax.f32 %v11872_v56, 0.0 }
 0x5b7   : > { %v7425_v61 = vpop.permute.xlu1 %7424 }
 0x5b8   : > { %v7427_v2 = vunpack.i.h.bf16 %v7425_v61  ;;  %v7426_v9 = vunpack.i.l.bf16 %v7425_v61  ;;  %v13430_v61 = vmax.f32 %v11802_v14, 0.0  ;;  %v7326_v14 = vunpack.i.l.bf16 %v11839_v1 }
 0x5ba   : > { %v4908_v22 = vsel %vm3041_vm14, %v4876_v51, %v7426_v9  ;;  %v4909_v60 = vsel %vm3041_vm14, %v4877_v32, %v7427_v2  ;;  %v7864_v9 = vld [vmem:[#allocation3 + $0x38] sm:$0xff]  ;;  %v4750_v30 = vsel %vm370_vm10, %v7865_v21, %v7326_v14  ;;  %v13431_v51 = vld [vmem:[#allocation18_spill] sm:$0xff] }
 0x5bb   : > { %3748 = vxpose.xlu2.b32.cont [3/16] (narrow) %v13421_v29, 32  ;;  %3780 = vxpose.xlu0.b32.cont [3/16] (narrow) %v13422_v6, 32  ;;  %v4942_v58 = vpack.c.bf16 %v4909_v60, %v4908_v22  ;;  %v4751_v0 = vsel %vm370_vm10, %v7864_v9, %v7327_v53  ;;  %v13432_v32 = vmax.f32 %v13431_v51, 0.0  ;;  %v13449_v9 = vld [vmem:[#allocation38_spill] sm:$0xff] }
 0x5be   : > { %7534 = vrot.lane.b32.xlu1 %v11637_v39, %s7993_s21  ;;  %v13426_v39 = vmax.f32 %v11283_v3, 0.0  ;;  %v7376_v3 = vunpack.i.l.bf16 %v12150_v44 }
 0x5c0   : > { %v12262_v49 = vpop.permute.xlu1 %7429 }
 0x5c3   : > { %3749 = vxpose.xlu2.b32.cont [4/16] (narrow) %v13423_v57, 32  ;;  %3781 = vxpose.xlu0.b32.cont [4/16] (narrow) %v13424_v46, 32  ;;  %v13433_v57 = vld [vmem:[#allocation43_spill] sm:$0xff] }
 0x5c6   : > { %7549 = vrot.lane.b32.xlu1 %v13425_v7, %s7990_s26 }
 0x5c8   : > { %v7435_v18 = vpop.permute.xlu1 %7434 }
 0x5c9   : > { %v7437_v31 = vunpack.i.h.bf16 %v7435_v18  ;;  %v7436_v29 = vunpack.i.l.bf16 %v7435_v18 }
 0x5cb   : > { %3750 = vxpose.xlu2.b32.cont [5/16] (narrow) %v13426_v39, 32  ;;  %3782 = vxpose.xlu0.b32.cont [5/16] (narrow) %v13427_v37, 32  ;;  %v4782_v22 = vsel %vm3008_vm13, %v4750_v30, %v7436_v29  ;;  %v4783_v60 = vsel %vm3008_vm13, %v4751_v0, %v7437_v31  ;;  %v13435_v37 = vld [vmem:[#allocation49_spill] sm:$0xff]  ;;  %v13446_v29 = vld [vmem:[#allocation12_spill] sm:$0xff]  ;;  %v13450_v0 = vld [vmem:[#allocation11_spill] sm:$0xff] }
 0x5cc   : > { %v13451_v21 = vmax.f32 %v13450_v0, 0.0 }
 0x5ce   : > { %7564 = vrot.lane.b32.xlu1 %v13428_v52, %s7992_s12  ;;  %v13436_v52 = vmax.f32 %v13435_v37, 0.0  ;;  %v13458_v37 = vld [vmem:[#allocation27_spill] sm:$0xff] }
 0x5d0   : > { %v12280_v16 = vpop.permute.xlu1 %7439 }
 0x5d1   : > { %v7442_v33 = vunpack.i.h.bf16 %v12280_v16 }
 0x5d3   : > { %3751 = vxpose.xlu2.b32.cont [6/16] (narrow) %v13429_v15, 32  ;;  %3783 = vxpose.xlu0.b32.cont [6/16] (narrow) %v13430_v61, 32  ;;  %v4842_v38 = vsel %vm370_vm10, %v11257_v11, %v7442_v33  ;;  %v4907_v11 = vsel %vm3041_vm14, %v12163_v41, %v7382_v13  ;;  %v13434_v41 = vmax.f32 %v13433_v57, 0.0  ;;  %v13438_v33 = vld [vmem:[#allocation54_spill] sm:$0xff]  ;;  %v13439_v61 = vld [vmem:[#allocation55_spill] sm:$0xff] }
 0x5d4   : > { %v4874_v20 = vsel %vm3008_vm13, %v4842_v38, %v7376_v3  ;;  %v13440_v3 = vmax.f32 %v13439_v61, 0.0 }
 0x5d5   : > { %v4906_v44 = vsel %vm3041_vm14, %v4874_v20, %v7381_v19  ;;  %v13441_v19 = vld [vmem:[#allocation16_spill] sm:$0xff]  ;;  %v13443_v20 = vld [vmem:[#allocation21_spill] sm:$0xff] }
 0x5d6   : > { %7579 = vrot.lane.b32.xlu1 %v7578_v62, %s7992_s12  ;;  %v4939_v6 = vpack.c.bf16 %v4907_v11, %v4906_v44  ;;  %v13442_v38 = vmax.f32 %v13441_v19, 0.0  ;;  %v13447_v11 = vmax.f32 %v13446_v29, 0.0 }
 0x5d8   : > { %v7445_v2 = vpop.permute.xlu1 %7444  ;;  %5279 = vmatmul.bf16.vlgmr.msrb.gmra.mxu0 %v4939_v6  ;;  %v13448_v6 = vld [vmem:[#allocation35_spill] sm:$0xff] }
 0x5d9   : > { %v7447_v59 = vunpack.i.h.bf16 %v7445_v2  ;;  %v7446_v1 = vunpack.i.l.bf16 %v7445_v2  ;;  %v4846_v2 = vsel %vm370_vm10, %v13448_v6, %v7407_v47  ;;  %v13464_v6 = vld [vmem:[#allocation51_spill] sm:$0xff] }
 0x5db   : > { %3752 = vxpose.xlu2.b32.cont [7/16] (narrow) %v13432_v32, 32  ;;  %3784 = vxpose.xlu0.b32.cont [7/16] (narrow) %v13434_v41, 32  ;;  %v4814_v46 = vsel %vm3041_vm14, %v4782_v22, %v7446_v1  ;;  %v4815_v7 = vsel %vm3041_vm14, %v4783_v60, %v7447_v59  ;;  %v13452_v32 = vld [vmem:[#allocation65_spill] sm:$0xff]  ;;  %v13454_v41 = vld [vmem:[#allocation24_spill] sm:$0xff] }
 0x5dc   : > { %v4944_v18 = vpack.c.bf16 %v4815_v7, %v4814_v46  ;;  %v13455_v46 = vmax.f32 %v13454_v41, 0.0  ;;  %v13456_v7 = vld [vmem:[#allocation30_spill] sm:$0xff]  ;;  %v13470_v41 = vld [vmem:[#allocation45_spill] sm:$0xff] }
 0x5de   : > { %7594 = vrot.lane.b32.xlu1 %v7578_v62, %s7993_s21  ;;  %5200 = vmatmul.bf16.gmra.mxu3 %v4944_v18  ;;  %v13444_v62 = vld [vmem:[#allocation58_spill] sm:$0xff]  ;;  %v13457_v18 = vmax.f32 %v13456_v7, 0.0 }
 0x5df   : > { %v13445_v56 = vpack.i.bf16 %v13443_v20, %v13444_v62  ;;  %v13453_v22 = vpack.i.bf16 %v13444_v62, %v13452_v32 }
 0x5e0   : > { %v12313_v39 = vpop.permute.xlu1 %7449 }
 0x5e1   : > { %v7451_v13 = vunpack.i.l.bf16 %v12313_v39 }
 0x5e3   : > { %3753 = vxpose.xlu2.b32.cont [8/16] (narrow) %v13436_v52, 32  ;;  %3785 = vxpose.xlu0.b32.cont [8/16] (narrow) %v13437_v23, 32  ;;  %v4847_v4 = vsel %vm370_vm10, %v13449_v9, %v7451_v13  ;;  %v13459_v52 = vld [vmem:[#allocation31_spill] sm:$0xff]  ;;  %v13466_v9 = vmax.f32 %v12023_v55, 0.0 }
 0x5e4   : > { %v7653_v23 = vpack.i.bf16 %v13459_v52, %v13458_v37 }
 0x5e6   : > { %7609 = vrot.lane.b32.xlu1 %v13438_v33, %s7993_s21  ;;  %v13460_v33 = vld [vmem:[#allocation22_spill] sm:$0xff] }
 0x5e7   : > { %v7331_v61 = vunpack.i.l.bf16 %v13460_v33 }
 0x5e8   : > { %v7455_v15 = vpop.permute.xlu1 %7454  ;;  %5284 = vmatmul.bf16.gmra.mxu0 %v4942_v58 }
 0x5e9   : > { %v7457_v53 = vunpack.i.h.bf16 %v7455_v15  ;;  %v7456_v14 = vunpack.i.l.bf16 %v7455_v15  ;;  %v7332_v15 = vunpack.i.h.bf16 %v13460_v33  ;;  %v4752_v13 = vsel %vm370_vm10, %v12089_v34, %v7331_v61 }
 0x5ea   : > { %v13473_v61 = vpack.i.bf16 %v12059_v5, %v11982_v48 }
 0x5eb   : > { %3754 = vxpose.xlu2.b32.cont [9/16] (narrow) %v13440_v3, 32  ;;  %3786 = vxpose.xlu0.b32.cont [9/16] (narrow) %v13442_v38, 32  ;;  %v4878_v30 = vsel %vm3008_vm13, %v4846_v2, %v7456_v14  ;;  %v4879_v59 = vsel %vm3008_vm13, %v4847_v4, %v7457_v53  ;;  %v4753_v47 = vsel %vm370_vm10, %v12091_v40, %v7332_v15  ;;  %v13465_v2 = vmax.f32 %v13464_v6, 0.0 }
 0x5ec   : > { %v7452_v4 = vunpack.i.h.bf16 %v12313_v39 }
 0x5ee   : > { %7624 = vrot.lane.b32.xlu1 %v13445_v56, %s7990_s26  ;;  %v13461_v56 = vld [vmem:[#allocation60_spill] sm:$0xff] }
 0x5ef   : > { %v13462_v53 = vmax.f32 %v13461_v56, 0.0  ;;  %v13476_v56 = vld [vmem:[#allocation72_spill] sm:$0xff] }
 0x5f0   : > { %v7460_v44 = vpop.permute.xlu1 %7459 }
 0x5f1   : > { %v7462_v31 = vunpack.i.h.bf16 %v7460_v44  ;;  %v7461_v58 = vunpack.i.l.bf16 %v7460_v44 }
 0x5f3   : > { %3755 = vxpose.xlu2.b32.cont [10/16] (narrow) %v13447_v11, 32  ;;  %3787 = vxpose.xlu0.b32.cont [10/16] (narrow) %v13451_v21, 32  ;;  %v4910_v1 = vsel %vm3041_vm14, %v4878_v30, %v7461_v58  ;;  %v4911_v51 = vsel %vm3041_vm14, %v4879_v59, %v7462_v31  ;;  %v13463_v31 = vmax.f32 %v11991_v8, 0.0  ;;  %v7485_v11 = vpop.permute.xlu2 %7484  ;;  %v12376_v30 = vpop.permute.xlu0 %7499 }
 0x5f4   : > { %v4945_v60 = vpack.c.bf16 %v4911_v51, %v4910_v1  ;;  %v13467_v51 = vld [vmem:[#allocation59_spill] sm:$0xff] }
 0x5f5   : > { %v13468_v32 = vmax.f32 %v13467_v51, 0.0  ;;  %v13481_v51 = vld [vmem:[#allocation32_spill] sm:$0xff] }
 0x5f6   : > { %7639 = vrot.lane.b32.xlu1 %v13453_v22, %s7992_s12  ;;  %v7487_v22 = vunpack.i.h.bf16 %v7485_v11 }
 0x5f8   : > { %v7465_v57 = vpop.permute.xlu1 %7464  ;;  %5289 = vmatmul.bf16.gmra.mxu0 %v4945_v60  ;;  %v7486_v60 = vunpack.i.l.bf16 %v7485_v11 }
 0x5f9   : > { %v7467_v3 = vunpack.i.h.bf16 %v7465_v57  ;;  %v7466_v19 = vunpack.i.l.bf16 %v7465_v57  ;;  %v13469_v57 = vld [vmem:[#allocation62_spill] sm:$0xff] }
 0x5fa   : > { %v4848_v55 = vsel %vm370_vm10, %v13469_v57, %v7452_v4 }
 0x5fb   : > { %3756 = vxpose.xlu2.b32.cont [11/16] (narrow) %v13455_v46, 32  ;;  %3788 = vxpose.xlu0.b32.cont [11/16] (narrow) %v13457_v18, 32  ;;  %v4784_v14 = vsel %vm3008_vm13, %v4752_v13, %v7466_v19  ;;  %v4785_v44 = vsel %vm3008_vm13, %v4753_v47, %v7467_v3  ;;  %v7495_v0 = vpop.permute.xlu2 %7494  ;;  %v13471_v46 = vmax.f32 %v12054_v63, 0.0  ;;  %v7515_v5 = vpop.permute.xlu0 %7514 }
 0x5fc   : > { %v7497_v13 = vunpack.i.h.bf16 %v7495_v0 }
 0x5fe   : > { %7654 = vrot.lane.b32.xlu1 %v7653_v23, %s7992_s12 }
 0x600   : > { %v7470_v38 = vpop.permute.xlu1 %7469 }
 0x601   : > { %v7472_v20 = vunpack.i.h.bf16 %v7470_v38  ;;  %v7471_v62 = vunpack.i.l.bf16 %v7470_v38  ;;  %v13474_v38 = vld [vmem:[#allocation48_spill] sm:$0xff] }
 0x602   : > { %v13475_v47 = vmax.f32 %v13474_v38, 0.0 }
 0x603   : > { %3757 = vxpose.xlu2.b32.cont [12/16] (narrow) %v13462_v53, 32  ;;  %3789 = vxpose.xlu0.b32.cont [12/16] (narrow) %v13463_v31, 32  ;;  %v4816_v58 = vsel %vm3041_vm14, %v4784_v14, %v7471_v62  ;;  %v4817_v29 = vsel %vm3041_vm14, %v4785_v44, %v7472_v20  ;;  %v7496_v20 = vunpack.i.l.bf16 %v7495_v0  ;;  %v7510_v14 = vpop.permute.xlu2 %7509  ;;  %v13477_v44 = vld [vmem:[#allocation61_spill] sm:$0xff]  ;;  %v4128_v0 = vrot.slane %v12180_v45, 1 }
 0x604   : > { %v4947_v40 = vpack.c.bf16 %v4817_v29, %v4816_v58  ;;  %v13478_v31 = vmax.f32 %v13477_v44, 0.0 }
 0x606   : > { %7669 = vrot.lane.b32.xlu1 %v7653_v23, %s7993_s21  ;;  %5205 = vmatmul.bf16.gmra.mxu3 %v4947_v40  ;;  %v13472_v23 = vld [vmem:[#allocation13_spill] sm:$0xff] }
 0x607   : > { %v7337_v33 = vunpack.i.h.bf16 %v13472_v23  ;;  %v7336_v15 = vunpack.i.l.bf16 %v13472_v23 }
 0x608   : > { %v7475_v34 = vpop.permute.xlu1 %7474 }
 0x609   : > { %v7476_v8 = vunpack.i.l.bf16 %v7475_v34  ;;  %v4755_v62 = vsel %vm370_vm10, %v12146_v12, %v7337_v33  ;;  %v4754_v53 = vsel %vm370_vm10, %v13476_v56, %v7336_v15  ;;  %v7477_v12 = vunpack.i.h.bf16 %v7475_v34  ;;  %v13483_v34 = vld [vmem:[#allocation25_spill] sm:$0xff] }
 0x60b   : > { %3758 = vxpose.xlu2.b32.cont [13/16] (narrow) %v13465_v2, 32  ;;  %3790 = vxpose.xlu0.b32.cont [13/16] (narrow) %v13466_v9, 32  ;;  %v4849_v39 = vsel %vm370_vm10, %v13470_v41, %v7476_v8  ;;  %v7501_v2 = vunpack.i.l.bf16 %v12376_v30  ;;  %v13479_v9 = vld [vmem:[#allocation29_spill] sm:$0xff]  ;;  %v4129_v8 = vrot.slane %v12182_v17, 1  ;;  %v12417_v57 = vpop.permute.xlu2 %7524  ;;  %v13485_v17 = vld [vmem:[#allocation64_spill] sm:$0xff] }
 0x60c   : > { %v13480_v4 = vpack.i.bf16 %v11982_v48, %v13479_v9  ;;  %v13484_v48 = vld [vmem:[#allocation50_spill] sm:$0xff] }
 0x60d   : > { %v4850_v41 = vsel %vm370_vm10, %v13484_v48, %v7477_v12  ;;  %v7502_v12 = vunpack.i.h.bf16 %v12376_v30 }
 0x60e   : > { %7684 = vrot.lane.b32.xlu1 %v12004_v27, %s7993_s21 }
 0x610   : > { %v7480_v21 = vpop.permute.xlu1 %7479 }
 0x611   : > { %v7482_v59 = vunpack.i.h.bf16 %v7480_v21  ;;  %v7481_v1 = vunpack.i.l.bf16 %v7480_v21 }
 0x613   : > { %3759 = vxpose.xlu2.b32.cont [14/16] (narrow) %v13468_v32, 32  ;;  %3791 = vxpose.xlu0.b32.cont [14/16] (narrow) %v13471_v46, 32  ;;  %v4880_v27 = vsel %vm3008_vm13, %v4848_v55, %v7481_v1  ;;  %v4881_v7 = vsel %vm3008_vm13, %v4849_v39, %v7482_v59  ;;  %v13482_v32 = vmax.f32 %v13481_v51, 0.0  ;;  %v4851_v55 = vsel %vm370_vm10, %v13483_v34, %v7501_v2 }
 0x614   : > { %v4912_v18 = vsel %vm3041_vm14, %v4880_v27, %v7486_v60  ;;  %v4913_v37 = vsel %vm3041_vm14, %v4881_v7, %v7487_v22  ;;  %v7512_v22 = vunpack.i.h.bf16 %v7510_v14  ;;  %v7511_v60 = vunpack.i.l.bf16 %v7510_v14  ;;  %v12427_v27 = vld [vmem:[#allocation3 + $0x1a8] sm:$0x3] }
 0x615   : > { %v4948_v52 = vpack.c.bf16 %v4913_v37, %v4912_v18  ;;  %v13486_v39 = vmax.f32 %v13485_v17, 0.0  ;;  %v12430_v7 = vsel %vm582_vm0, %v4128_v0, %v4129_v8  ;;  %v13487_v18 = vld [vmem:[#allocation66_spill] sm:$0xff]  ;;  %v13488_v37 = vld [vmem:[#allocation37_spill] sm:$0xff]  ;;  %v4131_v15 = vrot.slane %v12427_v27, 1 }
 0x616   : > { %7699 = vrot.lane.b32.xlu1 %v13473_v61, %s7990_s26  ;;  %v13489_v61 = vld [vmem:[#allocation23_spill] sm:$0xff]  ;;  %v7526_v2 = vunpack.i.l.bf16 %v12417_v57 }
 0x617   : > { %5294 = vmatmul.bf16.gmra.mxu0 %v4948_v52  ;;  %v7728_v52 = vpack.i.bf16 %v13488_v37, %v13487_v18 }
 0x618   : > { %v7490_v63 = vpop.permute.xlu1 %7489 }
 0x619   : > { %v7492_v3 = vunpack.i.h.bf16 %v7490_v63  ;;  %v7491_v19 = vunpack.i.l.bf16 %v7490_v63  ;;  %v7342_v63 = vunpack.i.h.bf16 %v13489_v61 }
 0x61b   : > { %3760 = vxpose.xlu2.b32.cont [15/16] (narrow) %v13475_v47, 32  ;;  %3792 = vxpose.xlu0.b32.cont [15/16] (narrow) %v13478_v31, 32  ;;  %v4786_v58 = vsel %vm3008_vm13, %v4754_v53, %v7491_v19  ;;  %v4787_v29 = vsel %vm3008_vm13, %v4755_v62, %v7492_v3  ;;  %v7341_v3 = vunpack.i.l.bf16 %v13489_v61  ;;  %v7530_v19 = vpop.permute.xlu0 %7529  ;;  %v7517_v47 = vunpack.i.h.bf16 %v7515_v5 }
 0x61c   : > { %v4818_v40 = vsel %vm3041_vm14, %v4786_v58, %v7496_v20  ;;  %v4819_v11 = vsel %vm3041_vm14, %v4787_v29, %v7497_v13  ;;  %v7516_v13 = vunpack.i.l.bf16 %v7515_v5  ;;  %v12441_v20 = vsel %vm582_vm0, %v4129_v8, %v4131_v15  ;;  %v13490_v8 = vld [vmem:[#allocation33_spill] sm:$0xff] }
 0x61d   : > { %v4950_v6 = vpack.c.bf16 %v4819_v11, %v4818_v40  ;;  %v7788_v62 = vpack.i.bf16 %v12441_v20, %v12430_v7  ;;  %v4757_v53 = vsel %vm370_vm10, %v12214_v10, %v7342_v63  ;;  %v4756_v14 = vsel %vm370_vm10, %v12212_v42, %v7341_v3  ;;  %v7540_v11 = vpop.permute.xlu2 %7539  ;;  %v5191_v20 = vpop.f32.mrf.mxu3 }
 0x61e   : > { %7714 = vrot.lane.b32.xlu1 %v13480_v4, %s7992_s12  ;;  %v4788_v5 = vsel %vm3008_vm13, %v4756_v14, %v7516_v13  ;;  %v4789_v58 = vsel %vm3008_vm13, %v4757_v53, %v7517_v47  ;;  %v7532_v10 = vunpack.i.h.bf16 %v7530_v19  ;;  %v7531_v9 = vunpack.i.l.bf16 %v7530_v19 }
 0x61f   : > { %5210 = vmatmul.bf16.gmra.mxu3 %v4950_v6  ;;  %v4853_v0 = vsel %vm370_vm10, %v13490_v8, %v7526_v2  ;;  %v7866_v8 = vld [vmem:[#allocation3 + $0xb0] sm:$0xff] }
 0x620   : > { %v7505_v21 = vpop.permute.xlu1 %7504  ;;  %v4885_v34 = vsel %vm3008_vm13, %v4853_v0, %v7532_v10 }
 0x621   : > { %v7507_v59 = vunpack.i.h.bf16 %v7505_v21  ;;  %v7506_v1 = vunpack.i.l.bf16 %v7505_v21  ;;  %v13491_v21 = vld [vmem:[#allocation39_spill] sm:$0xff] }
 0x623   : > { %3761 = vxpose.xlu2.b32.end [16/16] (narrow) %v13482_v32, 32  ;;  %3793 = vxpose.xlu0.b32.end [16/16] (narrow) %v13486_v39, 32  ;;  %v4883_v45 = vsel %vm3008_vm13, %v4851_v55, %v7507_v59  ;;  %v4882_v46 = vsel %vm3008_vm13, %v4850_v41, %v7506_v1  ;;  %v7545_v42 = vpop.permute.xlu0 %7544  ;;  %v4852_v59 = vsel %vm370_vm10, %v13491_v21, %v7502_v12  ;;  %v13492_v32 = vld [vmem:[#allocation26_spill] sm:$0xff]  ;;  %v7542_v39 = vunpack.i.h.bf16 %v7540_v11  ;;  %v7867_v21 = vld [vmem:[#allocation3 + $0xa8] sm:$0xff] }
 0x624   : > { %v4914_v23 = vsel %vm3041_vm14, %v4882_v46, %v7511_v60  ;;  %v4915_v33 = vsel %vm3041_vm14, %v4883_v45, %v7512_v22  ;;  %v7352_v22 = vunpack.i.h.bf16 %v13492_v32  ;;  %v7351_v60 = vunpack.i.l.bf16 %v13492_v32 }
 0x625   : > { %v4951_v38 = vpack.c.bf16 %v4915_v33, %v4914_v23  ;;  %v4884_v30 = vsel %vm3008_vm13, %v4852_v59, %v7531_v9  ;;  %v7758_v41 = vpack.i.bf16 %v12178_v54, %v12175_v28  ;;  %v7541_v45 = vunpack.i.l.bf16 %v7540_v11  ;;  %v7555_v37 = vpop.permute.xlu2 %7554 }
 0x626   : > { %7729 = vrot.lane.b32.xlu1 %v7728_v52, %s7992_s12  ;;  %v4759_v46 = vsel %vm370_vm10, %v12234_v43, %v7352_v22  ;;  %v4758_v18 = vsel %vm370_vm10, %v12232_v36, %v7351_v60  ;;  %v7546_v23 = vunpack.i.l.bf16 %v7545_v42  ;;  %v7557_v47 = vunpack.i.h.bf16 %v7555_v37  ;;  %s7907_s12 = scalar_lea.hbm %s12860_s9, 128 }
 0x627   : > { %5299 = vmatmul.bf16.gmra.mxu0 %v4951_v38  ;;  %v4790_v63 = vsel %vm3008_vm13, %v4758_v18, %v7541_v45  ;;  %v4791_v3 = vsel %vm3008_vm13, %v4759_v46, %v7542_v39  ;;  %v13493_v38 = vld [vmem:[#allocation41_spill] sm:$0xff]  ;;  %v7556_v53 = vunpack.i.l.bf16 %v7555_v37  ;;  %v13496_v45 = vld [vmem:[#allocation67_spill] sm:$0xff] }
 0x628   : > { %v7520_v56 = vpop.permute.xlu1 %7519  ;;  %v4822_v19 = vsel %vm3041_vm14, %v4790_v63, %v7546_v23  ;;  %v13497_v18 = vld [vmem:[#allocation15_spill] sm:$0xff] }
 0x629   : > { %v7522_v44 = vunpack.i.h.bf16 %v7520_v56  ;;  %v7521_v31 = vunpack.i.l.bf16 %v7520_v56  ;;  %v7527_v56 = vunpack.i.h.bf16 %v12417_v57 }
 0x62b   : > { %v4820_v29 = vsel %vm3041_vm14, %v4788_v5, %v7521_v31  ;;  %v4821_v40 = vsel %vm3041_vm14, %v4789_v58, %v7522_v44  ;;  %v7560_v15 = vpop.permute.xlu0 %7559 }
 0x62c   : > { %v4953_v6 = vpack.c.bf16 %v4821_v40, %v4820_v29  ;;  %v7562_v31 = vunpack.i.h.bf16 %v7560_v15  ;;  %v7561_v5 = vunpack.i.l.bf16 %v7560_v15  ;;  %v13494_v40 = vld [vmem:[#allocation14_spill] sm:$0xff] }
 0x62d   : > { %v7570_v44 = vpop.permute.xlu2 %7569  ;;  %v4854_v11 = vsel %vm370_vm10, %v13494_v40, %v7527_v56  ;;  %v7868_v40 = vld [vmem:[#allocation3 + $0xc8] sm:$0xff] }
 0x62e   : > { %7744 = vrot.lane.b32.xlu1 %v7728_v52, %s7993_s21  ;;  %v7547_v52 = vunpack.i.h.bf16 %v7545_v42  ;;  %v7572_v32 = vunpack.i.h.bf16 %v7570_v44  ;;  %v7571_v22 = vunpack.i.l.bf16 %v7570_v44  ;;  %v5193_v44 = vpop.f32.mrf.mxu3 }
 0x62f   : > { %5215 = vmatmul.bf16.gmra.mxu3 %v4953_v6  ;;  %v13495_v6 = vld [vmem:[#allocation40_spill] sm:$0xff] }
 0x630   : > { %v7535_v4 = vpop.permute.xlu1 %7534  ;;  %v4823_v43 = vsel %vm3041_vm14, %v4791_v3, %v7547_v52  ;;  %v7362_v2 = vunpack.i.h.bf16 %v13495_v6  ;;  %v7361_v57 = vunpack.i.l.bf16 %v13495_v6  ;;  %v7869_v6 = vld [vmem:[#allocation3 + $0xc0] sm:$0xff] }
 0x631   : > { %v7537_v1 = vunpack.i.h.bf16 %v7535_v4  ;;  %v7536_v51 = vunpack.i.l.bf16 %v7535_v4  ;;  %v4956_v13 = vpack.c.bf16 %v4823_v43, %v4822_v19  ;;  %v13498_v43 = vld [vmem:[#allocation70_spill] sm:$0xff] }
 0x632   : > { %v4761_v0 = vsel %vm370_vm10, %v7866_v8, %v7362_v2  ;;  %v4760_v59 = vsel %vm370_vm10, %v7867_v21, %v7361_v57 }
 0x633   : > { %v4916_v55 = vsel %vm3041_vm14, %v4884_v30, %v7536_v51  ;;  %v4917_v48 = vsel %vm3041_vm14, %v4885_v34, %v7537_v1  ;;  %v12483_v29 = vpop.permute.xlu0 %7574 }
 0x634   : > { %v4954_v17 = vpack.c.bf16 %v4917_v48, %v4916_v55  ;;  %v7576_v34 = vunpack.i.l.bf16 %v12483_v29 }
 0x635   : > { %v7585_v30 = vpop.permute.xlu2 %7584 }
 0x636   : > { %7759 = vrot.lane.b32.xlu1 %v7758_v41, %s7993_s21  ;;  %v4857_v46 = vsel %vm370_vm10, %v13496_v45, %v7576_v34  ;;  %v7586_v15 = vunpack.i.l.bf16 %v7585_v30 }
 0x637   : > { %5304 = vmatmul.bf16.gmra.mxu0 %v4954_v17 }
 0x638   : > { %v7550_v33 = vpop.permute.xlu1 %7549 }
 0x639   : > { %v7551_v61 = vunpack.i.l.bf16 %v7550_v33  ;;  %v7552_v55 = vunpack.i.h.bf16 %v7550_v33  ;;  %v7587_v33 = vunpack.i.h.bf16 %v7585_v30 }
 0x63b   : > { %v4855_v36 = vsel %vm370_vm10, %v13493_v38, %v7551_v61  ;;  %v7590_v17 = vpop.permute.xlu0 %7589  ;;  %v4856_v37 = vsel %vm370_vm10, %v13497_v18, %v7552_v55  ;;  %v7372_v38 = vunpack.i.h.bf16 %v13498_v43  ;;  %v13502_v18 = vld [vmem:[#allocation68_spill] sm:$0xff] }
 0x63c   : > { %v4887_v14 = vsel %vm3008_vm13, %v4855_v36, %v7557_v47  ;;  %v7371_v36 = vunpack.i.l.bf16 %v13498_v43  ;;  %v7592_v47 = vunpack.i.h.bf16 %v7590_v17 }
 0x63d   : > { %v4919_v12 = vsel %vm3041_vm14, %v4887_v14, %v7562_v31  ;;  %v12509_v63 = vpop.permute.xlu2 %7599 }
 0x63e   : > { %7774 = vrot.lane.b32.xlu1 %v12152_v35, %s7993_s21  ;;  %v4886_v35 = vsel %vm3008_vm13, %v4854_v11, %v7556_v53  ;;  %v12518_v53 = vld [vmem:[%s12857_s6] ss:$0 sm:$0xff]  ;;  %v4763_v11 = vsel %vm370_vm10, %v7868_v40, %v7372_v38  ;;  %v4762_v2 = vsel %vm370_vm10, %v7869_v6, %v7371_v36  ;;  %v7601_v8 = vunpack.i.l.bf16 %v12509_v63 }
 0x63f   : > { %5220 = vmatmul.bf16.gmra.mxu3 %v4956_v13  ;;  %v4918_v42 = vsel %vm3041_vm14, %v4886_v35, %v7561_v5  ;;  %v7591_v13 = vunpack.i.l.bf16 %v7590_v17  ;;  %v4795_v35 = vsel %vm3008_vm13, %v4763_v11, %v7592_v47 }
 0x640   : > { %v7565_v58 = vpop.permute.xlu1 %7564  ;;  %v4957_v4 = vpack.c.bf16 %v4919_v12, %v4918_v42 }
 0x641   : > { %v7567_v10 = vunpack.i.h.bf16 %v7565_v58  ;;  %v7566_v9 = vunpack.i.l.bf16 %v7565_v58  ;;  %v4794_v12 = vsel %vm3008_vm13, %v4762_v2, %v7591_v13  ;;  %v7870_v13 = vld [vmem:[#allocation3 + $0xe0] sm:$0xff] }
 0x643   : > { %v4792_v1 = vsel %vm3008_vm13, %v4760_v59, %v7566_v9  ;;  %v4793_v51 = vsel %vm3008_vm13, %v4761_v0, %v7567_v10  ;;  %v7605_v56 = vpop.permute.xlu0 %7604  ;;  %v5192_v10 = vadd.f32 %v12518_v53, %v5191_v20  ;;  %v7577_v0 = vunpack.i.h.bf16 %v12483_v29  ;;  %v13501_v20 = vld [vmem:[#allocation47_spill] sm:$0xff] }
 0x644   : > { %v4824_v48 = vsel %vm3041_vm14, %v4792_v1, %v7571_v22  ;;  %v4825_v41 = vsel %vm3041_vm14, %v4793_v51, %v7572_v32  ;;  %v7607_v59 = vunpack.i.h.bf16 %v7605_v56  ;;  %v7606_v1 = vunpack.i.l.bf16 %v7605_v56  ;;  %v5196_v22 = vpop.f32.mrf.mxu3 }
 0x645   : > { %v7615_v21 = vpop.permute.xlu2 %7614  ;;  %v5194_v51 = vadd.f32 %v12518_v53, %v5193_v44  ;;  %v4858_v29 = vsel %vm370_vm10, %v13501_v20, %v7577_v0  ;;  %v7602_v0 = vunpack.i.h.bf16 %v12509_v63 }
 0x646   : > { %7789 = vrot.lane.b32.xlu1 %v7788_v62, %s7993_s21  ;;  %v4959_v62 = vpack.c.bf16 %v4825_v41, %v4824_v48  ;;  %v13499_v48 = vld [vmem:[#allocation46_spill] sm:$0xff]  ;;  %v4890_v45 = vsel %vm3008_vm13, %v4858_v29, %v7606_v1  ;;  %v7617_v43 = vunpack.i.h.bf16 %v7615_v21  ;;  %v7616_v38 = vunpack.i.l.bf16 %v7615_v21  ;;  %v13506_v29 = vld [vmem:[#allocation69_spill] sm:$0xff]  ;;  %s5739_s21 = scalar_lea.hbm %s12860_s9, %s6134_s29 }
 0x647   : > { %5309 = vmatmul.bf16.gmra.mxu0 %v4957_v4  ;;  %s5742_s25 = sshll.u32 %s5739_s21, 4  ;;  %s5743_s25 = int_to_ptr.hbm [resolvable:$true] %s5742_s25 }
 0x648   : > { %v7580_v60 = vpop.permute.xlu1 %7579  ;;  %s7901_s30 = sshra.s32 %s5743_s25, 4  ;;  %s7902_s30 = int_to_ptr.hbm [resolvable:$true] %s7901_s30 }
 0x649   : > { %v7582_v39 = vunpack.i.h.bf16 %v7580_v60  ;;  %v7581_v7 = vunpack.i.l.bf16 %v7580_v60  ;;  %s7903_s18 = scalar_lea.hbm %s7902_s30, 64  ;;  %p7908_p0 = scmp.lt.s32.totalorder %s7902_s30, %s12860_s9 }
 0x64a   : > { %p7904_p11 = scmp.ne.s32.totalorder %s7902_s30, %s7903_s18  ;;  %p7909_p1 = scmp.lt.s32.totalorder %s7907_s12, %s7903_s18 }
 0x64b   : > { %v4889_v52 = vsel %vm3008_vm13, %v4857_v46, %v7582_v39  ;;  %v4888_v23 = vsel %vm3008_vm13, %v4856_v37, %v7581_v7  ;;  %v7620_v55 = vpop.permute.xlu0 %7619  ;;  %v13500_v39 = vld [vmem:[#allocation42_spill] sm:$0xff] }
 0x64c   : > { %v4920_v3 = vsel %vm3041_vm14, %v4888_v23, %v7586_v15  ;;  %v4921_v19 = vsel %vm3041_vm14, %v4889_v52, %v7587_v33  ;;  %v4859_v7 = vsel %vm370_vm10, %v13500_v39, %v7601_v8  ;;  %v7387_v52 = vunpack.i.h.bf16 %v12166_v25  ;;  %v5198_v40 = vpop.f32.mrf.mxu3  ;;  %p7905_p12 = pnand %p7904_p11, %p8088_p5  ;;  %p7910_p2 = por %p7909_p1, %p7908_p0 }
 0x64d   : > { %v4960_v14 = vpack.c.bf16 %v4921_v19, %v4920_v3  ;;  %v4891_v46 = vsel %vm3008_vm13, %v4859_v7, %v7607_v59  ;;  %v7386_v23 = vunpack.i.l.bf16 %v12166_v25  ;;  %v12544_v19 = vpop.f32.mrf.mxu1  ;;  %v7622_v25 = vunpack.i.h.bf16 %v7620_v55  ;;  %v13505_v7 = vld [vmem:[#allocation57_spill] sm:$0xff] }
 0x64e   : > { %v4765_v56 = vsel %vm370_vm10, %v7870_v13, %v7387_v52  ;;  %v5199_v59 = vadd.f32 %v12518_v53, %v5198_v40  ;;  %v4860_v63 = vsel %vm370_vm10, %v13505_v7, %v7602_v0  ;;  %v7401_v52 = vunpack.i.l.bf16 %v12203_v24  ;;  %p7906_p13 = pneg %p7905_p12 }
 0x64f   : > { %5225 = vmatmul.bf16.gmra.mxu3 %v4959_v62 }
 0x650   : > { %v7595_v61 = vpop.permute.xlu1 %7594  ;;  %p7911_p3 = pnand %p7910_p2, %p7906_p13 }
 0x651   : > { %v7597_v31 = vunpack.i.h.bf16 %v7595_v61  ;;  %v7596_v5 = vunpack.i.l.bf16 %v7595_v61 }
 0x653   : > { %v4826_v9 = vsel %vm3041_vm14, %v4794_v12, %v7596_v5  ;;  %v4827_v42 = vsel %vm3041_vm14, %v4795_v35, %v7597_v31  ;;  %v7630_v31 = vpop.permute.xlu2 %7629  ;;  %v7621_v5 = vunpack.i.l.bf16 %v7620_v55  ;;  %v7635_v2 = vpop.permute.xlu0 %7634  ;;  %v4797_v35 = vsel %vm3008_vm13, %v4765_v56, %v7617_v43  ;;  %v7873_v56 = vld [vmem:[#allocation3 + $0xf0] sm:$0xff] }
 0x654   : > { %v4962_v32 = vpack.c.bf16 %v4827_v42, %v4826_v9  ;;  %v4829_v9 = vsel %vm3041_vm14, %v4797_v35, %v7622_v25  ;;  %v7632_v21 = vunpack.i.h.bf16 %v7630_v31 }
 0x655   : > { %v5280_v58 = vpop.f32.mrf.mxu0 }
 0x656   : > { %v5281_v4 = vadd.f32 %v5280_v58, %v5192_v10 }
 0x657   : > { %5314 = vmatmul.bf16.gmra.mxu0 %v4960_v14  ;;  %v7871_v14 = vld [vmem:[#allocation3 + $0xd8] sm:$0xff] }
 0x658   : > { %v7610_v57 = vpop.permute.xlu1 %7609  ;;  %v5370_v41 = vadd.f32 %v13499_v48, %v5281_v4  ;;  %v4764_v44 = vsel %vm370_vm10, %v7871_v14, %v7386_v23  ;;  %v13503_v4 = vld [vmem:[#allocation52_spill] sm:$0xff]  ;;  %v4766_v14 = vsel %vm370_vm10, %v7873_v56, %v7401_v52  ;;  %v7412_v52 = vunpack.i.h.bf16 %v12218_v50 }
 0x659   : > { %v7612_v60 = vunpack.i.h.bf16 %v7610_v57  ;;  %v7611_v30 = vunpack.i.l.bf16 %v7610_v57  ;;  %v5197_v57 = vadd.f32 %v12518_v53, %v5196_v22  ;;  %v4796_v12 = vsel %vm3008_vm13, %v4764_v44, %v7616_v38 }
 0x65a   : > { %v5449_v61 = vmax.f32 %v5370_v41, 0.0  ;;  %v4828_v10 = vsel %vm3041_vm14, %v4796_v12, %v7621_v5  ;;  %v7637_v41 = vunpack.i.h.bf16 %v7635_v2 }
 0x65b   : > { %v4922_v33 = vsel %vm3041_vm14, %v4890_v45, %v7611_v30  ;;  %v4923_v15 = vsel %vm3041_vm14, %v4891_v46, %v7612_v60  ;;  %v4965_v1 = vpack.c.bf16 %v4829_v9, %v4828_v10  ;;  %v13504_v60 = vld [vmem:[#allocation63_spill] sm:$0xff]  ;;  %v7645_v48 = vpop.permute.xlu2 %7644  ;;  %v12565_v20 = vpop.permute.xlu0 %7649 }
 0x65c   : > { %v4963_v47 = vpack.c.bf16 %v4923_v15, %v4922_v33  ;;  %v7647_v5 = vunpack.i.h.bf16 %v7645_v48 }
 0x65d   : > { %v5282_v34 = vpop.f32.mrf.mxu0 }
 0x65e   : > { %v5283_v17 = vadd.f32 %v5282_v34, %v5194_v51  ;;  %v12559_v51 = vpop.f32.mrf.mxu1 }
 0x65f   : > { %5230 = vmatmul.bf16.gmra.mxu3 %v4962_v32  ;;  %v7631_v32 = vunpack.i.l.bf16 %v7630_v31 }
 0x660   : > { %v12535_v62 = vpop.permute.xlu1 %7624  ;;  %v5372_v37 = vadd.f32 %v13502_v18, %v5283_v17  ;;  %v7636_v17 = vunpack.i.l.bf16 %v7635_v2 }
 0x661   : > { %v7626_v11 = vunpack.i.l.bf16 %v12535_v62  ;;  %v5201_v39 = vpop.f32.mrf.mxu3  ;;  %v4892_v18 = vsel %vm3008_vm13, %v4860_v63, %v7631_v32  ;;  %v7627_v2 = vunpack.i.h.bf16 %v12535_v62  ;;  %v13508_v32 = vld [vmem:[#allocation44_spill] sm:$0xff] }
 0x662   : > { %v5450_v3 = vmax.f32 %v5372_v37, 0.0  ;;  %v7402_v37 = vunpack.i.h.bf16 %v12203_v24  ;;  %v4924_v43 = vsel %vm3041_vm14, %v4892_v18, %v7636_v17  ;;  %v5202_v40 = vadd.f32 %v12518_v53, %v5201_v39  ;;  %v13510_v39 = vld [vmem:[#allocation73_spill] sm:$0xff] }
 0x663   : > { %v4861_v8 = vsel %vm370_vm10, %v13503_v4, %v7626_v11  ;;  %v7660_v11 = vpop.permute.xlu2 %7659  ;;  %v7665_v10 = vpop.permute.xlu0 %7664 }
 0x664   : > { %v5481_v36 = vpack.c.bf16 %v5450_v3, %v5449_v61  ;;  %v4893_v55 = vsel %vm3008_vm13, %v4861_v8, %v7632_v21  ;;  %v7661_v17 = vunpack.i.l.bf16 %v7660_v11 }
 0x665   : > { %v5285_v58 = vpop.f32.mrf.mxu0  ;;  %v4925_v23 = vsel %vm3041_vm14, %v4893_v55, %v7637_v41  ;;  %v7662_v41 = vunpack.i.h.bf16 %v7660_v11  ;;  %v7652_v11 = vunpack.i.h.bf16 %v12565_v20 }
 0x666   : > { %6070 = vmatmul.msk.bf16.vlgmr.msrb.gmra.mxu2 %vm370_vm10, %v5481_v36  ;;  %v5286_v42 = vadd.f32 %v5285_v58, %v5197_v57  ;;  %v4966_v36 = vpack.c.bf16 %v4925_v23, %v4924_v43  ;;  %v12578_v25 = vpop.f32.mrf.mxu1  ;;  %v7646_v58 = vunpack.i.l.bf16 %v7645_v48  ;;  %v7411_v23 = vunpack.i.l.bf16 %v12218_v50 }
 0x667   : > { %5319 = vmatmul.bf16.gmra.mxu0 %v4963_v47  ;;  %v7872_v47 = vld [vmem:[#allocation3 + $0xf8] sm:$0xff] }
 0x668   : > { %v7640_v6 = vpop.permute.xlu1 %7639  ;;  %v5375_v30 = vadd.f32 %v13504_v60, %v5286_v42  ;;  %v4767_v13 = vsel %vm370_vm10, %v7872_v47, %v7402_v37 }
 0x669   : > { %v7642_v15 = vunpack.i.h.bf16 %v7640_v6  ;;  %v7641_v61 = vunpack.i.l.bf16 %v7640_v6  ;;  %v7651_v6 = vunpack.i.l.bf16 %v12565_v20  ;;  %v5203_v57 = vpop.f32.mrf.mxu3 }
 0x66a   : > { %v5451_v33 = vmax.f32 %v5375_v30, 0.0  ;;  %v5204_v0 = vadd.f32 %v12518_v53, %v5203_v57 }
 0x66b   : > { %v4798_v31 = vsel %vm3008_vm13, %v4766_v14, %v7641_v61  ;;  %v4799_v24 = vsel %vm3008_vm13, %v4767_v13, %v7642_v15  ;;  %v7666_v15 = vunpack.i.l.bf16 %v7665_v10  ;;  %v7680_v61 = vpop.permute.xlu0 %7679  ;;  %v7874_v13 = vld [vmem:[#allocation3 + $0x110] sm:$0xff]  ;;  %v7875_v14 = vld [vmem:[#allocation3 + $0x108] sm:$0xff] }
 0x66c   : > { %v4830_v12 = vsel %vm3041_vm14, %v4798_v31, %v7646_v58  ;;  %v4831_v35 = vsel %vm3041_vm14, %v4799_v24, %v7647_v5  ;;  %v4769_v56 = vsel %vm370_vm10, %v7874_v13, %v7412_v52  ;;  %v7681_v57 = vunpack.i.l.bf16 %v7680_v61  ;;  %v13513_v13 = vld [vmem:[#allocation34_spill] sm:$0xff] }
 0x66d   : > { %v5287_v22 = vpop.f32.mrf.mxu0  ;;  %v4968_v21 = vpack.c.bf16 %v4831_v35, %v4830_v12 }
 0x66e   : > { %v5288_v34 = vadd.f32 %v5287_v22, %v5199_v59  ;;  %v13507_v59 = vld [vmem:[#allocation28_spill] sm:$0xff]  ;;  %v4862_v22 = vsel %vm370_vm10, %v13508_v32, %v7627_v2  ;;  %v12594_v63 = vpop.f32.mrf.mxu1  ;;  %v7682_v2 = vunpack.i.h.bf16 %v7680_v61  ;;  %v7422_v32 = vunpack.i.h.bf16 %v12238_v26 }
 0x66f   : > { %5235 = vmatmul.bf16.gmra.mxu3 %v4965_v1  ;;  %v4863_v1 = vsel %vm370_vm10, %v13507_v59, %v7651_v6 }
 0x670   : > { %v5377_v45 = vadd.f32 %v13506_v29, %v5288_v34  ;;  %v7655_v46 = vpop.permute.xlu1 %7654  ;;  %v13509_v34 = vld [vmem:[#allocation71_spill] sm:$0xff] }
 0x671   : > { %v7657_v9 = vunpack.i.h.bf16 %v7655_v46  ;;  %v7656_v42 = vunpack.i.l.bf16 %v7655_v46  ;;  %v12598_v46 = vpop.permute.xlu2 %7674 }
 0x672   : > { %v5452_v3 = vmax.f32 %v5377_v45, 0.0 }
 0x673   : > { %v4895_v60 = vsel %vm3008_vm13, %v4863_v1, %v7657_v9  ;;  %v4894_v30 = vsel %vm3008_vm13, %v4862_v22, %v7656_v42  ;;  %v7695_v42 = vpop.permute.xlu0 %7694  ;;  %v7421_v22 = vunpack.i.l.bf16 %v12238_v26 }
 0x674   : > { %v5482_v38 = vpack.c.bf16 %v5452_v3, %v5451_v33  ;;  %v4926_v29 = vsel %vm3041_vm14, %v4894_v30, %v7661_v17  ;;  %v4927_v45 = vsel %vm3041_vm14, %v4895_v60, %v7662_v41  ;;  %v7667_v33 = vunpack.i.h.bf16 %v7665_v10  ;;  %v7876_v17 = vld [vmem:[#allocation3 + $0x128] sm:$0xff] }
 0x675   : > { %v5290_v44 = vpop.f32.mrf.mxu0 }
 0x676   : > { %6071 = vmatmul.msk.bf16.gmra.mxu2 %vm370_vm10, %v5482_v38  ;;  %v5291_v4 = vadd.f32 %v5290_v44, %v5202_v40  ;;  %v4969_v38 = vpack.c.bf16 %v4927_v45, %v4926_v29  ;;  %v4768_v44 = vsel %vm370_vm10, %v7875_v14, %v7411_v23  ;;  %v4801_v50 = vsel %vm3008_vm13, %v4769_v56, %v7667_v33  ;;  %v12609_v58 = vpop.f32.mrf.mxu1 }
 0x677   : > { %5324 = vmatmul.bf16.gmra.mxu0 %v4966_v36  ;;  %v4800_v31 = vsel %vm3008_vm13, %v4768_v44, %v7666_v15  ;;  %v7676_v40 = vunpack.i.l.bf16 %v12598_v46  ;;  %v7697_v45 = vunpack.i.h.bf16 %v7695_v42 }
 0x678   : > { %v7670_v8 = vpop.permute.xlu1 %7669  ;;  %v5380_v55 = vadd.f32 %v13509_v34, %v5291_v4 }
 0x679   : > { %v7672_v36 = vunpack.i.h.bf16 %v7670_v8  ;;  %v7671_v47 = vunpack.i.l.bf16 %v7670_v8  ;;  %v7690_v6 = vpop.permute.xlu2 %7689  ;;  %v13511_v8 = vld [vmem:[#allocation19_spill] sm:$0xff] }
 0x67a   : > { %v5453_v18 = vmax.f32 %v5380_v55, 0.0  ;;  %v7692_v34 = vunpack.i.h.bf16 %v7690_v6  ;;  %v7691_v55 = vunpack.i.l.bf16 %v7690_v6 }
 0x67b   : > { %v4832_v24 = vsel %vm3041_vm14, %v4800_v31, %v7671_v47  ;;  %v4833_v5 = vsel %vm3041_vm14, %v4801_v50, %v7672_v36  ;;  %v7710_v33 = vpop.permute.xlu0 %7709 }
 0x67c   : > { %v4971_v12 = vpack.c.bf16 %v4833_v5, %v4832_v24  ;;  %v7677_v5 = vunpack.i.h.bf16 %v12598_v46  ;;  %v7431_v46 = vunpack.i.l.bf16 %v12262_v49 }
 0x67d   : > { %v5292_v62 = vpop.f32.mrf.mxu0 }
 0x67e   : > { %v5293_v48 = vadd.f32 %v5292_v62, %v5204_v0  ;;  %v4865_v0 = vsel %vm370_vm10, %v13511_v8, %v7676_v40  ;;  %v12625_v41 = vpop.f32.mrf.mxu1  ;;  %v7432_v8 = vunpack.i.h.bf16 %v12262_v49  ;;  %v7878_v49 = vld [vmem:[#allocation3 + $0x140] sm:$0xff] }
 0x67f   : > { %5240 = vmatmul.bf16.gmra.mxu3 %v4968_v21  ;;  %v13512_v21 = vld [vmem:[#allocation20_spill] sm:$0xff]  ;;  %v4897_v20 = vsel %vm3008_vm13, %v4865_v0, %v7682_v2 }
 0x680   : > { %v5382_v7 = vadd.f32 %v13510_v39, %v5293_v48  ;;  %v7685_v43 = vpop.permute.xlu1 %7684  ;;  %v4864_v59 = vsel %vm370_vm10, %v13512_v21, %v7652_v11  ;;  %v4771_v39 = vsel %vm370_vm10, %v7876_v17, %v7422_v32 }
 0x681   : > { %v7687_v35 = vunpack.i.h.bf16 %v7685_v43  ;;  %v7686_v10 = vunpack.i.l.bf16 %v7685_v43  ;;  %v4896_v1 = vsel %vm3008_vm13, %v4864_v59, %v7681_v57  ;;  %v4803_v43 = vsel %vm3008_vm13, %v4771_v39, %v7692_v34 }
 0x682   : > { %v5454_v37 = vmax.f32 %v5382_v7, 0.0  ;;  %v7877_v7 = vld [vmem:[#allocation3 + $0x120] sm:$0xff]  ;;  %v4835_v36 = vsel %vm3041_vm14, %v4803_v43, %v7697_v45  ;;  %v7712_v57 = vunpack.i.h.bf16 %v7710_v33 }
 0x683   : > { %v4928_v62 = vsel %vm3041_vm14, %v4896_v1, %v7686_v10  ;;  %v4929_v60 = vsel %vm3041_vm14, %v4897_v20, %v7687_v35  ;;  %v4770_v29 = vsel %vm370_vm10, %v7877_v7, %v7421_v22  ;;  %v12650_v59 = vpop.permute.xlu0 %7724 }
 0x684   : > { %v5483_v3 = vpack.c.bf16 %v5454_v37, %v5453_v18  ;;  %v4972_v48 = vpack.c.bf16 %v4929_v60, %v4928_v62  ;;  %v7696_v18 = vunpack.i.l.bf16 %v7695_v42  ;;  %v7705_v37 = vpop.permute.xlu2 %7704  ;;  %v13514_v42 = vld [vmem:[#allocation10_spill] sm:$0xff] }
 0x685   : > { %v7707_v44 = vunpack.i.h.bf16 %v7705_v37  ;;  %v7706_v40 = vunpack.i.l.bf16 %v7705_v37 }
 0x686   : > { %6072 = vmatmul.msk.bf16.gmra.mxu2 %vm370_vm10, %v5483_v3  ;;  %v4802_v3 = vsel %vm3008_vm13, %v4770_v29, %v7691_v55  ;;  %v12642_v2 = vpop.f32.mrf.mxu1  ;;  %v4773_v55 = vsel %vm370_vm10, %v7878_v49, %v7432_v8 }
 0x687   : > { %5329 = vmatmul.bf16.gmra.mxu0 %v4969_v38  ;;  %v4834_v38 = vsel %vm3041_vm14, %v4802_v3, %v7696_v18 }
 0x688   : > { %v12613_v4 = vpop.permute.xlu1 %7699  ;;  %v4974_v24 = vpack.c.bf16 %v4835_v36, %v4834_v38 }
 0x689   : > { %v5206_v9 = vpop.f32.mrf.mxu3  ;;  %v7701_v52 = vunpack.i.l.bf16 %v12613_v4 }
 0x68a   : > { %v5207_v26 = vadd.f32 %v12518_v53, %v5206_v9 }
 0x68b   : > { %v4867_v56 = vsel %vm370_vm10, %v13513_v13, %v7701_v52  ;;  %v7702_v52 = vunpack.i.h.bf16 %v12613_v4 }
 0x68c   : > { %v4899_v6 = vsel %vm3008_vm13, %v4867_v56, %v7707_v44  ;;  %v7720_v35 = vpop.permute.xlu2 %7719 }
 0x68d   : > { %v7722_v29 = vunpack.i.h.bf16 %v7720_v35  ;;  %v7721_v45 = vunpack.i.l.bf16 %v7720_v35 }
 0x68e   : > { %v12659_v37 = vpop.f32.mrf.mxu1 }
 0x68f   : > { %5245 = vmatmul.bf16.gmra.mxu3 %v4971_v12  ;;  %v7711_v12 = vunpack.i.l.bf16 %v7710_v33 }
 0x690   : > { %v7715_v15 = vpop.permute.xlu1 %7714 }
 0x691   : > { %v5208_v23 = vpop.f32.mrf.mxu3  ;;  %v7717_v1 = vunpack.i.h.bf16 %v7715_v15  ;;  %v7716_v20 = vunpack.i.l.bf16 %v7715_v15 }
 0x692   : > { %v5209_v47 = vadd.f32 %v12518_v53, %v5208_v23 }
 0x693   : > { %v4805_v7 = vsel %vm3008_vm13, %v4773_v55, %v7717_v1 }
 0x694   : > { %v5295_v30 = vpop.f32.mrf.mxu0  ;;  %v4837_v15 = vsel %vm3041_vm14, %v4805_v7, %v7722_v29 }
 0x695   : > { %v5296_v61 = vadd.f32 %v5295_v30, %v5207_v26  ;;  %v7726_v26 = vunpack.i.l.bf16 %v12650_v59 }
 0x697   : > { %5334 = vmatmul.bf16.gmra.mxu0 %v4972_v48  ;;  %v5385_v31 = vadd.f32 %v12544_v19, %v5296_v61  ;;  %v4866_v19 = vsel %vm370_vm10, %v13514_v42, %v7677_v5  ;;  %v7879_v48 = vld [vmem:[#allocation3 + $0x138] sm:$0xff]  ;;  %v7735_v61 = vpop.permute.xlu2 %7734 }
 0x698   : > { %v4898_v21 = vsel %vm3008_vm13, %v4866_v19, %v7706_v40  ;;  %v7730_v32 = vpop.permute.xlu1 %7729  ;;  %v4772_v17 = vsel %vm370_vm10, %v7879_v48, %v7431_v46 }
 0x699   : > { %v5455_v10 = vmax.f32 %v5385_v31, 0.0  ;;  %v4930_v60 = vsel %vm3041_vm14, %v4898_v21, %v7711_v12  ;;  %v4804_v39 = vsel %vm3008_vm13, %v4772_v17, %v7716_v20  ;;  %v7732_v3 = vunpack.i.h.bf16 %v7730_v32  ;;  %v13515_v31 = vld [vmem:[#allocation17_spill] sm:$0xff]  ;;  %v7881_v12 = vld [vmem:[#allocation3 + $0x198] sm:$0xff] }
 0x69a   : > { %v4836_v33 = vsel %vm3041_vm14, %v4804_v39, %v7721_v45  ;;  %v7731_v43 = vunpack.i.l.bf16 %v7730_v32  ;;  %v4869_v4 = vsel %vm370_vm10, %v13515_v31, %v7726_v26  ;;  %v4133_v35 = vrot.slane %v7881_v12, 2  ;;  %v7882_v39 = vld [vmem:[#allocation3 + $0x150] sm:$0xff] }
 0x69b   : > { %v4977_v44 = vpack.c.bf16 %v4837_v15, %v4836_v33  ;;  %v4901_v5 = vsel %vm3008_vm13, %v4869_v4, %v7732_v3  ;;  %v7441_v21 = vunpack.i.l.bf16 %v12280_v16  ;;  %v4136_v32 = vrot.slane %v12427_v27, 2  ;;  %v7883_v27 = vld [vmem:[#allocation3 + $0x158] sm:$0xff] }
 0x69c   : > { %v5297_v14 = vpop.f32.mrf.mxu0 }
 0x69d   : > { %v5298_v50 = vadd.f32 %v5297_v14, %v5209_v47  ;;  %v7740_v47 = vpop.permute.xlu0 %7739  ;;  %v4774_v7 = vsel %vm370_vm10, %v7882_v39, %v7441_v21 }
 0x69f   : > { %v5387_v11 = vadd.f32 %v12559_v51, %v5298_v50  ;;  %5250 = vmatmul.bf16.gmra.mxu3 %v4974_v24  ;;  %v4931_v51 = vsel %vm3041_vm14, %v4899_v6, %v7712_v57  ;;  %v13516_v50 = vld [vmem:[#allocation56_spill] sm:$0xff] }
 0x6a0   : > { %v4975_v34 = vpack.c.bf16 %v4931_v51, %v4930_v60  ;;  %v7745_v13 = vpop.permute.xlu1 %7744  ;;  %v4868_v24 = vsel %vm370_vm10, %v13516_v50, %v7702_v52  ;;  %v7880_v6 = vld [vmem:[#allocation3 + $0x1a0] sm:$0xff]  ;;  %v12676_v51 = vpop.f32.mrf.mxu1  ;;  %v7741_v60 = vunpack.i.l.bf16 %v7740_v47 }
 0x6a1   : > { %v5456_v9 = vmax.f32 %v5387_v11, 0.0  ;;  %v4900_v40 = vsel %vm3008_vm13, %v4868_v24, %v7731_v43  ;;  %v4134_v57 = vrot.slane %v7880_v6, 2  ;;  %v7747_v55 = vunpack.i.h.bf16 %v7745_v13 }
 0x6a2   : > { %v5211_v0 = vpop.f32.mrf.mxu3  ;;  %v7746_v48 = vunpack.i.l.bf16 %v7745_v13  ;;  %v4806_v45 = vsel %vm3008_vm13, %v4774_v7, %v7741_v60 }
 0x6a3   : > { %v5484_v22 = vpack.c.bf16 %v5456_v9, %v5455_v10  ;;  %v5212_v30 = vadd.f32 %v12518_v53, %v5211_v0  ;;  %v7736_v10 = vunpack.i.l.bf16 %v7735_v61  ;;  %v4135_v20 = vsel %vm663_vm1, %v4133_v35, %v4134_v57 }
 0x6a4   : > { %v5300_v62 = vpop.f32.mrf.mxu0  ;;  %v4137_v16 = vsel %vm663_vm1, %v4134_v57, %v4136_v32 }
 0x6a5   : > { %6073 = vmatmul.msk.bf16.gmra.mxu2 %vm370_vm10, %v5484_v22  ;;  %v5301_v18 = vadd.f32 %v5300_v62, %v5212_v30  ;;  %v4932_v8 = vsel %vm3041_vm14, %v4900_v40, %v7736_v10  ;;  %v7750_v22 = vpop.permute.xlu2 %7749  ;;  %v7742_v62 = vunpack.i.h.bf16 %v7740_v47  ;;  %v7755_v30 = vpop.permute.xlu0 %7754 }
 0x6a6   : > { %v7751_v3 = vunpack.i.l.bf16 %v7750_v22  ;;  %v7757_v43 = vunpack.i.h.bf16 %v7755_v30 }
 0x6a7   : > { %5339 = vmatmul.bf16.gmra.mxu0 %v4975_v34  ;;  %v5390_v56 = vadd.f32 %v12578_v25, %v5301_v18  ;;  %v7737_v25 = vunpack.i.h.bf16 %v7735_v61  ;;  %v7752_v61 = vunpack.i.h.bf16 %v7750_v22 }
 0x6a8   : > { %v7760_v17 = vpop.permute.xlu1 %7759 }
 0x6a9   : > { %v5457_v9 = vmax.f32 %v5390_v56, 0.0  ;;  %v4933_v46 = vsel %vm3041_vm14, %v4901_v5, %v7737_v25  ;;  %v7761_v31 = vunpack.i.l.bf16 %v7760_v17  ;;  %v13517_v5 = vld [vmem:[#allocation36_spill] sm:$0xff] }
 0x6aa   : > { %v5213_v23 = vpop.f32.mrf.mxu3  ;;  %v4978_v49 = vpack.c.bf16 %v4933_v46, %v4932_v8  ;;  %v4871_v40 = vsel %vm370_vm10, %v13517_v5, %v7752_v61 }
 0x6ab   : > { %v5214_v38 = vadd.f32 %v12518_v53, %v5213_v23  ;;  %v4838_v23 = vsel %vm3041_vm14, %v4806_v45, %v7746_v48 }
 0x6ac   : > { %v5302_v36 = vpop.f32.mrf.mxu0 }
 0x6ad   : > { %v5303_v14 = vadd.f32 %v5302_v36, %v5214_v38  ;;  %v7756_v36 = vunpack.i.l.bf16 %v7755_v30  ;;  %v7765_v4 = vpop.permute.xlu2 %7764  ;;  %v7770_v50 = vpop.permute.xlu0 %7769  ;;  %v7885_v30 = vld [vmem:[#allocation3 + $0x168] sm:$0xff] }
 0x6ae   : > { %v7766_v8 = vunpack.i.l.bf16 %v7765_v4  ;;  %v7771_v21 = vunpack.i.l.bf16 %v7770_v50 }
 0x6af   : > { %v5392_v11 = vadd.f32 %v12594_v63, %v5303_v14  ;;  %5255 = vmatmul.bf16.gmra.mxu3 %v4977_v44  ;;  %v7727_v63 = vunpack.i.h.bf16 %v12650_v59  ;;  %v4985_v59 = vpack.c.bf16 %v4137_v16, %v4135_v20  ;;  %v12694_v14 = vpop.f32.mrf.mxu1  ;;  %v7762_v44 = vunpack.i.h.bf16 %v7760_v17 }
 0x6b0   : > { %v7775_v12 = vpop.permute.xlu1 %7774 }
 0x6b1   : > { %v5458_v42 = vmax.f32 %v5392_v11, 0.0  ;;  %v4775_v29 = vsel %vm370_vm10, %v7883_v27, %v7727_v63  ;;  %6061 = vmatmul.msk.bf16.gmra.mxu1 %vm370_vm10, %v4985_v59  ;;  %v13518_v11 = vld [vmem:[#allocation53_spill] sm:$0xff]  ;;  %v7777_v20 = vunpack.i.h.bf16 %v7775_v12  ;;  %v7776_v32 = vunpack.i.l.bf16 %v7775_v12 }
 0x6b2   : > { %v5216_v19 = vpop.f32.mrf.mxu3  ;;  %v4807_v18 = vsel %vm3008_vm13, %v4775_v29, %v7742_v62  ;;  %v4870_v6 = vsel %vm370_vm10, %v13518_v11, %v7751_v3  ;;  %v7884_v62 = vld [vmem:[#allocation3 + $0x170] sm:$0xff] }
 0x6b3   : > { %v5485_v0 = vpack.c.bf16 %v5458_v42, %v5457_v9  ;;  %v5217_v34 = vadd.f32 %v12518_v53, %v5216_v19  ;;  %v4839_v33 = vsel %vm3041_vm14, %v4807_v18, %v7747_v55  ;;  %v4902_v57 = vsel %vm3008_vm13, %v4870_v6, %v7756_v36 }
 0x6b4   : > { %v5305_v1 = vpop.f32.mrf.mxu0  ;;  %v4980_v56 = vpack.c.bf16 %v4839_v33, %v4838_v23  ;;  %v4934_v9 = vsel %vm3041_vm14, %v4902_v57, %v7761_v31  ;;  %v7767_v19 = vunpack.i.h.bf16 %v7765_v4 }
 0x6b5   : > { %6074 = vmatmul.msk.bf16.gmra.mxu2 %vm370_vm10, %v5485_v0  ;;  %v5306_v26 = vadd.f32 %v5305_v1, %v5217_v34  ;;  %v7772_v0 = vunpack.i.h.bf16 %v7770_v50  ;;  %v4776_v34 = vsel %vm370_vm10, %v7885_v30, %v7766_v8  ;;  %v7785_v16 = vpop.permute.xlu0 %7784 }
 0x6b6   : > { %v4777_v60 = vsel %vm370_vm10, %v7884_v62, %v7767_v19  ;;  %v4808_v55 = vsel %vm3008_vm13, %v4776_v34, %v7771_v21  ;;  %v7786_v23 = vunpack.i.l.bf16 %v7785_v16 }
 0x6b7   : > { %5344 = vmatmul.bf16.gmra.mxu0 %v4978_v49  ;;  %v5395_v47 = vadd.f32 %v12609_v58, %v5306_v26  ;;  %v4903_v58 = vsel %vm3008_vm13, %v4871_v40, %v7757_v43  ;;  %v12707_v22 = vpop.f32.mrf.mxu1  ;;  %v7780_v49 = vpop.permute.xlu2 %7779  ;;  %v4809_v48 = vsel %vm3008_vm13, %v4777_v60, %v7772_v0  ;;  %v4840_v39 = vsel %vm3041_vm14, %v4808_v55, %v7776_v32  ;;  %v12736_v0 = vld [vmem:[%s12859_s8] ss:$0 sm:$0xff] }
 0x6b8   : > { %v4935_v42 = vsel %vm3041_vm14, %v4903_v58, %v7762_v44  ;;  %v4841_v7 = vsel %vm3041_vm14, %v4809_v48, %v7777_v20  ;;  %v7790_v27 = vpop.permute.xlu1 %7789  ;;  %v7782_v45 = vunpack.i.h.bf16 %v7780_v49  ;;  %v7781_v18 = vunpack.i.l.bf16 %v7780_v49 }
 0x6b9   : > { %v5459_v35 = vmax.f32 %v5395_v47, 0.0  ;;  %v4981_v1 = vpack.c.bf16 %v4935_v42, %v4934_v9  ;;  %v7787_v26 = vunpack.i.h.bf16 %v7785_v16  ;;  %v4983_v61 = vpack.c.bf16 %v4841_v7, %v4840_v39 }
 0x6ba   : > { %v5218_v52 = vpop.f32.mrf.mxu3  ;;  %v7792_v3 = vunpack.i.h.bf16 %v7790_v27  ;;  %v7791_v43 = vunpack.i.l.bf16 %v7790_v27  ;;  %v4873_v36 = vsel %vm370_vm10, %v12178_v54, %v7782_v45  ;;  %v4872_v47 = vsel %vm370_vm10, %v12175_v28, %v7781_v18 }
 0x6bb   : > { %v5219_v15 = vadd.f32 %v12518_v53, %v5218_v52 }
 0x6bc   : > { %v5307_v38 = vpop.f32.mrf.mxu0 }
 0x6bd   : > { %v5308_v13 = vadd.f32 %v5307_v38, %v5219_v15 }
 0x6bf   : > { %v5397_v24 = vadd.f32 %v12625_v41, %v5308_v13  ;;  %5260 = vmatmul.bf16.gmra.mxu3 %v4980_v56  ;;  %v4904_v13 = vsel %vm3008_vm13, %v4872_v47, %v7786_v23  ;;  %v4905_v56 = vsel %vm3008_vm13, %v4873_v36, %v7787_v26 }
 0x6c0   : > { %v4936_v4 = vsel %vm3041_vm14, %v4904_v13, %v7791_v43  ;;  %v4937_v50 = vsel %vm3041_vm14, %v4905_v56, %v7792_v3 }
 0x6c1   : > { %v5460_v25 = vmax.f32 %v5397_v24, 0.0  ;;  %v5411_v24 = vpop.f32.mrf.mxu1  ;;  %v4984_v54 = vpack.c.bf16 %v4937_v50, %v4936_v4 }
 0x6c2   : > { %v5221_v10 = vpop.f32.mrf.mxu3 }
 0x6c3   : > { %v5486_v41 = vpack.c.bf16 %v5460_v25, %v5459_v35  ;;  %v5222_v63 = vadd.f32 %v12518_v53, %v5221_v10 }
 0x6c4   : > { %v5310_v46 = vpop.f32.mrf.mxu0 }
 0x6c5   : > { %6075 = vmatmul.msk.bf16.gmra.mxu2 %vm370_vm10, %v5486_v41  ;;  %v5311_v17 = vadd.f32 %v5310_v46, %v5222_v63 }
 0x6c7   : > { %5349 = vmatmul.bf16.gmra.mxu0 %v4981_v1  ;;  %v5400_v33 = vadd.f32 %v12642_v2, %v5311_v17 }
 0x6c9   : > { %v5461_v44 = vmax.f32 %v5400_v33, 0.0  ;;  %v5414_v58 = vpop.f32.mrf.mxu1 }
 0x6ca   : > { %v5223_v59 = vpop.f32.mrf.mxu3 }
 0x6cb   : > { %v5224_v29 = vadd.f32 %v12518_v53, %v5223_v59 }
 0x6cc   : > { %v5312_v52 = vpop.f32.mrf.mxu0 }
 0x6cd   : > { %v5313_v15 = vadd.f32 %v5312_v52, %v5224_v29 }
 0x6cf   : > { %v5402_v38 = vadd.f32 %v12659_v37, %v5313_v15  ;;  %5265 = vmatmul.bf16.gmra.mxu3 %v4983_v61 }
 0x6d1   : > { %v5462_v31 = vmax.f32 %v5402_v38, 0.0  ;;  %v5416_v46 = vpop.f32.mrf.mxu1 }
 0x6d2   : > { %v5226_v2 = vpop.f32.mrf.mxu3 }
 0x6d3   : > { %v5487_v37 = vpack.c.bf16 %v5462_v31, %v5461_v44  ;;  %v5227_v40 = vadd.f32 %v12518_v53, %v5226_v2 }
 0x6d4   : > { %v5315_v5 = vpop.f32.mrf.mxu0 }
 0x6d5   : > { %6076 = vmatmul.msk.bf16.gmra.mxu2 %vm370_vm10, %v5487_v37  ;;  %v5316_v28 = vadd.f32 %v5315_v5, %v5227_v40 }
 0x6d7   : > { %5354 = vmatmul.bf16.gmra.mxu0 %v4984_v54  ;;  %v5405_v12 = vadd.f32 %v12676_v51, %v5316_v28 }
 0x6d9   : > { %v5463_v10 = vmax.f32 %v5405_v12, 0.0  ;;  %v5419_v30 = vpop.f32.mrf.mxu1 }
 0x6da   : > { %v5228_v11 = vpop.f32.mrf.mxu3 }
 0x6db   : > { %v5229_v6 = vadd.f32 %v12518_v53, %v5228_v11 }
 0x6dc   : > { %v5317_v57 = vpop.f32.mrf.mxu0 }
 0x6dd   : > { %v5318_v35 = vadd.f32 %v5317_v57, %v5229_v6 }
 0x6df   : > { %v5407_v25 = vadd.f32 %v12694_v14, %v5318_v35 }
 0x6e1   : > { %v5464_v9 = vmax.f32 %v5407_v25, 0.0  ;;  %v5421_v18 = vpop.f32.mrf.mxu1 }
 0x6e2   : > { %v5231_v42 = vpop.f32.mrf.mxu3 }
 0x6e3   : > { %v5488_v41 = vpack.c.bf16 %v5464_v9, %v5463_v10  ;;  %v5232_v8 = vadd.f32 %v12518_v53, %v5231_v42 }
 0x6e4   : > { %v5320_v19 = vpop.f32.mrf.mxu0 }
 0x6e5   : > { %6077 = vmatmul.msk.bf16.gmra.mxu2 %vm370_vm10, %v5488_v41  ;;  %v5321_v21 = vadd.f32 %v5320_v19, %v5232_v8 }
 0x6e7   : > { %v5410_v32 = vadd.f32 %v12707_v22, %v5321_v21 }
 0x6e9   : > { %v5574_v51 = vpop.f32.mrf.mxu2  ;;  %v5465_v34 = vmax.f32 %v5410_v32, 0.0  ;;  %v5424_v56 = vpop.f32.mrf.mxu1 }
 0x6ea   : > { %v5233_v63 = vpop.f32.mrf.mxu3  ;;  %v5575_v14 = vadd.f32 %v12736_v0, %v5574_v51 }
 0x6eb   : > { %v5234_v1 = vadd.f32 %v12518_v53, %v5233_v63 }
 0x6ec   : > { %v5322_v20 = vpop.f32.mrf.mxu0  ;;  %5654 = vxpose.xlu2.b32.start [1/16] (narrow) %v5575_v14, 16 }
 0x6ed   : > { %v5323_v62 = vadd.f32 %v5322_v20, %v5234_v1 }
 0x6ef   : > { %v5412_v60 = vadd.f32 %v5411_v24, %v5323_v62 }
 0x6f1   : > { %v5466_v49 = vmax.f32 %v5412_v60, 0.0  ;;  %v5576_v55 = vpop.f32.mrf.mxu2  ;;  %v5426_v54 = vpop.f32.mrf.mxu1 }
 0x6f2   : > { %v5236_v48 = vpop.f32.mrf.mxu3  ;;  %v5577_v17 = vadd.f32 %v12736_v0, %v5576_v55 }
 0x6f3   : > { %v5489_v16 = vpack.c.bf16 %v5466_v49, %v5465_v34  ;;  %v5237_v39 = vadd.f32 %v12518_v53, %v5236_v48 }
 0x6f4   : > { %v5325_v59 = vpop.f32.mrf.mxu0  ;;  %5655 = vxpose.xlu2.b32.cont [2/16] (narrow) %v5577_v17, 16 }
 0x6f5   : > { %6078 = vmatmul.msk.bf16.gmra.mxu2 %vm370_vm10, %v5489_v16  ;;  %v5326_v7 = vadd.f32 %v5325_v59, %v5237_v39 }
 0x6f7   : > { %v5415_v52 = vadd.f32 %v5414_v58, %v5326_v7 }
 0x6f9   : > { %v5579_v27 = vpop.f32.mrf.mxu2  ;;  %v5467_v15 = vmax.f32 %v5415_v52, 0.0  ;;  %v5429_v9 = vpop.f32.mrf.mxu1 }
 0x6fa   : > { %v5238_v22 = vpop.f32.mrf.mxu3  ;;  %v5580_v29 = vadd.f32 %v12736_v0, %v5579_v27 }
 0x6fb   : > { %v5239_v45 = vadd.f32 %v12518_v53, %v5238_v22 }
 0x6fc   : > { %v5327_v26 = vpop.f32.mrf.mxu0  ;;  %5656 = vxpose.xlu2.b32.cont [3/16] (narrow) %v5580_v29, 16 }
 0x6fd   : > { %v5328_v23 = vadd.f32 %v5327_v26, %v5239_v45 }
 0x6ff   : > { %v5417_v33 = vadd.f32 %v5416_v46, %v5328_v23 }
 0x701   : > { %v5468_v61 = vmax.f32 %v5417_v33, 0.0  ;;  %v5581_v3 = vpop.f32.mrf.mxu2  ;;  %v5431_v20 = vpop.f32.mrf.mxu1 }
 0x702   : > { %v5241_v43 = vpop.f32.mrf.mxu3  ;;  %v5582_v36 = vadd.f32 %v12736_v0, %v5581_v3 }
 0x703   : > { %v5490_v38 = vpack.c.bf16 %v5468_v61, %v5467_v15  ;;  %v5242_v13 = vadd.f32 %v12518_v53, %v5241_v43 }
 0x704   : > { %v5330_v47 = vpop.f32.mrf.mxu0  ;;  %5657 = vxpose.xlu2.b32.cont [4/16] (narrow) %v5582_v36, 16 }
 0x705   : > { %6079 = vmatmul.msk.bf16.gmra.mxu2 %vm370_vm10, %v5490_v38  ;;  %v5331_v44 = vadd.f32 %v5330_v47, %v5242_v13 }
 0x707   : > { %v5420_v37 = vadd.f32 %v5419_v30, %v5331_v44 }
 0x709   : > { %v5584_v31 = vpop.f32.mrf.mxu2  ;;  %v5469_v28 = vmax.f32 %v5420_v37, 0.0  ;;  %v5434_v59 = vpop.f32.mrf.mxu1 }
 0x70a   : > { %v5243_v2 = vpop.f32.mrf.mxu3  ;;  %v5585_v4 = vadd.f32 %v12736_v0, %v5584_v31 }
 0x70b   : > { %v5244_v50 = vadd.f32 %v12518_v53, %v5243_v2 }
 0x70c   : > { %v5332_v24 = vpop.f32.mrf.mxu0  ;;  %5658 = vxpose.xlu2.b32.cont [5/16] (narrow) %v5585_v4, 16 }
 0x70d   : > { %v5333_v5 = vadd.f32 %v5332_v24, %v5244_v50 }
 0x70f   : > { %v5422_v40 = vadd.f32 %v5421_v18, %v5333_v5  ;;  %v7886_v5 = vld [vmem:[%s12857_s6] ss:$0 sm:$0xff] }
 0x711   : > { %v5470_v11 = vmax.f32 %v5422_v40, 0.0  ;;  %v5586_v6 = vpop.f32.mrf.mxu2  ;;  %v5436_v23 = vpop.f32.mrf.mxu1 }
 0x712   : > { %v5246_v57 = vpop.f32.mrf.mxu3  ;;  %v5587_v12 = vadd.f32 %v12736_v0, %v5586_v6 }
 0x713   : > { %v5491_v58 = vpack.c.bf16 %v5470_v11, %v5469_v28  ;;  %v5247_v25 = vadd.f32 %v12518_v53, %v5246_v57 }
 0x714   : > { %v5335_v35 = vpop.f32.mrf.mxu0  ;;  %5659 = vxpose.xlu2.b32.cont [6/16] (narrow) %v5587_v12, 16 }
 0x715   : > { %6080 = vmatmul.msk.bf16.gmra.mxu2 %vm370_vm10, %v5491_v58  ;;  %v5336_v10 = vadd.f32 %v5335_v35, %v5247_v25 }
 0x717   : > { %v5425_v8 = vadd.f32 %v5424_v56, %v5336_v10 }
 0x719   : > { %v5471_v51 = vmax.f32 %v5425_v8, 0.0  ;;  %v5439_v4 = vpop.f32.mrf.mxu1 }
 0x71a   : > { %v5248_v42 = vpop.f32.mrf.mxu3 }
 0x71b   : > { %v5249_v41 = vadd.f32 %v12518_v53, %v5248_v42 }
 0x71c   : > { %v5337_v19 = vpop.f32.mrf.mxu0 }
 0x71d   : > { %v5338_v46 = vadd.f32 %v5337_v19, %v5249_v41 }
 0x71f   : > { %v5427_v21 = vadd.f32 %v5426_v54, %v5338_v46 }
 0x721   : > { %v5472_v63 = vmax.f32 %v5427_v21, 0.0  ;;  %v5441_v57 = vpop.f32.mrf.mxu1 }
 0x722   : > { %v5251_v14 = vpop.f32.mrf.mxu3 }
 0x723   : > { %v5492_v1 = vpack.c.bf16 %v5472_v63, %v5471_v51  ;;  %v5252_v62 = vadd.f32 %v12518_v53, %v5251_v14 }
 0x724   : > { %v5340_v32 = vpop.f32.mrf.mxu0 }
 0x725   : > { %6081 = vmatmul.msk.bf16.gmra.mxu2 %vm370_vm10, %v5492_v1  ;;  %v5341_v30 = vadd.f32 %v5340_v32, %v5252_v62 }
 0x727   : > { %v5430_v16 = vadd.f32 %v5429_v9, %v5341_v30 }
 0x728   : > { %v5589_v60 = vpop.f32.mrf.mxu2 }
 0x729   : > { %v5590_v34 = vadd.f32 %v12736_v0, %v5589_v60  ;;  %v5473_v27 = vmax.f32 %v5430_v16, 0.0 }
 0x72a   : > { %v5253_v49 = vpop.f32.mrf.mxu3 }
 0x72b   : > { %v5254_v55 = vadd.f32 %v12518_v53, %v5253_v49  ;;  %5660 = vxpose.xlu2.b32.cont [7/16] (narrow) %v5590_v34, 16 }
 0x72c   : > { %v5342_v48 = vpop.f32.mrf.mxu0 }
 0x72d   : > { %v5343_v17 = vadd.f32 %v5342_v48, %v5254_v55 }
 0x72e   : > { %v5444_v46 = vpop.f32.mrf.mxu1 }
 0x72f   : > { %v5432_v39 = vadd.f32 %v5431_v20, %v5343_v17 }
 0x730   : > { %v5591_v7 = vpop.f32.mrf.mxu2 }
 0x731   : > { %v5474_v22 = vmax.f32 %v5432_v39, 0.0  ;;  %v5592_v29 = vadd.f32 %v12736_v0, %v5591_v7 }
 0x732   : > { %v5256_v45 = vpop.f32.mrf.mxu3 }
 0x733   : > { %v5493_v18 = vpack.c.bf16 %v5474_v22, %v5473_v27  ;;  %5661 = vxpose.xlu2.b32.cont [8/16] (narrow) %v5592_v29, 16  ;;  %v5257_v52 = vadd.f32 %v12518_v53, %v5256_v45 }
 0x734   : > { %v5345_v26 = vpop.f32.mrf.mxu0 }
 0x735   : > { %6082 = vmatmul.msk.bf16.gmra.mxu2 %vm370_vm10, %v5493_v18  ;;  %v5346_v15 = vadd.f32 %v5345_v26, %v5257_v52 }
 0x736   : > { %v5446_v34 = vpop.f32.mrf.mxu1 }
 0x737   : > { %v5435_v36 = vadd.f32 %v5434_v59, %v5346_v15 }
 0x738   : > { %v5594_v33 = vpop.f32.mrf.mxu2 }
 0x739   : > { %v5595_v61 = vadd.f32 %v12736_v0, %v5594_v33  ;;  %v5475_v44 = vmax.f32 %v5435_v36, 0.0 }
 0x73a   : > { %v5258_v3 = vpop.f32.mrf.mxu3 }
 0x73b   : > { %v5259_v43 = vadd.f32 %v12518_v53, %v5258_v3  ;;  %5662 = vxpose.xlu2.b32.cont [9/16] (narrow) %v5595_v61, 16 }
 0x73c   : > { %v5347_v38 = vpop.f32.mrf.mxu0 }
 0x73d   : > { %v5348_v47 = vadd.f32 %v5347_v38, %v5259_v43 }
 0x73f   : > { %v5437_v13 = vadd.f32 %v5436_v23, %v5348_v47 }
 0x740   : > { %v5596_v56 = vpop.f32.mrf.mxu2 }
 0x741   : > { %v5476_v31 = vmax.f32 %v5437_v13, 0.0  ;;  %v5597_v2 = vadd.f32 %v12736_v0, %v5596_v56 }
 0x742   : > { %v5261_v50 = vpop.f32.mrf.mxu3 }
 0x743   : > { %v5494_v24 = vpack.c.bf16 %v5476_v31, %v5475_v44  ;;  %5663 = vxpose.xlu2.b32.cont [10/16] (narrow) %v5597_v2, 16  ;;  %v5262_v53 = vadd.f32 %v7886_v5, %v5261_v50 }
 0x744   : > { %v5350_v37 = vpop.f32.mrf.mxu0 }
 0x745   : > { %6083 = vmatmul.msk.bf16.gmra.mxu2 %vm370_vm10, %v5494_v24  ;;  %v5351_v54 = vadd.f32 %v5350_v37, %v5262_v53  ;;  %v3794_v53 = vpop.trf.xlu0 }
 0x746   : > { %3811 = vst [vmem:[%s356_s11 + $0x8] sm:$0xff] %v3794_v53 }
 0x747   : > { %v5440_v12 = vadd.f32 %v5439_v4, %v5351_v54 }
 0x748   : > { %v5599_v40 = vpop.f32.mrf.mxu2 }
 0x749   : > { %v5600_v28 = vadd.f32 %v12736_v0, %v5599_v40  ;;  %v5477_v9 = vmax.f32 %v5440_v12, 0.0  ;;  %v3762_v40 = vpop.trf.xlu2 }
 0x74a   : > { %v5263_v11 = vpop.f32.mrf.mxu3  ;;  %3810 = vst [vmem:[%s356_s11] sm:$0xff] %v3762_v40 }
 0x74b   : > { %v5264_v6 = vadd.f32 %v7886_v5, %v5263_v11  ;;  %5664 = vxpose.xlu2.b32.cont [11/16] (narrow) %v5600_v28, 16 }
 0x74c   : > { %v5352_v58 = vpop.f32.mrf.mxu0 }
 0x74d   : > { %v5353_v35 = vadd.f32 %v5352_v58, %v5264_v6  ;;  %v3795_v11 = vpop.trf.xlu0 }
 0x74e   : > { %3813 = vst [vmem:[%s356_s11 + $0x18] sm:$0xff] %v3795_v11 }
 0x74f   : > { %v5442_v25 = vadd.f32 %v5441_v57, %v5353_v35 }
 0x750   : > { %v5601_v10 = vpop.f32.mrf.mxu2 }
 0x751   : > { %v5478_v42 = vmax.f32 %v5442_v25, 0.0  ;;  %v5602_v41 = vadd.f32 %v12736_v0, %v5601_v10  ;;  %v3763_v6 = vpop.trf.xlu2 }
 0x752   : > { %v5266_v19 = vpop.f32.mrf.mxu3  ;;  %3812 = vst [vmem:[%s356_s11 + $0x10] sm:$0xff] %v3763_v6 }
 0x753   : > { %v5495_v8 = vpack.c.bf16 %v5478_v42, %v5477_v9  ;;  %5665 = vxpose.xlu2.b32.cont [12/16] (narrow) %v5602_v41, 16  ;;  %v5267_v51 = vadd.f32 %v7886_v5, %v5266_v19 }
 0x754   : > { %v5355_v21 = vpop.f32.mrf.mxu0 }
 0x755   : > { %6084 = vmatmul.msk.bf16.gmra.mxu2 %vm370_vm10, %v5495_v8  ;;  %v5356_v14 = vadd.f32 %v5355_v21, %v5267_v51  ;;  %v3796_v12 = vpop.trf.xlu0 }
 0x756   : > { %3815 = vst [vmem:[%s356_s11 + $0x28] sm:$0xff] %v3796_v12 }
 0x757   : > { %v5445_v60 = vadd.f32 %v5444_v46, %v5356_v14 }
 0x758   : > { %v5604_v63 = vpop.f32.mrf.mxu2 }
 0x759   : > { %v5605_v1 = vadd.f32 %v12736_v0, %v5604_v63  ;;  %v5479_v48 = vmax.f32 %v5445_v60, 0.0  ;;  %v3764_v35 = vpop.trf.xlu2 }
 0x75a   : > { %v5268_v20 = vpop.f32.mrf.mxu3  ;;  %3814 = vst [vmem:[%s356_s11 + $0x20] sm:$0xff] %v3764_v35 }
 0x75b   : > { %v5269_v32 = vadd.f32 %v7886_v5, %v5268_v20  ;;  %5666 = vxpose.xlu2.b32.cont [13/16] (narrow) %v5605_v1, 16 }
 0x75c   : > { %v5357_v62 = vpop.f32.mrf.mxu0 }
 0x75d   : > { %v5358_v30 = vadd.f32 %v5357_v62, %v5269_v32  ;;  %v3797_v9 = vpop.trf.xlu0 }
 0x75e   : > { %3817 = vst [vmem:[%s356_s11 + $0x38] sm:$0xff] %v3797_v9 }
 0x75f   : > { %v5447_v49 = vadd.f32 %v5446_v34, %v5358_v30 }
 0x760   : > { %v5606_v55 = vpop.f32.mrf.mxu2 }
 0x761   : > { %v5480_v16 = vmax.f32 %v5447_v49, 0.0  ;;  %v5607_v17 = vadd.f32 %v12736_v0, %v5606_v55  ;;  %v3765_v42 = vpop.trf.xlu2 }
 0x762   : > { %3816 = vst [vmem:[%s356_s11 + $0x30] sm:$0xff] %v3765_v42 }
 0x763   : > { %v5496_v59 = vpack.c.bf16 %v5480_v16, %v5479_v48  ;;  %5667 = vxpose.xlu2.b32.cont [14/16] (narrow) %v5607_v17, 16 }
 0x765   : > { %6085 = vmatmul.msk.bf16.gmra.mxu2 %vm370_vm10, %v5496_v59 }
 0x768   : > { %v5609_v39 = vpop.f32.mrf.mxu2 }
 0x769   : > { %v5610_v7 = vadd.f32 %v12736_v0, %v5609_v39 }
 0x76b   : > { %5668 = vxpose.xlu2.b32.cont [15/16] (narrow) %v5610_v7, 16 }
 0x770   : > { %v5611_v27 = vpop.f32.mrf.mxu2 }
 0x771   : > { %v5612_v22 = vadd.f32 %v12736_v0, %v5611_v27 }
 0x773   : > { %5669 = vxpose.xlu2.b32.end [16/16] (narrow) %v5612_v22, 16 }
 0x778   : > { %v5614_v29 = vpop.f32.mrf.mxu2 }
 0x779   : > { %v5615_v45 = vadd.f32 %v12736_v0, %v5614_v29 }
 0x77b   : > { %5686 = vxpose.xlu0.b32.start [1/16] (narrow) %v5615_v45, 16 }
 0x780   : > { %v5616_v18 = vpop.f32.mrf.mxu2 }
 0x781   : > { %v5617_v26 = vadd.f32 %v12736_v0, %v5616_v18 }
 0x783   : > { %5687 = vxpose.xlu0.b32.cont [2/16] (narrow) %v5617_v26, 16 }
 0x788   : > { %v5619_v52 = vpop.f32.mrf.mxu2 }
 0x789   : > { %v5620_v23 = vadd.f32 %v12736_v0, %v5619_v52 }
 0x78b   : > { %5688 = vxpose.xlu0.b32.cont [3/16] (narrow) %v5620_v23, 16 }
 0x790   : > { %v5621_v33 = vpop.f32.mrf.mxu2 }
 0x791   : > { %v5622_v15 = vadd.f32 %v12736_v0, %v5621_v33 }
 0x793   : > { %5689 = vxpose.xlu0.b32.cont [4/16] (narrow) %v5622_v15, 16 }
 0x798   : > { %v5624_v61 = vpop.f32.mrf.mxu2 }
 0x799   : > { %v5625_v3 = vadd.f32 %v12736_v0, %v5624_v61 }
 0x79b   : > { %5690 = vxpose.xlu0.b32.cont [5/16] (narrow) %v5625_v3, 16 }
 0x7a0   : > { %v5626_v43 = vpop.f32.mrf.mxu2 }
 0x7a1   : > { %v5627_v38 = vadd.f32 %v12736_v0, %v5626_v43 }
 0x7a3   : > { %5691 = vxpose.xlu0.b32.cont [6/16] (narrow) %v5627_v38, 16 }
 0x7a8   : > { %v5629_v36 = vpop.f32.mrf.mxu2 }
 0x7a9   : > { %v5630_v47 = vadd.f32 %v12736_v0, %v5629_v36 }
 0x7ab   : > { %5692 = vxpose.xlu0.b32.cont [7/16] (narrow) %v5630_v47, 16 }
 0x7b0   : > { %v5631_v13 = vpop.f32.mrf.mxu2 }
 0x7b1   : > { %v5632_v56 = vadd.f32 %v12736_v0, %v5631_v13 }
 0x7b3   : > { %5693 = vxpose.xlu0.b32.cont [8/16] (narrow) %v5632_v56, 16 }
 0x7b8   : > { %v5634_v44 = vpop.f32.mrf.mxu2 }
 0x7b9   : > { %v5635_v31 = vadd.f32 %v12736_v0, %v5634_v44 }
 0x7bb   : > { %5694 = vxpose.xlu0.b32.cont [9/16] (narrow) %v5635_v31, 16 }
 0x7c0   : > { %v5636_v2 = vpop.f32.mrf.mxu2 }
 0x7c1   : > { %v5637_v4 = vadd.f32 %v12736_v0, %v5636_v2 }
 0x7c3   : > { %5695 = vxpose.xlu0.b32.cont [10/16] (narrow) %v5637_v4, 16 }
 0x7c8   : > { %v5639_v50 = vpop.f32.mrf.mxu2 }
 0x7c9   : > { %v5640_v24 = vadd.f32 %v12736_v0, %v5639_v50 }
 0x7cb   : > { %5696 = vxpose.xlu0.b32.cont [11/16] (narrow) %v5640_v24, 16 }
 0x7d0   : > { %v5641_v37 = vpop.f32.mrf.mxu2 }
 0x7d1   : > { %v5642_v5 = vadd.f32 %v12736_v0, %v5641_v37 }
 0x7d3   : > { %5697 = vxpose.xlu0.b32.cont [12/16] (narrow) %v5642_v5, 16 }
 0x7d8   : > { %v5644_v54 = vpop.f32.mrf.mxu2 }
 0x7d9   : > { %v5645_v28 = vadd.f32 %v12736_v0, %v5644_v54 }
 0x7db   : > { %5698 = vxpose.xlu0.b32.cont [13/16] (narrow) %v5645_v28, 16 }
 0x7e0   : > { %v5646_v57 = vpop.f32.mrf.mxu2 }
 0x7e1   : > { %v5647_v58 = vadd.f32 %v12736_v0, %v5646_v57 }
 0x7e3   : > { %5699 = vxpose.xlu0.b32.cont [14/16] (narrow) %v5647_v58, 16 }
 0x7e8   : > { %v5649_v25 = vpop.f32.mrf.mxu2 }
 0x7e9   : > { %v5650_v10 = vadd.f32 %v12736_v0, %v5649_v25 }
 0x7eb   : > { %5700 = vxpose.xlu0.b32.cont [15/16] (narrow) %v5650_v10, 16 }
 0x7ec   : > { %7914 = shalt.err (!%p7911_p3)
}
 0x7ed   : > { %s13085_s11 = smov 256   ;;  %s13519_s1 = smov 16   ;;  %v5670_v8 = vpop.trf.xlu2 }
 0x7ee   : > { %6137 = dma.vmem_to_hbm [thread:$0]  (%p8088_p5), %s5741_s20, 1024, %s5743_s25, %s5723_s27, %s13085_s11, %s13085_s11, %s13519_s1  }
 0x7ef   : > { %s5860_s29 = sshll.u32 %s12789_s28, 5  ;;  %s6135_s18 = sshll.u32 %s8071_s17, 5 }
 0x7f0   : > { %v5651_v41 = vpop.f32.mrf.mxu2  ;;  %s363_s0 = scalar_lea.vmem [#allocation6], %s5860_s29  ;;  %s5756_s12 = scalar_lea.hbm %s12861_s10, %s6135_s18 }
 0x7f1   : > { %v5652_v19 = vadd.f32 %v12736_v0, %v5651_v41  ;;  %5718 = vst [vmem:[%s363_s0] sm:$0xff] %v5670_v8  ;;  %s5757_s20 = sshll.u32 %s363_s0, 4  ;;  %s5759_s25 = sshll.u32 %s5756_s12, 4  ;;  %s5758_s20 = int_to_ptr.vmem [resolvable:$true] %s5757_s20  ;;  %s5760_s25 = int_to_ptr.hbm [resolvable:$true] %s5759_s25 }
 0x7f2   : > { %s5728_s27 = scalar_lea.sflag [#allocation7], %s12789_s28  ;;  %s7929_s21 = sshra.s32 %s5760_s25, 4  ;;  %s7930_s21 = int_to_ptr.hbm [resolvable:$true] %s7929_s21 }
 0x7f3   : > { %5701 = vxpose.xlu0.b32.end [16/16] (narrow) %v5652_v19, 16  ;;  %s7931_s29 = scalar_lea.hbm %s7930_s21, 32  ;;  %s7935_s2 = scalar_lea.hbm %s12861_s10, 64 }
 0x7f4   : > { %p7932_p4 = scmp.ne.s32.totalorder %s7930_s21, %s7931_s29  ;;  %p7936_p9 = scmp.lt.s32.totalorder %s7930_s21, %s12861_s10 }
 0x7f5   : > { %v5671_v46 = vpop.trf.xlu2  ;;  %p7937_p10 = scmp.lt.s32.totalorder %s7935_s2, %s7931_s29 }
 0x7f6   : > { %5720 = vst [vmem:[%s363_s0 + $0x10] sm:$0xff] %v5671_v46  ;;  %p7933_p7 = pnand %p7932_p4, %p8088_p5 }
 0x7f7   : > { %p7938_p11 = por %p7937_p10, %p7936_p9 }
 0x7f8   : > { %p7934_p8 = pneg %p7933_p7 }
 0x7fa   : > { %p7939_p12 = pnand %p7938_p11, %p7934_p8 }
 0x81f   : > { %v5702_v21 = vpop.trf.xlu0 }
 0x820   : > { %5719 = vst [vmem:[%s363_s0 + $0x8] sm:$0xff] %v5702_v21 }
 0x827   : > { %v5703_v0 = vpop.trf.xlu0 }
 0x828   : > { %5721 = vst [vmem:[%s363_s0 + $0x18] sm:$0xff] %v5703_v0 }
 0x829   : > { %7942 = shalt.err (!%p7939_p12)
}
 0x82a   : > { %s13520_s28 = smov 256  }
 0x82b   : > { %6138 = dma.vmem_to_hbm [thread:$0]  (%p8088_p5), %s5758_s20, 512, %s5760_s25, %s5728_s27, %s13520_s28, %s13520_s28, %s13519_s1  }
 0x82c PF: > { %p6148_p13 = scmp.ge.s32.totalorder %s7981_s16, 2  ;;  %s5774_s11 = sand.u32 1, %s7969_s13  }
 0x82d   : > { %s5775_s0 = scalar_lea.sflag [#allocation5], %s5774_s11 }
 0x82e   : > { %p6142_p0 = pnand %p6148_p13, %p8092_p6 }
 0x830   : > { %p6143_p1 = pneg %p6142_p0 }
 0x832   : > { %7960 = dma.done.wait (%p6143_p1), %s5775_s0, 1024  }
 0x833   : > { %7962 = vsyncadd (%p6143_p1), %s5775_s0, 4294966272  ;;  %s5785_s2 = scalar_lea.sflag [#allocation7], %s5774_s11 }
 0x834   : > { %7964 = dma.done.wait (%p6143_p1), %s5785_s2, 512  }
 0x835   : > { %7966 = vsyncadd (%p6143_p1), %s5785_s2, 4294966784  ;;  %p24_p5 = scmp.ge.s32.totalorder %s8075_s19, 4   ;;  %s13521_s13 = smov %s7973_s14 }
 0x836   : > { %s13522_s14 = smov %s7977_s15  ;;  %s13523_s15 = smov %s8086_s22 }
 0x837   : > { %s13524_s16 = smov %s8075_s19  ;;  %26 = sbr.rel (!%p24_p5) target bundleno = 9 (0x9), region = 110 }
 0x83c   :  { %5791 = vsyncpa [#allocation5], 1 }
 0x83d   :  { %5793 = vsyncpa [#allocation5 + $0x1], 1 }
 0x83e   :  { %5794 = vsyncpa [#allocation7], 1 }
 0x83f   :  { %5796 = vsyncpa [#allocation7 + $0x1], 1 }

</bundles_post_ra>
